<compile_context>
chip_gen: v7x
topology: tpu7x:2x2x1
jax: 0.10.0
libtpu: 0.0.40
codegen_flags: <defaults>
</compile_context>

<pallas_src>
import functools

import jax
import jax.numpy as jnp
from jax import lax
from jax.experimental import pallas as pl
from jax.experimental.pallas import tpu as pltpu


# ---------------------------------------------------------------------------
# Fused kernel
# ---------------------------------------------------------------------------
def _lenet5_kernel(
    # inputs
    x_ref, w1_ref, b1_ref, w2_ref, b2_ref, w3_ref, b3_ref,
    fc1w_ref, fc1b_ref, fc2w_ref, fc2b_ref,
    # outputs
    logits_ref, probs_ref,
    # scratch
    a1_ref, t1_ref, p1_ref, a2_ref, t2_ref, p2_ref, a3_ref,
    *, N, W, S, C1, C2, L1, LP1, L2, LP2, K,
):
    KK = K * K

    # ---- conv1 (Cin=1 -> C1): assemble 25-tap stack, one lane-dense GEMM --
    for t in range(KK):
        i, j = divmod(t, K)
        off = i * W + j                         # dilation 1
        a1_ref[t:t + 1, :] = x_ref[:, off:off + L1]
    c1 = jnp.dot(w1_ref[...], a1_ref[...],
                 preferred_element_type=jnp.float32)
    t1_ref[...] = jnp.tanh(c1 + b1_ref[...])                    # (C1, L1)

    # ---- avg-pool 2x2: four shifted slices, results live at dilation 2 ----
    p1_ref[...] = 0.25 * (t1_ref[:, 0:LP1] + t1_ref[:, 1:LP1 + 1]
                          + t1_ref[:, W:LP1 + W] + t1_ref[:, W + 1:LP1 + W + 1])

    # ---- conv2 (C1 -> C2): taps are dilated by 2 --------------------------
    for t in range(KK):
        i, j = divmod(t, K)
        off = 2 * (i * W + j)
        a2_ref[t * C1:(t + 1) * C1, :] = p1_ref[:, off:off + L2]
    c2 = jnp.dot(w2_ref[...], a2_ref[...],
                 preferred_element_type=jnp.float32)
    t2_ref[...] = jnp.tanh(c2 + b2_ref[...])                    # (C2, L2)

    # ---- avg-pool 2x2: results live at dilation 4 --------------------------
    p2_ref[...] = 0.25 * (t2_ref[:, 0:LP2] + t2_ref[:, 2:LP2 + 2]
                          + t2_ref[:, 2 * W:LP2 + 2 * W]
                          + t2_ref[:, 2 * W + 2:LP2 + 2 * W + 2])

    # ---- conv3 (5x5 -> 1x1): gather the 25 dilated taps of each image -----
    for t in range(KK):
        i, j = divmod(t, K)
        off = 4 * (i * W + j)
        for n in range(N):
            col = n * S + off
            a3_ref[t * C2:(t + 1) * C2, n:n + 1] = p2_ref[:, col:col + 1]
    feats = jnp.tanh(
        jnp.dot(w3_ref[...], a3_ref[...],
                preferred_element_type=jnp.float32) + b3_ref[...])   # (120, N)

    # ---- classifier (features on sublanes, batch on lanes) ----------------
    h = jnp.tanh(
        jnp.dot(fc1w_ref[...], feats,
                preferred_element_type=jnp.float32) + fc1b_ref[...])  # (84, N)
    logits = jnp.dot(fc2w_ref[...], h,
                     preferred_element_type=jnp.float32) + fc2b_ref[...]
    logits_ref[...] = logits                                    # (n_classes, N)

    # ---- softmax over classes (sublane axis, size n_classes) --------------
    m = jnp.max(logits, axis=0, keepdims=True)
    e = jnp.exp(logits - m)
    s = jnp.sum(e, axis=0, keepdims=True)
    probs_ref[...] = e * pl.reciprocal(s, approx=False)


# ---------------------------------------------------------------------------
# Wrapper: host-side weight repacking + single pallas_call
# ---------------------------------------------------------------------------
def lenet5_forward(params, x):
    N, Cin, H, W = x.shape
    assert Cin == 1 and H == 32 and W == 32, "kernel specialised to LeNet-5 input"
    K = 5
    C1, C2, C3 = 6, 16, 120
    S = H * W
    T = N * S
    n_classes = params["fc2_w"].shape[1]

    mx = (K - 1) * W + (K - 1)        # 132: largest 5x5 tap offset (dilation 1)
    mp = W + 1                        # 33 : largest 2x2 pool offset (dilation 1)
    L1 = T - mx                       # conv1 stack width
    LP1 = L1 - mp                     # pool1 width
    L2 = LP1 - 2 * mx                 # conv2 stack width
    LP2 = L2 - 2 * mp                 # pool2 width
    assert (N - 1) * S + 4 * mx < LP2  # conv3 taps stay in-bounds

    f32 = jnp.float32
    # flat input: lane index = n*1024 + y*32 + x
    x_flat = x.reshape(1, T).astype(f32)
    # GEMM-ready weights (f32 operands), column order matches tap order.
    w1m = params["w1"].reshape(C1, K * K).astype(f32)                              # (6, 25)
    w2m = params["w2"].transpose(0, 2, 3, 1).reshape(C2, K * K * C1).astype(f32)   # (16, 150)
    w3m = params["w3"].transpose(0, 2, 3, 1).reshape(C3, K * K * C2).astype(f32)   # (120, 400)
    fc1w = params["fc1_w"].T.astype(f32)                                           # (84, 120)
    fc2w = params["fc2_w"].T.astype(f32)                                           # (nc, 84)
    b1 = params["b1"].reshape(C1, 1).astype(f32)
    b2 = params["b2"].reshape(C2, 1).astype(f32)
    b3 = params["b3"].reshape(C3, 1).astype(f32)
    fc1b = params["fc1_b"].reshape(-1, 1).astype(f32)
    fc2b = params["fc2_b"].reshape(-1, 1).astype(f32)

    kern = functools.partial(
        _lenet5_kernel, N=N, W=W, S=S, C1=C1, C2=C2,
        L1=L1, LP1=LP1, L2=L2, LP2=LP2, K=K)

    full2d = lambda i: (0, 0)
    inputs = (x_flat, w1m, b1, w2m, b2, w3m, b3, fc1w, fc1b, fc2w, fc2b)

    logits_t, probs_t = pl.pallas_call(
        kern,
        out_shape=(jax.ShapeDtypeStruct((n_classes, N), f32),
                   jax.ShapeDtypeStruct((n_classes, N), f32)),
        grid=(1,),
        in_specs=[pl.BlockSpec(a.shape, full2d) for a in inputs],
        out_specs=(pl.BlockSpec((n_classes, N), full2d),
                   pl.BlockSpec((n_classes, N), full2d)),
        scratch_shapes=[
            pltpu.VMEM((K * K, L1), f32),        # conv1 tap stack
            pltpu.VMEM((C1, L1), f32),           # tanh(conv1)
            pltpu.VMEM((C1, LP1), f32),          # pool1
            pltpu.VMEM((K * K * C1, L2), f32),   # conv2 tap stack
            pltpu.VMEM((C2, L2), f32),           # tanh(conv2)
            pltpu.VMEM((C2, LP2), f32),          # pool2
            pltpu.VMEM((K * K * C2, N), f32),    # conv3 tap stack (compact)
        ],
        compiler_params=pltpu.CompilerParams(
            dimension_semantics=("arbitrary",)),
    )(*inputs)

    # tiny (n_classes, N) -> (N, n_classes) layout fix outside the kernel
    return logits_t.T, probs_t.T


# ---------------------------------------------------------------------------
# Plain-JAX reference (for validation only)
# ---------------------------------------------------------------------------
def lenet5_reference(params, x):
    def conv(v, w, b):
        y = lax.conv_general_dilated(
            v, w, window_strides=(1, 1), padding="VALID",
            dimension_numbers=("NCHW", "OIHW", "NCHW"))
        return jnp.tanh(y + b.reshape(1, -1, 1, 1))

    def pool(v):
        n, c, h, w = v.shape
        return v.reshape(n, c, h // 2, 2, w // 2, 2).mean(axis=(3, 5))

    y = conv(x, params["w1"], params["b1"])
    y = pool(y)
    y = conv(y, params["w2"], params["b2"])
    y = pool(y)
    y = conv(y, params["w3"], params["b3"])
    feats = y.reshape(y.shape[0], -1)
    h = jnp.tanh(feats @ params["fc1_w"] + params["fc1_b"])
    logits = h @ params["fc2_w"] + params["fc2_b"]
    return logits, jax.nn.softmax(logits, axis=1)


# ---------------------------------------------------------------------------
# Parameters (deterministic, PyTorch-default-style uniform fan-in init)
# ---------------------------------------------------------------------------
def init_params(key, n_classes):
    ks = jax.random.split(key, 10)

    def p(k, shape, fan_in):
        bound = 1.0 / jnp.sqrt(float(fan_in))
        return jax.random.uniform(k, shape, jnp.float32, -bound, bound)

    return {
        "w1": p(ks[0], (6, 1, 5, 5), 1 * 25),     "b1": p(ks[1], (6,), 1 * 25),
        "w2": p(ks[2], (16, 6, 5, 5), 6 * 25),    "b2": p(ks[3], (16,), 6 * 25),
        "w3": p(ks[4], (120, 16, 5, 5), 16 * 25), "b3": p(ks[5], (120,), 16 * 25),
        "fc1_w": p(ks[6], (120, 84), 120),        "fc1_b": p(ks[7], (84,), 120),
        "fc2_w": p(ks[8], (84, 10), 84),          "fc2_b": p(ks[9], (10,), 84),
    }


if __name__ == "__main__":
    n_classes = 10
    key = jax.random.PRNGKey(0)
    k_param, k_x = jax.random.split(key)

    params = init_params(k_param, n_classes)
    # LeNet-5 canonical input: batch=2, 1 channel, 32x32 spatial (NCHW)
    x = jax.random.normal(k_x, (2, 1, 32, 32), dtype=jnp.float32)

    logits, probs = jax.jit(lenet5_forward)(params, x)
    jax.block_until_ready((logits, probs))

    assert logits.shape == (2, n_classes)
    assert probs.shape == (2, n_classes)
    assert bool(jnp.allclose(jnp.sum(probs, axis=1), 1.0, atol=1e-5))

    # cross-check vs. plain JAX (all-f32 kernel => tight tolerances)
    ref_logits, ref_probs = jax.jit(lenet5_reference)(params, x)
    assert bool(jnp.allclose(logits, ref_logits, atol=1e-3, rtol=1e-3))
    assert bool(jnp.allclose(probs, ref_probs, atol=1e-4))

    print("KERNEL_OK")
</pallas_src>

<mosaic_0001>
module attributes {stable_mosaic.version = 11 : i64} {
  func.func @_lenet5_kernel(%arg0: i32, %arg1: memref<1x2048xf32, #tpu.memory_space<vmem>>, %arg2: memref<6x25xf32, #tpu.memory_space<vmem>>, %arg3: memref<6x1xf32, #tpu.memory_space<vmem>>, %arg4: memref<16x150xf32, #tpu.memory_space<vmem>>, %arg5: memref<16x1xf32, #tpu.memory_space<vmem>>, %arg6: memref<120x400xf32, #tpu.memory_space<vmem>>, %arg7: memref<120x1xf32, #tpu.memory_space<vmem>>, %arg8: memref<84x120xf32, #tpu.memory_space<vmem>>, %arg9: memref<84x1xf32, #tpu.memory_space<vmem>>, %arg10: memref<10x84xf32, #tpu.memory_space<vmem>>, %arg11: memref<10x1xf32, #tpu.memory_space<vmem>>, %arg12: memref<10x2xf32, #tpu.memory_space<vmem>>, %arg13: memref<10x2xf32, #tpu.memory_space<vmem>>, %arg14: memref<25x1916xf32, #tpu.memory_space<vmem>>, %arg15: memref<6x1916xf32, #tpu.memory_space<vmem>>, %arg16: memref<6x1883xf32, #tpu.memory_space<vmem>>, %arg17: memref<150x1619xf32, #tpu.memory_space<vmem>>, %arg18: memref<16x1619xf32, #tpu.memory_space<vmem>>, %arg19: memref<16x1553xf32, #tpu.memory_space<vmem>>, %arg20: memref<400x2xf32, #tpu.memory_space<vmem>>) attributes {dimension_semantics = [#tpu.dimension_semantics<arbitrary>], iteration_bounds = array<i64: 1>, scalar_prefetch = 0 : i64, scratch_operands = 7 : i64, tpu.core_type = #tpu.core_type<tc>, window_params = [{pipeline_mode = #tpu.pipeline_mode<synchronous>, transform_indices = @transform_0, window_bounds = array<i64: 1, 2048>}, {pipeline_mode = #tpu.pipeline_mode<synchronous>, transform_indices = @transform_1, window_bounds = array<i64: 6, 25>}, {pipeline_mode = #tpu.pipeline_mode<synchronous>, transform_indices = @transform_2, window_bounds = array<i64: 6, 1>}, {pipeline_mode = #tpu.pipeline_mode<synchronous>, transform_indices = @transform_3, window_bounds = array<i64: 16, 150>}, {pipeline_mode = #tpu.pipeline_mode<synchronous>, transform_indices = @transform_4, window_bounds = array<i64: 16, 1>}, {pipeline_mode = #tpu.pipeline_mode<synchronous>, transform_indices = @transform_5, window_bounds = array<i64: 120, 400>}, {pipeline_mode = #tpu.pipeline_mode<synchronous>, transform_indices = @transform_6, window_bounds = array<i64: 120, 1>}, {pipeline_mode = #tpu.pipeline_mode<synchronous>, transform_indices = @transform_7, window_bounds = array<i64: 84, 120>}, {pipeline_mode = #tpu.pipeline_mode<synchronous>, transform_indices = @transform_8, window_bounds = array<i64: 84, 1>}, {pipeline_mode = #tpu.pipeline_mode<synchronous>, transform_indices = @transform_9, window_bounds = array<i64: 10, 84>}, {pipeline_mode = #tpu.pipeline_mode<synchronous>, transform_indices = @transform_10, window_bounds = array<i64: 10, 1>}, {pipeline_mode = #tpu.pipeline_mode<synchronous>, transform_indices = @transform_11, window_bounds = array<i64: 10, 2>}, {pipeline_mode = #tpu.pipeline_mode<synchronous>, transform_indices = @transform_12, window_bounds = array<i64: 10, 2>}]} {
    %c0 = arith.constant 0 : index
    %c0_0 = arith.constant 0 : index
    %0 = vector.load %arg1[%c0, %c0_0] : memref<1x2048xf32, #tpu.memory_space<vmem>>, vector<1x1916xf32>
    %c0_1 = arith.constant 0 : index
    %c0_2 = arith.constant 0 : index
    %1 = vector.load %arg14[%c0_1, %c0_2] : memref<25x1916xf32, #tpu.memory_space<vmem>>, vector<1x1916xf32>
    tpu.vector_store %arg14[%c0_1, %c0_2], %0 {strides = array<i32>} : memref<25x1916xf32, #tpu.memory_space<vmem>>, vector<1x1916xf32>,
    %c0_3 = arith.constant 0 : index
    %c1 = arith.constant 1 : index
    %2 = vector.load %arg1[%c0_3, %c1] : memref<1x2048xf32, #tpu.memory_space<vmem>>, vector<1x1916xf32>
    %c1_4 = arith.constant 1 : index
    %c0_5 = arith.constant 0 : index
    %3 = vector.load %arg14[%c1_4, %c0_5] : memref<25x1916xf32, #tpu.memory_space<vmem>>, vector<1x1916xf32>
    tpu.vector_store %arg14[%c1_4, %c0_5], %2 {strides = array<i32>} : memref<25x1916xf32, #tpu.memory_space<vmem>>, vector<1x1916xf32>,
    %c0_6 = arith.constant 0 : index
    %c2 = arith.constant 2 : index
    %4 = vector.load %arg1[%c0_6, %c2] : memref<1x2048xf32, #tpu.memory_space<vmem>>, vector<1x1916xf32>
    %c2_7 = arith.constant 2 : index
    %c0_8 = arith.constant 0 : index
    %5 = vector.load %arg14[%c2_7, %c0_8] : memref<25x1916xf32, #tpu.memory_space<vmem>>, vector<1x1916xf32>
    tpu.vector_store %arg14[%c2_7, %c0_8], %4 {strides = array<i32>} : memref<25x1916xf32, #tpu.memory_space<vmem>>, vector<1x1916xf32>,
    %c0_9 = arith.constant 0 : index
    %c3 = arith.constant 3 : index
    %6 = vector.load %arg1[%c0_9, %c3] : memref<1x2048xf32, #tpu.memory_space<vmem>>, vector<1x1916xf32>
    %c3_10 = arith.constant 3 : index
    %c0_11 = arith.constant 0 : index
    %7 = vector.load %arg14[%c3_10, %c0_11] : memref<25x1916xf32, #tpu.memory_space<vmem>>, vector<1x1916xf32>
    tpu.vector_store %arg14[%c3_10, %c0_11], %6 {strides = array<i32>} : memref<25x1916xf32, #tpu.memory_space<vmem>>, vector<1x1916xf32>,
    %c0_12 = arith.constant 0 : index
    %c4 = arith.constant 4 : index
    %8 = vector.load %arg1[%c0_12, %c4] : memref<1x2048xf32, #tpu.memory_space<vmem>>, vector<1x1916xf32>
    %c4_13 = arith.constant 4 : index
    %c0_14 = arith.constant 0 : index
    %9 = vector.load %arg14[%c4_13, %c0_14] : memref<25x1916xf32, #tpu.memory_space<vmem>>, vector<1x1916xf32>
    tpu.vector_store %arg14[%c4_13, %c0_14], %8 {strides = array<i32>} : memref<25x1916xf32, #tpu.memory_space<vmem>>, vector<1x1916xf32>,
    %c0_15 = arith.constant 0 : index
    %c32 = arith.constant 32 : index
    %10 = vector.load %arg1[%c0_15, %c32] : memref<1x2048xf32, #tpu.memory_space<vmem>>, vector<1x1916xf32>
    %c5 = arith.constant 5 : index
    %c0_16 = arith.constant 0 : index
    %11 = vector.load %arg14[%c5, %c0_16] : memref<25x1916xf32, #tpu.memory_space<vmem>>, vector<1x1916xf32>
    tpu.vector_store %arg14[%c5, %c0_16], %10 {strides = array<i32>} : memref<25x1916xf32, #tpu.memory_space<vmem>>, vector<1x1916xf32>,
    %c0_17 = arith.constant 0 : index
    %c33 = arith.constant 33 : index
    %12 = vector.load %arg1[%c0_17, %c33] : memref<1x2048xf32, #tpu.memory_space<vmem>>, vector<1x1916xf32>
    %c6 = arith.constant 6 : index
    %c0_18 = arith.constant 0 : index
    %13 = vector.load %arg14[%c6, %c0_18] : memref<25x1916xf32, #tpu.memory_space<vmem>>, vector<1x1916xf32>
    tpu.vector_store %arg14[%c6, %c0_18], %12 {strides = array<i32>} : memref<25x1916xf32, #tpu.memory_space<vmem>>, vector<1x1916xf32>,
    %c0_19 = arith.constant 0 : index
    %c34 = arith.constant 34 : index
    %14 = vector.load %arg1[%c0_19, %c34] : memref<1x2048xf32, #tpu.memory_space<vmem>>, vector<1x1916xf32>
    %c7 = arith.constant 7 : index
    %c0_20 = arith.constant 0 : index
    %15 = vector.load %arg14[%c7, %c0_20] : memref<25x1916xf32, #tpu.memory_space<vmem>>, vector<1x1916xf32>
    tpu.vector_store %arg14[%c7, %c0_20], %14 {strides = array<i32>} : memref<25x1916xf32, #tpu.memory_space<vmem>>, vector<1x1916xf32>,
    %c0_21 = arith.constant 0 : index
    %c35 = arith.constant 35 : index
    %16 = vector.load %arg1[%c0_21, %c35] : memref<1x2048xf32, #tpu.memory_space<vmem>>, vector<1x1916xf32>
    %c8 = arith.constant 8 : index
    %c0_22 = arith.constant 0 : index
    %17 = vector.load %arg14[%c8, %c0_22] : memref<25x1916xf32, #tpu.memory_space<vmem>>, vector<1x1916xf32>
    tpu.vector_store %arg14[%c8, %c0_22], %16 {strides = array<i32>} : memref<25x1916xf32, #tpu.memory_space<vmem>>, vector<1x1916xf32>,
    %c0_23 = arith.constant 0 : index
    %c36 = arith.constant 36 : index
    %18 = vector.load %arg1[%c0_23, %c36] : memref<1x2048xf32, #tpu.memory_space<vmem>>, vector<1x1916xf32>
    %c9 = arith.constant 9 : index
    %c0_24 = arith.constant 0 : index
    %19 = vector.load %arg14[%c9, %c0_24] : memref<25x1916xf32, #tpu.memory_space<vmem>>, vector<1x1916xf32>
    tpu.vector_store %arg14[%c9, %c0_24], %18 {strides = array<i32>} : memref<25x1916xf32, #tpu.memory_space<vmem>>, vector<1x1916xf32>,
    %c0_25 = arith.constant 0 : index
    %c64 = arith.constant 64 : index
    %20 = vector.load %arg1[%c0_25, %c64] : memref<1x2048xf32, #tpu.memory_space<vmem>>, vector<1x1916xf32>
    %c10 = arith.constant 10 : index
    %c0_26 = arith.constant 0 : index
    %21 = vector.load %arg14[%c10, %c0_26] : memref<25x1916xf32, #tpu.memory_space<vmem>>, vector<1x1916xf32>
    tpu.vector_store %arg14[%c10, %c0_26], %20 {strides = array<i32>} : memref<25x1916xf32, #tpu.memory_space<vmem>>, vector<1x1916xf32>,
    %c0_27 = arith.constant 0 : index
    %c65 = arith.constant 65 : index
    %22 = vector.load %arg1[%c0_27, %c65] : memref<1x2048xf32, #tpu.memory_space<vmem>>, vector<1x1916xf32>
    %c11 = arith.constant 11 : index
    %c0_28 = arith.constant 0 : index
    %23 = vector.load %arg14[%c11, %c0_28] : memref<25x1916xf32, #tpu.memory_space<vmem>>, vector<1x1916xf32>
    tpu.vector_store %arg14[%c11, %c0_28], %22 {strides = array<i32>} : memref<25x1916xf32, #tpu.memory_space<vmem>>, vector<1x1916xf32>,
    %c0_29 = arith.constant 0 : index
    %c66 = arith.constant 66 : index
    %24 = vector.load %arg1[%c0_29, %c66] : memref<1x2048xf32, #tpu.memory_space<vmem>>, vector<1x1916xf32>
    %c12 = arith.constant 12 : index
    %c0_30 = arith.constant 0 : index
    %25 = vector.load %arg14[%c12, %c0_30] : memref<25x1916xf32, #tpu.memory_space<vmem>>, vector<1x1916xf32>
    tpu.vector_store %arg14[%c12, %c0_30], %24 {strides = array<i32>} : memref<25x1916xf32, #tpu.memory_space<vmem>>, vector<1x1916xf32>,
    %c0_31 = arith.constant 0 : index
    %c67 = arith.constant 67 : index
    %26 = vector.load %arg1[%c0_31, %c67] : memref<1x2048xf32, #tpu.memory_space<vmem>>, vector<1x1916xf32>
    %c13 = arith.constant 13 : index
    %c0_32 = arith.constant 0 : index
    %27 = vector.load %arg14[%c13, %c0_32] : memref<25x1916xf32, #tpu.memory_space<vmem>>, vector<1x1916xf32>
    tpu.vector_store %arg14[%c13, %c0_32], %26 {strides = array<i32>} : memref<25x1916xf32, #tpu.memory_space<vmem>>, vector<1x1916xf32>,
    %c0_33 = arith.constant 0 : index
    %c68 = arith.constant 68 : index
    %28 = vector.load %arg1[%c0_33, %c68] : memref<1x2048xf32, #tpu.memory_space<vmem>>, vector<1x1916xf32>
    %c14 = arith.constant 14 : index
    %c0_34 = arith.constant 0 : index
    %29 = vector.load %arg14[%c14, %c0_34] : memref<25x1916xf32, #tpu.memory_space<vmem>>, vector<1x1916xf32>
    tpu.vector_store %arg14[%c14, %c0_34], %28 {strides = array<i32>} : memref<25x1916xf32, #tpu.memory_space<vmem>>, vector<1x1916xf32>,
    %c0_35 = arith.constant 0 : index
    %c96 = arith.constant 96 : index
    %30 = vector.load %arg1[%c0_35, %c96] : memref<1x2048xf32, #tpu.memory_space<vmem>>, vector<1x1916xf32>
    %c15 = arith.constant 15 : index
    %c0_36 = arith.constant 0 : index
    %31 = vector.load %arg14[%c15, %c0_36] : memref<25x1916xf32, #tpu.memory_space<vmem>>, vector<1x1916xf32>
    tpu.vector_store %arg14[%c15, %c0_36], %30 {strides = array<i32>} : memref<25x1916xf32, #tpu.memory_space<vmem>>, vector<1x1916xf32>,
    %c0_37 = arith.constant 0 : index
    %c97 = arith.constant 97 : index
    %32 = vector.load %arg1[%c0_37, %c97] : memref<1x2048xf32, #tpu.memory_space<vmem>>, vector<1x1916xf32>
    %c16 = arith.constant 16 : index
    %c0_38 = arith.constant 0 : index
    %33 = vector.load %arg14[%c16, %c0_38] : memref<25x1916xf32, #tpu.memory_space<vmem>>, vector<1x1916xf32>
    tpu.vector_store %arg14[%c16, %c0_38], %32 {strides = array<i32>} : memref<25x1916xf32, #tpu.memory_space<vmem>>, vector<1x1916xf32>,
    %c0_39 = arith.constant 0 : index
    %c98 = arith.constant 98 : index
    %34 = vector.load %arg1[%c0_39, %c98] : memref<1x2048xf32, #tpu.memory_space<vmem>>, vector<1x1916xf32>
    %c17 = arith.constant 17 : index
    %c0_40 = arith.constant 0 : index
    %35 = vector.load %arg14[%c17, %c0_40] : memref<25x1916xf32, #tpu.memory_space<vmem>>, vector<1x1916xf32>
    tpu.vector_store %arg14[%c17, %c0_40], %34 {strides = array<i32>} : memref<25x1916xf32, #tpu.memory_space<vmem>>, vector<1x1916xf32>,
    %c0_41 = arith.constant 0 : index
    %c99 = arith.constant 99 : index
    %36 = vector.load %arg1[%c0_41, %c99] : memref<1x2048xf32, #tpu.memory_space<vmem>>, vector<1x1916xf32>
    %c18 = arith.constant 18 : index
    %c0_42 = arith.constant 0 : index
    %37 = vector.load %arg14[%c18, %c0_42] : memref<25x1916xf32, #tpu.memory_space<vmem>>, vector<1x1916xf32>
    tpu.vector_store %arg14[%c18, %c0_42], %36 {strides = array<i32>} : memref<25x1916xf32, #tpu.memory_space<vmem>>, vector<1x1916xf32>,
    %c0_43 = arith.constant 0 : index
    %c100 = arith.constant 100 : index
    %38 = vector.load %arg1[%c0_43, %c100] : memref<1x2048xf32, #tpu.memory_space<vmem>>, vector<1x1916xf32>
    %c19 = arith.constant 19 : index
    %c0_44 = arith.constant 0 : index
    %39 = vector.load %arg14[%c19, %c0_44] : memref<25x1916xf32, #tpu.memory_space<vmem>>, vector<1x1916xf32>
    tpu.vector_store %arg14[%c19, %c0_44], %38 {strides = array<i32>} : memref<25x1916xf32, #tpu.memory_space<vmem>>, vector<1x1916xf32>,
    %c0_45 = arith.constant 0 : index
    %c128 = arith.constant 128 : index
    %40 = vector.load %arg1[%c0_45, %c128] : memref<1x2048xf32, #tpu.memory_space<vmem>>, vector<1x1916xf32>
    %c20 = arith.constant 20 : index
    %c0_46 = arith.constant 0 : index
    %41 = vector.load %arg14[%c20, %c0_46] : memref<25x1916xf32, #tpu.memory_space<vmem>>, vector<1x1916xf32>
    tpu.vector_store %arg14[%c20, %c0_46], %40 {strides = array<i32>} : memref<25x1916xf32, #tpu.memory_space<vmem>>, vector<1x1916xf32>,
    %c0_47 = arith.constant 0 : index
    %c129 = arith.constant 129 : index
    %42 = vector.load %arg1[%c0_47, %c129] : memref<1x2048xf32, #tpu.memory_space<vmem>>, vector<1x1916xf32>
    %c21 = arith.constant 21 : index
    %c0_48 = arith.constant 0 : index
    %43 = vector.load %arg14[%c21, %c0_48] : memref<25x1916xf32, #tpu.memory_space<vmem>>, vector<1x1916xf32>
    tpu.vector_store %arg14[%c21, %c0_48], %42 {strides = array<i32>} : memref<25x1916xf32, #tpu.memory_space<vmem>>, vector<1x1916xf32>,
    %c0_49 = arith.constant 0 : index
    %c130 = arith.constant 130 : index
    %44 = vector.load %arg1[%c0_49, %c130] : memref<1x2048xf32, #tpu.memory_space<vmem>>, vector<1x1916xf32>
    %c22 = arith.constant 22 : index
    %c0_50 = arith.constant 0 : index
    %45 = vector.load %arg14[%c22, %c0_50] : memref<25x1916xf32, #tpu.memory_space<vmem>>, vector<1x1916xf32>
    tpu.vector_store %arg14[%c22, %c0_50], %44 {strides = array<i32>} : memref<25x1916xf32, #tpu.memory_space<vmem>>, vector<1x1916xf32>,
    %c0_51 = arith.constant 0 : index
    %c131 = arith.constant 131 : index
    %46 = vector.load %arg1[%c0_51, %c131] : memref<1x2048xf32, #tpu.memory_space<vmem>>, vector<1x1916xf32>
    %c23 = arith.constant 23 : index
    %c0_52 = arith.constant 0 : index
    %47 = vector.load %arg14[%c23, %c0_52] : memref<25x1916xf32, #tpu.memory_space<vmem>>, vector<1x1916xf32>
    tpu.vector_store %arg14[%c23, %c0_52], %46 {strides = array<i32>} : memref<25x1916xf32, #tpu.memory_space<vmem>>, vector<1x1916xf32>,
    %c0_53 = arith.constant 0 : index
    %c132 = arith.constant 132 : index
    %48 = vector.load %arg1[%c0_53, %c132] : memref<1x2048xf32, #tpu.memory_space<vmem>>, vector<1x1916xf32>
    %c24 = arith.constant 24 : index
    %c0_54 = arith.constant 0 : index
    %49 = vector.load %arg14[%c24, %c0_54] : memref<25x1916xf32, #tpu.memory_space<vmem>>, vector<1x1916xf32>
    tpu.vector_store %arg14[%c24, %c0_54], %48 {strides = array<i32>} : memref<25x1916xf32, #tpu.memory_space<vmem>>, vector<1x1916xf32>,
    %c0_55 = arith.constant 0 : index
    %c0_56 = arith.constant 0 : index
    %50 = vector.load %arg2[%c0_55, %c0_56] : memref<6x25xf32, #tpu.memory_space<vmem>>, vector<6x25xf32>
    %c0_57 = arith.constant 0 : index
    %c0_58 = arith.constant 0 : index
    %51 = vector.load %arg14[%c0_57, %c0_58] : memref<25x1916xf32, #tpu.memory_space<vmem>>, vector<25x1916xf32>
    %cst = arith.constant dense<0.000000e+00> : vector<6x1916xf32>
    %52 = tpu.matmul %50, %51, %cst {dimension_numbers = #tpu.dot_dimension_numbers<[1], [0], [0], [1], [0, 0, 1, 1], [], []>} : vector<6x25xf32>, vector<25x1916xf32>, vector<6x1916xf32> -> vector<6x1916xf32>
    %c0_59 = arith.constant 0 : index
    %c0_60 = arith.constant 0 : index
    %53 = vector.load %arg3[%c0_59, %c0_60] : memref<6x1xf32, #tpu.memory_space<vmem>>, vector<6x1xf32>
    %54 = vector.broadcast %53 : vector<6x1xf32> to vector<6x1916xf32>
    %55 = arith.addf %52, %54 : vector<6x1916xf32>
    %56 = math.tanh %55 : vector<6x1916xf32>
    %c0_61 = arith.constant 0 : index
    %c0_62 = arith.constant 0 : index
    %57 = vector.load %arg15[%c0_61, %c0_62] : memref<6x1916xf32, #tpu.memory_space<vmem>>, vector<6x1916xf32>
    tpu.vector_store %arg15[%c0_61, %c0_62], %56 {strides = array<i32>} : memref<6x1916xf32, #tpu.memory_space<vmem>>, vector<6x1916xf32>,
    %c0_63 = arith.constant 0 : index
    %c0_64 = arith.constant 0 : index
    %58 = vector.load %arg15[%c0_63, %c0_64] : memref<6x1916xf32, #tpu.memory_space<vmem>>, vector<6x1883xf32>
    %c0_65 = arith.constant 0 : index
    %c1_66 = arith.constant 1 : index
    %59 = vector.load %arg15[%c0_65, %c1_66] : memref<6x1916xf32, #tpu.memory_space<vmem>>, vector<6x1883xf32>
    %60 = arith.addf %58, %59 : vector<6x1883xf32>
    %c0_67 = arith.constant 0 : index
    %c32_68 = arith.constant 32 : index
    %61 = vector.load %arg15[%c0_67, %c32_68] : memref<6x1916xf32, #tpu.memory_space<vmem>>, vector<6x1883xf32>
    %62 = arith.addf %60, %61 : vector<6x1883xf32>
    %c0_69 = arith.constant 0 : index
    %c33_70 = arith.constant 33 : index
    %63 = vector.load %arg15[%c0_69, %c33_70] : memref<6x1916xf32, #tpu.memory_space<vmem>>, vector<6x1883xf32>
    %64 = arith.addf %62, %63 : vector<6x1883xf32>
    %cst_71 = arith.constant 2.500000e-01 : f32
    %65 = vector.broadcast %cst_71 : f32 to vector<6x1883xf32>
    %66 = arith.mulf %65, %64 : vector<6x1883xf32>
    %c0_72 = arith.constant 0 : index
    %c0_73 = arith.constant 0 : index
    %67 = vector.load %arg16[%c0_72, %c0_73] : memref<6x1883xf32, #tpu.memory_space<vmem>>, vector<6x1883xf32>
    tpu.vector_store %arg16[%c0_72, %c0_73], %66 {strides = array<i32>} : memref<6x1883xf32, #tpu.memory_space<vmem>>, vector<6x1883xf32>,
    %c0_74 = arith.constant 0 : index
    %c0_75 = arith.constant 0 : index
    %68 = vector.load %arg16[%c0_74, %c0_75] : memref<6x1883xf32, #tpu.memory_space<vmem>>, vector<6x1619xf32>
    %c0_76 = arith.constant 0 : index
    %c0_77 = arith.constant 0 : index
    %69 = vector.load %arg17[%c0_76, %c0_77] : memref<150x1619xf32, #tpu.memory_space<vmem>>, vector<6x1619xf32>
    tpu.vector_store %arg17[%c0_76, %c0_77], %68 {strides = array<i32>} : memref<150x1619xf32, #tpu.memory_space<vmem>>, vector<6x1619xf32>,
    %c0_78 = arith.constant 0 : index
    %c2_79 = arith.constant 2 : index
    %70 = vector.load %arg16[%c0_78, %c2_79] : memref<6x1883xf32, #tpu.memory_space<vmem>>, vector<6x1619xf32>
    %c6_80 = arith.constant 6 : index
    %c0_81 = arith.constant 0 : index
    %71 = vector.load %arg17[%c6_80, %c0_81] : memref<150x1619xf32, #tpu.memory_space<vmem>>, vector<6x1619xf32>
    tpu.vector_store %arg17[%c6_80, %c0_81], %70 {strides = array<i32>} : memref<150x1619xf32, #tpu.memory_space<vmem>>, vector<6x1619xf32>,
    %c0_82 = arith.constant 0 : index
    %c4_83 = arith.constant 4 : index
    %72 = vector.load %arg16[%c0_82, %c4_83] : memref<6x1883xf32, #tpu.memory_space<vmem>>, vector<6x1619xf32>
    %c12_84 = arith.constant 12 : index
    %c0_85 = arith.constant 0 : index
    %73 = vector.load %arg17[%c12_84, %c0_85] : memref<150x1619xf32, #tpu.memory_space<vmem>>, vector<6x1619xf32>
    tpu.vector_store %arg17[%c12_84, %c0_85], %72 {strides = array<i32>} : memref<150x1619xf32, #tpu.memory_space<vmem>>, vector<6x1619xf32>,
    %c0_86 = arith.constant 0 : index
    %c6_87 = arith.constant 6 : index
    %74 = vector.load %arg16[%c0_86, %c6_87] : memref<6x1883xf32, #tpu.memory_space<vmem>>, vector<6x1619xf32>
    %c18_88 = arith.constant 18 : index
    %c0_89 = arith.constant 0 : index
    %75 = vector.load %arg17[%c18_88, %c0_89] : memref<150x1619xf32, #tpu.memory_space<vmem>>, vector<6x1619xf32>
    tpu.vector_store %arg17[%c18_88, %c0_89], %74 {strides = array<i32>} : memref<150x1619xf32, #tpu.memory_space<vmem>>, vector<6x1619xf32>,
    %c0_90 = arith.constant 0 : index
    %c8_91 = arith.constant 8 : index
    %76 = vector.load %arg16[%c0_90, %c8_91] : memref<6x1883xf32, #tpu.memory_space<vmem>>, vector<6x1619xf32>
    %c24_92 = arith.constant 24 : index
    %c0_93 = arith.constant 0 : index
    %77 = vector.load %arg17[%c24_92, %c0_93] : memref<150x1619xf32, #tpu.memory_space<vmem>>, vector<6x1619xf32>
    tpu.vector_store %arg17[%c24_92, %c0_93], %76 {strides = array<i32>} : memref<150x1619xf32, #tpu.memory_space<vmem>>, vector<6x1619xf32>,
    %c0_94 = arith.constant 0 : index
    %c64_95 = arith.constant 64 : index
    %78 = vector.load %arg16[%c0_94, %c64_95] : memref<6x1883xf32, #tpu.memory_space<vmem>>, vector<6x1619xf32>
    %c30 = arith.constant 30 : index
    %c0_96 = arith.constant 0 : index
    %79 = vector.load %arg17[%c30, %c0_96] : memref<150x1619xf32, #tpu.memory_space<vmem>>, vector<6x1619xf32>
    tpu.vector_store %arg17[%c30, %c0_96], %78 {strides = array<i32>} : memref<150x1619xf32, #tpu.memory_space<vmem>>, vector<6x1619xf32>,
    %c0_97 = arith.constant 0 : index
    %c66_98 = arith.constant 66 : index
    %80 = vector.load %arg16[%c0_97, %c66_98] : memref<6x1883xf32, #tpu.memory_space<vmem>>, vector<6x1619xf32>
    %c36_99 = arith.constant 36 : index
    %c0_100 = arith.constant 0 : index
    %81 = vector.load %arg17[%c36_99, %c0_100] : memref<150x1619xf32, #tpu.memory_space<vmem>>, vector<6x1619xf32>
    tpu.vector_store %arg17[%c36_99, %c0_100], %80 {strides = array<i32>} : memref<150x1619xf32, #tpu.memory_space<vmem>>, vector<6x1619xf32>,
    %c0_101 = arith.constant 0 : index
    %c68_102 = arith.constant 68 : index
    %82 = vector.load %arg16[%c0_101, %c68_102] : memref<6x1883xf32, #tpu.memory_space<vmem>>, vector<6x1619xf32>
    %c42 = arith.constant 42 : index
    %c0_103 = arith.constant 0 : index
    %83 = vector.load %arg17[%c42, %c0_103] : memref<150x1619xf32, #tpu.memory_space<vmem>>, vector<6x1619xf32>
    tpu.vector_store %arg17[%c42, %c0_103], %82 {strides = array<i32>} : memref<150x1619xf32, #tpu.memory_space<vmem>>, vector<6x1619xf32>,
    %c0_104 = arith.constant 0 : index
    %c70 = arith.constant 70 : index
    %84 = vector.load %arg16[%c0_104, %c70] : memref<6x1883xf32, #tpu.memory_space<vmem>>, vector<6x1619xf32>
    %c48 = arith.constant 48 : index
    %c0_105 = arith.constant 0 : index
    %85 = vector.load %arg17[%c48, %c0_105] : memref<150x1619xf32, #tpu.memory_space<vmem>>, vector<6x1619xf32>
    tpu.vector_store %arg17[%c48, %c0_105], %84 {strides = array<i32>} : memref<150x1619xf32, #tpu.memory_space<vmem>>, vector<6x1619xf32>,
    %c0_106 = arith.constant 0 : index
    %c72 = arith.constant 72 : index
    %86 = vector.load %arg16[%c0_106, %c72] : memref<6x1883xf32, #tpu.memory_space<vmem>>, vector<6x1619xf32>
    %c54 = arith.constant 54 : index
    %c0_107 = arith.constant 0 : index
    %87 = vector.load %arg17[%c54, %c0_107] : memref<150x1619xf32, #tpu.memory_space<vmem>>, vector<6x1619xf32>
    tpu.vector_store %arg17[%c54, %c0_107], %86 {strides = array<i32>} : memref<150x1619xf32, #tpu.memory_space<vmem>>, vector<6x1619xf32>,
    %c0_108 = arith.constant 0 : index
    %c128_109 = arith.constant 128 : index
    %88 = vector.load %arg16[%c0_108, %c128_109] : memref<6x1883xf32, #tpu.memory_space<vmem>>, vector<6x1619xf32>
    %c60 = arith.constant 60 : index
    %c0_110 = arith.constant 0 : index
    %89 = vector.load %arg17[%c60, %c0_110] : memref<150x1619xf32, #tpu.memory_space<vmem>>, vector<6x1619xf32>
    tpu.vector_store %arg17[%c60, %c0_110], %88 {strides = array<i32>} : memref<150x1619xf32, #tpu.memory_space<vmem>>, vector<6x1619xf32>,
    %c0_111 = arith.constant 0 : index
    %c130_112 = arith.constant 130 : index
    %90 = vector.load %arg16[%c0_111, %c130_112] : memref<6x1883xf32, #tpu.memory_space<vmem>>, vector<6x1619xf32>
    %c66_113 = arith.constant 66 : index
    %c0_114 = arith.constant 0 : index
    %91 = vector.load %arg17[%c66_113, %c0_114] : memref<150x1619xf32, #tpu.memory_space<vmem>>, vector<6x1619xf32>
    tpu.vector_store %arg17[%c66_113, %c0_114], %90 {strides = array<i32>} : memref<150x1619xf32, #tpu.memory_space<vmem>>, vector<6x1619xf32>,
    %c0_115 = arith.constant 0 : index
    %c132_116 = arith.constant 132 : index
    %92 = vector.load %arg16[%c0_115, %c132_116] : memref<6x1883xf32, #tpu.memory_space<vmem>>, vector<6x1619xf32>
    %c72_117 = arith.constant 72 : index
    %c0_118 = arith.constant 0 : index
    %93 = vector.load %arg17[%c72_117, %c0_118] : memref<150x1619xf32, #tpu.memory_space<vmem>>, vector<6x1619xf32>
    tpu.vector_store %arg17[%c72_117, %c0_118], %92 {strides = array<i32>} : memref<150x1619xf32, #tpu.memory_space<vmem>>, vector<6x1619xf32>,
    %c0_119 = arith.constant 0 : index
    %c134 = arith.constant 134 : index
    %94 = vector.load %arg16[%c0_119, %c134] : memref<6x1883xf32, #tpu.memory_space<vmem>>, vector<6x1619xf32>
    %c78 = arith.constant 78 : index
    %c0_120 = arith.constant 0 : index
    %95 = vector.load %arg17[%c78, %c0_120] : memref<150x1619xf32, #tpu.memory_space<vmem>>, vector<6x1619xf32>
    tpu.vector_store %arg17[%c78, %c0_120], %94 {strides = array<i32>} : memref<150x1619xf32, #tpu.memory_space<vmem>>, vector<6x1619xf32>,
    %c0_121 = arith.constant 0 : index
    %c136 = arith.constant 136 : index
    %96 = vector.load %arg16[%c0_121, %c136] : memref<6x1883xf32, #tpu.memory_space<vmem>>, vector<6x1619xf32>
    %c84 = arith.constant 84 : index
    %c0_122 = arith.constant 0 : index
    %97 = vector.load %arg17[%c84, %c0_122] : memref<150x1619xf32, #tpu.memory_space<vmem>>, vector<6x1619xf32>
    tpu.vector_store %arg17[%c84, %c0_122], %96 {strides = array<i32>} : memref<150x1619xf32, #tpu.memory_space<vmem>>, vector<6x1619xf32>,
    %c0_123 = arith.constant 0 : index
    %c192 = arith.constant 192 : index
    %98 = vector.load %arg16[%c0_123, %c192] : memref<6x1883xf32, #tpu.memory_space<vmem>>, vector<6x1619xf32>
    %c90 = arith.constant 90 : index
    %c0_124 = arith.constant 0 : index
    %99 = vector.load %arg17[%c90, %c0_124] : memref<150x1619xf32, #tpu.memory_space<vmem>>, vector<6x1619xf32>
    tpu.vector_store %arg17[%c90, %c0_124], %98 {strides = array<i32>} : memref<150x1619xf32, #tpu.memory_space<vmem>>, vector<6x1619xf32>,
    %c0_125 = arith.constant 0 : index
    %c194 = arith.constant 194 : index
    %100 = vector.load %arg16[%c0_125, %c194] : memref<6x1883xf32, #tpu.memory_space<vmem>>, vector<6x1619xf32>
    %c96_126 = arith.constant 96 : index
    %c0_127 = arith.constant 0 : index
    %101 = vector.load %arg17[%c96_126, %c0_127] : memref<150x1619xf32, #tpu.memory_space<vmem>>, vector<6x1619xf32>
    tpu.vector_store %arg17[%c96_126, %c0_127], %100 {strides = array<i32>} : memref<150x1619xf32, #tpu.memory_space<vmem>>, vector<6x1619xf32>,
    %c0_128 = arith.constant 0 : index
    %c196 = arith.constant 196 : index
    %102 = vector.load %arg16[%c0_128, %c196] : memref<6x1883xf32, #tpu.memory_space<vmem>>, vector<6x1619xf32>
    %c102 = arith.constant 102 : index
    %c0_129 = arith.constant 0 : index
    %103 = vector.load %arg17[%c102, %c0_129] : memref<150x1619xf32, #tpu.memory_space<vmem>>, vector<6x1619xf32>
    tpu.vector_store %arg17[%c102, %c0_129], %102 {strides = array<i32>} : memref<150x1619xf32, #tpu.memory_space<vmem>>, vector<6x1619xf32>,
    %c0_130 = arith.constant 0 : index
    %c198 = arith.constant 198 : index
    %104 = vector.load %arg16[%c0_130, %c198] : memref<6x1883xf32, #tpu.memory_space<vmem>>, vector<6x1619xf32>
    %c108 = arith.constant 108 : index
    %c0_131 = arith.constant 0 : index
    %105 = vector.load %arg17[%c108, %c0_131] : memref<150x1619xf32, #tpu.memory_space<vmem>>, vector<6x1619xf32>
    tpu.vector_store %arg17[%c108, %c0_131], %104 {strides = array<i32>} : memref<150x1619xf32, #tpu.memory_space<vmem>>, vector<6x1619xf32>,
    %c0_132 = arith.constant 0 : index
    %c200 = arith.constant 200 : index
    %106 = vector.load %arg16[%c0_132, %c200] : memref<6x1883xf32, #tpu.memory_space<vmem>>, vector<6x1619xf32>
    %c114 = arith.constant 114 : index
    %c0_133 = arith.constant 0 : index
    %107 = vector.load %arg17[%c114, %c0_133] : memref<150x1619xf32, #tpu.memory_space<vmem>>, vector<6x1619xf32>
    tpu.vector_store %arg17[%c114, %c0_133], %106 {strides = array<i32>} : memref<150x1619xf32, #tpu.memory_space<vmem>>, vector<6x1619xf32>,
    %c0_134 = arith.constant 0 : index
    %c256 = arith.constant 256 : index
    %108 = vector.load %arg16[%c0_134, %c256] : memref<6x1883xf32, #tpu.memory_space<vmem>>, vector<6x1619xf32>
    %c120 = arith.constant 120 : index
    %c0_135 = arith.constant 0 : index
    %109 = vector.load %arg17[%c120, %c0_135] : memref<150x1619xf32, #tpu.memory_space<vmem>>, vector<6x1619xf32>
    tpu.vector_store %arg17[%c120, %c0_135], %108 {strides = array<i32>} : memref<150x1619xf32, #tpu.memory_space<vmem>>, vector<6x1619xf32>,
    %c0_136 = arith.constant 0 : index
    %c258 = arith.constant 258 : index
    %110 = vector.load %arg16[%c0_136, %c258] : memref<6x1883xf32, #tpu.memory_space<vmem>>, vector<6x1619xf32>
    %c126 = arith.constant 126 : index
    %c0_137 = arith.constant 0 : index
    %111 = vector.load %arg17[%c126, %c0_137] : memref<150x1619xf32, #tpu.memory_space<vmem>>, vector<6x1619xf32>
    tpu.vector_store %arg17[%c126, %c0_137], %110 {strides = array<i32>} : memref<150x1619xf32, #tpu.memory_space<vmem>>, vector<6x1619xf32>,
    %c0_138 = arith.constant 0 : index
    %c260 = arith.constant 260 : index
    %112 = vector.load %arg16[%c0_138, %c260] : memref<6x1883xf32, #tpu.memory_space<vmem>>, vector<6x1619xf32>
    %c132_139 = arith.constant 132 : index
    %c0_140 = arith.constant 0 : index
    %113 = vector.load %arg17[%c132_139, %c0_140] : memref<150x1619xf32, #tpu.memory_space<vmem>>, vector<6x1619xf32>
    tpu.vector_store %arg17[%c132_139, %c0_140], %112 {strides = array<i32>} : memref<150x1619xf32, #tpu.memory_space<vmem>>, vector<6x1619xf32>,
    %c0_141 = arith.constant 0 : index
    %c262 = arith.constant 262 : index
    %114 = vector.load %arg16[%c0_141, %c262] : memref<6x1883xf32, #tpu.memory_space<vmem>>, vector<6x1619xf32>
    %c138 = arith.constant 138 : index
    %c0_142 = arith.constant 0 : index
    %115 = vector.load %arg17[%c138, %c0_142] : memref<150x1619xf32, #tpu.memory_space<vmem>>, vector<6x1619xf32>
    tpu.vector_store %arg17[%c138, %c0_142], %114 {strides = array<i32>} : memref<150x1619xf32, #tpu.memory_space<vmem>>, vector<6x1619xf32>,
    %c0_143 = arith.constant 0 : index
    %c264 = arith.constant 264 : index
    %116 = vector.load %arg16[%c0_143, %c264] : memref<6x1883xf32, #tpu.memory_space<vmem>>, vector<6x1619xf32>
    %c144 = arith.constant 144 : index
    %c0_144 = arith.constant 0 : index
    %117 = vector.load %arg17[%c144, %c0_144] : memref<150x1619xf32, #tpu.memory_space<vmem>>, vector<6x1619xf32>
    tpu.vector_store %arg17[%c144, %c0_144], %116 {strides = array<i32>} : memref<150x1619xf32, #tpu.memory_space<vmem>>, vector<6x1619xf32>,
    %c0_145 = arith.constant 0 : index
    %c0_146 = arith.constant 0 : index
    %118 = vector.load %arg4[%c0_145, %c0_146] : memref<16x150xf32, #tpu.memory_space<vmem>>, vector<16x150xf32>
    %c0_147 = arith.constant 0 : index
    %c0_148 = arith.constant 0 : index
    %119 = vector.load %arg17[%c0_147, %c0_148] : memref<150x1619xf32, #tpu.memory_space<vmem>>, vector<150x1619xf32>
    %cst_149 = arith.constant dense<0.000000e+00> : vector<16x1619xf32>
    %120 = tpu.matmul %118, %119, %cst_149 {dimension_numbers = #tpu.dot_dimension_numbers<[1], [0], [0], [1], [0, 0, 1, 1], [], []>} : vector<16x150xf32>, vector<150x1619xf32>, vector<16x1619xf32> -> vector<16x1619xf32>
    %c0_150 = arith.constant 0 : index
    %c0_151 = arith.constant 0 : index
    %121 = vector.load %arg5[%c0_150, %c0_151] : memref<16x1xf32, #tpu.memory_space<vmem>>, vector<16x1xf32>
    %122 = vector.broadcast %121 : vector<16x1xf32> to vector<16x1619xf32>
    %123 = arith.addf %120, %122 : vector<16x1619xf32>
    %124 = math.tanh %123 : vector<16x1619xf32>
    %c0_152 = arith.constant 0 : index
    %c0_153 = arith.constant 0 : index
    %125 = vector.load %arg18[%c0_152, %c0_153] : memref<16x1619xf32, #tpu.memory_space<vmem>>, vector<16x1619xf32>
    tpu.vector_store %arg18[%c0_152, %c0_153], %124 {strides = array<i32>} : memref<16x1619xf32, #tpu.memory_space<vmem>>, vector<16x1619xf32>,
    %c0_154 = arith.constant 0 : index
    %c0_155 = arith.constant 0 : index
    %126 = vector.load %arg18[%c0_154, %c0_155] : memref<16x1619xf32, #tpu.memory_space<vmem>>, vector<16x1553xf32>
    %c0_156 = arith.constant 0 : index
    %c2_157 = arith.constant 2 : index
    %127 = vector.load %arg18[%c0_156, %c2_157] : memref<16x1619xf32, #tpu.memory_space<vmem>>, vector<16x1553xf32>
    %128 = arith.addf %126, %127 : vector<16x1553xf32>
    %c0_158 = arith.constant 0 : index
    %c64_159 = arith.constant 64 : index
    %129 = vector.load %arg18[%c0_158, %c64_159] : memref<16x1619xf32, #tpu.memory_space<vmem>>, vector<16x1553xf32>
    %130 = arith.addf %128, %129 : vector<16x1553xf32>
    %c0_160 = arith.constant 0 : index
    %c66_161 = arith.constant 66 : index
    %131 = vector.load %arg18[%c0_160, %c66_161] : memref<16x1619xf32, #tpu.memory_space<vmem>>, vector<16x1553xf32>
    %132 = arith.addf %130, %131 : vector<16x1553xf32>
    %cst_162 = arith.constant 2.500000e-01 : f32
    %133 = vector.broadcast %cst_162 : f32 to vector<16x1553xf32>
    %134 = arith.mulf %133, %132 : vector<16x1553xf32>
    %c0_163 = arith.constant 0 : index
    %c0_164 = arith.constant 0 : index
    %135 = vector.load %arg19[%c0_163, %c0_164] : memref<16x1553xf32, #tpu.memory_space<vmem>>, vector<16x1553xf32>
    tpu.vector_store %arg19[%c0_163, %c0_164], %134 {strides = array<i32>} : memref<16x1553xf32, #tpu.memory_space<vmem>>, vector<16x1553xf32>,
    %c0_165 = arith.constant 0 : index
    %c0_166 = arith.constant 0 : index
    %136 = vector.load %arg19[%c0_165, %c0_166] : memref<16x1553xf32, #tpu.memory_space<vmem>>, vector<16x1xf32>
    %c0_167 = arith.constant 0 : index
    %c0_168 = arith.constant 0 : index
    %137 = vector.load %arg20[%c0_167, %c0_168] : memref<400x2xf32, #tpu.memory_space<vmem>>, vector<16x1xf32>
    tpu.vector_store %arg20[%c0_167, %c0_168], %136 {strides = array<i32>} : memref<400x2xf32, #tpu.memory_space<vmem>>, vector<16x1xf32>,
    %c0_169 = arith.constant 0 : index
    %c1024 = arith.constant 1024 : index
    %138 = vector.load %arg19[%c0_169, %c1024] : memref<16x1553xf32, #tpu.memory_space<vmem>>, vector<16x1xf32>
    %c0_170 = arith.constant 0 : index
    %c1_171 = arith.constant 1 : index
    %139 = vector.load %arg20[%c0_170, %c1_171] : memref<400x2xf32, #tpu.memory_space<vmem>>, vector<16x1xf32>
    tpu.vector_store %arg20[%c0_170, %c1_171], %138 {strides = array<i32>} : memref<400x2xf32, #tpu.memory_space<vmem>>, vector<16x1xf32>,
    %c0_172 = arith.constant 0 : index
    %c4_173 = arith.constant 4 : index
    %140 = vector.load %arg19[%c0_172, %c4_173] : memref<16x1553xf32, #tpu.memory_space<vmem>>, vector<16x1xf32>
    %c16_174 = arith.constant 16 : index
    %c0_175 = arith.constant 0 : index
    %141 = vector.load %arg20[%c16_174, %c0_175] : memref<400x2xf32, #tpu.memory_space<vmem>>, vector<16x1xf32>
    tpu.vector_store %arg20[%c16_174, %c0_175], %140 {strides = array<i32>} : memref<400x2xf32, #tpu.memory_space<vmem>>, vector<16x1xf32>,
    %c0_176 = arith.constant 0 : index
    %c1028 = arith.constant 1028 : index
    %142 = vector.load %arg19[%c0_176, %c1028] : memref<16x1553xf32, #tpu.memory_space<vmem>>, vector<16x1xf32>
    %c16_177 = arith.constant 16 : index
    %c1_178 = arith.constant 1 : index
    %143 = vector.load %arg20[%c16_177, %c1_178] : memref<400x2xf32, #tpu.memory_space<vmem>>, vector<16x1xf32>
    tpu.vector_store %arg20[%c16_177, %c1_178], %142 {strides = array<i32>} : memref<400x2xf32, #tpu.memory_space<vmem>>, vector<16x1xf32>,
    %c0_179 = arith.constant 0 : index
    %c8_180 = arith.constant 8 : index
    %144 = vector.load %arg19[%c0_179, %c8_180] : memref<16x1553xf32, #tpu.memory_space<vmem>>, vector<16x1xf32>
    %c32_181 = arith.constant 32 : index
    %c0_182 = arith.constant 0 : index
    %145 = vector.load %arg20[%c32_181, %c0_182] : memref<400x2xf32, #tpu.memory_space<vmem>>, vector<16x1xf32>
    tpu.vector_store %arg20[%c32_181, %c0_182], %144 {strides = array<i32>} : memref<400x2xf32, #tpu.memory_space<vmem>>, vector<16x1xf32>,
    %c0_183 = arith.constant 0 : index
    %c1032 = arith.constant 1032 : index
    %146 = vector.load %arg19[%c0_183, %c1032] : memref<16x1553xf32, #tpu.memory_space<vmem>>, vector<16x1xf32>
    %c32_184 = arith.constant 32 : index
    %c1_185 = arith.constant 1 : index
    %147 = vector.load %arg20[%c32_184, %c1_185] : memref<400x2xf32, #tpu.memory_space<vmem>>, vector<16x1xf32>
    tpu.vector_store %arg20[%c32_184, %c1_185], %146 {strides = array<i32>} : memref<400x2xf32, #tpu.memory_space<vmem>>, vector<16x1xf32>,
    %c0_186 = arith.constant 0 : index
    %c12_187 = arith.constant 12 : index
    %148 = vector.load %arg19[%c0_186, %c12_187] : memref<16x1553xf32, #tpu.memory_space<vmem>>, vector<16x1xf32>
    %c48_188 = arith.constant 48 : index
    %c0_189 = arith.constant 0 : index
    %149 = vector.load %arg20[%c48_188, %c0_189] : memref<400x2xf32, #tpu.memory_space<vmem>>, vector<16x1xf32>
    tpu.vector_store %arg20[%c48_188, %c0_189], %148 {strides = array<i32>} : memref<400x2xf32, #tpu.memory_space<vmem>>, vector<16x1xf32>,
    %c0_190 = arith.constant 0 : index
    %c1036 = arith.constant 1036 : index
    %150 = vector.load %arg19[%c0_190, %c1036] : memref<16x1553xf32, #tpu.memory_space<vmem>>, vector<16x1xf32>
    %c48_191 = arith.constant 48 : index
    %c1_192 = arith.constant 1 : index
    %151 = vector.load %arg20[%c48_191, %c1_192] : memref<400x2xf32, #tpu.memory_space<vmem>>, vector<16x1xf32>
    tpu.vector_store %arg20[%c48_191, %c1_192], %150 {strides = array<i32>} : memref<400x2xf32, #tpu.memory_space<vmem>>, vector<16x1xf32>,
    %c0_193 = arith.constant 0 : index
    %c16_194 = arith.constant 16 : index
    %152 = vector.load %arg19[%c0_193, %c16_194] : memref<16x1553xf32, #tpu.memory_space<vmem>>, vector<16x1xf32>
    %c64_195 = arith.constant 64 : index
    %c0_196 = arith.constant 0 : index
    %153 = vector.load %arg20[%c64_195, %c0_196] : memref<400x2xf32, #tpu.memory_space<vmem>>, vector<16x1xf32>
    tpu.vector_store %arg20[%c64_195, %c0_196], %152 {strides = array<i32>} : memref<400x2xf32, #tpu.memory_space<vmem>>, vector<16x1xf32>,
    %c0_197 = arith.constant 0 : index
    %c1040 = arith.constant 1040 : index
    %154 = vector.load %arg19[%c0_197, %c1040] : memref<16x1553xf32, #tpu.memory_space<vmem>>, vector<16x1xf32>
    %c64_198 = arith.constant 64 : index
    %c1_199 = arith.constant 1 : index
    %155 = vector.load %arg20[%c64_198, %c1_199] : memref<400x2xf32, #tpu.memory_space<vmem>>, vector<16x1xf32>
    tpu.vector_store %arg20[%c64_198, %c1_199], %154 {strides = array<i32>} : memref<400x2xf32, #tpu.memory_space<vmem>>, vector<16x1xf32>,
    %c0_200 = arith.constant 0 : index
    %c128_201 = arith.constant 128 : index
    %156 = vector.load %arg19[%c0_200, %c128_201] : memref<16x1553xf32, #tpu.memory_space<vmem>>, vector<16x1xf32>
    %c80 = arith.constant 80 : index
    %c0_202 = arith.constant 0 : index
    %157 = vector.load %arg20[%c80, %c0_202] : memref<400x2xf32, #tpu.memory_space<vmem>>, vector<16x1xf32>
    tpu.vector_store %arg20[%c80, %c0_202], %156 {strides = array<i32>} : memref<400x2xf32, #tpu.memory_space<vmem>>, vector<16x1xf32>,
    %c0_203 = arith.constant 0 : index
    %c1152 = arith.constant 1152 : index
    %158 = vector.load %arg19[%c0_203, %c1152] : memref<16x1553xf32, #tpu.memory_space<vmem>>, vector<16x1xf32>
    %c80_204 = arith.constant 80 : index
    %c1_205 = arith.constant 1 : index
    %159 = vector.load %arg20[%c80_204, %c1_205] : memref<400x2xf32, #tpu.memory_space<vmem>>, vector<16x1xf32>
    tpu.vector_store %arg20[%c80_204, %c1_205], %158 {strides = array<i32>} : memref<400x2xf32, #tpu.memory_space<vmem>>, vector<16x1xf32>,
    %c0_206 = arith.constant 0 : index
    %c132_207 = arith.constant 132 : index
    %160 = vector.load %arg19[%c0_206, %c132_207] : memref<16x1553xf32, #tpu.memory_space<vmem>>, vector<16x1xf32>
    %c96_208 = arith.constant 96 : index
    %c0_209 = arith.constant 0 : index
    %161 = vector.load %arg20[%c96_208, %c0_209] : memref<400x2xf32, #tpu.memory_space<vmem>>, vector<16x1xf32>
    tpu.vector_store %arg20[%c96_208, %c0_209], %160 {strides = array<i32>} : memref<400x2xf32, #tpu.memory_space<vmem>>, vector<16x1xf32>,
    %c0_210 = arith.constant 0 : index
    %c1156 = arith.constant 1156 : index
    %162 = vector.load %arg19[%c0_210, %c1156] : memref<16x1553xf32, #tpu.memory_space<vmem>>, vector<16x1xf32>
    %c96_211 = arith.constant 96 : index
    %c1_212 = arith.constant 1 : index
    %163 = vector.load %arg20[%c96_211, %c1_212] : memref<400x2xf32, #tpu.memory_space<vmem>>, vector<16x1xf32>
    tpu.vector_store %arg20[%c96_211, %c1_212], %162 {strides = array<i32>} : memref<400x2xf32, #tpu.memory_space<vmem>>, vector<16x1xf32>,
    %c0_213 = arith.constant 0 : index
    %c136_214 = arith.constant 136 : index
    %164 = vector.load %arg19[%c0_213, %c136_214] : memref<16x1553xf32, #tpu.memory_space<vmem>>, vector<16x1xf32>
    %c112 = arith.constant 112 : index
    %c0_215 = arith.constant 0 : index
    %165 = vector.load %arg20[%c112, %c0_215] : memref<400x2xf32, #tpu.memory_space<vmem>>, vector<16x1xf32>
    tpu.vector_store %arg20[%c112, %c0_215], %164 {strides = array<i32>} : memref<400x2xf32, #tpu.memory_space<vmem>>, vector<16x1xf32>,
    %c0_216 = arith.constant 0 : index
    %c1160 = arith.constant 1160 : index
    %166 = vector.load %arg19[%c0_216, %c1160] : memref<16x1553xf32, #tpu.memory_space<vmem>>, vector<16x1xf32>
    %c112_217 = arith.constant 112 : index
    %c1_218 = arith.constant 1 : index
    %167 = vector.load %arg20[%c112_217, %c1_218] : memref<400x2xf32, #tpu.memory_space<vmem>>, vector<16x1xf32>
    tpu.vector_store %arg20[%c112_217, %c1_218], %166 {strides = array<i32>} : memref<400x2xf32, #tpu.memory_space<vmem>>, vector<16x1xf32>,
    %c0_219 = arith.constant 0 : index
    %c140 = arith.constant 140 : index
    %168 = vector.load %arg19[%c0_219, %c140] : memref<16x1553xf32, #tpu.memory_space<vmem>>, vector<16x1xf32>
    %c128_220 = arith.constant 128 : index
    %c0_221 = arith.constant 0 : index
    %169 = vector.load %arg20[%c128_220, %c0_221] : memref<400x2xf32, #tpu.memory_space<vmem>>, vector<16x1xf32>
    tpu.vector_store %arg20[%c128_220, %c0_221], %168 {strides = array<i32>} : memref<400x2xf32, #tpu.memory_space<vmem>>, vector<16x1xf32>,
    %c0_222 = arith.constant 0 : index
    %c1164 = arith.constant 1164 : index
    %170 = vector.load %arg19[%c0_222, %c1164] : memref<16x1553xf32, #tpu.memory_space<vmem>>, vector<16x1xf32>
    %c128_223 = arith.constant 128 : index
    %c1_224 = arith.constant 1 : index
    %171 = vector.load %arg20[%c128_223, %c1_224] : memref<400x2xf32, #tpu.memory_space<vmem>>, vector<16x1xf32>
    tpu.vector_store %arg20[%c128_223, %c1_224], %170 {strides = array<i32>} : memref<400x2xf32, #tpu.memory_space<vmem>>, vector<16x1xf32>,
    %c0_225 = arith.constant 0 : index
    %c144_226 = arith.constant 144 : index
    %172 = vector.load %arg19[%c0_225, %c144_226] : memref<16x1553xf32, #tpu.memory_space<vmem>>, vector<16x1xf32>
    %c144_227 = arith.constant 144 : index
    %c0_228 = arith.constant 0 : index
    %173 = vector.load %arg20[%c144_227, %c0_228] : memref<400x2xf32, #tpu.memory_space<vmem>>, vector<16x1xf32>
    tpu.vector_store %arg20[%c144_227, %c0_228], %172 {strides = array<i32>} : memref<400x2xf32, #tpu.memory_space<vmem>>, vector<16x1xf32>,
    %c0_229 = arith.constant 0 : index
    %c1168 = arith.constant 1168 : index
    %174 = vector.load %arg19[%c0_229, %c1168] : memref<16x1553xf32, #tpu.memory_space<vmem>>, vector<16x1xf32>
    %c144_230 = arith.constant 144 : index
    %c1_231 = arith.constant 1 : index
    %175 = vector.load %arg20[%c144_230, %c1_231] : memref<400x2xf32, #tpu.memory_space<vmem>>, vector<16x1xf32>
    tpu.vector_store %arg20[%c144_230, %c1_231], %174 {strides = array<i32>} : memref<400x2xf32, #tpu.memory_space<vmem>>, vector<16x1xf32>,
    %c0_232 = arith.constant 0 : index
    %c256_233 = arith.constant 256 : index
    %176 = vector.load %arg19[%c0_232, %c256_233] : memref<16x1553xf32, #tpu.memory_space<vmem>>, vector<16x1xf32>
    %c160 = arith.constant 160 : index
    %c0_234 = arith.constant 0 : index
    %177 = vector.load %arg20[%c160, %c0_234] : memref<400x2xf32, #tpu.memory_space<vmem>>, vector<16x1xf32>
    tpu.vector_store %arg20[%c160, %c0_234], %176 {strides = array<i32>} : memref<400x2xf32, #tpu.memory_space<vmem>>, vector<16x1xf32>,
    %c0_235 = arith.constant 0 : index
    %c1280 = arith.constant 1280 : index
    %178 = vector.load %arg19[%c0_235, %c1280] : memref<16x1553xf32, #tpu.memory_space<vmem>>, vector<16x1xf32>
    %c160_236 = arith.constant 160 : index
    %c1_237 = arith.constant 1 : index
    %179 = vector.load %arg20[%c160_236, %c1_237] : memref<400x2xf32, #tpu.memory_space<vmem>>, vector<16x1xf32>
    tpu.vector_store %arg20[%c160_236, %c1_237], %178 {strides = array<i32>} : memref<400x2xf32, #tpu.memory_space<vmem>>, vector<16x1xf32>,
    %c0_238 = arith.constant 0 : index
    %c260_239 = arith.constant 260 : index
    %180 = vector.load %arg19[%c0_238, %c260_239] : memref<16x1553xf32, #tpu.memory_space<vmem>>, vector<16x1xf32>
    %c176 = arith.constant 176 : index
    %c0_240 = arith.constant 0 : index
    %181 = vector.load %arg20[%c176, %c0_240] : memref<400x2xf32, #tpu.memory_space<vmem>>, vector<16x1xf32>
    tpu.vector_store %arg20[%c176, %c0_240], %180 {strides = array<i32>} : memref<400x2xf32, #tpu.memory_space<vmem>>, vector<16x1xf32>,
    %c0_241 = arith.constant 0 : index
    %c1284 = arith.constant 1284 : index
    %182 = vector.load %arg19[%c0_241, %c1284] : memref<16x1553xf32, #tpu.memory_space<vmem>>, vector<16x1xf32>
    %c176_242 = arith.constant 176 : index
    %c1_243 = arith.constant 1 : index
    %183 = vector.load %arg20[%c176_242, %c1_243] : memref<400x2xf32, #tpu.memory_space<vmem>>, vector<16x1xf32>
    tpu.vector_store %arg20[%c176_242, %c1_243], %182 {strides = array<i32>} : memref<400x2xf32, #tpu.memory_space<vmem>>, vector<16x1xf32>,
    %c0_244 = arith.constant 0 : index
    %c264_245 = arith.constant 264 : index
    %184 = vector.load %arg19[%c0_244, %c264_245] : memref<16x1553xf32, #tpu.memory_space<vmem>>, vector<16x1xf32>
    %c192_246 = arith.constant 192 : index
    %c0_247 = arith.constant 0 : index
    %185 = vector.load %arg20[%c192_246, %c0_247] : memref<400x2xf32, #tpu.memory_space<vmem>>, vector<16x1xf32>
    tpu.vector_store %arg20[%c192_246, %c0_247], %184 {strides = array<i32>} : memref<400x2xf32, #tpu.memory_space<vmem>>, vector<16x1xf32>,
    %c0_248 = arith.constant 0 : index
    %c1288 = arith.constant 1288 : index
    %186 = vector.load %arg19[%c0_248, %c1288] : memref<16x1553xf32, #tpu.memory_space<vmem>>, vector<16x1xf32>
    %c192_249 = arith.constant 192 : index
    %c1_250 = arith.constant 1 : index
    %187 = vector.load %arg20[%c192_249, %c1_250] : memref<400x2xf32, #tpu.memory_space<vmem>>, vector<16x1xf32>
    tpu.vector_store %arg20[%c192_249, %c1_250], %186 {strides = array<i32>} : memref<400x2xf32, #tpu.memory_space<vmem>>, vector<16x1xf32>,
    %c0_251 = arith.constant 0 : index
    %c268 = arith.constant 268 : index
    %188 = vector.load %arg19[%c0_251, %c268] : memref<16x1553xf32, #tpu.memory_space<vmem>>, vector<16x1xf32>
    %c208 = arith.constant 208 : index
    %c0_252 = arith.constant 0 : index
    %189 = vector.load %arg20[%c208, %c0_252] : memref<400x2xf32, #tpu.memory_space<vmem>>, vector<16x1xf32>
    tpu.vector_store %arg20[%c208, %c0_252], %188 {strides = array<i32>} : memref<400x2xf32, #tpu.memory_space<vmem>>, vector<16x1xf32>,
    %c0_253 = arith.constant 0 : index
    %c1292 = arith.constant 1292 : index
    %190 = vector.load %arg19[%c0_253, %c1292] : memref<16x1553xf32, #tpu.memory_space<vmem>>, vector<16x1xf32>
    %c208_254 = arith.constant 208 : index
    %c1_255 = arith.constant 1 : index
    %191 = vector.load %arg20[%c208_254, %c1_255] : memref<400x2xf32, #tpu.memory_space<vmem>>, vector<16x1xf32>
    tpu.vector_store %arg20[%c208_254, %c1_255], %190 {strides = array<i32>} : memref<400x2xf32, #tpu.memory_space<vmem>>, vector<16x1xf32>,
    %c0_256 = arith.constant 0 : index
    %c272 = arith.constant 272 : index
    %192 = vector.load %arg19[%c0_256, %c272] : memref<16x1553xf32, #tpu.memory_space<vmem>>, vector<16x1xf32>
    %c224 = arith.constant 224 : index
    %c0_257 = arith.constant 0 : index
    %193 = vector.load %arg20[%c224, %c0_257] : memref<400x2xf32, #tpu.memory_space<vmem>>, vector<16x1xf32>
    tpu.vector_store %arg20[%c224, %c0_257], %192 {strides = array<i32>} : memref<400x2xf32, #tpu.memory_space<vmem>>, vector<16x1xf32>,
    %c0_258 = arith.constant 0 : index
    %c1296 = arith.constant 1296 : index
    %194 = vector.load %arg19[%c0_258, %c1296] : memref<16x1553xf32, #tpu.memory_space<vmem>>, vector<16x1xf32>
    %c224_259 = arith.constant 224 : index
    %c1_260 = arith.constant 1 : index
    %195 = vector.load %arg20[%c224_259, %c1_260] : memref<400x2xf32, #tpu.memory_space<vmem>>, vector<16x1xf32>
    tpu.vector_store %arg20[%c224_259, %c1_260], %194 {strides = array<i32>} : memref<400x2xf32, #tpu.memory_space<vmem>>, vector<16x1xf32>,
    %c0_261 = arith.constant 0 : index
    %c384 = arith.constant 384 : index
    %196 = vector.load %arg19[%c0_261, %c384] : memref<16x1553xf32, #tpu.memory_space<vmem>>, vector<16x1xf32>
    %c240 = arith.constant 240 : index
    %c0_262 = arith.constant 0 : index
    %197 = vector.load %arg20[%c240, %c0_262] : memref<400x2xf32, #tpu.memory_space<vmem>>, vector<16x1xf32>
    tpu.vector_store %arg20[%c240, %c0_262], %196 {strides = array<i32>} : memref<400x2xf32, #tpu.memory_space<vmem>>, vector<16x1xf32>,
    %c0_263 = arith.constant 0 : index
    %c1408 = arith.constant 1408 : index
    %198 = vector.load %arg19[%c0_263, %c1408] : memref<16x1553xf32, #tpu.memory_space<vmem>>, vector<16x1xf32>
    %c240_264 = arith.constant 240 : index
    %c1_265 = arith.constant 1 : index
    %199 = vector.load %arg20[%c240_264, %c1_265] : memref<400x2xf32, #tpu.memory_space<vmem>>, vector<16x1xf32>
    tpu.vector_store %arg20[%c240_264, %c1_265], %198 {strides = array<i32>} : memref<400x2xf32, #tpu.memory_space<vmem>>, vector<16x1xf32>,
    %c0_266 = arith.constant 0 : index
    %c388 = arith.constant 388 : index
    %200 = vector.load %arg19[%c0_266, %c388] : memref<16x1553xf32, #tpu.memory_space<vmem>>, vector<16x1xf32>
    %c256_267 = arith.constant 256 : index
    %c0_268 = arith.constant 0 : index
    %201 = vector.load %arg20[%c256_267, %c0_268] : memref<400x2xf32, #tpu.memory_space<vmem>>, vector<16x1xf32>
    tpu.vector_store %arg20[%c256_267, %c0_268], %200 {strides = array<i32>} : memref<400x2xf32, #tpu.memory_space<vmem>>, vector<16x1xf32>,
    %c0_269 = arith.constant 0 : index
    %c1412 = arith.constant 1412 : index
    %202 = vector.load %arg19[%c0_269, %c1412] : memref<16x1553xf32, #tpu.memory_space<vmem>>, vector<16x1xf32>
    %c256_270 = arith.constant 256 : index
    %c1_271 = arith.constant 1 : index
    %203 = vector.load %arg20[%c256_270, %c1_271] : memref<400x2xf32, #tpu.memory_space<vmem>>, vector<16x1xf32>
    tpu.vector_store %arg20[%c256_270, %c1_271], %202 {strides = array<i32>} : memref<400x2xf32, #tpu.memory_space<vmem>>, vector<16x1xf32>,
    %c0_272 = arith.constant 0 : index
    %c392 = arith.constant 392 : index
    %204 = vector.load %arg19[%c0_272, %c392] : memref<16x1553xf32, #tpu.memory_space<vmem>>, vector<16x1xf32>
    %c272_273 = arith.constant 272 : index
    %c0_274 = arith.constant 0 : index
    %205 = vector.load %arg20[%c272_273, %c0_274] : memref<400x2xf32, #tpu.memory_space<vmem>>, vector<16x1xf32>
    tpu.vector_store %arg20[%c272_273, %c0_274], %204 {strides = array<i32>} : memref<400x2xf32, #tpu.memory_space<vmem>>, vector<16x1xf32>,
    %c0_275 = arith.constant 0 : index
    %c1416 = arith.constant 1416 : index
    %206 = vector.load %arg19[%c0_275, %c1416] : memref<16x1553xf32, #tpu.memory_space<vmem>>, vector<16x1xf32>
    %c272_276 = arith.constant 272 : index
    %c1_277 = arith.constant 1 : index
    %207 = vector.load %arg20[%c272_276, %c1_277] : memref<400x2xf32, #tpu.memory_space<vmem>>, vector<16x1xf32>
    tpu.vector_store %arg20[%c272_276, %c1_277], %206 {strides = array<i32>} : memref<400x2xf32, #tpu.memory_space<vmem>>, vector<16x1xf32>,
    %c0_278 = arith.constant 0 : index
    %c396 = arith.constant 396 : index
    %208 = vector.load %arg19[%c0_278, %c396] : memref<16x1553xf32, #tpu.memory_space<vmem>>, vector<16x1xf32>
    %c288 = arith.constant 288 : index
    %c0_279 = arith.constant 0 : index
    %209 = vector.load %arg20[%c288, %c0_279] : memref<400x2xf32, #tpu.memory_space<vmem>>, vector<16x1xf32>
    tpu.vector_store %arg20[%c288, %c0_279], %208 {strides = array<i32>} : memref<400x2xf32, #tpu.memory_space<vmem>>, vector<16x1xf32>,
    %c0_280 = arith.constant 0 : index
    %c1420 = arith.constant 1420 : index
    %210 = vector.load %arg19[%c0_280, %c1420] : memref<16x1553xf32, #tpu.memory_space<vmem>>, vector<16x1xf32>
    %c288_281 = arith.constant 288 : index
    %c1_282 = arith.constant 1 : index
    %211 = vector.load %arg20[%c288_281, %c1_282] : memref<400x2xf32, #tpu.memory_space<vmem>>, vector<16x1xf32>
    tpu.vector_store %arg20[%c288_281, %c1_282], %210 {strides = array<i32>} : memref<400x2xf32, #tpu.memory_space<vmem>>, vector<16x1xf32>,
    %c0_283 = arith.constant 0 : index
    %c400 = arith.constant 400 : index
    %212 = vector.load %arg19[%c0_283, %c400] : memref<16x1553xf32, #tpu.memory_space<vmem>>, vector<16x1xf32>
    %c304 = arith.constant 304 : index
    %c0_284 = arith.constant 0 : index
    %213 = vector.load %arg20[%c304, %c0_284] : memref<400x2xf32, #tpu.memory_space<vmem>>, vector<16x1xf32>
    tpu.vector_store %arg20[%c304, %c0_284], %212 {strides = array<i32>} : memref<400x2xf32, #tpu.memory_space<vmem>>, vector<16x1xf32>,
    %c0_285 = arith.constant 0 : index
    %c1424 = arith.constant 1424 : index
    %214 = vector.load %arg19[%c0_285, %c1424] : memref<16x1553xf32, #tpu.memory_space<vmem>>, vector<16x1xf32>
    %c304_286 = arith.constant 304 : index
    %c1_287 = arith.constant 1 : index
    %215 = vector.load %arg20[%c304_286, %c1_287] : memref<400x2xf32, #tpu.memory_space<vmem>>, vector<16x1xf32>
    tpu.vector_store %arg20[%c304_286, %c1_287], %214 {strides = array<i32>} : memref<400x2xf32, #tpu.memory_space<vmem>>, vector<16x1xf32>,
    %c0_288 = arith.constant 0 : index
    %c512 = arith.constant 512 : index
    %216 = vector.load %arg19[%c0_288, %c512] : memref<16x1553xf32, #tpu.memory_space<vmem>>, vector<16x1xf32>
    %c320 = arith.constant 320 : index
    %c0_289 = arith.constant 0 : index
    %217 = vector.load %arg20[%c320, %c0_289] : memref<400x2xf32, #tpu.memory_space<vmem>>, vector<16x1xf32>
    tpu.vector_store %arg20[%c320, %c0_289], %216 {strides = array<i32>} : memref<400x2xf32, #tpu.memory_space<vmem>>, vector<16x1xf32>,
    %c0_290 = arith.constant 0 : index
    %c1536 = arith.constant 1536 : index
    %218 = vector.load %arg19[%c0_290, %c1536] : memref<16x1553xf32, #tpu.memory_space<vmem>>, vector<16x1xf32>
    %c320_291 = arith.constant 320 : index
    %c1_292 = arith.constant 1 : index
    %219 = vector.load %arg20[%c320_291, %c1_292] : memref<400x2xf32, #tpu.memory_space<vmem>>, vector<16x1xf32>
    tpu.vector_store %arg20[%c320_291, %c1_292], %218 {strides = array<i32>} : memref<400x2xf32, #tpu.memory_space<vmem>>, vector<16x1xf32>,
    %c0_293 = arith.constant 0 : index
    %c516 = arith.constant 516 : index
    %220 = vector.load %arg19[%c0_293, %c516] : memref<16x1553xf32, #tpu.memory_space<vmem>>, vector<16x1xf32>
    %c336 = arith.constant 336 : index
    %c0_294 = arith.constant 0 : index
    %221 = vector.load %arg20[%c336, %c0_294] : memref<400x2xf32, #tpu.memory_space<vmem>>, vector<16x1xf32>
    tpu.vector_store %arg20[%c336, %c0_294], %220 {strides = array<i32>} : memref<400x2xf32, #tpu.memory_space<vmem>>, vector<16x1xf32>,
    %c0_295 = arith.constant 0 : index
    %c1540 = arith.constant 1540 : index
    %222 = vector.load %arg19[%c0_295, %c1540] : memref<16x1553xf32, #tpu.memory_space<vmem>>, vector<16x1xf32>
    %c336_296 = arith.constant 336 : index
    %c1_297 = arith.constant 1 : index
    %223 = vector.load %arg20[%c336_296, %c1_297] : memref<400x2xf32, #tpu.memory_space<vmem>>, vector<16x1xf32>
    tpu.vector_store %arg20[%c336_296, %c1_297], %222 {strides = array<i32>} : memref<400x2xf32, #tpu.memory_space<vmem>>, vector<16x1xf32>,
    %c0_298 = arith.constant 0 : index
    %c520 = arith.constant 520 : index
    %224 = vector.load %arg19[%c0_298, %c520] : memref<16x1553xf32, #tpu.memory_space<vmem>>, vector<16x1xf32>
    %c352 = arith.constant 352 : index
    %c0_299 = arith.constant 0 : index
    %225 = vector.load %arg20[%c352, %c0_299] : memref<400x2xf32, #tpu.memory_space<vmem>>, vector<16x1xf32>
    tpu.vector_store %arg20[%c352, %c0_299], %224 {strides = array<i32>} : memref<400x2xf32, #tpu.memory_space<vmem>>, vector<16x1xf32>,
    %c0_300 = arith.constant 0 : index
    %c1544 = arith.constant 1544 : index
    %226 = vector.load %arg19[%c0_300, %c1544] : memref<16x1553xf32, #tpu.memory_space<vmem>>, vector<16x1xf32>
    %c352_301 = arith.constant 352 : index
    %c1_302 = arith.constant 1 : index
    %227 = vector.load %arg20[%c352_301, %c1_302] : memref<400x2xf32, #tpu.memory_space<vmem>>, vector<16x1xf32>
    tpu.vector_store %arg20[%c352_301, %c1_302], %226 {strides = array<i32>} : memref<400x2xf32, #tpu.memory_space<vmem>>, vector<16x1xf32>,
    %c0_303 = arith.constant 0 : index
    %c524 = arith.constant 524 : index
    %228 = vector.load %arg19[%c0_303, %c524] : memref<16x1553xf32, #tpu.memory_space<vmem>>, vector<16x1xf32>
    %c368 = arith.constant 368 : index
    %c0_304 = arith.constant 0 : index
    %229 = vector.load %arg20[%c368, %c0_304] : memref<400x2xf32, #tpu.memory_space<vmem>>, vector<16x1xf32>
    tpu.vector_store %arg20[%c368, %c0_304], %228 {strides = array<i32>} : memref<400x2xf32, #tpu.memory_space<vmem>>, vector<16x1xf32>,
    %c0_305 = arith.constant 0 : index
    %c1548 = arith.constant 1548 : index
    %230 = vector.load %arg19[%c0_305, %c1548] : memref<16x1553xf32, #tpu.memory_space<vmem>>, vector<16x1xf32>
    %c368_306 = arith.constant 368 : index
    %c1_307 = arith.constant 1 : index
    %231 = vector.load %arg20[%c368_306, %c1_307] : memref<400x2xf32, #tpu.memory_space<vmem>>, vector<16x1xf32>
    tpu.vector_store %arg20[%c368_306, %c1_307], %230 {strides = array<i32>} : memref<400x2xf32, #tpu.memory_space<vmem>>, vector<16x1xf32>,
    %c0_308 = arith.constant 0 : index
    %c528 = arith.constant 528 : index
    %232 = vector.load %arg19[%c0_308, %c528] : memref<16x1553xf32, #tpu.memory_space<vmem>>, vector<16x1xf32>
    %c384_309 = arith.constant 384 : index
    %c0_310 = arith.constant 0 : index
    %233 = vector.load %arg20[%c384_309, %c0_310] : memref<400x2xf32, #tpu.memory_space<vmem>>, vector<16x1xf32>
    tpu.vector_store %arg20[%c384_309, %c0_310], %232 {strides = array<i32>} : memref<400x2xf32, #tpu.memory_space<vmem>>, vector<16x1xf32>,
    %c0_311 = arith.constant 0 : index
    %c1552 = arith.constant 1552 : index
    %234 = vector.load %arg19[%c0_311, %c1552] : memref<16x1553xf32, #tpu.memory_space<vmem>>, vector<16x1xf32>
    %c384_312 = arith.constant 384 : index
    %c1_313 = arith.constant 1 : index
    %235 = vector.load %arg20[%c384_312, %c1_313] : memref<400x2xf32, #tpu.memory_space<vmem>>, vector<16x1xf32>
    tpu.vector_store %arg20[%c384_312, %c1_313], %234 {strides = array<i32>} : memref<400x2xf32, #tpu.memory_space<vmem>>, vector<16x1xf32>,
    %c0_314 = arith.constant 0 : index
    %c0_315 = arith.constant 0 : index
    %236 = vector.load %arg6[%c0_314, %c0_315] : memref<120x400xf32, #tpu.memory_space<vmem>>, vector<120x400xf32>
    %c0_316 = arith.constant 0 : index
    %c0_317 = arith.constant 0 : index
    %237 = vector.load %arg20[%c0_316, %c0_317] : memref<400x2xf32, #tpu.memory_space<vmem>>, vector<400x2xf32>
    %cst_318 = arith.constant dense<0.000000e+00> : vector<120x2xf32>
    %238 = tpu.matmul %236, %237, %cst_318 {dimension_numbers = #tpu.dot_dimension_numbers<[1], [0], [0], [1], [0, 0, 1, 1], [], []>} : vector<120x400xf32>, vector<400x2xf32>, vector<120x2xf32> -> vector<120x2xf32>
    %c0_319 = arith.constant 0 : index
    %c0_320 = arith.constant 0 : index
    %239 = vector.load %arg7[%c0_319, %c0_320] : memref<120x1xf32, #tpu.memory_space<vmem>>, vector<120x1xf32>
    %240 = vector.broadcast %239 : vector<120x1xf32> to vector<120x2xf32>
    %241 = arith.addf %238, %240 : vector<120x2xf32>
    %242 = math.tanh %241 : vector<120x2xf32>
    %c0_321 = arith.constant 0 : index
    %c0_322 = arith.constant 0 : index
    %243 = vector.load %arg8[%c0_321, %c0_322] : memref<84x120xf32, #tpu.memory_space<vmem>>, vector<84x120xf32>
    %cst_323 = arith.constant dense<0.000000e+00> : vector<84x2xf32>
    %244 = tpu.matmul %243, %242, %cst_323 {dimension_numbers = #tpu.dot_dimension_numbers<[1], [0], [0], [1], [0, 0, 1, 1], [], []>} : vector<84x120xf32>, vector<120x2xf32>, vector<84x2xf32> -> vector<84x2xf32>
    %c0_324 = arith.constant 0 : index
    %c0_325 = arith.constant 0 : index
    %245 = vector.load %arg9[%c0_324, %c0_325] : memref<84x1xf32, #tpu.memory_space<vmem>>, vector<84x1xf32>
    %246 = vector.broadcast %245 : vector<84x1xf32> to vector<84x2xf32>
    %247 = arith.addf %244, %246 : vector<84x2xf32>
    %248 = math.tanh %247 : vector<84x2xf32>
    %c0_326 = arith.constant 0 : index
    %c0_327 = arith.constant 0 : index
    %249 = vector.load %arg10[%c0_326, %c0_327] : memref<10x84xf32, #tpu.memory_space<vmem>>, vector<10x84xf32>
    %cst_328 = arith.constant dense<0.000000e+00> : vector<10x2xf32>
    %250 = tpu.matmul %249, %248, %cst_328 {dimension_numbers = #tpu.dot_dimension_numbers<[1], [0], [0], [1], [0, 0, 1, 1], [], []>} : vector<10x84xf32>, vector<84x2xf32>, vector<10x2xf32> -> vector<10x2xf32>
    %c0_329 = arith.constant 0 : index
    %c0_330 = arith.constant 0 : index
    %251 = vector.load %arg11[%c0_329, %c0_330] : memref<10x1xf32, #tpu.memory_space<vmem>>, vector<10x1xf32>
    %252 = vector.broadcast %251 : vector<10x1xf32> to vector<10x2xf32>
    %253 = arith.addf %250, %252 : vector<10x2xf32>
    %c0_331 = arith.constant 0 : index
    %c0_332 = arith.constant 0 : index
    %254 = vector.load %arg12[%c0_331, %c0_332] : memref<10x2xf32, #tpu.memory_space<vmem>>, vector<10x2xf32>
    tpu.vector_store %arg12[%c0_331, %c0_332], %253 {strides = array<i32>} : memref<10x2xf32, #tpu.memory_space<vmem>>, vector<10x2xf32>,
    %cst_333 = arith.constant dense<0xFF800000> : vector<2xf32>
    %255 = vector.multi_reduction <maximumf>, %253, %cst_333 [0] : vector<10x2xf32> to vector<2xf32>
    %256 = vector.shape_cast %255 : vector<2xf32> to vector<1x2xf32>
    %257 = vector.broadcast %256 : vector<1x2xf32> to vector<10x2xf32>
    %258 = arith.subf %253, %257 : vector<10x2xf32>
    %259 = math.exp %258 : vector<10x2xf32>
    %cst_334 = arith.constant dense<0.000000e+00> : vector<2xf32>
    %260 = vector.multi_reduction <add>, %259, %cst_334 [0] : vector<10x2xf32> to vector<2xf32>
    %261 = vector.shape_cast %260 : vector<2xf32> to vector<1x2xf32>
    %262 = tpu.reciprocal %261 : vector<1x2xf32> -> vector<1x2xf32>
    %263 = vector.broadcast %262 : vector<1x2xf32> to vector<10x2xf32>
    %264 = arith.mulf %259, %263 : vector<10x2xf32>
    %c0_335 = arith.constant 0 : index
    %c0_336 = arith.constant 0 : index
    %265 = vector.load %arg13[%c0_335, %c0_336] : memref<10x2xf32, #tpu.memory_space<vmem>>, vector<10x2xf32>
    tpu.vector_store %arg13[%c0_335, %c0_336], %264 {strides = array<i32>} : memref<10x2xf32, #tpu.memory_space<vmem>>, vector<10x2xf32>,
    return
  }
  func.func @transform_0(%arg0: i32) -> (i32, i32) {
    %c0_i32 = arith.constant 0 : i32
    %c0_i32_0 = arith.constant 0 : i32
    %c0_i32_1 = arith.constant 0 : i32
    return %c0_i32, %c0_i32_0 : i32, i32
  }
  func.func @transform_1(%arg0: i32) -> (i32, i32) {
    %c0_i32 = arith.constant 0 : i32
    %c0_i32_0 = arith.constant 0 : i32
    %c0_i32_1 = arith.constant 0 : i32
    return %c0_i32, %c0_i32_0 : i32, i32
  }
  func.func @transform_2(%arg0: i32) -> (i32, i32) {
    %c0_i32 = arith.constant 0 : i32
    %c0_i32_0 = arith.constant 0 : i32
    %c0_i32_1 = arith.constant 0 : i32
    return %c0_i32, %c0_i32_0 : i32, i32
  }
  func.func @transform_3(%arg0: i32) -> (i32, i32) {
    %c0_i32 = arith.constant 0 : i32
    %c0_i32_0 = arith.constant 0 : i32
    %c0_i32_1 = arith.constant 0 : i32
    return %c0_i32, %c0_i32_0 : i32, i32
  }
  func.func @transform_4(%arg0: i32) -> (i32, i32) {
    %c0_i32 = arith.constant 0 : i32
    %c0_i32_0 = arith.constant 0 : i32
    %c0_i32_1 = arith.constant 0 : i32
    return %c0_i32, %c0_i32_0 : i32, i32
  }
  func.func @transform_5(%arg0: i32) -> (i32, i32) {
    %c0_i32 = arith.constant 0 : i32
    %c0_i32_0 = arith.constant 0 : i32
    %c0_i32_1 = arith.constant 0 : i32
    return %c0_i32, %c0_i32_0 : i32, i32
  }
  func.func @transform_6(%arg0: i32) -> (i32, i32) {
    %c0_i32 = arith.constant 0 : i32
    %c0_i32_0 = arith.constant 0 : i32
    %c0_i32_1 = arith.constant 0 : i32
    return %c0_i32, %c0_i32_0 : i32, i32
  }
  func.func @transform_7(%arg0: i32) -> (i32, i32) {
    %c0_i32 = arith.constant 0 : i32
    %c0_i32_0 = arith.constant 0 : i32
    %c0_i32_1 = arith.constant 0 : i32
    return %c0_i32, %c0_i32_0 : i32, i32
  }
  func.func @transform_8(%arg0: i32) -> (i32, i32) {
    %c0_i32 = arith.constant 0 : i32
    %c0_i32_0 = arith.constant 0 : i32
    %c0_i32_1 = arith.constant 0 : i32
    return %c0_i32, %c0_i32_0 : i32, i32
  }
  func.func @transform_9(%arg0: i32) -> (i32, i32) {
    %c0_i32 = arith.constant 0 : i32
    %c0_i32_0 = arith.constant 0 : i32
    %c0_i32_1 = arith.constant 0 : i32
    return %c0_i32, %c0_i32_0 : i32, i32
  }
  func.func @transform_10(%arg0: i32) -> (i32, i32) {
    %c0_i32 = arith.constant 0 : i32
    %c0_i32_0 = arith.constant 0 : i32
    %c0_i32_1 = arith.constant 0 : i32
    return %c0_i32, %c0_i32_0 : i32, i32
  }
  func.func @transform_11(%arg0: i32) -> (i32, i32) {
    %c0_i32 = arith.constant 0 : i32
    %c0_i32_0 = arith.constant 0 : i32
    %c0_i32_1 = arith.constant 0 : i32
    return %c0_i32, %c0_i32_0 : i32, i32
  }
  func.func @transform_12(%arg0: i32) -> (i32, i32) {
    %c0_i32 = arith.constant 0 : i32
    %c0_i32_0 = arith.constant 0 : i32
    %c0_i32_1 = arith.constant 0 : i32
    return %c0_i32, %c0_i32_0 : i32, i32
  }
}

</mosaic_0001>

<bundles_post_ra>
// kernel: lenet5_forward.1
= control target key start
LH: loop header
LB: loop body
LE: loop exit
PB: predicated region body
PF: predicated region fallthrough
CT: control target
= control target key end

     0   :  { %s7879_s23 = smov 126   ;;  %s7880_s24 = smov 127   ;;  %v44_v6 = vlaneseq  ;;  %v7898_v14 = vmov 0.0   ;;  %vm61_vm1 = vcmask 1046528   ;;  %vm85_vm2 = vcmask 1031168   ;;  %s10818_s0 = inlined_call_operand.vmem [shape: f32[1,2048], index: 0, kind: input, shape index: {}]   ;;  %s10819_s2 = inlined_call_operand.vmem [shape: f32[6,1], index: 2, kind: input, shape index: {}]   ;;  %s10820_s1 = inlined_call_operand.vmem [shape: f32[6,25], index: 1, kind: input, shape index: {}]   ;;  %s10821_s3 = inlined_call_operand.vmem [shape: f32[16,150], index: 3, kind: input, shape index: {}]   ;;  %s10822_s4 = inlined_call_operand.vmem [shape: f32[16,1], index: 4, kind: input, shape index: {}]   ;;  %s10823_s6 = inlined_call_operand.vmem [shape: f32[120,1], index: 6, kind: input, shape index: {}]   ;;  %s10824_s5 = inlined_call_operand.vmem [shape: f32[120,400], index: 5, kind: input, shape index: {}]   ;;  %s10825_s8 = inlined_call_operand.vmem [shape: f32[84,1], index: 8, kind: input, shape index: {}]   ;;  %s10826_s10 = inlined_call_operand.vmem [shape: f32[10,1], index: 10, kind: input, shape index: {}]   ;;  %s10827_s7 = inlined_call_operand.vmem [shape: f32[84,120], index: 7, kind: input, shape index: {}]   ;;  %s10828_s9 = inlined_call_operand.vmem [shape: f32[10,84], index: 9, kind: input, shape index: {}]   ;;  %s10829_s11 = inlined_call_operand.vmem [shape: f32[10,2], index: 11, kind: output, shape index: {0}]   ;;  %s10830_s12 = inlined_call_operand.vmem [shape: f32[10,2], index: 12, kind: output, shape index: {1}]  }
   0x1   :  { %v7981_v0 = vld [vmem:[%s10818_s0] sm:$0xff]  ;;  %v75_v1 = vld [vmem:[%s10818_s0 + $0x8] sm:$0x7f]  ;;  %s7881_s15 = smov 125   ;;  %s7882_s18 = smov 124   ;;  %743 = vmatprep.mubr.f32.mxu0 %v7898_v14  ;;  %814 = vmatprep.mubr.f32.mxu1 %v7898_v14  ;;  %vm63_vm3 = vcmask 1039360  }
   0x2   :  { %78 = vrot.lane.b32.xlu1 %v7981_v0, %s7879_s23  ;;  %55 = vrot.lane.b32.xlu0 %v7981_v0, %s7880_s24  ;;  %42 = vst [vmem:[#allocation2] ss:$8 sm:$0xf] %v7981_v0  ;;  %43 = vst [vmem:[#allocation2] ss:$8 sm:$0xf0] %v7981_v0 }
   0x3   :  { %v52_v2 = vld [vmem:[%s10818_s0 + $0x8] sm:$0x7f]  ;;  %s7883_s19 = smov 96   ;;  %vm8019_vm0 = vcmp.lt.s32.totalorder %v44_v6, 892  ;;  %s7884_s22 = smov 95   ;;  %v7899_v19 = vmov 0  }
   0x4   :  { %v7998_v3 = vld [vmem:[%s10818_s0 + $0x1] sm:$0xff]  ;;  %s7885_s25 = smov 94   ;;  %s7886_s26 = smov 93   ;;  %v479_v9 = vld [vmem:[%s10818_s0 + $0x9] sm:$0x7f]  ;;  %7729 = vset.pattern.permute.xlu0 %v7899_v19  ;;  %7730 = vset.pattern.permute.xlu1 %v7899_v19  ;;  %vm107_vm4 = vcmask 1022976  }
   0x5   :  { %473 = vst [vmem:[#allocation2 + $0xf4] ss:$8 sm:$0xf] %v7998_v3  ;;  %474 = vst [vmem:[#allocation2 + $0xf4] ss:$8 sm:$0xf0] %v7998_v3 }
   0x6   :  { %80 = vrot.lane.b32.xlu1 %v75_v1, %s7879_s23  ;;  %57 = vrot.lane.b32.xlu0 %v52_v2, %s7880_s24  ;;  %v97_v4 = vld [vmem:[%s10818_s0 + $0x8] sm:$0x7f]  ;;  %s7887_s27 = smov 92   ;;  %s7888_s28 = smov 64   ;;  %v623_v20 = vld [vmem:[%s10819_s2] sm:$0x3f] }
   0x7   :  { %v119_v5 = vld [vmem:[%s10818_s0 + $0x8] sm:$0xff]  ;;  %s7889_s29 = smov 63   ;;  %s7890_s30 = smov 62   ;;  %vm10833_vm5 = vcmask 1014784   ;;  %vm151_vm6 = vcmask 785408   ;;  %vm173_vm7 = vcmask 777216  }
   0x8   :  { %v41_v8 = vld [vmem:[%s10818_s0 + $0x8] sm:$0x7f]  ;;  %s7891_s13 = smov 61   ;;  %s7892_s14 = smov 60   ;;  %vm195_vm8 = vcmask 769024   ;;  %vm217_vm9 = vcmask 760832  }
   0x9   :  { %49 = vst.msk [vmem:[#allocation2 + $0x40] ss:$8 sm:$0xf] %vm8019_vm0, %v41_v8  ;;  %50 = vst.msk [vmem:[#allocation2 + $0x40] ss:$8 sm:$0x70] %vm8019_vm0, %v41_v8 }
   0xa   :  { %102 = vrot.lane.b32.xlu1 %v97_v4, %s7881_s15  ;;  %100 = vrot.lane.b32.xlu0 %v7981_v0, %s7881_s15  ;;  %s7893_s16 = smov 32   ;;  %s7894_s17 = smov 31   ;;  %v500_v10 = vld [vmem:[%s10818_s0 + $0x9] sm:$0x7f]  ;;  %vm239_vm10 = vcmask 752640   ;;  %vm261_vm11 = vcmask 523264  }
   0xb   :  { %s7895_s20 = smov 30   ;;  %s7896_s21 = smov 29   ;;  %v471_v11 = vld [vmem:[%s10818_s0 + $0x9] sm:$0x7f]  ;;  %vm283_vm12 = vcmask 515072   ;;  %vm305_vm13 = vcmask 506880  }
   0xc   :  { %476 = vst.msk [vmem:[#allocation2 + $0x134] ss:$8 sm:$0xf] %vm8019_vm0, %v471_v11  ;;  %477 = vst.msk [vmem:[#allocation2 + $0x134] ss:$8 sm:$0x70] %vm8019_vm0, %v471_v11 }
   0xd   :  { %v521_v12 = vld [vmem:[%s10818_s0 + $0x9] sm:$0x7f]  ;;  %vm327_vm14 = vcmask 498688   ;;  %vm349_vm15 = vcmask 490496   ;;  %s7909_s2 = smov 1  }
   0xe   :  { %124 = vrot.lane.b32.xlu1 %v119_v5, %s7882_s18  ;;  %122 = vrot.lane.b32.xlu0 %v7981_v0, %s7882_s18  ;;  %v542_v13 = vld [vmem:[%s10818_s0 + $0x9] sm:$0xff] }
  0x12   :  { %146 = vrot.lane.b32.xlu1 %v119_v5, %s7883_s19  ;;  %144 = vrot.lane.b32.xlu0 %v7981_v0, %s7883_s19 }
  0x16   :  { %168 = vrot.lane.b32.xlu1 %v119_v5, %s7884_s22  ;;  %166 = vrot.lane.b32.xlu0 %v7981_v0, %s7884_s22 }
  0x1a   :  { %190 = vrot.lane.b32.xlu1 %v119_v5, %s7885_s25  ;;  %188 = vrot.lane.b32.xlu0 %v7981_v0, %s7885_s25  ;;  %s7897_s25 = smov 28  }
  0x1e   :  { %212 = vrot.lane.b32.xlu1 %v119_v5, %s7886_s26  ;;  %210 = vrot.lane.b32.xlu0 %v7981_v0, %s7886_s26 }
  0x22   :  { %234 = vrot.lane.b32.xlu1 %v119_v5, %s7887_s27  ;;  %232 = vrot.lane.b32.xlu0 %v7981_v0, %s7887_s27  ;;  %s7908_s27 = smov 112  }
  0x26   :  { %256 = vrot.lane.b32.xlu1 %v119_v5, %s7888_s28  ;;  %254 = vrot.lane.b32.xlu0 %v7981_v0, %s7888_s28 }
  0x2a   :  { %278 = vrot.lane.b32.xlu1 %v119_v5, %s7889_s29  ;;  %276 = vrot.lane.b32.xlu0 %v7981_v0, %s7889_s29  ;;  %s7910_s29 = smov 121  }
  0x2e   :  { %300 = vrot.lane.b32.xlu1 %v119_v5, %s7890_s30  ;;  %298 = vrot.lane.b32.xlu0 %v7981_v0, %s7890_s30 }
  0x32   :  { %322 = vrot.lane.b32.xlu1 %v119_v5, %s7891_s13  ;;  %320 = vrot.lane.b32.xlu0 %v7981_v0, %s7891_s13  ;;  %s7911_s13 = smov 117  }
  0x36   :  { %344 = vrot.lane.b32.xlu1 %v119_v5, %s7892_s14  ;;  %342 = vrot.lane.b32.xlu0 %v7981_v0, %s7892_s14 }
  0x3a   :  { %366 = vrot.lane.b32.xlu1 %v119_v5, %s7893_s16  ;;  %364 = vrot.lane.b32.xlu0 %v7981_v0, %s7893_s16 }
  0x3e   :  { %388 = vrot.lane.b32.xlu1 %v119_v5, %s7894_s17  ;;  %386 = vrot.lane.b32.xlu0 %v7981_v0, %s7894_s17 }
  0x42   :  { %410 = vrot.lane.b32.xlu1 %v119_v5, %s7895_s20  ;;  %408 = vrot.lane.b32.xlu0 %v7981_v0, %s7895_s20 }
  0x46   :  { %432 = vrot.lane.b32.xlu1 %v119_v5, %s7896_s21  ;;  %430 = vrot.lane.b32.xlu0 %v7981_v0, %s7896_s21 }
  0x4a   :  { %454 = vrot.lane.b32.xlu1 %v119_v5, %s7897_s25  ;;  %452 = vrot.lane.b32.xlu0 %v7981_v0, %s7897_s25 }
  0x4e   :  { %484 = vrot.lane.b32.xlu1 %v479_v9, %s7880_s24  ;;  %482 = vrot.lane.b32.xlu0 %v7998_v3, %s7880_s24 }
  0x52   :  { %505 = vrot.lane.b32.xlu1 %v500_v10, %s7879_s23  ;;  %503 = vrot.lane.b32.xlu0 %v7998_v3, %s7879_s23 }
  0x56   :  { %526 = vrot.lane.b32.xlu1 %v521_v12, %s7881_s15  ;;  %524 = vrot.lane.b32.xlu0 %v7998_v3, %s7881_s15 }
  0x5a   :  { %547 = vrot.lane.b32.xlu1 %v542_v13, %s7882_s18  ;;  %545 = vrot.lane.b32.xlu0 %v7998_v3, %s7882_s18 }
  0x5e   :  { %626 = vperm.xlu0 %7729, %v623_v20  }
  0x74   :  { %v79_v15 = vpop.permute.xlu1 %78  ;;  %v56_v16 = vpop.permute.xlu0 %55 }
  0x75   :  { %v82_v21 = vrot.slane %v79_v15, 1  ;;  %v59_v22 = vrot.slane %v56_v16, 1 }
  0x78   :  { %v81_v17 = vpop.permute.xlu1 %80  ;;  %v58_v18 = vpop.permute.xlu0 %57 }
  0x79   :  { %v83_v23 = vrot.slane %v81_v17, 1  ;;  %v60_v24 = vrot.slane %v58_v18, 1 }
  0x7b   :  { %v84_v25 = vsel %vm61_vm1, %v82_v21, %v83_v23  ;;  %v87_v26 = vsel %vm85_vm2, %v81_v17, %v83_v23  ;;  %v62_v27 = vsel %vm61_vm1, %v59_v22, %v60_v24  ;;  %v65_v28 = vsel %vm63_vm3, %v58_v18, %v60_v24 }
  0x7c   :  { %v86_v29 = vsel %vm85_vm2, %v79_v15, %v84_v25  ;;  %94 = vst.msk [vmem:[#allocation2 + $0x42] ss:$8 sm:$0xf] %vm8019_vm0, %v87_v26  ;;  %95 = vst.msk [vmem:[#allocation2 + $0x42] ss:$8 sm:$0x70] %vm8019_vm0, %v87_v26  ;;  %v64_v30 = vsel %vm63_vm3, %v56_v16, %v62_v27  ;;  %v103_v31 = vpop.permute.xlu1 %102  ;;  %v101_v32 = vpop.permute.xlu0 %100 }
  0x7d   :  { %72 = vst.msk [vmem:[#allocation2 + $0x41] ss:$8 sm:$0xf] %vm8019_vm0, %v65_v28  ;;  %73 = vst.msk [vmem:[#allocation2 + $0x41] ss:$8 sm:$0x70] %vm8019_vm0, %v65_v28 }
  0x7e   :  { %91 = vst [vmem:[#allocation2 + $0x2] ss:$8 sm:$0xf] %v86_v29  ;;  %92 = vst [vmem:[#allocation2 + $0x2] ss:$8 sm:$0xf0] %v86_v29 }
  0x7f   :  { %69 = vst [vmem:[#allocation2 + $0x1] ss:$8 sm:$0xf] %v64_v30  ;;  %70 = vst [vmem:[#allocation2 + $0x1] ss:$8 sm:$0xf0] %v64_v30 }
  0x80   :  { %v105_v33 = vrot.slane %v103_v31, 1  ;;  %v104_v34 = vrot.slane %v101_v32, 1  ;;  %v125_v38 = vpop.permute.xlu1 %124  ;;  %v123_v39 = vpop.permute.xlu0 %122 }
  0x81   :  { %v127_v40 = vrot.slane %v125_v38, 1  ;;  %v126_v41 = vrot.slane %v123_v39, 1 }
  0x82   :  { %v109_v35 = vsel %vm107_vm4, %v103_v31, %v105_v33  ;;  %v106_v36 = vsel %vm61_vm1, %v104_v34, %v105_v33 }
  0x83   :  { %116 = vst.msk [vmem:[#allocation2 + $0x43] ss:$8 sm:$0xf] %vm8019_vm0, %v109_v35  ;;  %117 = vst.msk [vmem:[#allocation2 + $0x43] ss:$8 sm:$0x70] %vm8019_vm0, %v109_v35  ;;  %v108_v37 = vsel %vm107_vm4, %v101_v32, %v106_v36  ;;  %v131_v42 = vsel %vm10833_vm5, %v125_v38, %v127_v40  ;;  %v128_v43 = vsel %vm61_vm1, %v126_v41, %v127_v40 }
  0x84   :  { %113 = vst [vmem:[#allocation2 + $0x3] ss:$8 sm:$0xf] %v108_v37  ;;  %114 = vst [vmem:[#allocation2 + $0x3] ss:$8 sm:$0xf0] %v108_v37  ;;  %v130_v44 = vsel %vm10833_vm5, %v123_v39, %v128_v43  ;;  %v147_v45 = vpop.permute.xlu1 %146  ;;  %v145_v46 = vpop.permute.xlu0 %144 }
  0x85   :  { %138 = vst.msk [vmem:[#allocation2 + $0x44] ss:$8 sm:$0xf] %vm8019_vm0, %v131_v42  ;;  %139 = vst.msk [vmem:[#allocation2 + $0x44] ss:$8 sm:$0x70] %vm8019_vm0, %v131_v42 }
  0x86   :  { %135 = vst [vmem:[#allocation2 + $0x4] ss:$8 sm:$0xf] %v130_v44  ;;  %136 = vst [vmem:[#allocation2 + $0x4] ss:$8 sm:$0xf0] %v130_v44 }
  0x87   :  { %v149_v47 = vrot.slane %v147_v45, 1  ;;  %v148_v48 = vrot.slane %v145_v46, 1 }
  0x88   :  { %v169_v52 = vpop.permute.xlu1 %168  ;;  %v167_v53 = vpop.permute.xlu0 %166 }
  0x89   :  { %v153_v49 = vsel %vm151_vm6, %v147_v45, %v149_v47  ;;  %v150_v50 = vsel %vm61_vm1, %v148_v48, %v149_v47  ;;  %v171_v54 = vrot.slane %v169_v52, 1  ;;  %v170_v55 = vrot.slane %v167_v53, 1 }
  0x8a   :  { %160 = vst.msk [vmem:[#allocation2 + $0x45] ss:$8 sm:$0xf] %vm8019_vm0, %v153_v49  ;;  %161 = vst.msk [vmem:[#allocation2 + $0x45] ss:$8 sm:$0x70] %vm8019_vm0, %v153_v49  ;;  %v152_v51 = vsel %vm151_vm6, %v145_v46, %v150_v50 }
  0x8b   :  { %157 = vst [vmem:[#allocation2 + $0x5] ss:$8 sm:$0xf] %v152_v51  ;;  %158 = vst [vmem:[#allocation2 + $0x5] ss:$8 sm:$0xf0] %v152_v51  ;;  %v175_v56 = vsel %vm173_vm7, %v169_v52, %v171_v54  ;;  %v172_v57 = vsel %vm61_vm1, %v170_v55, %v171_v54 }
  0x8c   :  { %182 = vst.msk [vmem:[#allocation2 + $0x46] ss:$8 sm:$0xf] %vm8019_vm0, %v175_v56  ;;  %183 = vst.msk [vmem:[#allocation2 + $0x46] ss:$8 sm:$0x70] %vm8019_vm0, %v175_v56  ;;  %v174_v58 = vsel %vm173_vm7, %v167_v53, %v172_v57  ;;  %v191_v59 = vpop.permute.xlu1 %190  ;;  %v189_v60 = vpop.permute.xlu0 %188 }
  0x8d   :  { %179 = vst [vmem:[#allocation2 + $0x6] ss:$8 sm:$0xf] %v174_v58  ;;  %180 = vst [vmem:[#allocation2 + $0x6] ss:$8 sm:$0xf0] %v174_v58 }
  0x8e   :  { %v193_v61 = vrot.slane %v191_v59, 1  ;;  %v192_v62 = vrot.slane %v189_v60, 1 }
  0x90   :  { %v197_v63 = vsel %vm195_vm8, %v191_v59, %v193_v61  ;;  %v194_v0 = vsel %vm61_vm1, %v192_v62, %v193_v61  ;;  %v213_v2 = vpop.permute.xlu1 %212  ;;  %v211_v3 = vpop.permute.xlu0 %210 }
  0x91   :  { %204 = vst.msk [vmem:[#allocation2 + $0x47] ss:$8 sm:$0xf] %vm8019_vm0, %v197_v63  ;;  %205 = vst.msk [vmem:[#allocation2 + $0x47] ss:$8 sm:$0x70] %vm8019_vm0, %v197_v63  ;;  %v196_v1 = vsel %vm195_vm8, %v189_v60, %v194_v0 }
  0x92   :  { %201 = vst [vmem:[#allocation2 + $0x7] ss:$8 sm:$0xf] %v196_v1  ;;  %202 = vst [vmem:[#allocation2 + $0x7] ss:$8 sm:$0xf0] %v196_v1 }
  0x93   :  { %v215_v4 = vrot.slane %v213_v2, 1  ;;  %v214_v5 = vrot.slane %v211_v3, 1  ;;  %vm371_vm8 = vcmask 261120  }
  0x94   :  { %v235_v10 = vpop.permute.xlu1 %234  ;;  %v233_v11 = vpop.permute.xlu0 %232 }
  0x95   :  { %v219_v6 = vsel %vm217_vm9, %v213_v2, %v215_v4  ;;  %v216_v8 = vsel %vm61_vm1, %v214_v5, %v215_v4  ;;  %v237_v12 = vrot.slane %v235_v10, 1  ;;  %v236_v13 = vrot.slane %v233_v11, 1 }
  0x96   :  { %226 = vst.msk [vmem:[#allocation2 + $0xb8] ss:$8 sm:$0xf] %vm8019_vm0, %v219_v6  ;;  %227 = vst.msk [vmem:[#allocation2 + $0xb8] ss:$8 sm:$0x70] %vm8019_vm0, %v219_v6  ;;  %v218_v9 = vsel %vm217_vm9, %v211_v3, %v216_v8 }
  0x97   :  { %223 = vst [vmem:[#allocation2 + $0x78] ss:$8 sm:$0xf] %v218_v9  ;;  %224 = vst [vmem:[#allocation2 + $0x78] ss:$8 sm:$0xf0] %v218_v9  ;;  %v241_v15 = vsel %vm239_vm10, %v235_v10, %v237_v12  ;;  %v238_v16 = vsel %vm61_vm1, %v236_v13, %v237_v12 }
  0x98   :  { %248 = vst.msk [vmem:[#allocation2 + $0xb9] ss:$8 sm:$0xf] %vm8019_vm0, %v241_v15  ;;  %249 = vst.msk [vmem:[#allocation2 + $0xb9] ss:$8 sm:$0x70] %vm8019_vm0, %v241_v15  ;;  %v240_v17 = vsel %vm239_vm10, %v233_v11, %v238_v16  ;;  %v257_v18 = vpop.permute.xlu1 %256  ;;  %v255_v19 = vpop.permute.xlu0 %254 }
  0x99   :  { %245 = vst [vmem:[#allocation2 + $0x79] ss:$8 sm:$0xf] %v240_v17  ;;  %246 = vst [vmem:[#allocation2 + $0x79] ss:$8 sm:$0xf0] %v240_v17 }
  0x9a   :  { %v259_v20 = vrot.slane %v257_v18, 1  ;;  %v258_v21 = vrot.slane %v255_v19, 1  ;;  %vm393_vm9 = vcmask 252928   ;;  %vm415_vm10 = vcmask 244736   ;;  %v564_v10 = vld [vmem:[#allocation2 + $0x8] sm:$0xff]  ;;  %v566_v11 = vld [vmem:[#allocation2 + $0x18] sm:$0xff] }
  0x9c   :  { %v263_v22 = vsel %vm261_vm11, %v257_v18, %v259_v20  ;;  %v260_v23 = vsel %vm61_vm1, %v258_v21, %v259_v20  ;;  %v279_v25 = vpop.permute.xlu1 %278  ;;  %v277_v26 = vpop.permute.xlu0 %276 }
  0x9d   :  { %270 = vst.msk [vmem:[#allocation2 + $0xba] ss:$8 sm:$0xf] %vm8019_vm0, %v263_v22  ;;  %271 = vst.msk [vmem:[#allocation2 + $0xba] ss:$8 sm:$0x70] %vm8019_vm0, %v263_v22  ;;  %v262_v24 = vsel %vm261_vm11, %v255_v19, %v260_v23 }
  0x9e   :  { %267 = vst [vmem:[#allocation2 + $0x7a] ss:$8 sm:$0xf] %v262_v24  ;;  %268 = vst [vmem:[#allocation2 + $0x7a] ss:$8 sm:$0xf0] %v262_v24 }
  0x9f   :  { %v281_v27 = vrot.slane %v279_v25, 1  ;;  %v280_v28 = vrot.slane %v277_v26, 1  ;;  %v563_v23 = vld [vmem:[#allocation2] sm:$0xff]  ;;  %v565_v24 = vld [vmem:[#allocation2 + $0x10] sm:$0xff] }
  0xa0   :  { %v301_v32 = vpop.permute.xlu1 %300  ;;  %v299_v33 = vpop.permute.xlu0 %298 }
  0xa1   :  { %v285_v29 = vsel %vm283_vm12, %v279_v25, %v281_v27  ;;  %v282_v30 = vsel %vm61_vm1, %v280_v28, %v281_v27  ;;  %v303_v34 = vrot.slane %v301_v32, 1  ;;  %v302_v35 = vrot.slane %v299_v33, 1 }
  0xa2   :  { %292 = vst.msk [vmem:[#allocation2 + $0xbb] ss:$8 sm:$0xf] %vm8019_vm0, %v285_v29  ;;  %293 = vst.msk [vmem:[#allocation2 + $0xbb] ss:$8 sm:$0x70] %vm8019_vm0, %v285_v29  ;;  %v284_v31 = vsel %vm283_vm12, %v277_v26, %v282_v30 }
  0xa3   :  { %289 = vst [vmem:[#allocation2 + $0x7b] ss:$8 sm:$0xf] %v284_v31  ;;  %290 = vst [vmem:[#allocation2 + $0x7b] ss:$8 sm:$0xf0] %v284_v31  ;;  %v307_v36 = vsel %vm305_vm13, %v301_v32, %v303_v34  ;;  %v304_v37 = vsel %vm61_vm1, %v302_v35, %v303_v34 }
  0xa4   :  { %314 = vst.msk [vmem:[#allocation2 + $0xbc] ss:$8 sm:$0xf] %vm8019_vm0, %v307_v36  ;;  %315 = vst.msk [vmem:[#allocation2 + $0xbc] ss:$8 sm:$0x70] %vm8019_vm0, %v307_v36  ;;  %v306_v38 = vsel %vm305_vm13, %v299_v33, %v304_v37  ;;  %v323_v39 = vpop.permute.xlu1 %322  ;;  %v321_v40 = vpop.permute.xlu0 %320 }
  0xa5   :  { %311 = vst [vmem:[#allocation2 + $0x7c] ss:$8 sm:$0xf] %v306_v38  ;;  %312 = vst [vmem:[#allocation2 + $0x7c] ss:$8 sm:$0xf0] %v306_v38 }
  0xa6   :  { %v325_v41 = vrot.slane %v323_v39, 1  ;;  %v324_v42 = vrot.slane %v321_v40, 1  ;;  %vm437_vm12 = vcmask 236544  }
  0xa8   :  { %v329_v43 = vsel %vm327_vm14, %v323_v39, %v325_v41  ;;  %v326_v44 = vsel %vm61_vm1, %v324_v42, %v325_v41  ;;  %v345_v46 = vpop.permute.xlu1 %344  ;;  %v343_v47 = vpop.permute.xlu0 %342 }
  0xa9   :  { %336 = vst.msk [vmem:[#allocation2 + $0xbd] ss:$8 sm:$0xf] %vm8019_vm0, %v329_v43  ;;  %337 = vst.msk [vmem:[#allocation2 + $0xbd] ss:$8 sm:$0x70] %vm8019_vm0, %v329_v43  ;;  %v328_v45 = vsel %vm327_vm14, %v321_v40, %v326_v44 }
  0xaa   :  { %333 = vst [vmem:[#allocation2 + $0x7d] ss:$8 sm:$0xf] %v328_v45  ;;  %334 = vst [vmem:[#allocation2 + $0x7d] ss:$8 sm:$0xf0] %v328_v45 }
  0xab   :  { %v347_v48 = vrot.slane %v345_v46, 1  ;;  %v346_v49 = vrot.slane %v343_v47, 1  ;;  %vm459_vm14 = vcmask 228352  }
  0xac   :  { %v367_v53 = vpop.permute.xlu1 %366  ;;  %v365_v54 = vpop.permute.xlu0 %364 }
  0xad   :  { %v351_v50 = vsel %vm349_vm15, %v345_v46, %v347_v48  ;;  %v348_v51 = vsel %vm61_vm1, %v346_v49, %v347_v48  ;;  %v369_v55 = vrot.slane %v367_v53, 1  ;;  %v368_v56 = vrot.slane %v365_v54, 1 }
  0xae   :  { %358 = vst.msk [vmem:[#allocation2 + $0xbe] ss:$8 sm:$0xf] %vm8019_vm0, %v351_v50  ;;  %359 = vst.msk [vmem:[#allocation2 + $0xbe] ss:$8 sm:$0x70] %vm8019_vm0, %v351_v50  ;;  %v350_v52 = vsel %vm349_vm15, %v343_v47, %v348_v51 }
  0xaf   :  { %355 = vst [vmem:[#allocation2 + $0x7e] ss:$8 sm:$0xf] %v350_v52  ;;  %356 = vst [vmem:[#allocation2 + $0x7e] ss:$8 sm:$0xf0] %v350_v52  ;;  %v373_v57 = vsel %vm371_vm8, %v367_v53, %v369_v55  ;;  %v370_v58 = vsel %vm61_vm1, %v368_v56, %v369_v55 }
  0xb0   :  { %380 = vst.msk [vmem:[#allocation2 + $0xbf] ss:$8 sm:$0xf] %vm8019_vm0, %v373_v57  ;;  %381 = vst.msk [vmem:[#allocation2 + $0xbf] ss:$8 sm:$0x70] %vm8019_vm0, %v373_v57  ;;  %v372_v59 = vsel %vm371_vm8, %v365_v54, %v370_v58  ;;  %v389_v60 = vpop.permute.xlu1 %388  ;;  %v387_v61 = vpop.permute.xlu0 %386 }
  0xb1   :  { %377 = vst [vmem:[#allocation2 + $0x7f] ss:$8 sm:$0xf] %v372_v59  ;;  %378 = vst [vmem:[#allocation2 + $0x7f] ss:$8 sm:$0xf0] %v372_v59 }
  0xb2   :  { %v391_v62 = vrot.slane %v389_v60, 1  ;;  %v390_v63 = vrot.slane %v387_v61, 1  ;;  %vm7900_vm8 = vmmov 1  }
  0xb4   :  { %v395_v0 = vsel %vm393_vm9, %v389_v60, %v391_v62  ;;  %v392_v1 = vsel %vm61_vm1, %v390_v63, %v391_v62  ;;  %v411_v3 = vpop.permute.xlu1 %410  ;;  %v409_v4 = vpop.permute.xlu0 %408 }
  0xb5   :  { %402 = vst.msk [vmem:[#allocation2 + $0x130] ss:$8 sm:$0xf] %vm8019_vm0, %v395_v0  ;;  %403 = vst.msk [vmem:[#allocation2 + $0x130] ss:$8 sm:$0x70] %vm8019_vm0, %v395_v0  ;;  %v394_v2 = vsel %vm393_vm9, %v387_v61, %v392_v1 }
  0xb6   :  { %399 = vst [vmem:[#allocation2 + $0xf0] ss:$8 sm:$0xf] %v394_v2  ;;  %400 = vst [vmem:[#allocation2 + $0xf0] ss:$8 sm:$0xf0] %v394_v2 }
  0xb7   :  { %v413_v5 = vrot.slane %v411_v3, 1  ;;  %v412_v6 = vrot.slane %v409_v4, 1 }
  0xb8   :  { %v433_v13 = vpop.permute.xlu1 %432  ;;  %v431_v15 = vpop.permute.xlu0 %430  ;;  %v579_v16 = vld [vmem:[#allocation2 + $0x80] sm:$0xff]  ;;  %v581_v17 = vld [vmem:[#allocation2 + $0x90] sm:$0xff]  ;;  %v578_v18 = vld [vmem:[#allocation2 + $0x78] sm:$0xff] }
  0xb9   :  { %v417_v8 = vsel %vm415_vm10, %v411_v3, %v413_v5  ;;  %v414_v9 = vsel %vm61_vm1, %v412_v6, %v413_v5  ;;  %v435_v19 = vrot.slane %v433_v13, 1  ;;  %v434_v20 = vrot.slane %v431_v15, 1  ;;  %v580_v25 = vld [vmem:[#allocation2 + $0x88] sm:$0xff]  ;;  %v583_v3 = vld [vmem:[#allocation2 + $0xa0] sm:$0xff] }
  0xba   :  { %424 = vst.msk [vmem:[#allocation2 + $0x131] ss:$8 sm:$0xf] %vm8019_vm0, %v417_v8  ;;  %425 = vst.msk [vmem:[#allocation2 + $0x131] ss:$8 sm:$0x70] %vm8019_vm0, %v417_v8  ;;  %v416_v12 = vsel %vm415_vm10, %v409_v4, %v414_v9  ;;  %v7275_v21 = vpack.c.bf16 %v579_v16, %v564_v10  ;;  %v7285_v22 = vpack.c.bf16 %v581_v17, %v566_v11 }
  0xbb   :  { %421 = vst [vmem:[#allocation2 + $0xf1] ss:$8 sm:$0xf] %v416_v12  ;;  %422 = vst [vmem:[#allocation2 + $0xf1] ss:$8 sm:$0xf0] %v416_v12  ;;  %v7277_v26 = vpack.c.bf16 %v578_v18, %v563_v23  ;;  %v7287_v27 = vpack.c.bf16 %v580_v25, %v565_v24  ;;  %v439_v28 = vsel %vm437_vm12, %v433_v13, %v435_v19 }
  0xbc   :  { %v436_v29 = vsel %vm61_vm1, %v434_v20, %v435_v19  ;;  %7276 = vmatprep.subr.bf16.mxu0 %v7275_v21  ;;  %7286 = vmatprep.subr.bf16.mxu1 %v7285_v22  ;;  %446 = vst.msk [vmem:[#allocation2 + $0x132] ss:$8 sm:$0xf] %vm8019_vm0, %v439_v28  ;;  %447 = vst.msk [vmem:[#allocation2 + $0x132] ss:$8 sm:$0x70] %vm8019_vm0, %v439_v28  ;;  %v455_v31 = vpop.permute.xlu1 %454  ;;  %v453_v32 = vpop.permute.xlu0 %452 }
  0xbd   :  { %v438_v30 = vsel %vm437_vm12, %v431_v15, %v436_v29  ;;  %7278 = vmatpush1.bf16.msra.mxu0 %v7277_v26  ;;  %7288 = vmatpush1.bf16.msra.mxu1 %v7287_v27  ;;  %v457_v33 = vrot.slane %v455_v31, 1  ;;  %v456_v34 = vrot.slane %v453_v32, 1  ;;  %v585_v4 = vld [vmem:[#allocation2 + $0xb0] sm:$0xff]  ;;  %v568_v18 = vld [vmem:[#allocation2 + $0x28] sm:$0xff]  ;;  %v570_v19 = vld [vmem:[#allocation2 + $0x38] sm:$0xff]  ;;  %vm1275_vm10 = vcmask 1012736  }
  0xbe   :  { %443 = vst [vmem:[#allocation2 + $0xf2] ss:$8 sm:$0xf] %v438_v30  ;;  %444 = vst [vmem:[#allocation2 + $0xf2] ss:$8 sm:$0xf0] %v438_v30  ;;  %v7295_v20 = vpack.c.bf16 %v583_v3, %v568_v18  ;;  %v7305_v21 = vpack.c.bf16 %v585_v4, %v570_v19 }
  0xbf   :  { %v461_v35 = vsel %vm459_vm14, %v455_v31, %v457_v33  ;;  %v458_v36 = vsel %vm61_vm1, %v456_v34, %v457_v33  ;;  %v582_v22 = vld [vmem:[#allocation2 + $0x98] sm:$0xff]  ;;  %v584_v23 = vld [vmem:[#allocation2 + $0xa8] sm:$0xff]  ;;  %v8246_v24 = vld [vmem:[%s10820_s1] sm:$0x3f]  ;;  %s7903_s1 = smov 120   ;;  %vm1558_vm12 = vcmask 742400  }
  0xc0   :  { %468 = vst.msk [vmem:[#allocation2 + $0x133] ss:$8 sm:$0xf] %vm8019_vm0, %v461_v35  ;;  %469 = vst.msk [vmem:[#allocation2 + $0x133] ss:$8 sm:$0x70] %vm8019_vm0, %v461_v35  ;;  %v460_v37 = vsel %vm459_vm14, %v453_v32, %v458_v36  ;;  %v485_v38 = vpop.permute.xlu1 %484  ;;  %v483_v39 = vpop.permute.xlu0 %482 }
  0xc1   :  { %465 = vst [vmem:[#allocation2 + $0xf3] ss:$8 sm:$0xf] %v460_v37  ;;  %466 = vst [vmem:[#allocation2 + $0xf3] ss:$8 sm:$0xf0] %v460_v37 }
  0xc2   :  { %v487_v40 = vrot.slane %v485_v38, 1  ;;  %v486_v41 = vrot.slane %v483_v39, 1  ;;  %v567_v27 = vld [vmem:[#allocation2 + $0x20] sm:$0xff]  ;;  %v569_v28 = vld [vmem:[#allocation2 + $0x30] sm:$0xff]  ;;  %v576_v3 = vld [vmem:[#allocation2 + $0x68] sm:$0xff]  ;;  %vm1585_vm14 = vcmask 676864  }
  0xc3   :  { %v7297_v29 = vpack.c.bf16 %v582_v22, %v567_v27  ;;  %v7307_v30 = vpack.c.bf16 %v584_v23, %v569_v28  ;;  %v587_v37 = vld [vmem:[#allocation2 + $0xc0] sm:$0xff] }
  0xc4   :  { %v490_v42 = vsel %vm63_vm3, %v485_v38, %v487_v40  ;;  %v488_v43 = vsel %vm61_vm1, %v486_v41, %v487_v40  ;;  %v506_v45 = vpop.permute.xlu1 %505  ;;  %v504_v46 = vpop.permute.xlu0 %503  ;;  %v589_v38 = vld [vmem:[#allocation2 + $0xd0] sm:$0xff] }
  0xc5   :  { %497 = vst.msk [vmem:[#allocation2 + $0x135] ss:$8 sm:$0xf] %vm8019_vm0, %v490_v42  ;;  %498 = vst.msk [vmem:[#allocation2 + $0x135] ss:$8 sm:$0x70] %vm8019_vm0, %v490_v42  ;;  %v489_v44 = vsel %vm63_vm3, %v483_v39, %v488_v43 }
  0xc6   :  { %494 = vst [vmem:[#allocation2 + $0xf5] ss:$8 sm:$0xf] %v489_v44  ;;  %495 = vst [vmem:[#allocation2 + $0xf5] ss:$8 sm:$0xf0] %v489_v44 }
  0xc7   :  { %v508_v47 = vrot.slane %v506_v45, 1  ;;  %v507_v48 = vrot.slane %v504_v46, 1  ;;  %v572_v43 = vld [vmem:[#allocation2 + $0x48] sm:$0xff]  ;;  %v574_v44 = vld [vmem:[#allocation2 + $0x58] sm:$0xff] }
  0xc8   :  { %v527_v52 = vpop.permute.xlu1 %526  ;;  %v525_v53 = vpop.permute.xlu0 %524 }
  0xc9   :  { %v511_v49 = vsel %vm85_vm2, %v506_v45, %v508_v47  ;;  %v509_v50 = vsel %vm61_vm1, %v507_v48, %v508_v47  ;;  %v529_v54 = vrot.slane %v527_v52, 1  ;;  %v528_v55 = vrot.slane %v525_v53, 1  ;;  %v586_v47 = vld [vmem:[#allocation2 + $0xb8] sm:$0xff]  ;;  %v588_v48 = vld [vmem:[#allocation2 + $0xc8] sm:$0xff] }
  0xca   :  { %518 = vst.msk [vmem:[#allocation2 + $0x136] ss:$8 sm:$0xf] %vm8019_vm0, %v511_v49  ;;  %519 = vst.msk [vmem:[#allocation2 + $0x136] ss:$8 sm:$0x70] %vm8019_vm0, %v511_v49  ;;  %v510_v51 = vsel %vm85_vm2, %v504_v46, %v509_v50  ;;  %v7315_v45 = vpack.c.bf16 %v587_v37, %v572_v43  ;;  %v7325_v46 = vpack.c.bf16 %v589_v38, %v574_v44 }
  0xcb   :  { %515 = vst [vmem:[#allocation2 + $0xf6] ss:$8 sm:$0xf] %v510_v51  ;;  %516 = vst [vmem:[#allocation2 + $0xf6] ss:$8 sm:$0xf0] %v510_v51  ;;  %v532_v56 = vsel %vm107_vm4, %v527_v52, %v529_v54  ;;  %v530_v57 = vsel %vm61_vm1, %v528_v55, %v529_v54 }
  0xcc   :  { %539 = vst.msk [vmem:[#allocation2 + $0x137] ss:$8 sm:$0xf] %vm8019_vm0, %v532_v56  ;;  %540 = vst.msk [vmem:[#allocation2 + $0x137] ss:$8 sm:$0x70] %vm8019_vm0, %v532_v56  ;;  %v531_v58 = vsel %vm107_vm4, %v525_v53, %v530_v57  ;;  %v548_v59 = vpop.permute.xlu1 %547  ;;  %v546_v60 = vpop.permute.xlu0 %545 }
  0xcd   :  { %536 = vst [vmem:[#allocation2 + $0xf7] ss:$8 sm:$0xf] %v531_v58  ;;  %537 = vst [vmem:[#allocation2 + $0xf7] ss:$8 sm:$0xf0] %v531_v58 }
  0xce   :  { %v550_v61 = vrot.slane %v548_v59, 1  ;;  %v549_v62 = vrot.slane %v546_v60, 1  ;;  %vm633_vm4 = vcmask 1040384   ;;  %v571_v51 = vld [vmem:[#allocation2 + $0x40] sm:$0xff]  ;;  %v573_v52 = vld [vmem:[#allocation2 + $0x50] sm:$0xff] }
  0xcf   :  { %vm8231_vm9 = vmpackc.low %vm633_vm4, %vm7900_vm8  ;;  %v7317_v53 = vpack.c.bf16 %v586_v47, %v571_v51  ;;  %v7327_v54 = vpack.c.bf16 %v588_v48, %v573_v52  ;;  %vm1807_vm4 = vcmask 678916   ;;  %vm1821_vm8 = vcmask 672768  }
  0xd0   :  { %v553_v63 = vsel %vm10833_vm5, %v548_v59, %v550_v61  ;;  %v551_v0 = vsel %vm61_vm1, %v549_v62, %v550_v61  ;;  %v591_v61 = vld [vmem:[#allocation2 + $0xe0] sm:$0xff]  ;;  %vm10831_vm1 = vmmov 0  }
  0xd1   :  { %560 = vst.msk [vmem:[#allocation2 + $0x1a8] ss:$8 sm:$0xf] %vm8019_vm0, %v553_v63  ;;  %561 = vst.msk [vmem:[#allocation2 + $0x1a8] ss:$8 sm:$0x70] %vm8019_vm0, %v553_v63  ;;  %v552_v1 = vsel %vm10833_vm5, %v546_v60, %v551_v0  ;;  %v7335_v4 = vpack.c.bf16 %v591_v61, %v576_v3 }
  0xd2   :  { %557 = vst [vmem:[#allocation2 + $0x168] ss:$8 sm:$0xf] %v552_v1  ;;  %558 = vst [vmem:[#allocation2 + $0x168] ss:$8 sm:$0xf0] %v552_v1 }
  0xd3   :  { %vm629_vm0 = vcmask 203776   ;;  %v602_v55 = vld [vmem:[#allocation2 + $0x138] sm:$0xff]  ;;  %v604_v56 = vld [vmem:[#allocation2 + $0x148] sm:$0xff]  ;;  %v601_v62 = vld [vmem:[#allocation2 + $0x130] sm:$0xff] }
  0xd4   :  { %v594_v5 = vld [vmem:[#allocation2 + $0xf8] sm:$0xff]  ;;  %v596_v6 = vld [vmem:[#allocation2 + $0x108] sm:$0xff]  ;;  %v593_v8 = vld [vmem:[#allocation2 + $0xf0] sm:$0xff] }
  0xd5   :  { %v595_v15 = vld [vmem:[#allocation2 + $0x100] sm:$0xff]  ;;  %v598_v31 = vld [vmem:[#allocation2 + $0x118] sm:$0xff]  ;;  %v600_v32 = vld [vmem:[#allocation2 + $0x128] sm:$0xff] }
  0xd6   :  { %v597_v39 = vld [vmem:[#allocation2 + $0x110] sm:$0xff]  ;;  %v599_v40 = vld [vmem:[#allocation2 + $0x120] sm:$0xff] }
  0xd7   :  { %v603_v63 = vld [vmem:[#allocation2 + $0x140] sm:$0xff]  ;;  %v605_v18 = vld [vmem:[#allocation2 + $0x150] sm:$0xff] }
  0xd8   :  { %v617_v49 = vld [vmem:[#allocation2 + $0x1b0] sm:$0x1]  ;;  %v619_v50 = vld [vmem:[#allocation2 + $0x1c0] sm:$0x1]  ;;  %v616_v59 = vld [vmem:[#allocation2 + $0x1a8] sm:$0x1] }
  0xd9   :  { %v609_v9 = vld [vmem:[#allocation2 + $0x170] sm:$0x1]  ;;  %v611_v10 = vld [vmem:[#allocation2 + $0x180] sm:$0x1]  ;;  %v608_v11 = vld [vmem:[#allocation2 + $0x168] sm:$0x1]  ;;  %v7319_v57 = vpack.c.bf16 %v617_v49, %v602_v55  ;;  %v7329_v58 = vpack.c.bf16 %v619_v50, %v604_v56  ;;  %v7322_v0 = vpack.c.bf16 %v616_v59, %v601_v62 }
  0xda   :  { %v7279_v7 = vpack.c.bf16 %v609_v9, %v594_v5  ;;  %v7289_v12 = vpack.c.bf16 %v611_v10, %v596_v6  ;;  %v7282_v13 = vpack.c.bf16 %v608_v11, %v593_v8  ;;  %v610_v16 = vld [vmem:[#allocation2 + $0x178] sm:$0x1]  ;;  %v613_v25 = vld [vmem:[#allocation2 + $0x190] sm:$0x1]  ;;  %v615_v26 = vld [vmem:[#allocation2 + $0x1a0] sm:$0x1] }
  0xdb   :  { %v7292_v17 = vpack.c.bf16 %v610_v16, %v595_v15  ;;  %v7299_v33 = vpack.c.bf16 %v613_v25, %v598_v31  ;;  %v7309_v34 = vpack.c.bf16 %v615_v26, %v600_v32  ;;  %v612_v35 = vld [vmem:[#allocation2 + $0x188] sm:$0x1]  ;;  %v614_v36 = vld [vmem:[#allocation2 + $0x198] sm:$0x1]  ;;  %v621_v8 = vld [vmem:[#allocation2 + $0x1d0] sm:$0x1] }
  0xdc   :  { %7281 = vmatprep.subr.msk.bf16.mxu0 %vm8231_vm9, %v7279_v7  ;;  %7291 = vmatprep.subr.msk.bf16.mxu1 %vm8231_vm9, %v7289_v12  ;;  %v7302_v41 = vpack.c.bf16 %v612_v35, %v597_v39  ;;  %v7312_v42 = vpack.c.bf16 %v614_v36, %v599_v40  ;;  %v618_v60 = vld [vmem:[#allocation2 + $0x1b8] sm:$0x1]  ;;  %v592_v6 = vld [vmem:[#allocation2 + $0xe8] sm:$0xff]  ;;  %v7901_v9 = vmov 0.0|0.0   ;;  %v575_v10 = vld [vmem:[#allocation2 + $0x60] sm:$0xff] }
  0xdd   :  { %7284 = vmatpush1.bf16.msk.msra.mxu0 %vm8231_vm9, %v7282_v13  ;;  %7294 = vmatpush1.bf16.msk.msra.mxu1 %vm8231_vm9, %v7292_v17  ;;  %v7332_v1 = vpack.c.bf16 %v618_v60, %v603_v63  ;;  %v590_v5 = vld [vmem:[#allocation2 + $0xd8] sm:$0xff]  ;;  %v577_v11 = vld [vmem:[#allocation2 + $0x70] sm:$0xff]  ;;  %v620_v16 = vld [vmem:[#allocation2 + $0x1c8] sm:$0x1]  ;;  %v8295_v22 = vpop.permute.xlu0 %626 }
  0xde   :  { %7296 = vmatprep.subr.bf16.mxu0 %v7295_v20  ;;  %7306 = vmatprep.subr.bf16.mxu1 %v7305_v21  ;;  %v7337_v7 = vpack.c.bf16 %v590_v5, %v575_v10  ;;  %v7346_v12 = vpack.c.bf16 %v592_v6, %v577_v11  ;;  %v606_v13 = vld [vmem:[#allocation2 + $0x158] sm:$0xff]  ;;  %v607_v19 = vld [vmem:[#allocation2 + $0x160] sm:$0xff]  ;;  %v7342_v20 = vpack.c.bf16 %v620_v16, %v605_v18 }
  0xdf   :  { %v7339_v15 = vpack.c.bf16 %v621_v8, %v606_v13  ;;  %v622_v17 = vld [vmem:[#allocation2 + $0x1d8] sm:$0x1] }
  0xe0   :  { %6978 = vmatmul.mubr.msk.f32.vlgmr.msra.gmra.mrb[0].mxu0 %vm629_vm0, %v8246_v24  ;;  %6981 = vmatmul.mubr.msk.f32.vlgmr.msra.gmra.mrb[0].mxu1 %vm629_vm0, %v8246_v24  ;;  %v7349_v21 = vpack.c.bf16 %v622_v17, %v607_v19 }
  0xe1   :  { %7298 = vmatpush1.bf16.msra.mxu0 %v7297_v29  ;;  %7308 = vmatpush1.bf16.msra.mxu1 %v7307_v30 }
  0xe2   :  { %7301 = vmatprep.subr.msk.bf16.mxu0 %vm8231_vm9, %v7299_v33  ;;  %7311 = vmatprep.subr.msk.bf16.mxu1 %vm8231_vm9, %v7309_v34 }
  0xe3   :  { %885 = vmatprep.mubr.f32.mxu0 %v7898_v14  ;;  %956 = vmatprep.mubr.f32.mxu1 %v7898_v14 }
  0xe5   :  { %7304 = vmatpush1.bf16.msk.msra.mxu0 %vm8231_vm9, %v7302_v41  ;;  %7314 = vmatpush1.bf16.msk.msra.mxu1 %vm8231_vm9, %v7312_v42 }
  0xe6   :  { %7316 = vmatprep.subr.bf16.mxu0 %v7315_v45  ;;  %7326 = vmatprep.subr.bf16.mxu1 %v7325_v46 }
  0xe8   :  { %6984 = vmatmul.mubr.msk.f32.vlgmr.msra.gmra.mrb[2].mxu0 %vm629_vm0, %v8246_v24  ;;  %6987 = vmatmul.mubr.msk.f32.vlgmr.msra.gmra.mrb[2].mxu1 %vm629_vm0, %v8246_v24 }
  0xe9   :  { %7318 = vmatpush1.bf16.msra.mxu0 %v7317_v53  ;;  %7328 = vmatpush1.bf16.msra.mxu1 %v7327_v54 }
  0xea   :  { %7321 = vmatprep.subr.msk.bf16.mxu0 %vm8231_vm9, %v7319_v57  ;;  %7331 = vmatprep.subr.msk.bf16.mxu1 %vm8231_vm9, %v7329_v58 }
  0xeb   :  { %1027 = vmatprep.mubr.f32.mxu0 %v7898_v14  ;;  %1098 = vmatprep.mubr.f32.mxu1 %v7898_v14 }
  0xed   :  { %7324 = vmatpush1.bf16.msk.msra.mxu0 %vm8231_vm9, %v7322_v0  ;;  %7334 = vmatpush1.bf16.msk.msra.mxu1 %vm8231_vm9, %v7332_v1 }
  0xee   :  { %7336 = vmatprep.subr.bf16.mxu0 %v7335_v4  ;;  %7345 = vmatprep.subr.bf16.mxu1 %v7901_v9 }
  0xf0   :  { %6990 = vmatmul.mubr.msk.f32.vlgmr.msra.gmra.mrb[4].mxu0 %vm629_vm0, %v8246_v24  ;;  %6993 = vmatmul.mubr.msk.f32.vlgmr.msra.gmra.mrb[4].mxu1 %vm629_vm0, %v8246_v24 }
  0xf1   :  { %7338 = vmatpush1.bf16.msra.mxu0 %v7337_v7  ;;  %7347 = vmatpush3.bf16.msra.mxu1 %v7346_v12 }
  0xf2   :  { %7341 = vmatprep.subr.msk.bf16.mxu0 %vm8231_vm9, %v7339_v15  ;;  %7348 = vmatprep.subr.bf16.mxu1 %v7901_v9 }
  0xf3   :  { %1169 = vmatprep.mubr.f32.mxu0 %v7898_v14  ;;  %7184 = vmatprep.mubr.msk.f32.mxu1 %vm10831_vm1, %v7898_v14  ;;  %vm1703_vm1 = vcmask 674816  }
  0xf5   :  { %7344 = vmatpush1.bf16.msk.msra.mxu0 %vm8231_vm9, %v7342_v20  ;;  %7351 = vmatpush3.bf16.msk.msra.mxu1 %vm8231_vm9, %v7349_v21  ;;  %vm2538_vm9 = vcmask 457728  }
  0xf8   :  { %6996 = vmatmul.mubr.msk.f32.vlgmr.msra.gmra.mrb[6].mxu0 %vm629_vm0, %v8246_v24  ;;  %7185 = vmatmul.mubr.msk.f32.vlgmr.msra.gmra.mrb[6].mxu1 %vm629_vm0, %v8246_v24  ;;  %vm10834_vm0 = vcmask 179200  }
 0x1b3   :  { %v745_v23 = vpop.f32.mrb[0].mxu0  ;;  %v816_v25 = vpop.f32.mrb[0].mxu1 }
 0x1b4   :  { %v746_v26 = vadd.f32 %v745_v23, %v8295_v22  ;;  %v817_v27 = vadd.f32 %v816_v25, %v8295_v22  ;;  %v747_v28 = vpop.f32.mrb[1].mxu0  ;;  %v818_v29 = vpop.f32.mrb[1].mxu1 }
 0x1b5   :  { %v748_v30 = vadd.f32 %v747_v28, %v8295_v22  ;;  %v819_v2 = vadd.f32 %v818_v29, %v8295_v22 }
 0x1b6   :  { %7731 = vtanh.f32 %v746_v26 }
 0x1b7   :  { %7733 = vtanh.f32 %v817_v27 }
 0x1b8   :  { %7735 = vtanh.f32 %v748_v30 }
 0x1b9   :  { %7737 = vtanh.f32 %v819_v2 }
 0x1bb   :  { %v887_v31 = vpop.f32.mrb[2].mxu0  ;;  %v958_v24 = vpop.f32.mrb[2].mxu1 }
 0x1bc   :  { %v888_v32 = vadd.f32 %v887_v31, %v8295_v22  ;;  %v959_v33 = vadd.f32 %v958_v24, %v8295_v22  ;;  %v889_v34 = vpop.f32.mrb[3].mxu0  ;;  %v960_v35 = vpop.f32.mrb[3].mxu1 }
 0x1bd   :  { %v890_v36 = vadd.f32 %v889_v34, %v8295_v22  ;;  %v961_v37 = vadd.f32 %v960_v35, %v8295_v22 }
 0x1be   :  { %7739 = vtanh.f32 %v888_v32 }
 0x1bf   :  { %7741 = vtanh.f32 %v959_v33 }
 0x1c0   :  { %v7732_v38 = vpop.eup %7731  ;;  %7743 = vtanh.f32 %v890_v36 }
 0x1c1   :  { %v7734_v39 = vpop.eup %7733  ;;  %1261 = vst [vmem:[#allocation3] sm:$0x3f] %v7732_v38  ;;  %7745 = vtanh.f32 %v961_v37 }
 0x1c2   :  { %v7736_v40 = vpop.eup %7735  ;;  %1263 = vst [vmem:[#allocation3 + $0x10] sm:$0x3f] %v7734_v39 }
 0x1c3   :  { %v7738_v41 = vpop.eup %7737  ;;  %1262 = vst [vmem:[#allocation3 + $0x8] sm:$0x3f] %v7736_v40  ;;  %v1029_v42 = vpop.f32.mrb[4].mxu0 }
 0x1c4   :  { %v1100_v43 = vpop.f32.mrb[4].mxu1  ;;  %1264 = vst [vmem:[#allocation3 + $0x18] sm:$0x3f] %v7738_v41  ;;  %v1030_v44 = vadd.f32 %v1029_v42, %v8295_v22  ;;  %v1031_v46 = vpop.f32.mrb[5].mxu0 }
 0x1c5   :  { %v1101_v45 = vadd.f32 %v1100_v43, %v8295_v22  ;;  %v1102_v47 = vpop.f32.mrb[5].mxu1  ;;  %v1032_v48 = vadd.f32 %v1031_v46, %v8295_v22 }
 0x1c6   :  { %v1103_v49 = vadd.f32 %v1102_v47, %v8295_v22  ;;  %7747 = vtanh.f32 %v1030_v44 }
 0x1c7   :  { %7749 = vtanh.f32 %v1101_v45 }
 0x1c8   :  { %v7740_v50 = vpop.eup %7739  ;;  %7751 = vtanh.f32 %v1032_v48  ;;  %v8320_v63 = vld [vmem:[#allocation3] sm:$0x3f] }
 0x1c9   :  { %v7742_v51 = vpop.eup %7741  ;;  %1265 = vst [vmem:[#allocation3 + $0x20] sm:$0x3f] %v7740_v50  ;;  %7753 = vtanh.f32 %v1103_v49  ;;  %v8309_v52 = vld [vmem:[#allocation3 + $0x10] sm:$0x3f] }
 0x1ca   :  { %v7744_v53 = vpop.eup %7743  ;;  %1267 = vst [vmem:[#allocation3 + $0x30] sm:$0x3f] %v7742_v51  ;;  %1311 = vrot.lane.b32.xlu1 %v8309_v52, %s7880_s24  ;;  %v8324_v0 = vld [vmem:[#allocation3 + $0x8] sm:$0x3f] }
 0x1cb   :  { %v7746_v54 = vpop.eup %7745  ;;  %1266 = vst [vmem:[#allocation3 + $0x28] sm:$0x3f] %v7744_v53  ;;  %v8313_v55 = vld [vmem:[#allocation3 + $0x18] sm:$0x3f]  ;;  %v1171_v56 = vpop.f32.mrb[6].mxu0 }
 0x1cc   :  { %v1242_v57 = vpop.f32.mrb[6].mxu1  ;;  %1268 = vst [vmem:[#allocation3 + $0x38] sm:$0x3f] %v7746_v54  ;;  %1313 = vrot.lane.b32.xlu0 %v8313_v55, %s7880_s24  ;;  %v1172_v58 = vadd.f32 %v1171_v56, %v8295_v22  ;;  %v1173_v60 = vpop.f32.mrb[7].mxu0 }
 0x1cd   :  { %v1243_v59 = vadd.f32 %v1242_v57, %v8295_v22  ;;  %v7186_v61 = vpop.f32.mrb[7].mxu1  ;;  %v1174_v62 = vadd.f32 %v1173_v60, %v8295_v22 }
 0x1ce   :  { %7755 = vtanh.f32 %v1172_v58  ;;  %1307 = vrot.lane.b32.xlu1 %v8320_v63, %s7880_s24 }
 0x1cf   :  { %7757 = vtanh.f32 %v1243_v59 }
 0x1d0   :  { %v7748_v1 = vpop.eup %7747  ;;  %7759 = vtanh.f32 %v1174_v62  ;;  %1383 = vrot.lane.b32.xlu0 %v8324_v0, %s7883_s19  ;;  %v8342_v11 = vld [vmem:[#allocation3 + $0x20] sm:$0x3f] }
 0x1d1   :  { %v7750_v3 = vpop.eup %7749  ;;  %1269 = vst [vmem:[#allocation3 + $0x40] sm:$0x3f] %v7748_v1  ;;  %v8352_v7 = vld [vmem:[#allocation3 + $0x30] sm:$0x3f] }
 0x1d2   :  { %v7752_v4 = vpop.eup %7751  ;;  %1271 = vst [vmem:[#allocation3 + $0x50] sm:$0x3f] %v7750_v3  ;;  %1385 = vrot.lane.b32.xlu1 %v8309_v52, %s7883_s19  ;;  %v8356_v12 = vld [vmem:[#allocation3 + $0x28] sm:$0x3f] }
 0x1d3   :  { %v7754_v5 = vpop.eup %7753  ;;  %1270 = vst [vmem:[#allocation3 + $0x48] sm:$0x3f] %v7752_v4  ;;  %v8366_v13 = vld [vmem:[#allocation3 + $0x38] sm:$0x3f] }
 0x1d4   :  { %1272 = vst [vmem:[#allocation3 + $0x58] sm:$0x3f] %v7754_v5  ;;  %1387 = vrot.lane.b32.xlu0 %v8313_v55, %s7883_s19 }
 0x1d6   :  { %1381 = vrot.lane.b32.xlu1 %v8320_v63, %s7883_s19 }
 0x1d8   :  { %v7756_v6 = vpop.eup %7755  ;;  %1457 = vrot.lane.b32.xlu0 %v8324_v0, %s7884_s22  ;;  %v8374_v15 = vld [vmem:[#allocation3 + $0x40] sm:$0x3f] }
 0x1d9   :  { %v7758_v8 = vpop.eup %7757  ;;  %1273 = vst [vmem:[#allocation3 + $0x60] sm:$0x3f] %v7756_v6  ;;  %v8384_v16 = vld [vmem:[#allocation3 + $0x50] sm:$0x3f] }
 0x1da   :  { %v7760_v10 = vpop.eup %7759  ;;  %1276 = vst.msk [vmem:[#allocation3 + $0x70] sm:$0x3f] %vm1275_vm10, %v7758_v8  ;;  %1459 = vrot.lane.b32.xlu1 %v8309_v52, %s7884_s22  ;;  %v8388_v17 = vld [vmem:[#allocation3 + $0x48] sm:$0x3f]  ;;  %vm4372_vm10 = vcmask 1045504  }
 0x1db   :  { %1274 = vst [vmem:[#allocation3 + $0x68] sm:$0x3f] %v7760_v10  ;;  %v8398_v18 = vld [vmem:[#allocation3 + $0x58] sm:$0x3f] }
 0x1dc   :  { %1461 = vrot.lane.b32.xlu0 %v8313_v55, %s7884_s22 }
 0x1de   :  { %1455 = vrot.lane.b32.xlu1 %v8320_v63, %s7884_s22 }
 0x1e0   :  { %1315 = vrot.lane.b32.xlu0 %v8342_v11, %s7880_s24  ;;  %v8406_v19 = vld [vmem:[#allocation3 + $0x60] sm:$0x3f] }
 0x1e1   :  { %v8416_v20 = vld [vmem:[#allocation3 + $0x70] sm:$0x3f] }
 0x1e2   :  { %1309 = vrot.lane.b32.xlu1 %v8324_v0, %s7880_s24  ;;  %v8424_v21 = vld [vmem:[#allocation3 + $0x68] sm:$0x3f] }
 0x1e4   :  { %1463 = vrot.lane.b32.xlu0 %v8342_v11, %s7884_s22 }
 0x1e6   :  { %1389 = vrot.lane.b32.xlu1 %v8342_v11, %s7883_s19 }
 0x1e8   :  { %1319 = vrot.lane.b32.xlu0 %v8352_v7, %s7880_s24 }
 0x1ea   :  { %1317 = vrot.lane.b32.xlu1 %v8356_v12, %s7880_s24 }
 0x1ec   :  { %1393 = vrot.lane.b32.xlu0 %v8352_v7, %s7883_s19 }
 0x1ee   :  { %1465 = vrot.lane.b32.xlu1 %v8356_v12, %s7884_s22 }
 0x1f0   :  { %1467 = vrot.lane.b32.xlu0 %v8352_v7, %s7884_s22 }
 0x1f2   :  { %1321 = vrot.lane.b32.xlu1 %v8366_v13, %s7880_s24 }
 0x1f4   :  { %1391 = vrot.lane.b32.xlu0 %v8356_v12, %s7883_s19 }
 0x1f6   :  { %1395 = vrot.lane.b32.xlu1 %v8366_v13, %s7883_s19 }
 0x1f8   :  { %1323 = vrot.lane.b32.xlu0 %v8374_v15, %s7880_s24 }
 0x1fa   :  { %1469 = vrot.lane.b32.xlu1 %v8366_v13, %s7884_s22 }
 0x1fc   :  { %1471 = vrot.lane.b32.xlu0 %v8374_v15, %s7884_s22 }
 0x1fe   :  { %1397 = vrot.lane.b32.xlu1 %v8374_v15, %s7883_s19 }
 0x200   :  { %1327 = vrot.lane.b32.xlu0 %v8384_v16, %s7880_s24 }
 0x202   :  { %1325 = vrot.lane.b32.xlu1 %v8388_v17, %s7880_s24 }
 0x204   :  { %1401 = vrot.lane.b32.xlu0 %v8384_v16, %s7883_s19 }
 0x206   :  { %1473 = vrot.lane.b32.xlu1 %v8388_v17, %s7884_s22 }
 0x208   :  { %1475 = vrot.lane.b32.xlu0 %v8384_v16, %s7884_s22 }
 0x20a   :  { %1329 = vrot.lane.b32.xlu1 %v8398_v18, %s7880_s24 }
 0x20c   :  { %1399 = vrot.lane.b32.xlu0 %v8388_v17, %s7883_s19 }
 0x20e   :  { %1403 = vrot.lane.b32.xlu1 %v8398_v18, %s7883_s19 }
 0x210   :  { %1405 = vrot.lane.b32.xlu0 %v8406_v19, %s7883_s19 }
 0x212   :  { %1477 = vrot.lane.b32.xlu1 %v8398_v18, %s7884_s22 }
 0x214   :  { %1479 = vrot.lane.b32.xlu0 %v8406_v19, %s7884_s22 }
 0x216   :  { %1331 = vrot.lane.b32.xlu1 %v8406_v19, %s7880_s24 }
 0x218   :  { %1335 = vrot.lane.b32.xlu0 %v8416_v20, %s7880_s24 }
 0x21a   :  { %1409 = vrot.lane.b32.xlu1 %v8416_v20, %s7883_s19 }
 0x21c   :  { %1483 = vrot.lane.b32.xlu0 %v8416_v20, %s7884_s22 }
 0x21e   :  { %1407 = vrot.lane.b32.xlu1 %v8424_v21, %s7883_s19  ;;  %s7905_s19 = smov 122  }
 0x220   :  { %1333 = vrot.lane.b32.xlu0 %v8424_v21, %s7880_s24  ;;  %s7904_s24 = smov 58  }
 0x224   :  { %1481 = vrot.lane.b32.xlu0 %v8424_v21, %s7884_s22  ;;  %s7906_s22 = smov 56  }
 0x23c   :  { %v1312_v22 = vpop.permute.xlu1 %1311 }
 0x23e   :  { %v1314_v23 = vpop.permute.xlu0 %1313 }
 0x23f   :  { %v1339_v30 = vsel %vm63_vm3, %v1312_v22, %v1314_v23 }
 0x240   :  { %v1308_v25 = vpop.permute.xlu1 %1307  ;;  %v1368_v24 = vadd.f32 %v1339_v30, %v8309_v52 }
 0x242   :  { %v1384_v26 = vpop.permute.xlu0 %1383 }
 0x244   :  { %v1386_v27 = vpop.permute.xlu1 %1385 }
 0x245   :  { %v1412_v47 = vsel %vm151_vm6, %v1384_v26, %v1386_v27 }
 0x246   :  { %v1388_v28 = vpop.permute.xlu0 %1387 }
 0x247   :  { %v1413_v31 = vsel %vm151_vm6, %v1386_v27, %v1388_v28 }
 0x248   :  { %v1382_v29 = vpop.permute.xlu1 %1381  ;;  %v1442_v33 = vadd.f32 %v1413_v31, %v1368_v24 }
 0x249   :  { %v1411_v48 = vsel %vm151_vm6, %v1382_v29, %v1384_v26 }
 0x24a   :  { %v1458_v2 = vpop.permute.xlu0 %1457 }
 0x24c   :  { %v1460_v32 = vpop.permute.xlu1 %1459 }
 0x24d   :  { %v1486_v53 = vsel %vm173_vm7, %v1458_v2, %v1460_v32 }
 0x24e   :  { %v1462_v34 = vpop.permute.xlu0 %1461 }
 0x24f   :  { %v1487_v35 = vsel %vm173_vm7, %v1460_v32, %v1462_v34 }
 0x250   :  { %v1516_v36 = vadd.f32 %v1487_v35, %v1442_v33  ;;  %v1456_v37 = vpop.permute.xlu1 %1455 }
 0x251   :  { %v1485_v54 = vsel %vm173_vm7, %v1456_v37, %v1458_v2 }
 0x252   :  { %v1531_v38 = vmul.f32 0.25, %v1516_v36  ;;  %v1316_v39 = vpop.permute.xlu0 %1315 }
 0x253   :  { %v1340_v41 = vsel %vm63_vm3, %v1314_v23, %v1316_v39 }
 0x254   :  { %1546 = vst [vmem:[#allocation4 + $0x10] sm:$0x3f] %v1531_v38  ;;  %v1310_v40 = vpop.permute.xlu1 %1309  ;;  %v1369_v49 = vadd.f32 %v1340_v41, %v8313_v55 }
 0x255   :  { %v1337_v42 = vsel %vm63_vm3, %v1308_v25, %v1310_v40  ;;  %v1338_v43 = vsel %vm63_vm3, %v1310_v40, %v1312_v22 }
 0x256   :  { %v1366_v44 = vadd.f32 %v1337_v42, %v8320_v63  ;;  %v1367_v45 = vadd.f32 %v1338_v43, %v8324_v0  ;;  %v1464_v46 = vpop.permute.xlu0 %1463 }
 0x257   :  { %v1488_v0 = vsel %vm173_vm7, %v1462_v34, %v1464_v46 }
 0x258   :  { %v1440_v50 = vadd.f32 %v1411_v48, %v1366_v44  ;;  %v1441_v51 = vadd.f32 %v1412_v47, %v1367_v45  ;;  %v1390_v52 = vpop.permute.xlu1 %1389 }
 0x259   :  { %v1414_v56 = vsel %vm151_vm6, %v1388_v28, %v1390_v52 }
 0x25a   :  { %v1514_v57 = vadd.f32 %v1485_v54, %v1440_v50  ;;  %v1515_v58 = vadd.f32 %v1486_v53, %v1441_v51  ;;  %v1443_v59 = vadd.f32 %v1414_v56, %v1369_v49  ;;  %v1320_v60 = vpop.permute.xlu0 %1319 }
 0x25b   :  { %v1562_v61 = vld [vmem:[#allocation4 + $0x10] sm:$0x3f] }
 0x25c   :  { %v2592_v62 = vld [vmem:[#allocation4 + $0x10] sm:$0x3f]  ;;  %1575 = vst [vmem:[#allocation5 + $0x10] sm:$0x3f] %v1562_v61  ;;  %v1529_v1 = vmul.f32 0.25, %v1514_v57  ;;  %v1530_v3 = vmul.f32 0.25, %v1515_v58  ;;  %v1517_v4 = vadd.f32 %v1488_v0, %v1443_v59  ;;  %v1318_v6 = vpop.permute.xlu1 %1317 }
 0x25d   :  { %v3651_v63 = vld [vmem:[#allocation4 + $0x10] sm:$0x3f]  ;;  %v2618_v55 = vrot.slane %v2592_v62, 4  ;;  %v1341_v25 = vsel %vm63_vm3, %v1316_v39, %v1318_v6  ;;  %v1342_v26 = vsel %vm63_vm3, %v1318_v6, %v1320_v60 }
 0x25e   :  { %3664 = vst [vmem:[#allocation5 + $0x618] sm:$0x3f] %v3651_v63  ;;  %v1930_v5 = vld [vmem:[#allocation4 + $0x10] sm:$0x3f]  ;;  %1544 = vst [vmem:[#allocation4] sm:$0x3f] %v1529_v1  ;;  %v1394_v10 = vpop.permute.xlu0 %1393  ;;  %v1370_v31 = vadd.f32 %v1341_v25, %v8342_v11  ;;  %v1371_v24 = vadd.f32 %v1342_v26, %v8356_v12 }
 0x25f   :  { %1958 = vrot.lane.b32.xlu1 %v1930_v5, %s7903_s1  ;;  %2644 = vst [vmem:[#allocation5 + $0x348] ss:$-100 sps:$4 sm:$0xf3] %v2618_v55   ;;  %1545 = vst [vmem:[#allocation4 + $0x8] sm:$0x3f] %v1530_v3  ;;  %v1532_v8 = vmul.f32 0.25, %v1517_v4 }
 0x260   :  { %v1466_v22 = vpop.permute.xlu1 %1465  ;;  %v2374_v42 = vld [vmem:[#allocation4 + $0x10] sm:$0x3f] }
 0x261   :  { %1547 = vst [vmem:[#allocation4 + $0x18] sm:$0x3f] %v1532_v8  ;;  %v1489_v11 = vsel %vm173_vm7, %v1464_v46, %v1466_v22  ;;  %v2773_v54 = vld [vmem:[#allocation4 + $0x10] sm:$0x3f] }
 0x262   :  { %v1468_v23 = vpop.permute.xlu0 %1467  ;;  %v3204_v63 = vld [vmem:[#allocation4 + $0x10] sm:$0x3f] }
 0x263   :  { %v1490_v12 = vsel %vm173_vm7, %v1466_v22, %v1468_v23 }
 0x264   :  { %v1322_v27 = vpop.permute.xlu1 %1321 }
 0x265   :  { %v1928_v30 = vld [vmem:[#allocation4] sm:$0x3f]  ;;  %v1343_v34 = vsel %vm63_vm3, %v1320_v60, %v1322_v27 }
 0x266   :  { %v2591_v28 = vld [vmem:[#allocation4 + $0x8] sm:$0x3f]  ;;  %v1392_v32 = vpop.permute.xlu0 %1391  ;;  %1954 = vrot.lane.b32.xlu1 %v1928_v30, %s7903_s1  ;;  %v1372_v44 = vadd.f32 %v1343_v34, %v8352_v7  ;;  %v2372_v7 = vld [vmem:[#allocation4] sm:$0x3f] }
 0x267   :  { %v1929_v29 = vld [vmem:[#allocation4 + $0x8] sm:$0x3f]  ;;  %v2617_v2 = vrot.slane %v2591_v28, 4  ;;  %v1415_v35 = vsel %vm151_vm6, %v1390_v52, %v1392_v32  ;;  %v1416_v36 = vsel %vm151_vm6, %v1392_v32, %v1394_v10  ;;  %v4012_v28 = vld [vmem:[#allocation4 + $0x10] sm:$0x3f] }
 0x268   :  { %1956 = vrot.lane.b32.xlu0 %v1929_v29, %s7903_s1  ;;  %v2593_v33 = vld [vmem:[#allocation4 + $0x18] sm:$0x3f]  ;;  %v1444_v38 = vadd.f32 %v1415_v35, %v1370_v31  ;;  %v1445_v39 = vadd.f32 %v1416_v36, %v1371_v24  ;;  %v1396_v40 = vpop.permute.xlu1 %1395  ;;  %v2373_v43 = vld [vmem:[#allocation4 + $0x8] sm:$0x3f]  ;;  %v1587_v31 = vld [vmem:[#allocation4] sm:$0x3f] }
 0x269   :  { %2643 = vst [vmem:[#allocation5 + $0x340] ss:$-100 sps:$4 sm:$0xf3] %v2617_v2   ;;  %v2619_v37 = vrot.slane %v2593_v33, 4  ;;  %v1417_v41 = vsel %vm151_vm6, %v1394_v10, %v1396_v40  ;;  %v2772_v62 = vld [vmem:[#allocation4 + $0x8] sm:$0x3f] }
 0x26a   :  { %v1518_v45 = vadd.f32 %v1489_v11, %v1444_v38  ;;  %v1519_v47 = vadd.f32 %v1490_v12, %v1445_v39  ;;  %v8462_v48 = vpop.permute.xlu0 %1323  ;;  %2402 = vrot.lane.b32.xlu1 %v2373_v43, %s7904_s24  ;;  %v1446_v50 = vadd.f32 %v1417_v41, %v1372_v44  ;;  %v1588_v0 = vld [vmem:[#allocation4 + $0x8] sm:$0x3f]  ;;  %v1589_v2 = vld [vmem:[#allocation4 + $0x10] sm:$0x3f] }
 0x26b   :  { %2645 = vst [vmem:[#allocation5 + $0x350] ss:$-100 sps:$4 sm:$0xf3] %v2619_v37   ;;  %v1344_v52 = vsel %vm63_vm3, %v1322_v27, %v8462_v48  ;;  %v3203_v6 = vld [vmem:[#allocation4 + $0x8] sm:$0x3f]  ;;  %v1615_v39 = vrot.slane %v1589_v2, 2 }
 0x26c   :  { %2404 = vrot.lane.b32.xlu0 %v2374_v42, %s7904_s24  ;;  %v1533_v49 = vmul.f32 0.25, %v1518_v45  ;;  %v1534_v46 = vmul.f32 0.25, %v1519_v47  ;;  %v1470_v51 = vpop.permute.xlu1 %1469  ;;  %v1373_v58 = vadd.f32 %v1344_v52, %v8366_v13  ;;  %v1614_v13 = vrot.slane %v1588_v0, 2  ;;  %v1706_v8 = vld [vmem:[#allocation4 + $0x8] sm:$0x3f] }
 0x26d   :  { %v1491_v53 = vsel %vm173_vm7, %v1468_v23, %v1470_v51  ;;  %v1732_v30 = vrot.slane %v1706_v8, 4  ;;  %v1707_v11 = vld [vmem:[#allocation4 + $0x10] sm:$0x3f]  ;;  %v1824_v12 = vld [vmem:[#allocation4 + $0x8] sm:$0x3f] }
 0x26e   :  { %1548 = vst [vmem:[#allocation4 + $0x20] sm:$0x3f] %v1533_v49  ;;  %1549 = vst [vmem:[#allocation4 + $0x28] sm:$0x3f] %v1534_v46  ;;  %v1520_v56 = vadd.f32 %v1491_v53, %v1446_v50  ;;  %v8469_v57 = vpop.permute.xlu0 %1471  ;;  %2400 = vrot.lane.b32.xlu1 %v2372_v7, %s7904_s24  ;;  %v1733_v49 = vrot.slane %v1707_v11, 4 }
 0x26f   :  { %v1492_v3 = vsel %vm173_vm7, %v1470_v51, %v8469_v57  ;;  %v1705_v53 = vld [vmem:[#allocation4] sm:$0x3f] }
 0x270   :  { %2800 = vrot.lane.b32.xlu0 %v2773_v54, %s7882_s18  ;;  %v1535_v59 = vmul.f32 0.25, %v1520_v56  ;;  %v1398_v60 = vpop.permute.xlu1 %1397  ;;  %v2020_v56 = vld [vmem:[#allocation4 + $0x8] sm:$0x3f]  ;;  %v1560_v8 = vld [vmem:[#allocation4] sm:$0x3f] }
 0x271   :  { %v1418_v61 = vsel %vm151_vm6, %v1396_v40, %v1398_v60  ;;  %v1613_v40 = vrot.slane %v1587_v31, 2  ;;  %1573 = vst [vmem:[#allocation5] sm:$0x3f] %v1560_v8 }
 0x272   :  { %1550 = vst [vmem:[#allocation4 + $0x30] sm:$0x3f] %v1535_v59  ;;  %v1447_v55 = vadd.f32 %v1418_v61, %v1373_v58  ;;  %v1328_v1 = vpop.permute.xlu0 %1327  ;;  %3233 = vrot.lane.b32.xlu1 %v3204_v63, %s7890_s30 }
 0x274   :  { %2798 = vrot.lane.b32.xlu0 %v2772_v62, %s7882_s18  ;;  %v1521_v4 = vadd.f32 %v1492_v3, %v1447_v55  ;;  %v1326_v5 = vpop.permute.xlu1 %1325  ;;  %v1731_v62 = vrot.slane %v1705_v53, 4 }
 0x275   :  { %v1564_v10 = vld [vmem:[#allocation4 + $0x20] sm:$0x3f]  ;;  %v2595_v22 = vld [vmem:[#allocation4 + $0x28] sm:$0x3f]  ;;  %v1345_v36 = vsel %vm63_vm3, %v8462_v48, %v1326_v5  ;;  %v1346_v37 = vsel %vm63_vm3, %v1326_v5, %v1328_v1 }
 0x276   :  { %v3653_v23 = vld [vmem:[#allocation4 + $0x20] sm:$0x3f]  ;;  %1577 = vst [vmem:[#allocation5 + $0x20] sm:$0x3f] %v1564_v10  ;;  %v2621_v25 = vrot.slane %v2595_v22, 4  ;;  %v1536_v26 = vmul.f32 0.25, %v1521_v4  ;;  %v1402_v27 = vpop.permute.xlu0 %1401  ;;  %3231 = vrot.lane.b32.xlu1 %v3203_v6, %s7890_s30  ;;  %v1374_v41 = vadd.f32 %v1345_v36, %v8374_v15  ;;  %v1375_v42 = vadd.f32 %v1346_v37, %v8388_v17 }
 0x277   :  { %3666 = vst [vmem:[#allocation5 + $0x628] sm:$0x3f] %v3653_v23  ;;  %v1850_v15 = vrot.slane %v1824_v12, 6  ;;  %v1825_v4 = vld [vmem:[#allocation4 + $0x10] sm:$0x3f] }
 0x278   :  { %1628 = vrot.lane.b32.xlu0 %v1614_v13, %s7879_s23  ;;  %2647 = vst [vmem:[#allocation5 + $0x360] ss:$-100 sps:$4 sm:$0xf3] %v2621_v25   ;;  %1551 = vst [vmem:[#allocation4 + $0x38] sm:$0x3f] %v1536_v26  ;;  %v1474_v29 = vpop.permute.xlu1 %1473  ;;  %v1851_v23 = vrot.slane %v1825_v4, 6 }
 0x279   :  { %v1566_v24 = vld [vmem:[#allocation4 + $0x30] sm:$0x3f]  ;;  %v1493_v17 = vsel %vm173_vm7, %v8469_v57, %v1474_v29  ;;  %v1823_v5 = vld [vmem:[#allocation4] sm:$0x3f]  ;;  %v1561_v6 = vld [vmem:[#allocation4 + $0x8] sm:$0x3f] }
 0x27a   :  { %v2596_v32 = vld [vmem:[#allocation4 + $0x30] sm:$0x3f]  ;;  %1579 = vst [vmem:[#allocation5 + $0x30] sm:$0x3f] %v1566_v24  ;;  %v1476_v35 = vpop.permute.xlu0 %1475  ;;  %4038 = vrot.lane.b32.xlu1 %v4012_v28, %s7903_s1  ;;  %1574 = vst [vmem:[#allocation5 + $0x8] sm:$0x3f] %v1561_v6 }
 0x27b   :  { %v3655_v33 = vld [vmem:[#allocation4 + $0x30] sm:$0x3f]  ;;  %v2622_v34 = vrot.slane %v2596_v32, 4  ;;  %v1494_v54 = vsel %vm173_vm7, %v1474_v29, %v1476_v35  ;;  %v1849_v25 = vrot.slane %v1823_v5, 6  ;;  %v2019_v28 = vld [vmem:[#allocation4] sm:$0x3f] }
 0x27c   :  { %3668 = vst [vmem:[#allocation5 + $0x638] sm:$0x3f] %v3655_v33  ;;  %1746 = vrot.lane.b32.xlu0 %v1732_v30, %s7882_s18  ;;  %v1330_v38 = vpop.permute.xlu1 %1329  ;;  %v2143_v36 = vld [vmem:[#allocation4 + $0x10] sm:$0x3f] }
 0x27d   :  { %2648 = vst [vmem:[#allocation5 + $0x368] ss:$-100 sps:$4 sm:$0xf3] %v2622_v34   ;;  %v1347_v45 = vsel %vm63_vm3, %v1328_v1, %v1330_v38  ;;  %v2048_v1 = vrot.slane %v2020_v56, 2  ;;  %v2047_v34 = vrot.slane %v2019_v28, 2 }
 0x27e   :  { %v1400_v43 = vpop.permute.xlu0 %1399  ;;  %1630 = vrot.lane.b32.xlu1 %v1615_v39, %s7879_s23  ;;  %v1376_v58 = vadd.f32 %v1347_v45, %v8384_v16  ;;  %v2264_v45 = vld [vmem:[#allocation4 + $0x8] sm:$0x3f]  ;;  %v2470_v6 = vld [vmem:[#allocation4 + $0x10] sm:$0x3f] }
 0x27f   :  { %v2597_v44 = vld [vmem:[#allocation4 + $0x38] sm:$0x3f]  ;;  %v1419_v47 = vsel %vm151_vm6, %v1398_v60, %v1400_v43  ;;  %v1420_v48 = vsel %vm151_vm6, %v1400_v43, %v1402_v27  ;;  %v2292_v56 = vrot.slane %v2264_v45, 6 }
 0x280   :  { %1626 = vrot.lane.b32.xlu0 %v1613_v40, %s7879_s23  ;;  %v2623_v46 = vrot.slane %v2597_v44, 4  ;;  %v1448_v50 = vadd.f32 %v1419_v47, %v1374_v41  ;;  %v1449_v51 = vadd.f32 %v1420_v48, %v1375_v42  ;;  %v1404_v52 = vpop.permute.xlu1 %1403  ;;  %v2171_v42 = vrot.slane %v2143_v36, 4  ;;  %v2265_v47 = vld [vmem:[#allocation4 + $0x10] sm:$0x3f]  ;;  %v1563_v45 = vld [vmem:[#allocation4 + $0x18] sm:$0x3f] }
 0x281   :  { %v1421_v7 = vsel %vm151_vm6, %v1402_v27, %v1404_v52  ;;  %v2021_v27 = vld [vmem:[#allocation4 + $0x10] sm:$0x3f]  ;;  %1576 = vst [vmem:[#allocation5 + $0x18] sm:$0x3f] %v1563_v45 }
 0x282   :  { %2649 = vst [vmem:[#allocation5 + $0x370] ss:$-100 sps:$4 sm:$0xf3] %v2623_v46   ;;  %v1522_v59 = vadd.f32 %v1493_v17, %v1448_v50  ;;  %v1523_v60 = vadd.f32 %v1494_v54, %v1449_v51  ;;  %v8498_v61 = vpop.permute.xlu0 %1405  ;;  %1748 = vrot.lane.b32.xlu1 %v1733_v49, %s7882_s18  ;;  %v1450_v0 = vadd.f32 %v1421_v7, %v1376_v58  ;;  %v2049_v33 = vrot.slane %v2021_v27, 2 }
 0x283   :  { %v1422_v2 = vsel %vm151_vm6, %v1404_v52, %v8498_v61  ;;  %v2293_v58 = vrot.slane %v2265_v47, 6 }
 0x284   :  { %1864 = vrot.lane.b32.xlu0 %v1850_v15, %s7905_s19  ;;  %v1537_v63 = vmul.f32 0.25, %v1522_v59  ;;  %v1538_v57 = vmul.f32 0.25, %v1523_v60  ;;  %v1478_v55 = vpop.permute.xlu1 %1477 }
 0x285   :  { %v1495_v3 = vsel %vm173_vm7, %v1476_v35, %v1478_v55  ;;  %v2142_v35 = vld [vmem:[#allocation4 + $0x8] sm:$0x3f] }
 0x286   :  { %1552 = vst [vmem:[#allocation4 + $0x40] sm:$0x3f] %v1537_v63  ;;  %1553 = vst [vmem:[#allocation4 + $0x48] sm:$0x3f] %v1538_v57  ;;  %v1524_v16 = vadd.f32 %v1495_v3, %v1450_v0  ;;  %v8503_v13 = vpop.permute.xlu0 %1479  ;;  %1744 = vrot.lane.b32.xlu1 %v1731_v62, %s7882_s18  ;;  %v2170_v44 = vrot.slane %v2142_v35, 4 }
 0x287   :  { %v2141_v62 = vld [vmem:[#allocation4] sm:$0x3f]  ;;  %v2863_v35 = vld [vmem:[#allocation4 + $0x10] sm:$0x3f] }
 0x288   :  { %2063 = vrot.lane.b32.xlu0 %v2048_v1, %s7888_s28  ;;  %v1539_v10 = vmul.f32 0.25, %v1524_v16  ;;  %v1332_v22 = vpop.permute.xlu1 %1331  ;;  %v2263_v63 = vld [vmem:[#allocation4] sm:$0x3f]  ;;  %v2169_v4 = vrot.slane %v2141_v62, 4  ;;  %v2469_v16 = vld [vmem:[#allocation4 + $0x8] sm:$0x3f] }
 0x289   :  { %v1348_v26 = vsel %vm63_vm3, %v1330_v38, %v1332_v22 }
 0x28a   :  { %1554 = vst [vmem:[#allocation4 + $0x50] sm:$0x3f] %v1539_v10  ;;  %v1377_v29 = vadd.f32 %v1348_v26, %v8398_v18  ;;  %v1336_v30 = vpop.permute.xlu0 %1335  ;;  %1866 = vrot.lane.b32.xlu1 %v1851_v23, %s7905_s19  ;;  %v1496_v18 = vsel %vm173_vm7, %v1478_v55, %v8503_v13  ;;  %v2498_v23 = vrot.slane %v2470_v6, 2  ;;  %v2468_v26 = vld [vmem:[#allocation4] sm:$0x3f] }
 0x28b   :  { %v1380_v31 = vadd.f32 %v1336_v30, %v8416_v20  ;;  %v2496_v28 = vrot.slane %v2468_v26, 2  ;;  %v2776_v6 = vld [vmem:[#allocation4 + $0x28] sm:$0x3f] }
 0x28c   :  { %1862 = vrot.lane.b32.xlu0 %v1849_v25, %s7905_s19  ;;  %v1451_v24 = vadd.f32 %v1422_v2, %v1377_v29  ;;  %v1410_v32 = vpop.permute.xlu1 %1409  ;;  %v2669_v25 = vld [vmem:[#allocation4 + $0x8] sm:$0x3f] }
 0x28d   :  { %v1568_v37 = vld [vmem:[#allocation4 + $0x40] sm:$0x3f]  ;;  %v2599_v38 = vld [vmem:[#allocation4 + $0x48] sm:$0x3f]  ;;  %v1454_v40 = vadd.f32 %v1410_v32, %v1380_v31  ;;  %v2695_v27 = vrot.slane %v2669_v25, 6 }
 0x28e   :  { %v3657_v39 = vld [vmem:[#allocation4 + $0x40] sm:$0x3f]  ;;  %1581 = vst [vmem:[#allocation5 + $0x40] sm:$0x3f] %v1568_v37  ;;  %v2625_v11 = vrot.slane %v2599_v38, 4  ;;  %v1525_v12 = vadd.f32 %v1496_v18, %v1451_v24  ;;  %v1484_v41 = vpop.permute.xlu0 %1483  ;;  %2065 = vrot.lane.b32.xlu1 %v2049_v33, %s7888_s28  ;;  %v2889_v37 = vrot.slane %v2863_v35, 2 }
 0x28f   :  { %3670 = vst [vmem:[#allocation5 + $0x648] sm:$0x3f] %v3657_v39  ;;  %v1528_v20 = vadd.f32 %v1484_v41, %v1454_v40  ;;  %v2862_v29 = vld [vmem:[#allocation4 + $0x8] sm:$0x3f]  ;;  %v3095_v38 = vld [vmem:[#allocation4 + $0x10] sm:$0x3f] }
 0x290   :  { %2061 = vrot.lane.b32.xlu0 %v2047_v34, %s7888_s28  ;;  %2651 = vst [vmem:[#allocation5 + $0x380] ss:$-100 sps:$4 sm:$0xf3] %v2625_v11   ;;  %v1540_v43 = vmul.f32 0.25, %v1525_v12  ;;  %v1408_v52 = vpop.permute.xlu1 %1407  ;;  %v2979_v34 = vld [vmem:[#allocation4 + $0x10] sm:$0x3f] }
 0x291   :  { %v1570_v48 = vld [vmem:[#allocation4 + $0x50] sm:$0x3f]  ;;  %v1543_v51 = vmul.f32 0.25, %v1528_v20  ;;  %v1423_v59 = vsel %vm151_vm6, %v8498_v61, %v1408_v52  ;;  %v1424_v60 = vsel %vm151_vm6, %v1408_v52, %v1410_v32  ;;  %v2291_v61 = vrot.slane %v2263_v63, 6  ;;  %v3094_v39 = vld [vmem:[#allocation4 + $0x8] sm:$0x3f] }
 0x292   :  { %v2600_v49 = vld [vmem:[#allocation4 + $0x50] sm:$0x3f]  ;;  %1583 = vst [vmem:[#allocation5 + $0x50] sm:$0x3f] %v1570_v48  ;;  %1555 = vst [vmem:[#allocation4 + $0x58] sm:$0x3f] %v1540_v43  ;;  %v1334_v15 = vpop.permute.xlu0 %1333  ;;  %2185 = vrot.lane.b32.xlu1 %v2170_v44, %s7890_s30 }
 0x293   :  { %v3659_v46 = vld [vmem:[#allocation4 + $0x50] sm:$0x3f]  ;;  %v2626_v50 = vrot.slane %v2600_v49, 4  ;;  %v1349_v53 = vsel %vm63_vm3, %v1332_v22, %v1334_v15  ;;  %v1350_v17 = vsel %vm63_vm3, %v1334_v15, %v1336_v30  ;;  %1559 = vst.msk [vmem:[#allocation4 + $0x70] sm:$0x3f] %vm1558_vm12, %v1543_v51  ;;  %v2888_v32 = vrot.slane %v2862_v29, 2 }
 0x294   :  { %3672 = vst [vmem:[#allocation5 + $0x658] sm:$0x3f] %v3659_v46  ;;  %2187 = vrot.lane.b32.xlu0 %v2171_v42, %s7890_s30  ;;  %v1378_v54 = vadd.f32 %v1349_v53, %v8406_v19  ;;  %v1379_v7 = vadd.f32 %v1350_v17, %v8424_v21  ;;  %v2670_v30 = vld [vmem:[#allocation4 + $0x10] sm:$0x3f]  ;;  %v3005_v36 = vrot.slane %v2979_v34, 4  ;;  %v3123_v18 = vrot.slane %v3095_v38, 6 }
 0x295   :  { %2652 = vst [vmem:[#allocation5 + $0x388] ss:$-100 sps:$4 sm:$0xf3] %v2626_v50   ;;  %v2696_v33 = vrot.slane %v2670_v30, 6  ;;  %v3122_v40 = vrot.slane %v3094_v39, 6  ;;  %vm1980_vm3 = vcmask 982016  }
 0x296   :  { %v1482_v57 = vpop.permute.xlu0 %1481  ;;  %v1452_v0 = vadd.f32 %v1423_v59, %v1378_v54  ;;  %v1453_v55 = vadd.f32 %v1424_v60, %v1379_v7  ;;  %2307 = vrot.lane.b32.xlu1 %v2292_v56, %s7892_s14  ;;  %v2978_v11 = vld [vmem:[#allocation4 + $0x8] sm:$0x3f]  ;;  %v3299_v43 = vld [vmem:[#allocation4 + $0x10] sm:$0x3f]  ;;  %v2594_v17 = vld [vmem:[#allocation4 + $0x20] sm:$0x3f] }
 0x297   :  { %v1497_v19 = vsel %vm173_vm7, %v8503_v13, %v1482_v57  ;;  %v1498_v21 = vsel %vm173_vm7, %v1482_v57, %v1484_v41  ;;  %v2497_v13 = vrot.slane %v2469_v16, 2  ;;  %v3298_v12 = vld [vmem:[#allocation4 + $0x8] sm:$0x3f]  ;;  %v3652_v41 = vld [vmem:[#allocation4 + $0x18] sm:$0x3f]  ;;  %v3004_v20 = vrot.slane %v2978_v11, 4 }
 0x298   :  { %2309 = vrot.lane.b32.xlu0 %v2293_v58, %s7892_s14  ;;  %v1526_v1 = vadd.f32 %v1497_v19, %v1452_v0  ;;  %v1527_v3 = vadd.f32 %v1498_v21, %v1453_v55  ;;  %3665 = vst [vmem:[#allocation5 + $0x620] sm:$0x3f] %v3652_v41  ;;  %v3326_v42 = vrot.slane %v3298_v12, 2  ;;  %v3542_v44 = vld [vmem:[#allocation4 + $0x8] sm:$0x3f]  ;;  %v3327_v47 = vrot.slane %v3299_v43, 2 }
 0x299   :  { %v2601_v5 = vld [vmem:[#allocation4 + $0x58] sm:$0x3f]  ;;  %v3570_v48 = vrot.slane %v3542_v44, 6  ;;  %v1565_v49 = vld [vmem:[#allocation4 + $0x28] sm:$0x3f]  ;;  %v2620_v56 = vrot.slane %v2594_v17, 4 }
 0x29a   :  { %v2627_v8 = vrot.slane %v2601_v5, 4  ;;  %v1541_v10 = vmul.f32 0.25, %v1526_v1  ;;  %v1542_v22 = vmul.f32 0.25, %v1527_v3  ;;  %2183 = vrot.lane.b32.xlu1 %v2169_v4, %s7890_s30  ;;  %v3421_v46 = vld [vmem:[#allocation4 + $0x10] sm:$0x3f]  ;;  %vm2428_vm6 = vcmask 474112  }
 0x29b   :  { %v3909_v50 = vld [vmem:[#allocation4 + $0x10] sm:$0x3f]  ;;  %1578 = vst [vmem:[#allocation5 + $0x28] sm:$0x3f] %v1565_v49  ;;  %v3449_v51 = vrot.slane %v3421_v46, 4  ;;  %vm1888_vm7 = vcmask 998400  }
 0x29c   :  { %2305 = vrot.lane.b32.xlu0 %v2291_v61, %s7892_s14  ;;  %2653 = vst [vmem:[#allocation5 + $0x390] ss:$-100 sps:$4 sm:$0xf3] %v2627_v8   ;;  %1556 = vst [vmem:[#allocation4 + $0x60] sm:$0x3f] %v1541_v10  ;;  %v3935_v52 = vrot.slane %v3909_v50, 6 }
 0x29d   :  { %1557 = vst [vmem:[#allocation4 + $0x68] sm:$0x3f] %v1542_v22  ;;  %v3420_v15 = vld [vmem:[#allocation4 + $0x8] sm:$0x3f]  ;;  %v3205_v54 = vld [vmem:[#allocation4 + $0x18] sm:$0x3f] }
 0x29e   :  { %2512 = vrot.lane.b32.xlu1 %v2497_v13, %s7906_s22  ;;  %v3448_v53 = vrot.slane %v3420_v15, 4  ;;  %v3543_v7 = vld [vmem:[#allocation4 + $0x10] sm:$0x3f]  ;;  %2646 = vst [vmem:[#allocation5 + $0x358] ss:$-100 sps:$4 sm:$0xf3] %v2620_v56  }
 0x29f   :  { %v3571_v58 = vrot.slane %v3543_v7, 6  ;;  %v1931_v59 = vld [vmem:[#allocation4 + $0x18] sm:$0x3f]  ;;  %v3677_v60 = vld [vmem:[#allocation4 + $0x10] sm:$0x3f]  ;;  %vm1689_vm12 = vcmask 678918  }
 0x2a0   :  { %2514 = vrot.lane.b32.xlu0 %v2498_v23, %s7906_s22  ;;  %v3703_v62 = vrot.slane %v3677_v60, 2  ;;  %v4014_v63 = vld [vmem:[#allocation4 + $0x20] sm:$0x3f]  ;;  %v3793_v57 = vld [vmem:[#allocation4 + $0x10] sm:$0x3f] }
 0x2a1   :  { %v3819_v0 = vrot.slane %v3793_v57, 4  ;;  %v1934_v55 = vld [vmem:[#allocation4 + $0x30] sm:$0x3f]  ;;  %v3654_v19 = vld [vmem:[#allocation4 + $0x28] sm:$0x3f] }
 0x2a2   :  { %2708 = vrot.lane.b32.xlu1 %v2695_v27, %s7879_s23  ;;  %v2774_v21 = vld [vmem:[#allocation4 + $0x18] sm:$0x3f]  ;;  %v2376_v1 = vld [vmem:[#allocation4 + $0x20] sm:$0x3f]  ;;  %3667 = vst [vmem:[#allocation5 + $0x630] sm:$0x3f] %v3654_v19 }
 0x2a3   :  { %v2602_v2 = vld [vmem:[#allocation4 + $0x60] sm:$0x3f]  ;;  %v4013_v3 = vld [vmem:[#allocation4 + $0x18] sm:$0x3f]  ;;  %v2378_v4 = vld [vmem:[#allocation4 + $0x30] sm:$0x3f] }
 0x2a4   :  { %2510 = vrot.lane.b32.xlu0 %v2496_v28, %s7906_s22  ;;  %v3661_v31 = vld [vmem:[#allocation4 + $0x60] sm:$0x3f]  ;;  %v2628_v24 = vrot.slane %v2602_v2, 4  ;;  %v3656_v61 = vld [vmem:[#allocation4 + $0x38] sm:$0x3f] }
 0x2a5   :  { %3674 = vst [vmem:[#allocation5 + $0x668] sm:$0x3f] %v3661_v31  ;;  %3669 = vst [vmem:[#allocation5 + $0x640] sm:$0x3f] %v3656_v61  ;;  %v2375_v16 = vld [vmem:[#allocation4 + $0x18] sm:$0x3f] }
 0x2a6   :  { %2654 = vst [vmem:[#allocation5 + $0x398] ss:$-100 sps:$4 sm:$0xf3] %v2628_v24   ;;  %2901 = vrot.lane.b32.xlu1 %v2888_v32, %s7905_s19  ;;  %v1567_v8 = vld [vmem:[#allocation4 + $0x38] sm:$0x3f] }
 0x2a7   :  { %1580 = vst [vmem:[#allocation5 + $0x38] sm:$0x3f] %v1567_v8  ;;  %v1932_v25 = vld [vmem:[#allocation4 + $0x20] sm:$0x3f]  ;;  %v3207_v26 = vld [vmem:[#allocation4 + $0x28] sm:$0x3f] }
 0x2a8   :  { %2710 = vrot.lane.b32.xlu0 %v2696_v33, %s7879_s23  ;;  %v1569_v27 = vld [vmem:[#allocation4 + $0x48] sm:$0x3f]  ;;  %v4016_v31 = vld [vmem:[#allocation4 + $0x30] sm:$0x3f]  ;;  %v2980_v24 = vld [vmem:[#allocation4 + $0x18] sm:$0x3f] }
 0x2a9   :  { %1582 = vst [vmem:[#allocation5 + $0x48] sm:$0x3f] %v1569_v27  ;;  %v1933_v2 = vld [vmem:[#allocation4 + $0x28] sm:$0x3f]  ;;  %v3006_v34 = vrot.slane %v2980_v24, 4 }
 0x2aa   :  { %3019 = vrot.lane.b32.xlu1 %v3005_v36, %s7903_s1  ;;  %v2377_v36 = vld [vmem:[#allocation4 + $0x28] sm:$0x3f]  ;;  %v2775_v12 = vld [vmem:[#allocation4 + $0x20] sm:$0x3f]  ;;  %v3300_v41 = vld [vmem:[#allocation4 + $0x18] sm:$0x3f] }
 0x2ab   :  { %v3328_v44 = vrot.slane %v3300_v41, 2  ;;  %v3208_v56 = vld [vmem:[#allocation4 + $0x30] sm:$0x3f]  ;;  %v4015_v57 = vld [vmem:[#allocation4 + $0x28] sm:$0x3f] }
 0x2ac   :  { %2903 = vrot.lane.b32.xlu0 %v2889_v37, %s7905_s19  ;;  %v3096_v37 = vld [vmem:[#allocation4 + $0x18] sm:$0x3f]  ;;  %v3658_v61 = vld [vmem:[#allocation4 + $0x48] sm:$0x3f] }
 0x2ad   :  { %3671 = vst [vmem:[#allocation5 + $0x650] sm:$0x3f] %v3658_v61 }
 0x2ae   :  { %3138 = vrot.lane.b32.xlu1 %v3123_v18, %s7888_s28  ;;  %v3124_v18 = vrot.slane %v3096_v37, 6  ;;  %v3662_v37 = vld [vmem:[#allocation4 + $0x68] sm:$0x3f] }
 0x2af   :  { %3675 = vst [vmem:[#allocation5 + $0x670] sm:$0x3f] %v3662_v37  ;;  %v1593_v37 = vld [vmem:[#allocation4 + $0x30] sm:$0x3f] }
 0x2b0   :  { %3136 = vrot.lane.b32.xlu0 %v3122_v40, %s7888_s28  ;;  %v2598_v40 = vld [vmem:[#allocation4 + $0x40] sm:$0x3f] }
 0x2b2   :  { %3017 = vrot.lane.b32.xlu1 %v3004_v20, %s7903_s1  ;;  %v2624_v20 = vrot.slane %v2598_v40, 4 }
 0x2b4   :  { %3340 = vrot.lane.b32.xlu0 %v3326_v42, %s7892_s14  ;;  %2650 = vst [vmem:[#allocation5 + $0x378] ss:$-100 sps:$4 sm:$0xf3] %v2624_v20  }
 0x2b6   :  { %3342 = vrot.lane.b32.xlu1 %v3327_v47, %s7892_s14  ;;  %v2777_v47 = vld [vmem:[#allocation4 + $0x30] sm:$0x3f] }
 0x2b8   :  { %3584 = vrot.lane.b32.xlu0 %v3570_v48, %s7906_s22  ;;  %v3422_v48 = vld [vmem:[#allocation4 + $0x18] sm:$0x3f] }
 0x2b9   :  { %v3450_v50 = vrot.slane %v3422_v48, 4 }
 0x2ba   :  { %3464 = vrot.lane.b32.xlu1 %v3449_v51, %s7904_s24  ;;  %v3206_v51 = vld [vmem:[#allocation4 + $0x20] sm:$0x3f] }
 0x2bc   :  { %3948 = vrot.lane.b32.xlu0 %v3935_v52, %s7905_s19  ;;  %v3544_v52 = vld [vmem:[#allocation4 + $0x18] sm:$0x3f] }
 0x2bd   :  { %v3572_v17 = vrot.slane %v3544_v52, 6 }
 0x2be   :  { %3462 = vrot.lane.b32.xlu1 %v3448_v53, %s7904_s24 }
 0x2c0   :  { %3235 = vrot.lane.b32.xlu0 %v3205_v54, %s7890_s30 }
 0x2c2   :  { %3586 = vrot.lane.b32.xlu1 %v3571_v58, %s7906_s22  ;;  %v1826_v58 = vld [vmem:[#allocation4 + $0x18] sm:$0x3f] }
 0x2c4   :  { %1960 = vrot.lane.b32.xlu0 %v1931_v59, %s7903_s1 }
 0x2c6   :  { %3716 = vrot.lane.b32.xlu1 %v3703_v62, %s7879_s23  ;;  %v1852_v62 = vrot.slane %v1826_v58, 6 }
 0x2c8   :  { %4042 = vrot.lane.b32.xlu0 %v4014_v63, %s7903_s1 }
 0x2ca   :  { %3832 = vrot.lane.b32.xlu1 %v3819_v0, %s7882_s18  ;;  %v2671_v0 = vld [vmem:[#allocation4 + $0x18] sm:$0x3f] }
 0x2cc   :  { %1966 = vrot.lane.b32.xlu0 %v1934_v55, %s7903_s1  ;;  %v2022_v55 = vld [vmem:[#allocation4 + $0x18] sm:$0x3f] }
 0x2ce   :  { %2802 = vrot.lane.b32.xlu1 %v2774_v21, %s7882_s18 }
 0x2d0   :  { %2408 = vrot.lane.b32.xlu0 %v2376_v1, %s7904_s24  ;;  %v2697_v1 = vrot.slane %v2671_v0, 6 }
 0x2d1   :  { %v8563_v5 = vpop.permute.xlu1 %1958 }
 0x2d2   :  { %4040 = vrot.lane.b32.xlu1 %v4013_v3, %s7903_s1  ;;  %v2050_v3 = vrot.slane %v2022_v55, 2 }
 0x2d4   :  { %2412 = vrot.lane.b32.xlu0 %v2378_v4, %s7904_s24  ;;  %v2864_v4 = vld [vmem:[#allocation4 + $0x18] sm:$0x3f] }
 0x2d5   :  { %v2890_v8 = vrot.slane %v2864_v4, 2 }
 0x2d6   :  { %2406 = vrot.lane.b32.xlu1 %v2375_v16, %s7904_s24 }
 0x2d8   :  { %2806 = vrot.lane.b32.xlu0 %v2776_v6, %s7882_s18  ;;  %v1955_v22 = vpop.permute.xlu1 %1954  ;;  %v2144_v6 = vld [vmem:[#allocation4 + $0x18] sm:$0x3f] }
 0x2da   :  { %v1957_v10 = vpop.permute.xlu0 %1956  ;;  %1962 = vrot.lane.b32.xlu1 %v1932_v25, %s7903_s1  ;;  %v2266_v25 = vld [vmem:[#allocation4 + $0x18] sm:$0x3f] }
 0x2db   :  { %v1982_v13 = vsel %vm1980_vm3, %v1957_v10, %v8563_v5  ;;  %v1981_v23 = vsel %vm1980_vm3, %v1955_v22, %v1957_v10  ;;  %v3660_v10 = vld [vmem:[#allocation4 + $0x58] sm:$0x3f]  ;;  %v2294_v40 = vrot.slane %v2266_v25, 6 }
 0x2dc   :  { %2007 = vst [vmem:[#allocation5 + $0x140] sm:$0x3f] %v1982_v13  ;;  %2006 = vst [vmem:[#allocation5 + $0x138] sm:$0x3f] %v1981_v23  ;;  %3239 = vrot.lane.b32.xlu0 %v3207_v26, %s7890_s30  ;;  %v2403_v29 = vpop.permute.xlu1 %2402  ;;  %v2172_v23 = vrot.slane %v2144_v6, 4 }
 0x2dd   :  { %v3678_v26 = vld [vmem:[#allocation4 + $0x18] sm:$0x3f]  ;;  %3673 = vst [vmem:[#allocation5 + $0x660] sm:$0x3f] %v3660_v10 }
 0x2de   :  { %v8572_v28 = vpop.permute.xlu0 %2404  ;;  %1964 = vrot.lane.b32.xlu1 %v1933_v2, %s7903_s1  ;;  %v1708_v10 = vld [vmem:[#allocation4 + $0x18] sm:$0x3f] }
 0x2df   :  { %v2430_v30 = vsel %vm2428_vm6, %v2403_v29, %v8572_v28 }
 0x2e0   :  { %2456 = vst [vmem:[#allocation5 + $0x278] sm:$0x3f] %v2430_v30  ;;  %4046 = vrot.lane.b32.xlu0 %v4016_v31, %s7903_s1  ;;  %v2401_v33 = vpop.permute.xlu1 %2400  ;;  %v2603_v31 = vld [vmem:[#allocation4 + $0x68] sm:$0x3f] }
 0x2e1   :  { %v2429_v35 = vsel %vm2428_vm6, %v2401_v33, %v2403_v29  ;;  %v2629_v33 = vrot.slane %v2603_v31, 4  ;;  %v2471_v31 = vld [vmem:[#allocation4 + $0x18] sm:$0x3f] }
 0x2e2   :  { %v8578_v32 = vpop.permute.xlu0 %2800  ;;  %2455 = vst [vmem:[#allocation5 + $0x270] sm:$0x3f] %v2429_v35  ;;  %2410 = vrot.lane.b32.xlu1 %v2377_v36, %s7904_s24  ;;  %v1572_v35 = vld [vmem:[#allocation4 + $0x60] sm:$0x3f]  ;;  %v1571_v36 = vld [vmem:[#allocation4 + $0x58] sm:$0x3f] }
 0x2e3   :  { %1586 = vst.msk [vmem:[#allocation5 + $0x60] sm:$0x3f] %vm1585_vm14, %v1572_v35  ;;  %1584 = vst [vmem:[#allocation5 + $0x58] sm:$0x3f] %v1571_v36  ;;  %v2499_v36 = vrot.slane %v2471_v31, 2 }
 0x2e4   :  { %3021 = vrot.lane.b32.xlu0 %v3006_v34, %s7903_s1  ;;  %v8583_v39 = vpop.permute.xlu1 %3233  ;;  %v3663_v34 = vld [vmem:[#allocation4 + $0x70] sm:$0x3f]  ;;  %2655 = vst.msk [vmem:[#allocation5 + $0x338] sm:$0xf0] %vm1807_vm4, %v2629_v33 }
 0x2e5   :  { %3676 = vst.msk [vmem:[#allocation5 + $0x678] sm:$0x3f] %vm1585_vm14, %v3663_v34 }
 0x2e6   :  { %v2799_v38 = vpop.permute.xlu0 %2798  ;;  %2804 = vrot.lane.b32.xlu1 %v2775_v12, %s7882_s18  ;;  %v3679_v12 = vld [vmem:[#allocation4 + $0x20] sm:$0x3f]  ;;  %2668 = vst.msk [vmem:[#allocation5 + $0x3a0] sm:$0x3] %vm1821_vm8, %v2629_v33 }
 0x2e7   :  { %v2824_v11 = vsel %vm10833_vm5, %v2799_v38, %v8578_v32 }
 0x2e8   :  { %2849 = vst [vmem:[#allocation5 + $0x3a8] sm:$0x3f] %v2824_v11  ;;  %3140 = vrot.lane.b32.xlu0 %v3124_v18, %s7888_s28  ;;  %v3232_v43 = vpop.permute.xlu1 %3231  ;;  %v3704_v11 = vrot.slane %v3678_v26, 2  ;;  %v1734_v26 = vrot.slane %v1708_v10, 4 }
 0x2e9   :  { %v3259_v45 = vsel %vm305_vm13, %v3232_v43, %v8583_v39 }
 0x2ea   :  { %v1629_v42 = vpop.permute.xlu0 %1628  ;;  %3285 = vst [vmem:[#allocation5 + $0x4e0] sm:$0x3f] %v3259_v45  ;;  %2808 = vrot.lane.b32.xlu1 %v2777_v47, %s7882_s18 }
 0x2ec   :  { %3344 = vrot.lane.b32.xlu0 %v3328_v44, %s7892_s14  ;;  %v8593_v46 = vpop.permute.xlu1 %4038  ;;  %v3794_v44 = vld [vmem:[#allocation4 + $0x18] sm:$0x3f] }
 0x2ee   :  { %v1747_v49 = vpop.permute.xlu0 %1746  ;;  %3237 = vrot.lane.b32.xlu1 %v3206_v51, %s7890_s30  ;;  %v3795_v51 = vld [vmem:[#allocation4 + $0x20] sm:$0x3f] }
 0x2f0   :  { %3466 = vrot.lane.b32.xlu0 %v3450_v50, %s7904_s24  ;;  %v8597_v53 = vpop.permute.xlu1 %1630  ;;  %v3820_v50 = vrot.slane %v3794_v44, 4 }
 0x2f1   :  { %v1653_v7 = vsel %vm85_vm2, %v1629_v42, %v8597_v53 }
 0x2f2   :  { %v1627_v15 = vpop.permute.xlu0 %1626  ;;  %1678 = vst [vmem:[#allocation5 + $0x70] ss:$-100 sps:$4 sm:$0xcf] %v1653_v7   ;;  %3241 = vrot.lane.b32.xlu1 %v3208_v56, %s7890_s30 }
 0x2f3   :  { %v1652_v54 = vsel %vm85_vm2, %v1627_v15, %v1629_v42  ;;  %v3910_v15 = vld [vmem:[#allocation4 + $0x18] sm:$0x3f] }
 0x2f4   :  { %1677 = vst [vmem:[#allocation5 + $0x68] ss:$-100 sps:$4 sm:$0xcf] %v1652_v54   ;;  %3588 = vrot.lane.b32.xlu0 %v3572_v17, %s7906_s22  ;;  %v8604_v60 = vpop.permute.xlu1 %1748  ;;  %v3821_v17 = vrot.slane %v3795_v51, 4  ;;  %v3936_v56 = vrot.slane %v3910_v15, 6  ;;  %v4103_v15 = vld [vmem:[%s10821_s3 + $0x8] sm:$0xff] }
 0x2f5   :  { %v1771_v63 = vsel %vm10833_vm5, %v1747_v49, %v8604_v60  ;;  %v1710_v51 = vld [vmem:[#allocation4 + $0x28] sm:$0x3f]  ;;  %7001 = vmatprep.mubr.msk.f32.mxu0 %vm10834_vm0, %v4103_v15  ;;  %7005 = vmatprep.mubr.msk.f32.mxu1 %vm10834_vm0, %v4103_v15 }
 0x2f6   :  { %v1865_v59 = vpop.permute.xlu0 %1864  ;;  %1796 = vst [vmem:[#allocation5 + $0xd8] ss:$-100 sps:$4 sm:$0xf3] %v1771_v63   ;;  %4044 = vrot.lane.b32.xlu1 %v4015_v57, %s7903_s1 }
 0x2f8   :  { %1868 = vrot.lane.b32.xlu0 %v1852_v62, %s7905_s19  ;;  %v1745_v21 = vpop.permute.xlu1 %1744  ;;  %v1590_v62 = vld [vmem:[#allocation4 + $0x18] sm:$0x3f] }
 0x2f9   :  { %v1770_v16 = vsel %vm10833_vm5, %v1745_v21, %v1747_v49  ;;  %v4107_v30 = vld [vmem:[#allocation5 + $0x8] sm:$0xff]  ;;  %v3705_v49 = vrot.slane %v3679_v12, 2  ;;  %v1616_v61 = vrot.slane %v1590_v62, 2  ;;  %v1592_v12 = vld [vmem:[#allocation4 + $0x28] sm:$0x3f] }
 0x2fa   :  { %v2064_v19 = vpop.permute.xlu0 %2063  ;;  %1795 = vst [vmem:[#allocation5 + $0xd0] ss:$-100 sps:$4 sm:$0xf3] %v1770_v16   ;;  %2712 = vrot.lane.b32.xlu1 %v2697_v1, %s7879_s23  ;;  %v1618_v44 = vrot.slane %v1592_v12, 2 }
 0x2fb   :  { %v4106_v42 = vld [vmem:[#allocation5] sm:$0xff] }
 0x2fc   :  { %2067 = vrot.lane.b32.xlu0 %v2050_v3, %s7888_s28  ;;  %v8613_v13 = vpop.permute.xlu1 %1866 }
 0x2fd   :  { %v1890_v29 = vsel %vm1888_vm7, %v1865_v59, %v8613_v13  ;;  %v4120_v2 = vld [vmem:[#allocation5 + $0x70] sm:$0xff] }
 0x2fe   :  { %v1863_v22 = vpop.permute.xlu0 %1862  ;;  %1915 = vst [vmem:[#allocation5 + $0xd8] sm:$0xfc] %v1890_v29  ;;  %2905 = vrot.lane.b32.xlu1 %v2890_v8, %s7905_s19  ;;  %v7352_v24 = vpack.c.bf16 %v4120_v2, %v4107_v30  ;;  %v1591_v8 = vld [vmem:[#allocation4 + $0x20] sm:$0x3f] }
 0x2ff   :  { %v1889_v27 = vsel %vm1888_vm7, %v1863_v22, %v1865_v59  ;;  %v3911_v59 = vld [vmem:[#allocation4 + $0x20] sm:$0x3f]  ;;  %v1617_v25 = vrot.slane %v1591_v8, 2 }
 0x300   :  { %1914 = vst [vmem:[#allocation5 + $0xd0] sm:$0xfc] %v1889_v27  ;;  %2189 = vrot.lane.b32.xlu0 %v2172_v23, %s7890_s30  ;;  %7353 = vmatprep.subr.bf16.mxu0 %v7352_v24  ;;  %v8622_v18 = vpop.permute.xlu1 %2065  ;;  %v3937_v4 = vrot.slane %v3911_v59, 6  ;;  %v1709_v27 = vld [vmem:[#allocation4 + $0x20] sm:$0x3f] }
 0x301   :  { %v2090_v20 = vsel %vm261_vm11, %v2064_v19, %v8622_v18  ;;  %v4119_v43 = vld [vmem:[#allocation5 + $0x68] sm:$0xff]  ;;  %v1735_v35 = vrot.slane %v1709_v27, 4  ;;  %v1829_v59 = vld [vmem:[#allocation4 + $0x30] sm:$0x3f]  ;;  %v1828_v27 = vld [vmem:[#allocation4 + $0x28] sm:$0x3f] }
 0x302   :  { %v2062_v38 = vpop.permute.xlu0 %2061  ;;  %2116 = vst [vmem:[#allocation5 + $0x1a8] ss:$-100 sps:$4 sm:$0xcf] %v2090_v20   ;;  %3718 = vrot.lane.b32.xlu1 %v3704_v11, %s7879_s23  ;;  %v7354_v45 = vpack.c.bf16 %v4119_v43, %v4106_v42  ;;  %v1619_v43 = vrot.slane %v1593_v37, 2  ;;  %v1854_v31 = vrot.slane %v1828_v27, 6 }
 0x303   :  { %v2089_v41 = vsel %vm261_vm11, %v2062_v38, %v2064_v19  ;;  %v2672_v27 = vld [vmem:[#allocation4 + $0x20] sm:$0x3f] }
 0x304   :  { %2115 = vst [vmem:[#allocation5 + $0x1a0] ss:$-100 sps:$4 sm:$0xcf] %v2089_v41   ;;  %2311 = vrot.lane.b32.xlu0 %v2294_v40, %s7892_s14  ;;  %7355 = vmatpush1.bf16.msra.mxu0 %v7354_v45  ;;  %v2186_v48 = vpop.permute.xlu1 %2185  ;;  %v1711_v45 = vld [vmem:[#allocation4 + $0x30] sm:$0x3f] }
 0x305   :  { %v4133_v58 = vld [vmem:[#allocation5 + $0xd8] sm:$0xff] }
 0x306   :  { %v8631_v47 = vpop.permute.xlu0 %2187  ;;  %3834 = vrot.lane.b32.xlu1 %v3820_v50, %s7882_s18 }
 0x307   :  { %v2212_v52 = vsel %vm305_vm13, %v2186_v48, %v8631_v47  ;;  %v4132_v0 = vld [vmem:[#allocation5 + $0xd0] sm:$0xff] }
 0x308   :  { %2238 = vst [vmem:[#allocation5 + $0x210] ss:$-100 sps:$4 sm:$0xf3] %v2212_v52   ;;  %3720 = vrot.lane.b32.xlu0 %v3705_v49, %s7879_s23  ;;  %v2308_v7 = vpop.permute.xlu1 %2307 }
 0x309   :  { %v4146_v57 = vld [vmem:[#allocation5 + $0x140] sm:$0xff] }
 0x30a   :  { %v8637_v54 = vpop.permute.xlu0 %2309  ;;  %3950 = vrot.lane.b32.xlu1 %v3936_v56, %s7905_s19  ;;  %v7356_v19 = vpack.c.bf16 %v4146_v57, %v4133_v58  ;;  %v1737_v56 = vrot.slane %v1711_v45, 4  ;;  %v1736_v58 = vrot.slane %v1710_v51, 4 }
 0x30b   :  { %v2334_v63 = vsel %vm349_vm15, %v2308_v7, %v8637_v54  ;;  %v4145_v55 = vld [vmem:[#allocation5 + $0x138] sm:$0xff] }
 0x30c   :  { %2360 = vst [vmem:[#allocation5 + $0x210] sm:$0xfc] %v2334_v63  ;;  %3836 = vrot.lane.b32.xlu0 %v3821_v17, %s7882_s18  ;;  %v7358_v21 = vpack.c.bf16 %v4145_v55, %v4132_v0  ;;  %7357 = vmatprep.subr.bf16.mxu0 %v7356_v19  ;;  %v2184_v3 = vpop.permute.xlu1 %2183  ;;  %v1827_v0 = vld [vmem:[#allocation4 + $0x20] sm:$0x3f] }
 0x30d   :  { %v2211_v6 = vsel %vm305_vm13, %v2184_v3, %v2186_v48  ;;  %v1853_v3 = vrot.slane %v1827_v0, 6 }
 0x30e   :  { %v2306_v1 = vpop.permute.xlu0 %2305  ;;  %7359 = vmatpush1.bf16.msra.mxu0 %v7358_v21  ;;  %2237 = vst [vmem:[#allocation5 + $0x208] ss:$-100 sps:$4 sm:$0xf3] %v2211_v6   ;;  %1632 = vrot.lane.b32.xlu1 %v1616_v61, %s7879_s23  ;;  %v2025_v61 = vld [vmem:[#allocation4 + $0x30] sm:$0x3f] }
 0x30f   :  { %v2333_v16 = vsel %vm349_vm15, %v2306_v1, %v2308_v7  ;;  %v4159_v30 = vld [vmem:[#allocation5 + $0x1a8] sm:$0xff]  ;;  %v1855_v1 = vrot.slane %v1829_v59, 6  ;;  %v2053_v10 = vrot.slane %v2025_v61, 2  ;;  %v2146_v59 = vld [vmem:[#allocation4 + $0x28] sm:$0x3f] }
 0x310   :  { %2359 = vst [vmem:[#allocation5 + $0x208] sm:$0xfc] %v2333_v16  ;;  %3952 = vrot.lane.b32.xlu0 %v3937_v4, %s7905_s19  ;;  %v2513_v23 = vpop.permute.xlu1 %2512  ;;  %v2023_v16 = vld [vmem:[#allocation4 + $0x20] sm:$0x3f]  ;;  %v2174_v0 = vrot.slane %v2146_v59, 4 }
 0x311   :  { %v2982_v61 = vld [vmem:[#allocation4 + $0x28] sm:$0x3f] }
 0x312   :  { %v8647_v22 = vpop.permute.xlu0 %2514  ;;  %1750 = vrot.lane.b32.xlu1 %v1734_v26, %s7882_s18  ;;  %v2147_v26 = vld [vmem:[#allocation4 + $0x30] sm:$0x3f] }
 0x313   :  { %v2540_v29 = vsel %vm2538_vm9, %v2513_v23, %v8647_v22  ;;  %v4172_v2 = vld [vmem:[#allocation5 + $0x210] sm:$0xff] }
 0x314   :  { %2566 = vst [vmem:[#allocation5 + $0x2e0] ss:$-100 sps:$4 sm:$0xcf] %v2540_v29   ;;  %1634 = vrot.lane.b32.xlu0 %v1617_v25, %s7879_s23  ;;  %v7360_v24 = vpack.c.bf16 %v4172_v2, %v4159_v30  ;;  %v2709_v34 = vpop.permute.xlu1 %2708  ;;  %v2175_v2 = vrot.slane %v2147_v26, 4  ;;  %v3098_v26 = vld [vmem:[#allocation4 + $0x28] sm:$0x3f] }
 0x315   :  { %v4158_v40 = vld [vmem:[#allocation5 + $0x1a0] sm:$0xff] }
 0x316   :  { %v2511_v33 = vpop.permute.xlu0 %2510  ;;  %7361 = vmatprep.subr.bf16.mxu0 %v7360_v24  ;;  %2516 = vrot.lane.b32.xlu1 %v2499_v36, %s7906_s22 }
 0x317   :  { %v2539_v38 = vsel %vm2538_vm9, %v2511_v33, %v2513_v23  ;;  %v4171_v11 = vld [vmem:[#allocation5 + $0x208] sm:$0xff]  ;;  %v2051_v23 = vrot.slane %v2023_v16, 2  ;;  %v2269_v33 = vld [vmem:[#allocation4 + $0x30] sm:$0x3f]  ;;  %v2473_v16 = vld [vmem:[#allocation4 + $0x28] sm:$0x3f] }
 0x318   :  { %2565 = vst [vmem:[#allocation5 + $0x2d8] ss:$-100 sps:$4 sm:$0xcf] %v2539_v38   ;;  %1752 = vrot.lane.b32.xlu0 %v1735_v35, %s7882_s18  ;;  %v7362_v41 = vpack.c.bf16 %v4171_v11, %v4158_v40  ;;  %v2902_v42 = vpop.permute.xlu1 %2901  ;;  %v2297_v37 = vrot.slane %v2269_v33, 6  ;;  %v2472_v40 = vld [vmem:[#allocation4 + $0x20] sm:$0x3f] }
 0x319   :  { %v2145_v11 = vld [vmem:[#allocation4 + $0x20] sm:$0x3f] }
 0x31a   :  { %v8656_v20 = vpop.permute.xlu0 %2710  ;;  %7363 = vmatpush1.bf16.msra.mxu0 %v7362_v41  ;;  %1636 = vrot.lane.b32.xlu1 %v1618_v44, %s7879_s23 }
 0x31b   :  { %v2734_v48 = vsel %vm85_vm2, %v2709_v34, %v8656_v20  ;;  %v4185_v49 = vld [vmem:[#allocation5 + $0x278] sm:$0xff]  ;;  %v4198_v50 = vld [vmem:[#allocation5 + $0x2e0] sm:$0xff]  ;;  %v2024_v34 = vld [vmem:[#allocation4 + $0x28] sm:$0x3f] }
 0x31c   :  { %2759 = vst [vmem:[#allocation5 + $0x340] sm:$0xfc] %v2734_v48  ;;  %1638 = vrot.lane.b32.xlu0 %v1619_v43, %s7879_s23  ;;  %v7364_v52 = vpack.c.bf16 %v4198_v50, %v4185_v49  ;;  %v8667_v7 = vpop.permute.xlu1 %3019  ;;  %v2052_v38 = vrot.slane %v2024_v34, 2  ;;  %v2173_v43 = vrot.slane %v2145_v11, 4  ;;  %v2474_v48 = vld [vmem:[#allocation4 + $0x30] sm:$0x3f] }
 0x31d   :  { %v2267_v49 = vld [vmem:[#allocation4 + $0x20] sm:$0x3f] }
 0x31e   :  { %v8665_v17 = vpop.permute.xlu0 %2903  ;;  %7365 = vmatprep.subr.bf16.mxu0 %v7364_v52  ;;  %1754 = vrot.lane.b32.xlu1 %v1736_v58, %s7882_s18  ;;  %v2502_v52 = vrot.slane %v2474_v48, 2  ;;  %v2295_v15 = vrot.slane %v2267_v49, 6  ;;  %v2673_v58 = vld [vmem:[#allocation4 + $0x28] sm:$0x3f] }
 0x31f   :  { %v2927_v62 = vsel %vm1888_vm7, %v2902_v42, %v8665_v17  ;;  %v4184_v63 = vld [vmem:[#allocation5 + $0x270] sm:$0xff]  ;;  %v4197_v57 = vld [vmem:[#allocation5 + $0x2d8] sm:$0xff]  ;;  %v2500_v42 = vrot.slane %v2472_v40, 2 }
 0x320   :  { %2952 = vst [vmem:[#allocation5 + $0x410] ss:$-100 sps:$4 sm:$0xcf] %v2927_v62   ;;  %1756 = vrot.lane.b32.xlu0 %v1737_v56, %s7882_s18  ;;  %v7366_v55 = vpack.c.bf16 %v4197_v57, %v4184_v63  ;;  %v8675_v21 = vpop.permute.xlu1 %3138  ;;  %v2699_v57 = vrot.slane %v2673_v58, 6 }
 0x322   :  { %v3137_v19 = vpop.permute.xlu0 %3136  ;;  %7367 = vmatpush1.bf16.msra.mxu0 %v7366_v55  ;;  %1870 = vrot.lane.b32.xlu1 %v1853_v3, %s7905_s19  ;;  %v2866_v55 = vld [vmem:[#allocation4 + $0x28] sm:$0x3f] }
 0x323   :  { %v3164_v4 = vsel %vm261_vm11, %v3137_v19, %v8675_v21  ;;  %v2268_v19 = vld [vmem:[#allocation4 + $0x28] sm:$0x3f]  ;;  %v2892_v3 = vrot.slane %v2866_v55, 2 }
 0x324   :  { %3190 = vst [vmem:[#allocation5 + $0x478] sm:$0xfc] %v3164_v4  ;;  %1874 = vrot.lane.b32.xlu0 %v1855_v1, %s7905_s19  ;;  %v3018_v8 = vpop.permute.xlu1 %3017  ;;  %v2296_v4 = vrot.slane %v2268_v19, 6  ;;  %v3681_v19 = vld [vmem:[#allocation4 + $0x30] sm:$0x3f] }
 0x325   :  { %v3043_v25 = vsel %vm1980_vm3, %v3018_v8, %v8667_v7 }
 0x326   :  { %v3341_v6 = vpop.permute.xlu0 %3340  ;;  %3068 = vst [vmem:[#allocation5 + $0x478] ss:$-100 sps:$4 sm:$0xf3] %v3043_v25   ;;  %2069 = vrot.lane.b32.xlu1 %v2051_v23, %s7888_s28  ;;  %v2501_v23 = vrot.slane %v2473_v16, 2 }
 0x328   :  { %2073 = vrot.lane.b32.xlu0 %v2053_v10, %s7888_s28  ;;  %v8685_v30 = vpop.permute.xlu1 %3342  ;;  %v3008_v10 = vrot.slane %v2982_v61, 4  ;;  %v3707_v61 = vrot.slane %v3681_v19, 2 }
 0x329   :  { %v3368_v24 = vsel %vm349_vm15, %v3341_v6, %v8685_v30 }
 0x32a   :  { %v3585_v29 = vpop.permute.xlu0 %3584  ;;  %3394 = vst [vmem:[#allocation5 + $0x548] ss:$-100 sps:$4 sm:$0xcf] %v3368_v24   ;;  %1872 = vrot.lane.b32.xlu1 %v1854_v31, %s7905_s19  ;;  %v3126_v31 = vrot.slane %v3098_v26, 6  ;;  %v2698_v24 = vrot.slane %v2672_v27, 6 }
 0x32b   :  { %v3797_v26 = vld [vmem:[#allocation4 + $0x30] sm:$0x3f]  ;;  %v3097_v27 = vld [vmem:[#allocation4 + $0x20] sm:$0x3f] }
 0x32c   :  { %2195 = vrot.lane.b32.xlu0 %v2175_v2, %s7890_s30  ;;  %v8693_v36 = vpop.permute.xlu1 %3464 }
 0x32e   :  { %v8691_v35 = vpop.permute.xlu0 %3948  ;;  %2071 = vrot.lane.b32.xlu1 %v2052_v38, %s7888_s28 }
 0x330   :  { %2317 = vrot.lane.b32.xlu0 %v2297_v37, %s7892_s14  ;;  %v3463_v41 = vpop.permute.xlu1 %3462  ;;  %v3302_v37 = vld [vmem:[#allocation4 + $0x28] sm:$0x3f] }
 0x331   :  { %v3490_v45 = vsel %vm2428_vm6, %v3463_v41, %v8693_v36  ;;  %v3330_v11 = vrot.slane %v3302_v37, 2  ;;  %v3913_v37 = vld [vmem:[#allocation4 + $0x30] sm:$0x3f] }
 0x332   :  { %v8697_v12 = vpop.permute.xlu0 %3235  ;;  %3516 = vst [vmem:[#allocation5 + $0x5b0] ss:$-100 sps:$4 sm:$0xf3] %v3490_v45   ;;  %2191 = vrot.lane.b32.xlu1 %v2173_v43, %s7890_s30  ;;  %v3424_v43 = vld [vmem:[#allocation4 + $0x28] sm:$0x3f] }
 0x333   :  { %v3260_v44 = vsel %vm305_vm13, %v8583_v39, %v8697_v12  ;;  %v3452_v49 = vrot.slane %v3424_v43, 4 }
 0x334   :  { %3286 = vst [vmem:[#allocation5 + $0x4e8] sm:$0x3f] %v3260_v44  ;;  %2518 = vrot.lane.b32.xlu0 %v2500_v42, %s7906_s22  ;;  %v8708_v51 = vpop.permute.xlu1 %3586  ;;  %v2674_v44 = vld [vmem:[#allocation4 + $0x30] sm:$0x3f] }
 0x335   :  { %v3612_v56 = vsel %vm2538_vm9, %v3585_v29, %v8708_v51 }
 0x336   :  { %v8706_v50 = vpop.permute.xlu0 %1960  ;;  %3638 = vst [vmem:[#allocation5 + $0x5b0] sm:$0xfc] %v3612_v56  ;;  %2313 = vrot.lane.b32.xlu1 %v2295_v15, %s7892_s14 }
 0x337   :  { %v1983_v39 = vsel %vm1980_vm3, %v8563_v5, %v8706_v50 }
 0x338   :  { %2008 = vst [vmem:[#allocation5 + $0x148] sm:$0x3f] %v1983_v39  ;;  %2522 = vrot.lane.b32.xlu0 %v2502_v52, %s7906_s22  ;;  %v8719_v63 = vpop.permute.xlu1 %3716  ;;  %v2700_v52 = vrot.slane %v2674_v44, 6  ;;  %v3546_v39 = vld [vmem:[#allocation4 + $0x28] sm:$0x3f] }
 0x339   :  { %v3574_v59 = vrot.slane %v3546_v39, 6 }
 0x33a   :  { %v8717_v62 = vpop.permute.xlu0 %4042  ;;  %2193 = vrot.lane.b32.xlu1 %v2174_v0, %s7890_s30 }
 0x33c   :  { %2716 = vrot.lane.b32.xlu0 %v2699_v57, %s7879_s23  ;;  %v8725_v1 = vpop.permute.xlu1 %3832 }
 0x33e   :  { %v8723_v5 = vpop.permute.xlu0 %1966  ;;  %2315 = vrot.lane.b32.xlu1 %v2296_v4, %s7892_s14 }
 0x340   :  { %2909 = vrot.lane.b32.xlu0 %v2892_v3, %s7905_s19  ;;  %v8729_v8 = vpop.permute.xlu1 %2802  ;;  %v2981_v3 = vld [vmem:[#allocation4 + $0x20] sm:$0x3f] }
 0x341   :  { %v2825_v25 = vsel %vm10833_vm5, %v8578_v32, %v8729_v8  ;;  %v2865_v32 = vld [vmem:[#allocation4 + $0x20] sm:$0x3f]  ;;  %v3007_v16 = vrot.slane %v2981_v3, 4 }
 0x342   :  { %v2409_v6 = vpop.permute.xlu0 %2408  ;;  %2850 = vst [vmem:[#allocation5 + $0x3b0] sm:$0x3f] %v2825_v25  ;;  %2520 = vrot.lane.b32.xlu1 %v2501_v23, %s7906_s22  ;;  %v2891_v41 = vrot.slane %v2865_v32, 2  ;;  %v2983_v32 = vld [vmem:[#allocation4 + $0x30] sm:$0x3f] }
 0x344   :  { %3025 = vrot.lane.b32.xlu0 %v3008_v10, %s7903_s1  ;;  %v4041_v2 = vpop.permute.xlu1 %4040 }
 0x345   :  { %v4064_v33 = vsel %vm1980_vm3, %v8593_v46, %v4041_v2  ;;  %v4065_v34 = vsel %vm1980_vm3, %v4041_v2, %v8717_v62 }
 0x346   :  { %v8736_v29 = vpop.permute.xlu0 %2412  ;;  %4089 = vst [vmem:[#allocation5 + $0x750] sm:$0x3f] %v4064_v33  ;;  %4090 = vst [vmem:[#allocation5 + $0x758] sm:$0x3f] %v4065_v34  ;;  %2714 = vrot.lane.b32.xlu1 %v2698_v24, %s7879_s23  ;;  %v3823_v24 = vrot.slane %v3797_v26, 4  ;;  %v3125_v33 = vrot.slane %v3097_v27, 6 }
 0x347   :  { %v2675_v26 = vld [vmem:[#allocation4 + $0x38] sm:$0x3f]  ;;  %v3425_v27 = vld [vmem:[#allocation4 + $0x30] sm:$0x3f] }
 0x348   :  { %3144 = vrot.lane.b32.xlu0 %v3126_v31, %s7888_s28  ;;  %v2407_v40 = vpop.permute.xlu1 %2406 }
 0x349   :  { %v2431_v42 = vsel %vm2428_vm6, %v8572_v28, %v2407_v40  ;;  %v2432_v46 = vsel %vm2428_vm6, %v2407_v40, %v2409_v6  ;;  %v2867_v28 = vld [vmem:[#allocation4 + $0x30] sm:$0x3f] }
 0x34a   :  { %v8744_v38 = vpop.permute.xlu0 %2806  ;;  %2457 = vst [vmem:[#allocation5 + $0x280] sm:$0x3f] %v2431_v42  ;;  %2458 = vst [vmem:[#allocation5 + $0x288] sm:$0x3f] %v2432_v46  ;;  %2907 = vrot.lane.b32.xlu1 %v2891_v41, %s7905_s19  ;;  %v2893_v57 = vrot.slane %v2867_v28, 2  ;;  %v3009_v41 = vrot.slane %v2983_v32, 4 }
 0x34b   :  { %v3099_v46 = vld [vmem:[#allocation4 + $0x30] sm:$0x3f] }
 0x34c   :  { %3348 = vrot.lane.b32.xlu0 %v3330_v11, %s7892_s14  ;;  %v1963_v48 = vpop.permute.xlu1 %1962 }
 0x34d   :  { %v1984_v15 = vsel %vm1980_vm3, %v8706_v50, %v1963_v48 }
 0x34e   :  { %v8751_v45 = vpop.permute.xlu0 %3239  ;;  %2009 = vst [vmem:[#allocation5 + $0x150] sm:$0x3f] %v1984_v15  ;;  %2718 = vrot.lane.b32.xlu1 %v2700_v52, %s7879_s23  ;;  %v2778_v52 = vld [vmem:[#allocation4 + $0x38] sm:$0x3f]  ;;  %v3301_v15 = vld [vmem:[#allocation4 + $0x20] sm:$0x3f] }
 0x350   :  { %3470 = vrot.lane.b32.xlu0 %v3452_v49, %s7904_s24  ;;  %v1965_v58 = vpop.permute.xlu1 %1964 }
 0x351   :  { %v1985_v0 = vsel %vm1980_vm3, %v1963_v48, %v1965_v58  ;;  %v1986_v55 = vsel %vm1980_vm3, %v1965_v58, %v8723_v5  ;;  %v3127_v48 = vrot.slane %v3099_v46, 6 }
 0x352   :  { %v8757_v56 = vpop.permute.xlu0 %4046  ;;  %2010 = vst [vmem:[#allocation5 + $0x158] sm:$0x3f] %v1985_v0  ;;  %2011 = vst [vmem:[#allocation5 + $0x160] sm:$0x3f] %v1986_v55  ;;  %2911 = vrot.lane.b32.xlu1 %v2893_v57, %s7905_s19  ;;  %v3423_v57 = vld [vmem:[#allocation4 + $0x20] sm:$0x3f] }
 0x353   :  { %v3451_v19 = vrot.slane %v3423_v57, 4 }
 0x354   :  { %3592 = vrot.lane.b32.xlu0 %v3574_v59, %s7906_s22  ;;  %v2411_v4 = vpop.permute.xlu1 %2410  ;;  %v3209_v59 = vld [vmem:[#allocation4 + $0x38] sm:$0x3f] }
 0x355   :  { %v2433_v23 = vsel %vm2428_vm6, %v2409_v6, %v2411_v4  ;;  %v2434_v25 = vsel %vm2428_vm6, %v2411_v4, %v8736_v29  ;;  %v4018_v4 = vld [vmem:[#allocation4 + $0x40] sm:$0x3f] }
 0x356   :  { %v8764_v50 = vpop.permute.xlu0 %3021  ;;  %2459 = vst [vmem:[#allocation5 + $0x290] sm:$0x3f] %v2433_v23  ;;  %2460 = vst [vmem:[#allocation5 + $0x298] sm:$0x3f] %v2434_v25  ;;  %3023 = vrot.lane.b32.xlu1 %v3007_v16, %s7903_s1  ;;  %v1936_v25 = vld [vmem:[#allocation4 + $0x40] sm:$0x3f] }
 0x357   :  { %v3044_v10 = vsel %vm1980_vm3, %v8667_v7, %v8764_v50 }
 0x358   :  { %3069 = vst [vmem:[#allocation5 + $0x480] ss:$-100 sps:$4 sm:$0xf3] %v3044_v10   ;;  %3724 = vrot.lane.b32.xlu0 %v3707_v61, %s7879_s23  ;;  %v2805_v31 = vpop.permute.xlu1 %2804  ;;  %v3303_v61 = vld [vmem:[#allocation4 + $0x30] sm:$0x3f] }
 0x359   :  { %v2826_v6 = vsel %vm10833_vm5, %v8729_v8, %v2805_v31  ;;  %v2827_v34 = vsel %vm10833_vm5, %v2805_v31, %v8744_v38 }
 0x35a   :  { %v8774_v2 = vpop.permute.xlu0 %3140  ;;  %2851 = vst [vmem:[#allocation5 + $0x3b8] sm:$0x3f] %v2826_v6  ;;  %2852 = vst [vmem:[#allocation5 + $0x3c0] sm:$0x3f] %v2827_v34  ;;  %3142 = vrot.lane.b32.xlu1 %v3125_v33, %s7888_s28  ;;  %v2701_v33 = vrot.slane %v2675_v26, 6 }
 0x35b   :  { %v3165_v7 = vsel %vm261_vm11, %v8675_v21, %v8774_v2  ;;  %v3939_v21 = vrot.slane %v3913_v37, 6  ;;  %v2868_v6 = vld [vmem:[#allocation4 + $0x38] sm:$0x3f]  ;;  %v3545_v34 = vld [vmem:[#allocation4 + $0x20] sm:$0x3f] }
 0x35c   :  { %3191 = vst [vmem:[#allocation5 + $0x480] sm:$0xfc] %v3165_v7  ;;  %3840 = vrot.lane.b32.xlu0 %v3823_v24, %s7882_s18  ;;  %v8787_v11 = vpop.permute.xlu1 %2808  ;;  %v3453_v7 = vrot.slane %v3425_v27, 4 }
 0x35d   :  { %v2828_v42 = vsel %vm10833_vm5, %v8744_v38, %v8787_v11 }
 0x35e   :  { %v8785_v40 = vpop.permute.xlu0 %3344  ;;  %2853 = vst [vmem:[#allocation5 + $0x3c8] sm:$0x3f] %v2828_v42  ;;  %3027 = vrot.lane.b32.xlu1 %v3009_v41, %s7903_s1  ;;  %v3573_v41 = vrot.slane %v3545_v34, 6  ;;  %v3680_v42 = vld [vmem:[#allocation4 + $0x28] sm:$0x3f] }
 0x35f   :  { %v3369_v8 = vsel %vm349_vm15, %v8685_v30, %v8785_v40 }
 0x360   :  { %3395 = vst [vmem:[#allocation5 + $0x550] ss:$-100 sps:$4 sm:$0xcf] %v3369_v8   ;;  %3956 = vrot.lane.b32.xlu0 %v3939_v21, %s7905_s19  ;;  %v3238_v44 = vpop.permute.xlu1 %3237  ;;  %v2894_v21 = vrot.slane %v2868_v6, 2  ;;  %v2984_v8 = vld [vmem:[#allocation4 + $0x38] sm:$0x3f] }
 0x361   :  { %v3261_v30 = vsel %vm305_vm13, %v8697_v12, %v3238_v44  ;;  %v3262_v38 = vsel %vm305_vm13, %v3238_v44, %v8751_v45 }
 0x362   :  { %v8797_v43 = vpop.permute.xlu0 %3466  ;;  %3287 = vst [vmem:[#allocation5 + $0x4f0] sm:$0x3f] %v3261_v30  ;;  %3288 = vst [vmem:[#allocation5 + $0x4f8] sm:$0x3f] %v3262_v38  ;;  %3146 = vrot.lane.b32.xlu1 %v3127_v48, %s7888_s28  ;;  %v3010_v48 = vrot.slane %v2984_v8, 4  ;;  %v4223_v30 = vld [vmem:[#allocation5 + $0x3a8] sm:$0xff] }
 0x363   :  { %v3491_v49 = vsel %vm2428_vm6, %v8693_v36, %v8797_v43  ;;  %v3329_v36 = vrot.slane %v3301_v15, 2  ;;  %v3100_v38 = vld [vmem:[#allocation4 + $0x38] sm:$0x3f] }
 0x364   :  { %3517 = vst [vmem:[#allocation5 + $0x5b8] ss:$-100 sps:$4 sm:$0xf3] %v3491_v49   ;;  %2810 = vrot.lane.b32.xlu0 %v2778_v52, %s7882_s18  ;;  %v8810_v28 = vpop.permute.xlu1 %3241  ;;  %v3706_v49 = vrot.slane %v3680_v42, 2 }
 0x365   :  { %v3263_v58 = vsel %vm305_vm13, %v8751_v45, %v8810_v28 }
 0x366   :  { %v8808_v39 = vpop.permute.xlu0 %3588  ;;  %3289 = vst [vmem:[#allocation5 + $0x500] sm:$0x3f] %v3263_v58  ;;  %3346 = vrot.lane.b32.xlu1 %v3329_v36, %s7892_s14  ;;  %v3547_v36 = vld [vmem:[#allocation4 + $0x30] sm:$0x3f]  ;;  %v4210_v58 = vld [vmem:[#allocation5 + $0x340] sm:$0xff] }
 0x367   :  { %v3613_v12 = vsel %vm2538_vm9, %v8708_v51, %v8808_v39  ;;  %v7370_v57 = vpack.c.bf16 %v4223_v30, %v4210_v58  ;;  %v4263_v6 = vld [vmem:[#allocation5 + $0x4e8] sm:$0xff] }
 0x368   :  { %3639 = vst [vmem:[#allocation5 + $0x5b8] sm:$0xfc] %v3613_v12  ;;  %3243 = vrot.lane.b32.xlu0 %v3209_v59, %s7890_s30  ;;  %v4045_v55 = vpop.permute.xlu1 %4044 }
 0x369   :  { %v4066_v3 = vsel %vm1980_vm3, %v8717_v62, %v4045_v55  ;;  %v4067_v45 = vsel %vm1980_vm3, %v4045_v55, %v8757_v56 }
 0x36a   :  { %v8820_v0 = vpop.permute.xlu0 %1868  ;;  %4091 = vst [vmem:[#allocation5 + $0x760] sm:$0x3f] %v4066_v3  ;;  %4092 = vst [vmem:[#allocation5 + $0x768] sm:$0x3f] %v4067_v45  ;;  %3468 = vrot.lane.b32.xlu1 %v3451_v19, %s7904_s24  ;;  %v3575_v3 = vrot.slane %v3547_v36, 6  ;;  %v4236_v45 = vld [vmem:[#allocation5 + $0x410] sm:$0xff] }
 0x36b   :  { %v1891_v51 = vsel %vm1888_vm7, %v8613_v13, %v8820_v0  ;;  %v3331_v13 = vrot.slane %v3303_v61, 2  ;;  %v4276_v26 = vld [vmem:[#allocation5 + $0x550] sm:$0xff] }
 0x36c   :  { %1916 = vst [vmem:[#allocation5 + $0xe0] sm:$0xfc] %v1891_v51  ;;  %4050 = vrot.lane.b32.xlu0 %v4018_v4, %s7903_s1  ;;  %v8833_v10 = vpop.permute.xlu1 %2712  ;;  %v3128_v51 = vrot.slane %v3100_v38, 6  ;;  %v4249_v4 = vld [vmem:[#allocation5 + $0x478] sm:$0xff]  ;;  %v4288_v36 = vld [vmem:[#allocation5 + $0x5b0] sm:$0xff] }
 0x36d   :  { %v2735_v23 = vsel %vm85_vm2, %v8656_v20, %v8833_v10  ;;  %v7374_v27 = vpack.c.bf16 %v4249_v4, %v4236_v45  ;;  %v3683_v4 = vld [vmem:[#allocation4 + $0x40] sm:$0x3f] }
 0x36e   :  { %v8831_v16 = vpop.permute.xlu0 %2067  ;;  %2760 = vst [vmem:[#allocation5 + $0x348] sm:$0xfc] %v2735_v23  ;;  %3350 = vrot.lane.b32.xlu1 %v3331_v13, %s7892_s14  ;;  %v3304_v23 = vld [vmem:[#allocation4 + $0x38] sm:$0x3f] }
 0x36f   :  { %v2091_v62 = vsel %vm261_vm11, %v8622_v18, %v8831_v16  ;;  %v4289_v38 = vld [vmem:[#allocation5 + $0x5b8] sm:$0xff] }
 0x370   :  { %2117 = vst [vmem:[#allocation5 + $0x1b0] ss:$-100 sps:$4 sm:$0xcf] %v2091_v62   ;;  %1970 = vrot.lane.b32.xlu0 %v1936_v25, %s7903_s1  ;;  %v8845_v24 = vpop.permute.xlu1 %2905  ;;  %v3796_v25 = vld [vmem:[#allocation4 + $0x28] sm:$0x3f] }
 0x371   :  { %v2928_v20 = vsel %vm1888_vm7, %v8665_v17, %v8845_v24 }
 0x372   :  { %v8843_v31 = vpop.permute.xlu0 %2189  ;;  %2953 = vst [vmem:[#allocation5 + $0x418] ss:$-100 sps:$4 sm:$0xcf] %v2928_v20   ;;  %3472 = vrot.lane.b32.xlu1 %v3453_v7, %s7904_s24  ;;  %v3822_v20 = vrot.slane %v3796_v25, 4 }
 0x373   :  { %v2213_v18 = vsel %vm305_vm13, %v8631_v47, %v8843_v31 }
 0x374   :  { %2239 = vst [vmem:[#allocation5 + $0x218] ss:$-100 sps:$4 sm:$0xf3] %v2213_v18   ;;  %2720 = vrot.lane.b32.xlu0 %v2701_v33, %s7879_s23  ;;  %v3719_v32 = vpop.permute.xlu1 %3718  ;;  %v3332_v18 = vrot.slane %v3304_v23, 2 }
 0x375   :  { %v3742_v17 = vsel %vm85_vm2, %v8719_v63, %v3719_v32  ;;  %v4211_v52 = vld [vmem:[#allocation5 + $0x348] sm:$0xff] }
 0x376   :  { %v8855_v37 = vpop.permute.xlu0 %2311  ;;  %3767 = vst [vmem:[#allocation5 + $0x680] ss:$-100 sps:$4 sm:$0xcf] %v3742_v17   ;;  %3590 = vrot.lane.b32.xlu1 %v3573_v41, %s7906_s22  ;;  %v3426_v41 = vld [vmem:[#allocation4 + $0x38] sm:$0x3f] }
 0x377   :  { %v2335_v47 = vsel %vm349_vm15, %v8637_v54, %v8855_v37  ;;  %v4262_v17 = vld [vmem:[#allocation5 + $0x4e0] sm:$0xff] }
 0x378   :  { %2361 = vst [vmem:[#allocation5 + $0x218] sm:$0xfc] %v2335_v47  ;;  %2913 = vrot.lane.b32.xlu0 %v2894_v21, %s7905_s19  ;;  %v3835_v44 = vpop.permute.xlu1 %3834  ;;  %v7376_v21 = vpack.c.bf16 %v4276_v26, %v4263_v6  ;;  %v3912_v47 = vld [vmem:[#allocation4 + $0x28] sm:$0x3f]  ;;  %v3709_v26 = vrot.slane %v3683_v4, 2 }
 0x379   :  { %v3858_v63 = vsel %vm10833_vm5, %v8725_v1, %v3835_v44  ;;  %v4224_v15 = vld [vmem:[#allocation5 + $0x3b0] sm:$0xff]  ;;  %v4237_v59 = vld [vmem:[#allocation5 + $0x418] sm:$0xff]  ;;  %v4250_v1 = vld [vmem:[#allocation5 + $0x480] sm:$0xff]  ;;  %v3938_v30 = vrot.slane %v3912_v47, 6 }
 0x37a   :  { %v8864_v46 = vpop.permute.xlu0 %3720  ;;  %3883 = vst [vmem:[#allocation5 + $0x6e8] ss:$-100 sps:$4 sm:$0xf3] %v3858_v63   ;;  %3722 = vrot.lane.b32.xlu1 %v3706_v49, %s7879_s23  ;;  %v7368_v12 = vpack.c.bf16 %v4224_v15, %v4211_v52  ;;  %v7372_v62 = vpack.c.bf16 %v4250_v1, %v4237_v59  ;;  %v3454_v49 = vrot.slane %v3426_v41, 4  ;;  %v3548_v15 = vld [vmem:[#allocation4 + $0x38] sm:$0x3f] }
 0x37b   :  { %v3743_v54 = vsel %vm85_vm2, %v3719_v32, %v8864_v46  ;;  %v4341_v6 = vld [vmem:[#allocation5 + $0x758] sm:$0x3f]  ;;  %v1594_v4 = vld [vmem:[#allocation4 + $0x38] sm:$0x3f] }
 0x37c   :  { %3768 = vst [vmem:[#allocation5 + $0x688] ss:$-100 sps:$4 sm:$0xcf] %v3743_v54   ;;  %3029 = vrot.lane.b32.xlu0 %v3010_v48, %s7903_s1  ;;  %7369 = vmatprep.subr.bf16.mxu0 %v7368_v12  ;;  %v3951_v19 = vpop.permute.xlu1 %3950 }
 0x37d   :  { %v3974_v13 = vsel %vm1888_vm7, %v8691_v35, %v3951_v19  ;;  %7371 = vmatpush1.bf16.msra.mxu0 %v7370_v57  ;;  %v4275_v35 = vld [vmem:[#allocation5 + $0x548] sm:$0xff]  ;;  %v3576_v57 = vrot.slane %v3548_v15, 6 }
 0x37e   :  { %v8872_v55 = vpop.permute.xlu0 %3836  ;;  %3999 = vst [vmem:[#allocation5 + $0x6e8] sm:$0xfc] %v3974_v13  ;;  %3594 = vrot.lane.b32.xlu1 %v3575_v3, %s7906_s22  ;;  %7373 = vmatprep.subr.bf16.mxu0 %v7372_v62  ;;  %v7378_v42 = vpack.c.bf16 %v4275_v35, %v4262_v17  ;;  %v3915_v35 = vld [vmem:[#allocation4 + $0x40] sm:$0x3f] }
 0x37f   :  { %v3859_v61 = vsel %vm10833_vm5, %v3835_v44, %v8872_v55  ;;  %v3941_v15 = vrot.slane %v3915_v35, 6  ;;  %v1712_v35 = vld [vmem:[#allocation4 + $0x38] sm:$0x3f] }
 0x380   :  { %3884 = vst [vmem:[#allocation5 + $0x6f0] ss:$-100 sps:$4 sm:$0xf3] %v3859_v61   ;;  %3148 = vrot.lane.b32.xlu0 %v3128_v51, %s7888_s28  ;;  %v1633_v7 = vpop.permute.xlu1 %1632 }
 0x381   :  { %v1654_v32 = vsel %vm85_vm2, %v8597_v53, %v1633_v7  ;;  %7375 = vmatpush1.bf16.msra.mxu0 %v7374_v27  ;;  %v4301_v53 = vld [vmem:[#allocation5 + $0x618] sm:$0xff]  ;;  %v4314_v13 = vld [vmem:[#allocation5 + $0x680] sm:$0xff] }
 0x382   :  { %v8880_v33 = vpop.permute.xlu0 %3952  ;;  %1679 = vst [vmem:[#allocation5 + $0x78] ss:$-100 sps:$4 sm:$0xcf] %v1654_v32   ;;  %3838 = vrot.lane.b32.xlu1 %v3822_v20, %s7882_s18  ;;  %7377 = vmatprep.subr.bf16.mxu0 %v7376_v21  ;;  %v7382_v12 = vpack.c.bf16 %v4301_v53, %v4288_v36  ;;  %v3682_v20 = vld [vmem:[#allocation4 + $0x38] sm:$0x3f] }
 0x383   :  { %v3975_v34 = vsel %vm1888_vm7, %v3951_v19, %v8880_v33  ;;  %v4302_v8 = vld [vmem:[#allocation5 + $0x620] sm:$0xff]  ;;  %v4340_v21 = vld [vmem:[#allocation5 + $0x750] sm:$0x3f]  ;;  %v3708_v47 = vrot.slane %v3682_v20, 2 }
 0x384   :  { %4000 = vst [vmem:[#allocation5 + $0x6f0] sm:$0xfc] %v3975_v34  ;;  %3352 = vrot.lane.b32.xlu0 %v3332_v18, %s7892_s14  ;;  %v1751_v48 = vpop.permute.xlu1 %1750  ;;  %v7380_v52 = vpack.c.bf16 %v4302_v8, %v4289_v38  ;;  %v4017_v19 = vld [vmem:[#allocation4 + $0x38] sm:$0x3f]  ;;  %v3799_v18 = vld [vmem:[#allocation4 + $0x40] sm:$0x3f] }
 0x385   :  { %v1772_v63 = vsel %vm10833_vm5, %v8604_v60, %v1751_v48  ;;  %7379 = vmatpush1.bf16.msra.mxu0 %v7378_v42  ;;  %v4327_v51 = vld [vmem:[#allocation5 + $0x6e8] sm:$0xff]  ;;  %v3825_v41 = vrot.slane %v3799_v18, 4  ;;  %v8914_v8 = vld [vmem:[%s10821_s3] sm:$0xff]  ;;  %v1620_v18 = vrot.slane %v1594_v4, 2 }
 0x386   :  { %v1635_v44 = vpop.permute.xlu0 %1634  ;;  %1797 = vst [vmem:[#allocation5 + $0xe0] ss:$-100 sps:$4 sm:$0xf3] %v1772_v63   ;;  %3954 = vrot.lane.b32.xlu1 %v3938_v30, %s7905_s19  ;;  %7381 = vmatprep.subr.bf16.mxu0 %v7380_v52  ;;  %v7386_v62 = vpack.c.bf16 %v4327_v51, %v4314_v13  ;;  %v3798_v30 = vld [vmem:[#allocation4 + $0x38] sm:$0x3f] }
 0x387   :  { %v1655_v54 = vsel %vm85_vm2, %v1633_v7, %v1635_v44  ;;  %v4315_v1 = vld [vmem:[#allocation5 + $0x688] sm:$0xff]  ;;  %v1935_v7 = vld [vmem:[#allocation4 + $0x38] sm:$0x3f]  ;;  %v3824_v36 = vrot.slane %v3798_v30, 4 }
 0x388   :  { %1680 = vst [vmem:[#allocation5 + $0x80] ss:$-100 sps:$4 sm:$0xcf] %v1655_v54   ;;  %3474 = vrot.lane.b32.xlu0 %v3454_v49, %s7904_s24  ;;  %v8893_v59 = vpop.permute.xlu1 %2516 }
 0x389   :  { %v2541_v3 = vsel %vm2538_vm9, %v8647_v22, %v8893_v59  ;;  %7383 = vmatpush1.bf16.msra.mxu0 %v7382_v12  ;;  %v4108_v53 = vld [vmem:[#allocation5 + $0x10] sm:$0xff]  ;;  %v1595_v12 = vld [vmem:[#allocation4 + $0x40] sm:$0x3f] }
 0x38a   :  { %v1753_v58 = vpop.permute.xlu0 %1752  ;;  %2567 = vst [vmem:[#allocation5 + $0x2e8] ss:$-100 sps:$4 sm:$0xcf] %v2541_v3   ;;  %4048 = vrot.lane.b32.xlu1 %v4017_v19, %s7903_s1  ;;  %v1621_v19 = vrot.slane %v1595_v12, 2 }
 0x38b   :  { %v1773_v60 = vsel %vm10833_vm5, %v1751_v48, %v1753_v58  ;;  %v4328_v45 = vld [vmem:[#allocation5 + $0x6f0] sm:$0xff] }
 0x38c   :  { %1798 = vst [vmem:[#allocation5 + $0xe8] ss:$-100 sps:$4 sm:$0xf3] %v1773_v60   ;;  %3596 = vrot.lane.b32.xlu0 %v3576_v57, %s7906_s22  ;;  %v7384_v61 = vpack.c.bf16 %v4328_v45, %v4315_v1  ;;  %v1637_v25 = vpop.permute.xlu1 %1636  ;;  %v3914_v57 = vld [vmem:[#allocation4 + $0x38] sm:$0x3f] }
 0x38d   :  { %v1656_v22 = vsel %vm85_vm2, %v1635_v44, %v1637_v25  ;;  %v4121_v17 = vld [vmem:[#allocation5 + $0x78] sm:$0xff]  ;;  %v3940_v3 = vrot.slane %v3914_v57, 6  ;;  %v1713_v45 = vld [vmem:[#allocation4 + $0x40] sm:$0x3f] }
 0x38e   :  { %v8901_v23 = vpop.permute.xlu0 %1638  ;;  %7385 = vmatprep.subr.bf16.mxu0 %v7384_v61  ;;  %1681 = vst [vmem:[#allocation5 + $0x88] ss:$-100 sps:$4 sm:$0xcf] %v1656_v22   ;;  %1968 = vrot.lane.b32.xlu1 %v1935_v7, %s7903_s1  ;;  %v7390_v54 = vpack.c.bf16 %v4121_v17, %v4108_v53  ;;  %v1739_v7 = vrot.slane %v1713_v45, 4  ;;  %v4134_v17 = vld [vmem:[#allocation5 + $0xe0] sm:$0xff] }
 0x38f   :  { %v1657_v27 = vsel %vm85_vm2, %v1637_v25, %v8901_v23  ;;  %7387 = vmatpush1.bf16.msra.mxu0 %v7386_v62  ;;  %v4109_v48 = vld [vmem:[#allocation5 + $0x18] sm:$0xff]  ;;  %v1831_v57 = vld [vmem:[#allocation4 + $0x40] sm:$0x3f] }
 0x390   :  { %1682 = vst [vmem:[#allocation5 + $0x90] ss:$-100 sps:$4 sm:$0xcf] %v1657_v27   ;;  %3728 = vrot.lane.b32.xlu0 %v3709_v26, %s7879_s23  ;;  %6999 = vmatprep.subr.msk.mxu0 %vm4372_vm10, %v4341_v6  ;;  %v1755_v32 = vpop.permute.xlu1 %1754  ;;  %v1597_v6 = vld [vmem:[#allocation4 + $0x50] sm:$0x3f] }
 0x391   :  { %v1774_v42 = vsel %vm10833_vm5, %v1753_v58, %v1755_v32 }
 0x392   :  { %v8909_v34 = vpop.permute.xlu0 %1756  ;;  %1799 = vst [vmem:[#allocation5 + $0xf0] ss:$-100 sps:$4 sm:$0xf3] %v1774_v42   ;;  %3726 = vrot.lane.b32.xlu1 %v3708_v47, %s7879_s23  ;;  %v1738_v47 = vrot.slane %v1712_v35, 4  ;;  %v1715_v42 = vld [vmem:[#allocation4 + $0x50] sm:$0x3f] }
 0x393   :  { %v1775_v44 = vsel %vm10833_vm5, %v1755_v32, %v8909_v34  ;;  %7000 = vmatpush1.msk.msra.mxu0 %vm4372_vm10, %v4340_v21  ;;  %v4122_v49 = vld [vmem:[#allocation5 + $0x80] sm:$0xff]  ;;  %v1741_v12 = vrot.slane %v1715_v42, 4 }
 0x394   :  { %1800 = vst [vmem:[#allocation5 + $0xf8] ss:$-100 sps:$4 sm:$0xf3] %v1775_v44   ;;  %3844 = vrot.lane.b32.xlu0 %v3825_v41, %s7882_s18  ;;  %v7388_v38 = vpack.c.bf16 %v4122_v49, %v4109_v48  ;;  %4477 = vmatmul.mubr.f32.vlgmr.msra.gmra.mrb[8].mxu0 %v8914_v8  ;;  %v1871_v52 = vpop.permute.xlu1 %1870  ;;  %v1623_v41 = vrot.slane %v1597_v6, 2 }
 0x395   :  { %v1892_v58 = vsel %vm1888_vm7, %v8820_v0, %v1871_v52  ;;  %v4110_v0 = vld [vmem:[#allocation5 + $0x20] sm:$0xff] }
 0x396   :  { %v8923_v63 = vpop.permute.xlu0 %1874  ;;  %7389 = vmatprep.subr.bf16.mxu1 %v7388_v38  ;;  %1917 = vst [vmem:[#allocation5 + $0xe8] sm:$0xfc] %v1892_v58  ;;  %3842 = vrot.lane.b32.xlu1 %v3824_v36, %s7882_s18  ;;  %v1830_v38 = vld [vmem:[#allocation4 + $0x38] sm:$0x3f] }
 0x397   :  { %7391 = vmatpush1.bf16.msra.mxu1 %v7390_v54  ;;  %v4111_v1 = vld [vmem:[#allocation5 + $0x28] sm:$0xff]  ;;  %v1856_v58 = vrot.slane %v1830_v38, 6  ;;  %v8989_v38 = vld [vmem:[%s10821_s3 + $0x8] sm:$0xff] }
 0x398   :  { %3960 = vrot.lane.b32.xlu0 %v3941_v15, %s7905_s19  ;;  %v2070_v60 = vpop.permute.xlu1 %2069  ;;  %v4147_v54 = vld [vmem:[#allocation5 + $0x148] sm:$0xff] }
 0x399   :  { %v2092_v61 = vsel %vm261_vm11, %v8831_v16, %v2070_v60  ;;  %v4123_v62 = vld [vmem:[#allocation5 + $0x88] sm:$0xff] }
 0x39a   :  { %v8929_v51 = vpop.permute.xlu0 %2073  ;;  %2118 = vst [vmem:[#allocation5 + $0x1b8] ss:$-100 sps:$4 sm:$0xcf] %v2092_v61   ;;  %3958 = vrot.lane.b32.xlu1 %v3940_v3, %s7905_s19  ;;  %v7426_v26 = vpack.c.bf16 %v4123_v62, %v4110_v0  ;;  %v2026_v3 = vld [vmem:[#allocation4 + $0x38] sm:$0x3f] }
 0x39b   :  { %v4124_v13 = vld [vmem:[#allocation5 + $0x90] sm:$0xff]  ;;  %v2054_v61 = vrot.slane %v2026_v3, 2  ;;  %v2027_v0 = vld [vmem:[#allocation4 + $0x40] sm:$0x3f] }
 0x39c   :  { %1642 = vrot.lane.b32.xlu0 %v1621_v19, %s7879_s23  ;;  %v7424_v25 = vpack.c.bf16 %v4124_v13, %v4111_v1  ;;  %v1873_v27 = vpop.permute.xlu1 %1872  ;;  %v1857_v1 = vrot.slane %v1831_v57, 6  ;;  %v1596_v62 = vld [vmem:[#allocation4 + $0x48] sm:$0x3f] }
 0x39d   :  { %v1893_v20 = vsel %vm1888_vm7, %v1871_v52, %v1873_v27  ;;  %v1894_v16 = vsel %vm1888_vm7, %v1873_v27, %v8923_v63  ;;  %v4135_v49 = vld [vmem:[#allocation5 + $0xe8] sm:$0xff]  ;;  %v7394_v52 = vpack.c.bf16 %v4147_v54, %v4134_v17  ;;  %v1622_v6 = vrot.slane %v1596_v62, 2  ;;  %v8981_v17 = vld [vmem:[%s10821_s3 + $0x10] sm:$0xff]  ;;  %v4160_v57 = vld [vmem:[#allocation5 + $0x1b0] sm:$0xff] }
 0x39e   :  { %v8935_v22 = vpop.permute.xlu0 %2195  ;;  %7425 = vmatprep.subr.bf16.mxu0 %v7424_v25  ;;  %1918 = vst [vmem:[#allocation5 + $0xf0] sm:$0xfc] %v1893_v20  ;;  %1919 = vst [vmem:[#allocation5 + $0xf8] sm:$0xfc] %v1894_v16  ;;  %1640 = vrot.lane.b32.xlu1 %v1620_v18, %s7879_s23  ;;  %v2055_v16 = vrot.slane %v2027_v0, 2  ;;  %v4199_v0 = vld [vmem:[#allocation5 + $0x2e8] sm:$0xff] }
 0x39f   :  { %7427 = vmatpush1.bf16.msra.mxu0 %v7426_v26 }
 0x3a0   :  { %1760 = vrot.lane.b32.xlu0 %v1739_v7, %s7882_s18  ;;  %v2072_v21 = vpop.permute.xlu1 %2071 }
 0x3a1   :  { %v2093_v44 = vsel %vm261_vm11, %v2070_v60, %v2072_v21  ;;  %v2094_v48 = vsel %vm261_vm11, %v2072_v21, %v8929_v51  ;;  %v4148_v30 = vld [vmem:[#allocation5 + $0x150] sm:$0xff] }
 0x3a2   :  { %v8942_v32 = vpop.permute.xlu0 %2317  ;;  %2119 = vst [vmem:[#allocation5 + $0x1c0] ss:$-100 sps:$4 sm:$0xcf] %v2093_v44   ;;  %2120 = vst [vmem:[#allocation5 + $0x1c8] ss:$-100 sps:$4 sm:$0xcf] %v2094_v48   ;;  %1758 = vrot.lane.b32.xlu1 %v1738_v47, %s7882_s18  ;;  %v7392_v53 = vpack.c.bf16 %v4148_v30, %v4135_v49 }
 0x3a3   :  { %v1714_v47 = vld [vmem:[#allocation4 + $0x48] sm:$0x3f]  ;;  %v4173_v30 = vld [vmem:[#allocation5 + $0x218] sm:$0xff] }
 0x3a4   :  { %1646 = vrot.lane.b32.xlu0 %v1623_v41, %s7879_s23  ;;  %7393 = vmatprep.subr.bf16.mxu1 %v7392_v53  ;;  %v2192_v36 = vpop.permute.xlu1 %2191  ;;  %v1833_v41 = vld [vmem:[#allocation4 + $0x50] sm:$0x3f]  ;;  %v1740_v49 = vrot.slane %v1714_v47, 4  ;;  %v7398_v3 = vpack.c.bf16 %v4173_v30, %v4160_v57 }
 0x3a5   :  { %v2214_v60 = vsel %vm305_vm13, %v8843_v31, %v2192_v36  ;;  %7395 = vmatpush1.bf16.msra.mxu1 %v7394_v52  ;;  %v4137_v13 = vld [vmem:[#allocation5 + $0xf8] sm:$0xff]  ;;  %v4136_v25 = vld [vmem:[#allocation5 + $0xf0] sm:$0xff]  ;;  %v1859_v48 = vrot.slane %v1833_v41, 6 }
 0x3a6   :  { %v8949_v15 = vpop.permute.xlu0 %2518  ;;  %2240 = vst [vmem:[#allocation5 + $0x220] ss:$-100 sps:$4 sm:$0xf3] %v2214_v60   ;;  %1876 = vrot.lane.b32.xlu1 %v1856_v58, %s7905_s19 }
 0x3a7   :  { %v2542_v19 = vsel %vm2538_vm9, %v8893_v59, %v8949_v15 }
 0x3a8   :  { %2568 = vst [vmem:[#allocation5 + $0x2f0] ss:$-100 sps:$4 sm:$0xcf] %v2542_v19   ;;  %1764 = vrot.lane.b32.xlu0 %v1741_v12, %s7882_s18  ;;  %v2314_v4 = vpop.permute.xlu1 %2313  ;;  %v1832_v12 = vld [vmem:[#allocation4 + $0x48] sm:$0x3f] }
 0x3a9   :  { %v2336_v59 = vsel %vm349_vm15, %v8855_v37, %v2314_v4  ;;  %v4150_v31 = vld [vmem:[#allocation5 + $0x160] sm:$0xff]  ;;  %v4149_v26 = vld [vmem:[#allocation5 + $0x158] sm:$0xff]  ;;  %v8969_v37 = vld [vmem:[%s10821_s3 + $0x18] sm:$0xff] }
 0x3aa   :  { %v8958_v45 = vpop.permute.xlu0 %2522  ;;  %2362 = vst [vmem:[#allocation5 + $0x220] sm:$0xfc] %v2336_v59  ;;  %2075 = vrot.lane.b32.xlu1 %v2054_v61, %s7888_s28  ;;  %v7428_v27 = vpack.c.bf16 %v4150_v31, %v4137_v13  ;;  %v7430_v7 = vpack.c.bf16 %v4149_v26, %v4136_v25  ;;  %7002 = vmatprep.mubr.msk.f32.mxu0 %vm10834_vm0, %v8969_v37  ;;  %v1858_v61 = vrot.slane %v1832_v12, 6  ;;  %v4186_v13 = vld [vmem:[#allocation5 + $0x280] sm:$0xff]  ;;  %v1938_v31 = vld [vmem:[#allocation4 + $0x50] sm:$0x3f] }
 0x3ab   :  { %4483 = vmatmul.mubr.f32.gmra.mrb[10].mxu0 %v8981_v17  ;;  %v2029_v26 = vld [vmem:[#allocation4 + $0x50] sm:$0x3f]  ;;  %v2271_v12 = vld [vmem:[#allocation4 + $0x40] sm:$0x3f] }
 0x3ac   :  { %1878 = vrot.lane.b32.xlu0 %v1857_v1, %s7905_s19  ;;  %7429 = vmatprep.subr.bf16.mxu0 %v7428_v27  ;;  %v2194_v20 = vpop.permute.xlu1 %2193  ;;  %v7402_v27 = vpack.c.bf16 %v4199_v0, %v4186_v13 }
 0x3ad   :  { %v2215_v35 = vsel %vm305_vm13, %v2192_v36, %v2194_v20  ;;  %v2216_v21 = vsel %vm305_vm13, %v2194_v20, %v8935_v22  ;;  %7431 = vmatpush1.bf16.msra.mxu0 %v7430_v7  ;;  %7009 = vmatprep.mubr.msk.f32.mxu0 %vm10834_vm0, %v8989_v38  ;;  %v4161_v52 = vld [vmem:[#allocation5 + $0x1b8] sm:$0xff]  ;;  %v1937_v7 = vld [vmem:[#allocation4 + $0x48] sm:$0x3f] }
 0x3ae   :  { %v8964_v18 = vpop.permute.xlu0 %2716  ;;  %2241 = vst [vmem:[#allocation5 + $0x228] ss:$-100 sps:$4 sm:$0xf3] %v2215_v35   ;;  %2242 = vst [vmem:[#allocation5 + $0x230] ss:$-100 sps:$4 sm:$0xf3] %v2216_v21   ;;  %1644 = vrot.lane.b32.xlu1 %v1622_v6, %s7879_s23 }
 0x3af   :  { %v4187_v19 = vld [vmem:[#allocation5 + $0x288] sm:$0xff]  ;;  %v4200_v60 = vld [vmem:[#allocation5 + $0x2f0] sm:$0xff] }
 0x3b0   :  { %2077 = vrot.lane.b32.xlu0 %v2055_v16, %s7888_s28  ;;  %v2316_v44 = vpop.permute.xlu1 %2315  ;;  %v7400_v25 = vpack.c.bf16 %v4200_v60, %v4187_v19  ;;  %v2149_v35 = vld [vmem:[#allocation4 + $0x40] sm:$0x3f]  ;;  %v2028_v21 = vld [vmem:[#allocation4 + $0x48] sm:$0x3f] }
 0x3b1   :  { %v2337_v53 = vsel %vm349_vm15, %v2314_v4, %v2316_v44  ;;  %v2338_v54 = vsel %vm349_vm15, %v2316_v44, %v8942_v32  ;;  %v4174_v36 = vld [vmem:[#allocation5 + $0x220] sm:$0xff] }
 0x3b2   :  { %v8984_v42 = vpop.permute.xlu0 %2909  ;;  %2363 = vst [vmem:[#allocation5 + $0x228] sm:$0xfc] %v2337_v53  ;;  %2364 = vst [vmem:[#allocation5 + $0x230] sm:$0xfc] %v2338_v54  ;;  %1762 = vrot.lane.b32.xlu1 %v1740_v49, %s7882_s18  ;;  %v7396_v58 = vpack.c.bf16 %v4174_v36, %v4161_v52  ;;  %v2056_v36 = vrot.slane %v2028_v21, 2 }
 0x3b3   :  { %v2273_v21 = vld [vmem:[#allocation4 + $0x50] sm:$0x3f] }
 0x3b4   :  { %1882 = vrot.lane.b32.xlu0 %v1859_v48, %s7905_s19  ;;  %7397 = vmatprep.subr.bf16.mxu1 %v7396_v58  ;;  %v2521_v4 = vpop.permute.xlu1 %2520  ;;  %v2148_v58 = vld [vmem:[#allocation4 + $0x38] sm:$0x3f] }
 0x3b5   :  { %v2543_v62 = vsel %vm2538_vm9, %v8949_v15, %v2521_v4  ;;  %v2544_v59 = vsel %vm2538_vm9, %v2521_v4, %v8958_v45  ;;  %7399 = vmatpush1.bf16.msra.mxu1 %v7398_v3  ;;  %v2057_v15 = vrot.slane %v2029_v26, 2  ;;  %v4163_v6 = vld [vmem:[#allocation5 + $0x1c8] sm:$0xff]  ;;  %v4162_v48 = vld [vmem:[#allocation5 + $0x1c0] sm:$0xff] }
 0x3b6   :  { %v8998_v1 = vpop.permute.xlu0 %3025  ;;  %2569 = vst [vmem:[#allocation5 + $0x2f8] ss:$-100 sps:$4 sm:$0xcf] %v2543_v62   ;;  %2570 = vst [vmem:[#allocation5 + $0x300] ss:$-100 sps:$4 sm:$0xcf] %v2544_v59   ;;  %1880 = vrot.lane.b32.xlu1 %v1858_v61, %s7905_s19  ;;  %7401 = vmatprep.subr.bf16.mxu1 %v7400_v25 }
 0x3b7   :  { %v2299_v59 = vrot.slane %v2271_v12, 6  ;;  %v2151_v25 = vld [vmem:[#allocation4 + $0x50] sm:$0x3f] }
 0x3b8   :  { %1974 = vrot.lane.b32.xlu0 %v1938_v31, %s7903_s1  ;;  %v2715_v16 = vpop.permute.xlu1 %2714  ;;  %v2176_v31 = vrot.slane %v2148_v58, 4  ;;  %v2272_v58 = vld [vmem:[#allocation4 + $0x48] sm:$0x3f] }
 0x3b9   :  { %v2736_v41 = vsel %vm85_vm2, %v8833_v10, %v2715_v16  ;;  %v2737_v47 = vsel %vm85_vm2, %v2715_v16, %v8964_v18  ;;  %7403 = vmatpush1.bf16.msra.mxu1 %v7402_v27  ;;  %v4176_v44 = vld [vmem:[#allocation5 + $0x230] sm:$0xff]  ;;  %v4175_v49 = vld [vmem:[#allocation5 + $0x228] sm:$0xff]  ;;  %v2177_v10 = vrot.slane %v2149_v35, 4  ;;  %v2270_v27 = vld [vmem:[#allocation4 + $0x38] sm:$0x3f] }
 0x3ba   :  { %v9006_v20 = vpop.permute.xlu0 %3144  ;;  %2761 = vst [vmem:[#allocation5 + $0x350] sm:$0xfc] %v2736_v41  ;;  %2762 = vst [vmem:[#allocation5 + $0x358] sm:$0xfc] %v2737_v47  ;;  %1972 = vrot.lane.b32.xlu1 %v1937_v7, %s7903_s1  ;;  %v7432_v30 = vpack.c.bf16 %v4176_v44, %v4163_v6  ;;  %v7434_v53 = vpack.c.bf16 %v4175_v49, %v4162_v48  ;;  %v2179_v7 = vrot.slane %v2151_v25, 4  ;;  %v2298_v6 = vrot.slane %v2270_v27, 6 }
 0x3bb   :  { %v2150_v41 = vld [vmem:[#allocation4 + $0x48] sm:$0x3f]  ;;  %v2475_v25 = vld [vmem:[#allocation4 + $0x38] sm:$0x3f] }
 0x3bc   :  { %2081 = vrot.lane.b32.xlu0 %v2057_v15, %s7888_s28  ;;  %7433 = vmatprep.subr.bf16.mxu0 %v7432_v30  ;;  %v2908_v52 = vpop.permute.xlu1 %2907 }
 0x3bd   :  { %v2929_v57 = vsel %vm1888_vm7, %v8845_v24, %v2908_v52  ;;  %v2930_v19 = vsel %vm1888_vm7, %v2908_v52, %v8984_v42  ;;  %7435 = vmatpush1.bf16.msra.mxu0 %v7434_v53  ;;  %v4189_v60 = vld [vmem:[#allocation5 + $0x298] sm:$0xff]  ;;  %v4202_v3 = vld [vmem:[#allocation5 + $0x300] sm:$0xff]  ;;  %v4188_v4 = vld [vmem:[#allocation5 + $0x290] sm:$0xff] }
 0x3be   :  { %v9014_v54 = vpop.permute.xlu0 %3348  ;;  %2954 = vst [vmem:[#allocation5 + $0x420] ss:$-100 sps:$4 sm:$0xcf] %v2929_v57   ;;  %2955 = vst [vmem:[#allocation5 + $0x428] ss:$-100 sps:$4 sm:$0xcf] %v2930_v19   ;;  %2079 = vrot.lane.b32.xlu1 %v2056_v36, %s7888_s28  ;;  %v7436_v61 = vpack.c.bf16 %v4202_v3, %v4189_v60 }
 0x3bf   :  { %v4201_v13 = vld [vmem:[#allocation5 + $0x2f8] sm:$0xff]  ;;  %v2178_v36 = vrot.slane %v2150_v41, 4  ;;  %v2300_v60 = vrot.slane %v2272_v58, 6  ;;  %v2477_v58 = vld [vmem:[#allocation4 + $0x48] sm:$0x3f] }
 0x3c0   :  { %2199 = vrot.lane.b32.xlu0 %v2177_v10, %s7890_s30  ;;  %v7438_v0 = vpack.c.bf16 %v4201_v13, %v4188_v4  ;;  %7437 = vmatprep.subr.bf16.mxu0 %v7436_v61  ;;  %v9024_v24 = vpop.permute.xlu1 %2718  ;;  %v2301_v10 = vrot.slane %v2273_v21, 6  ;;  %v2380_v4 = vld [vmem:[#allocation4 + $0x40] sm:$0x3f]  ;;  %v2478_v21 = vld [vmem:[#allocation4 + $0x50] sm:$0x3f] }
 0x3c1   :  { %v2738_v26 = vsel %vm85_vm2, %v8964_v18, %v9024_v24  ;;  %v4213_v35 = vld [vmem:[#allocation5 + $0x358] sm:$0xff]  ;;  %v4212_v44 = vld [vmem:[#allocation5 + $0x350] sm:$0xff]  ;;  %v2476_v61 = vld [vmem:[#allocation4 + $0x40] sm:$0x3f] }
 0x3c2   :  { %v9022_v62 = vpop.permute.xlu0 %3470  ;;  %7439 = vmatpush1.bf16.msra.mxu0 %v7438_v0  ;;  %2763 = vst [vmem:[#allocation5 + $0x360] sm:$0xfc] %v2738_v26  ;;  %2197 = vrot.lane.b32.xlu1 %v2176_v31, %s7890_s30  ;;  %v2379_v31 = vld [vmem:[#allocation4 + $0x38] sm:$0x3f] }
 0x3c4   :  { %2321 = vrot.lane.b32.xlu0 %v2299_v59, %s7892_s14  ;;  %v9033_v15 = vpop.permute.xlu1 %2911  ;;  %v2504_v59 = vrot.slane %v2476_v61, 2 }
 0x3c5   :  { %v2931_v18 = vsel %vm1888_vm7, %v8984_v42, %v9033_v15  ;;  %v4226_v47 = vld [vmem:[#allocation5 + $0x3c0] sm:$0xff]  ;;  %v4225_v48 = vld [vmem:[#allocation5 + $0x3b8] sm:$0xff] }
 0x3c6   :  { %v9031_v16 = vpop.permute.xlu0 %3592  ;;  %2956 = vst [vmem:[#allocation5 + $0x430] ss:$-100 sps:$4 sm:$0xcf] %v2931_v18   ;;  %2319 = vrot.lane.b32.xlu1 %v2298_v6, %s7892_s14  ;;  %v7404_v49 = vpack.c.bf16 %v4226_v47, %v4213_v35  ;;  %v7406_v30 = vpack.c.bf16 %v4225_v48, %v4212_v44  ;;  %v2503_v6 = vrot.slane %v2475_v25, 2  ;;  %v2870_v25 = vld [vmem:[#allocation4 + $0x48] sm:$0x3f] }
 0x3c8   :  { %2203 = vrot.lane.b32.xlu0 %v2179_v7, %s7890_s30  ;;  %7405 = vmatprep.subr.bf16.mxu1 %v7404_v49  ;;  %v3024_v52 = vpop.permute.xlu1 %3023  ;;  %v2382_v7 = vld [vmem:[#allocation4 + $0x50] sm:$0x3f] }
 0x3c9   :  { %v3045_v12 = vsel %vm1980_vm3, %v8764_v50, %v3024_v52  ;;  %v3046_v42 = vsel %vm1980_vm3, %v3024_v52, %v8998_v1  ;;  %7407 = vmatpush1.bf16.msra.mxu1 %v7406_v30 }
 0x3ca   :  { %v9040_v53 = vpop.permute.xlu0 %3724  ;;  %3070 = vst [vmem:[#allocation5 + $0x488] ss:$-100 sps:$4 sm:$0xf3] %v3045_v12   ;;  %3071 = vst [vmem:[#allocation5 + $0x490] ss:$-100 sps:$4 sm:$0xf3] %v3046_v42   ;;  %2201 = vrot.lane.b32.xlu1 %v2178_v36, %s7890_s30 }
 0x3cb   :  { %v2381_v12 = vld [vmem:[#allocation4 + $0x48] sm:$0x3f] }
 0x3cc   :  { %2325 = vrot.lane.b32.xlu0 %v2301_v10, %s7892_s14  ;;  %v3143_v19 = vpop.permute.xlu1 %3142  ;;  %v2677_v42 = vld [vmem:[#allocation4 + $0x48] sm:$0x3f] }
 0x3cd   :  { %v3166_v3 = vsel %vm261_vm11, %v8774_v2, %v3143_v19  ;;  %v3167_v50 = vsel %vm261_vm11, %v3143_v19, %v9006_v20 }
 0x3ce   :  { %v9048_v57 = vpop.permute.xlu0 %3840  ;;  %3192 = vst [vmem:[#allocation5 + $0x488] sm:$0xfc] %v3166_v3  ;;  %3193 = vst [vmem:[#allocation5 + $0x490] sm:$0xfc] %v3167_v50  ;;  %2323 = vrot.lane.b32.xlu1 %v2300_v60, %s7892_s14  ;;  %v2703_v60 = vrot.slane %v2677_v42, 6  ;;  %v2505_v3 = vrot.slane %v2477_v58, 2 }
 0x3cf   :  { %v2678_v58 = vld [vmem:[#allocation4 + $0x50] sm:$0x3f] }
 0x3d0   :  { %2416 = vrot.lane.b32.xlu0 %v2380_v4, %s7904_s24  ;;  %v9058_v0 = vpop.permute.xlu1 %3027  ;;  %v2676_v4 = vld [vmem:[#allocation4 + $0x40] sm:$0x3f] }
 0x3d1   :  { %v3047_v2 = vsel %vm1980_vm3, %v8998_v1, %v9058_v0  ;;  %v4239_v35 = vld [vmem:[#allocation5 + $0x428] sm:$0xff]  ;;  %v4238_v47 = vld [vmem:[#allocation5 + $0x420] sm:$0xff] }
 0x3d2   :  { %v9056_v13 = vpop.permute.xlu0 %3956  ;;  %3072 = vst [vmem:[#allocation5 + $0x498] ss:$-100 sps:$4 sm:$0xf3] %v3047_v2   ;;  %2414 = vrot.lane.b32.xlu1 %v2379_v31, %s7904_s24  ;;  %v2702_v2 = vrot.slane %v2676_v4, 6  ;;  %v2872_v4 = vld [vmem:[#allocation4 + $0x58] sm:$0x3f] }
 0x3d4   :  { %2526 = vrot.lane.b32.xlu0 %v2504_v59, %s7906_s22  ;;  %v9067_v27 = vpop.permute.xlu1 %3146 }
 0x3d5   :  { %v3168_v1 = vsel %vm261_vm11, %v9006_v20, %v9067_v27  ;;  %v4252_v18 = vld [vmem:[#allocation5 + $0x490] sm:$0xff]  ;;  %v4251_v44 = vld [vmem:[#allocation5 + $0x488] sm:$0xff] }
 0x3d6   :  { %v9065_v26 = vpop.permute.xlu0 %2810  ;;  %3194 = vst [vmem:[#allocation5 + $0x498] sm:$0xfc] %v3168_v1  ;;  %2524 = vrot.lane.b32.xlu1 %v2503_v6, %s7906_s22  ;;  %v7408_v48 = vpack.c.bf16 %v4252_v18, %v4239_v35  ;;  %v7410_v49 = vpack.c.bf16 %v4251_v44, %v4238_v47  ;;  %v2679_v1 = vld [vmem:[#allocation4 + $0x58] sm:$0x3f]  ;;  %v2869_v18 = vld [vmem:[#allocation4 + $0x40] sm:$0x3f] }
 0x3d7   :  { %v2829_v41 = vsel %vm10833_vm5, %v8787_v11, %v9065_v26  ;;  %v2506_v11 = vrot.slane %v2478_v21, 2  ;;  %v2896_v21 = vrot.slane %v2870_v25, 2  ;;  %v4227_v25 = vld [vmem:[#allocation5 + $0x3c8] sm:$0xff] }
 0x3d8   :  { %2854 = vst [vmem:[#allocation5 + $0x3d0] sm:$0x3f] %v2829_v41  ;;  %2420 = vrot.lane.b32.xlu0 %v2382_v7, %s7904_s24  ;;  %7409 = vmatprep.subr.bf16.mxu1 %v7408_v48  ;;  %v3347_v52 = vpop.permute.xlu1 %3346  ;;  %v2779_v7 = vld [vmem:[#allocation4 + $0x40] sm:$0x3f] }
 0x3d9   :  { %v3370_v10 = vsel %vm349_vm15, %v8785_v40, %v3347_v52  ;;  %v3371_v36 = vsel %vm349_vm15, %v3347_v52, %v9014_v54  ;;  %7411 = vmatpush1.bf16.msra.mxu1 %v7410_v49 }
 0x3da   :  { %v9077_v30 = vpop.permute.xlu0 %3243  ;;  %3396 = vst [vmem:[#allocation5 + $0x558] ss:$-100 sps:$4 sm:$0xcf] %v3370_v10   ;;  %3397 = vst [vmem:[#allocation5 + $0x560] ss:$-100 sps:$4 sm:$0xcf] %v3371_v36   ;;  %2418 = vrot.lane.b32.xlu1 %v2381_v12, %s7904_s24 }
 0x3db   :  { %v3264_v20 = vsel %vm305_vm13, %v8810_v28, %v9077_v30  ;;  %v2895_v36 = vrot.slane %v2869_v18, 2  ;;  %v2871_v18 = vld [vmem:[#allocation4 + $0x50] sm:$0x3f] }
 0x3dc   :  { %3290 = vst [vmem:[#allocation5 + $0x508] sm:$0x3f] %v3264_v20  ;;  %2530 = vrot.lane.b32.xlu0 %v2506_v11, %s7906_s22  ;;  %v3469_v28 = vpop.permute.xlu1 %3468 }
 0x3dd   :  { %v3492_v40 = vsel %vm2428_vm6, %v8797_v43, %v3469_v28  ;;  %v3493_v50 = vsel %vm2428_vm6, %v3469_v28, %v9022_v62  ;;  %v2780_v43 = vld [vmem:[#allocation4 + $0x48] sm:$0x3f] }
 0x3de   :  { %v9088_v19 = vpop.permute.xlu0 %4050  ;;  %3518 = vst [vmem:[#allocation5 + $0x5c0] ss:$-100 sps:$4 sm:$0xf3] %v3492_v40   ;;  %3519 = vst [vmem:[#allocation5 + $0x5c8] ss:$-100 sps:$4 sm:$0xf3] %v3493_v50   ;;  %2528 = vrot.lane.b32.xlu1 %v2505_v3, %s7906_s22 }
 0x3df   :  { %v2704_v3 = vrot.slane %v2678_v58, 6  ;;  %v2782_v50 = vld [vmem:[#allocation4 + $0x58] sm:$0x3f] }
 0x3e0   :  { %2724 = vrot.lane.b32.xlu0 %v2703_v60, %s7879_s23  ;;  %v9098_v59 = vpop.permute.xlu1 %3350 }
 0x3e1   :  { %v3372_v31 = vsel %vm349_vm15, %v9014_v54, %v9098_v59  ;;  %v4265_v41 = vld [vmem:[#allocation5 + $0x4f8] sm:$0xff]  ;;  %v4264_v48 = vld [vmem:[#allocation5 + $0x4f0] sm:$0xff] }
 0x3e2   :  { %v9096_v61 = vpop.permute.xlu0 %1970  ;;  %3398 = vst [vmem:[#allocation5 + $0x568] ss:$-100 sps:$4 sm:$0xcf] %v3372_v31   ;;  %2722 = vrot.lane.b32.xlu1 %v2702_v2, %s7879_s23 }
 0x3e4   :  { %2814 = vrot.lane.b32.xlu0 %v2780_v43, %s7882_s18  ;;  %v9107_v35 = vpop.permute.xlu1 %3472  ;;  %v2781_v43 = vld [vmem:[#allocation4 + $0x50] sm:$0x3f] }
 0x3e5   :  { %v3494_v47 = vsel %vm2428_vm6, %v9022_v62, %v9107_v35  ;;  %v4278_v44 = vld [vmem:[#allocation5 + $0x560] sm:$0xff]  ;;  %v4277_v49 = vld [vmem:[#allocation5 + $0x558] sm:$0xff] }
 0x3e6   :  { %v9105_v6 = vpop.permute.xlu0 %2720  ;;  %3520 = vst [vmem:[#allocation5 + $0x5d0] ss:$-100 sps:$4 sm:$0xf3] %v3494_v47   ;;  %2812 = vrot.lane.b32.xlu1 %v2779_v7, %s7882_s18  ;;  %v7412_v52 = vpack.c.bf16 %v4278_v44, %v4265_v41  ;;  %v7414_v11 = vpack.c.bf16 %v4277_v49, %v4264_v48  ;;  %v4214_v47 = vld [vmem:[#allocation5 + $0x360] sm:$0xff] }
 0x3e7   :  { %v2739_v54 = vsel %vm85_vm2, %v9024_v24, %v9105_v6  ;;  %v2705_v24 = vrot.slane %v2679_v1, 6  ;;  %v7442_v44 = vpack.c.bf16 %v4227_v25, %v4214_v47 }
 0x3e8   :  { %2764 = vst [vmem:[#allocation5 + $0x368] sm:$0xfc] %v2739_v54  ;;  %2917 = vrot.lane.b32.xlu0 %v2896_v21, %s7905_s19  ;;  %7413 = vmatprep.subr.bf16.mxu1 %v7412_v52  ;;  %v3591_v10 = vpop.permute.xlu1 %3590  ;;  %v2897_v52 = vrot.slane %v2871_v18, 2 }
 0x3e9   :  { %v3614_v12 = vsel %vm2538_vm9, %v8808_v39, %v3591_v10  ;;  %v3615_v42 = vsel %vm2538_vm9, %v3591_v10, %v9031_v16  ;;  %7415 = vmatpush1.bf16.msra.mxu1 %v7414_v11  ;;  %v2985_v10 = vld [vmem:[#allocation4 + $0x40] sm:$0x3f] }
 0x3ea   :  { %v9117_v20 = vpop.permute.xlu0 %2913  ;;  %3640 = vst [vmem:[#allocation5 + $0x5c0] sm:$0xfc] %v3614_v12  ;;  %3641 = vst [vmem:[#allocation5 + $0x5c8] sm:$0xfc] %v3615_v42  ;;  %2915 = vrot.lane.b32.xlu1 %v2895_v36, %s7905_s19 }
 0x3eb   :  { %v2932_v62 = vsel %vm1888_vm7, %v9033_v15, %v9117_v20 }
 0x3ec   :  { %2957 = vst [vmem:[#allocation5 + $0x438] ss:$-100 sps:$4 sm:$0xcf] %v2932_v62   ;;  %2728 = vrot.lane.b32.xlu0 %v2705_v24, %s7879_s23  ;;  %v3723_v60 = vpop.permute.xlu1 %3722 }
 0x3ed   :  { %v3744_v15 = vsel %vm85_vm2, %v8864_v46, %v3723_v60  ;;  %v3745_v40 = vsel %vm85_vm2, %v3723_v60, %v9040_v53  ;;  %v2986_v46 = vld [vmem:[#allocation4 + $0x48] sm:$0x3f] }
 0x3ee   :  { %v9128_v28 = vpop.permute.xlu0 %3029  ;;  %3769 = vst [vmem:[#allocation5 + $0x690] ss:$-100 sps:$4 sm:$0xcf] %v3744_v15   ;;  %3770 = vst [vmem:[#allocation5 + $0x698] ss:$-100 sps:$4 sm:$0xcf] %v3745_v40   ;;  %2726 = vrot.lane.b32.xlu1 %v2704_v3, %s7879_s23 }
 0x3ef   :  { %v3048_v39 = vsel %vm1980_vm3, %v9058_v0, %v9128_v28  ;;  %v2898_v0 = vrot.slane %v2872_v4, 2  ;;  %v4215_v41 = vld [vmem:[#allocation5 + $0x368] sm:$0xff]  ;;  %v3012_v48 = vrot.slane %v2986_v46, 4  ;;  %v3011_v15 = vrot.slane %v2985_v10, 4  ;;  %v4253_v40 = vld [vmem:[#allocation5 + $0x498] sm:$0xff] }
 0x3f0   :  { %3073 = vst [vmem:[#allocation5 + $0x4a0] ss:$-100 sps:$4 sm:$0xf3] %v3048_v39   ;;  %2818 = vrot.lane.b32.xlu0 %v2782_v50, %s7882_s18  ;;  %v9141_v31 = vpop.permute.xlu1 %3594  ;;  %v2988_v50 = vld [vmem:[#allocation4 + $0x58] sm:$0x3f] }
 0x3f1   :  { %v3616_v21 = vsel %vm2538_vm9, %v9031_v16, %v9141_v31  ;;  %v4291_v11 = vld [vmem:[#allocation5 + $0x5c8] sm:$0xff]  ;;  %v3102_v16 = vld [vmem:[#allocation4 + $0x48] sm:$0x3f]  ;;  %v4290_v42 = vld [vmem:[#allocation5 + $0x5c0] sm:$0xff]  ;;  %v3014_v18 = vrot.slane %v2988_v50, 4 }
 0x3f2   :  { %v9139_v2 = vpop.permute.xlu0 %3148  ;;  %3642 = vst [vmem:[#allocation5 + $0x5d0] sm:$0xfc] %v3616_v21  ;;  %2816 = vrot.lane.b32.xlu1 %v2781_v43, %s7882_s18  ;;  %v3130_v39 = vrot.slane %v3102_v16, 6  ;;  %v3103_v16 = vld [vmem:[#allocation4 + $0x50] sm:$0x3f]  ;;  %v4266_v50 = vld [vmem:[#allocation5 + $0x500] sm:$0xff] }
 0x3f3   :  { %v3169_v7 = vsel %vm261_vm11, %v9067_v27, %v9139_v2  ;;  %v4228_v1 = vld [vmem:[#allocation5 + $0x3d0] sm:$0xff] }
 0x3f4   :  { %3195 = vst [vmem:[#allocation5 + $0x4a0] sm:$0xfc] %v3169_v7  ;;  %2921 = vrot.lane.b32.xlu0 %v2898_v0, %s7905_s19  ;;  %v7440_v54 = vpack.c.bf16 %v4228_v1, %v4215_v41  ;;  %v3839_v27 = vpop.permute.xlu1 %3838  ;;  %v3101_v7 = vld [vmem:[#allocation4 + $0x40] sm:$0x3f]  ;;  %v4240_v41 = vld [vmem:[#allocation5 + $0x430] sm:$0xff] }
 0x3f5   :  { %v3860_v36 = vsel %vm10833_vm5, %v8872_v55, %v3839_v27  ;;  %v3861_v62 = vsel %vm10833_vm5, %v3839_v27, %v9048_v57  ;;  %v4304_v12 = vld [vmem:[#allocation5 + $0x630] sm:$0xff]  ;;  %v4303_v58 = vld [vmem:[#allocation5 + $0x628] sm:$0xff]  ;;  %v3104_v27 = vld [vmem:[#allocation4 + $0x58] sm:$0x3f] }
 0x3f6   :  { %v9151_v49 = vpop.permute.xlu0 %3352  ;;  %7441 = vmatprep.subr.bf16.mxu0 %v7440_v54  ;;  %3885 = vst [vmem:[#allocation5 + $0x6f8] ss:$-100 sps:$4 sm:$0xf3] %v3860_v36   ;;  %3886 = vst [vmem:[#allocation5 + $0x700] ss:$-100 sps:$4 sm:$0xf3] %v3861_v62   ;;  %2919 = vrot.lane.b32.xlu1 %v2897_v52, %s7905_s19  ;;  %v7416_v60 = vpack.c.bf16 %v4304_v12, %v4291_v11  ;;  %v7418_v3 = vpack.c.bf16 %v4303_v58, %v4290_v42 }
 0x3f7   :  { %v3373_v24 = vsel %vm349_vm15, %v9098_v59, %v9151_v49  ;;  %7443 = vmatpush1.bf16.msra.mxu0 %v7442_v44  ;;  %v4241_v25 = vld [vmem:[#allocation5 + $0x438] sm:$0xff]  ;;  %v3129_v54 = vrot.slane %v3101_v7, 6  ;;  %v4279_v11 = vld [vmem:[#allocation5 + $0x568] sm:$0xff]  ;;  %v3211_v7 = vld [vmem:[#allocation4 + $0x48] sm:$0x3f] }
 0x3f8   :  { %3399 = vst [vmem:[#allocation5 + $0x570] ss:$-100 sps:$4 sm:$0xcf] %v3373_v24   ;;  %3033 = vrot.lane.b32.xlu0 %v3012_v48, %s7903_s1  ;;  %7417 = vmatprep.subr.bf16.mxu1 %v7416_v60  ;;  %v3955_v55 = vpop.permute.xlu1 %3954  ;;  %v2987_v52 = vld [vmem:[#allocation4 + $0x50] sm:$0x3f]  ;;  %v3132_v24 = vrot.slane %v3104_v27, 6 }
 0x3f9   :  { %v3976_v0 = vsel %vm1888_vm7, %v8880_v33, %v3955_v55  ;;  %v3977_v43 = vsel %vm1888_vm7, %v3955_v55, %v9056_v13  ;;  %7419 = vmatpush1.bf16.msra.mxu1 %v7418_v3  ;;  %v3305_v27 = vld [vmem:[#allocation4 + $0x40] sm:$0x3f] }
 0x3fa   :  { %v9162_v59 = vpop.permute.xlu0 %3474  ;;  %4001 = vst [vmem:[#allocation5 + $0x6f8] sm:$0xfc] %v3976_v0  ;;  %4002 = vst [vmem:[#allocation5 + $0x700] sm:$0xfc] %v3977_v43  ;;  %3031 = vrot.lane.b32.xlu1 %v3011_v15, %s7903_s1  ;;  %v3131_v43 = vrot.slane %v3103_v16, 6  ;;  %v3333_v16 = vrot.slane %v3305_v27, 2 }
 0x3fb   :  { %v3495_v4 = vsel %vm2428_vm6, %v9107_v35, %v9162_v59  ;;  %v4254_v46 = vld [vmem:[#allocation5 + $0x4a0] sm:$0xff]  ;;  %v7446_v35 = vpack.c.bf16 %v4253_v40, %v4240_v41  ;;  %v4343_v41 = vld [vmem:[#allocation5 + $0x768] sm:$0x3f]  ;;  %v3550_v27 = vld [vmem:[#allocation4 + $0x48] sm:$0x3f] }
 0x3fc   :  { %3521 = vst [vmem:[#allocation5 + $0x5d8] ss:$-100 sps:$4 sm:$0xf3] %v3495_v4   ;;  %3152 = vrot.lane.b32.xlu0 %v3130_v39, %s7888_s28  ;;  %v7444_v21 = vpack.c.bf16 %v4254_v46, %v4241_v25  ;;  %v4049_v33 = vpop.permute.xlu1 %4048  ;;  %v7450_v4 = vpack.c.bf16 %v4279_v11, %v4266_v50  ;;  %v3212_v50 = vld [vmem:[#allocation4 + $0x50] sm:$0x3f] }
 0x3fd   :  { %v4068_v44 = vsel %vm1980_vm3, %v8757_v56, %v4049_v33  ;;  %v4069_v48 = vsel %vm1980_vm3, %v4049_v33, %v9088_v19  ;;  %v3013_v56 = vrot.slane %v2987_v52, 4  ;;  %v4317_v36 = vld [vmem:[#allocation5 + $0x698] sm:$0xff]  ;;  %v4316_v12 = vld [vmem:[#allocation5 + $0x690] sm:$0xff] }
 0x3fe   :  { %v9173_v1 = vpop.permute.xlu0 %3596  ;;  %7445 = vmatprep.subr.bf16.mxu0 %v7444_v21  ;;  %4093 = vst [vmem:[#allocation5 + $0x770] sm:$0x3f] %v4068_v44  ;;  %4094 = vst [vmem:[#allocation5 + $0x778] sm:$0x3f] %v4069_v48  ;;  %3150 = vrot.lane.b32.xlu1 %v3129_v54, %s7888_s28  ;;  %v3306_v21 = vld [vmem:[#allocation4 + $0x48] sm:$0x3f] }
 0x3ff   :  { %v3617_v47 = vsel %vm2538_vm9, %v9141_v31, %v9173_v1  ;;  %7447 = vmatpush1.bf16.msra.mxu0 %v7446_v35  ;;  %v4267_v62 = vld [vmem:[#allocation5 + $0x508] sm:$0xff]  ;;  %v3428_v48 = vld [vmem:[#allocation4 + $0x48] sm:$0x3f] }
 0x400   :  { %3643 = vst [vmem:[#allocation5 + $0x5d8] sm:$0xfc] %v3617_v47  ;;  %3037 = vrot.lane.b32.xlu0 %v3014_v18, %s7903_s1  ;;  %v1969_v31 = vpop.permute.xlu1 %1968  ;;  %v3334_v18 = vrot.slane %v3306_v21, 2  ;;  %v3210_v44 = vld [vmem:[#allocation4 + $0x40] sm:$0x3f] }
 0x401   :  { %v1987_v42 = vsel %vm1980_vm3, %v8723_v5, %v1969_v31  ;;  %v1988_v58 = vsel %vm1980_vm3, %v1969_v31, %v9096_v61  ;;  %v4330_v60 = vld [vmem:[#allocation5 + $0x700] sm:$0xff]  ;;  %v4329_v55 = vld [vmem:[#allocation5 + $0x6f8] sm:$0xff]  ;;  %v4292_v31 = vld [vmem:[#allocation5 + $0x5d0] sm:$0xff] }
 0x402   :  { %v9184_v10 = vpop.permute.xlu0 %3728  ;;  %2012 = vst [vmem:[#allocation5 + $0x168] sm:$0x3f] %v1987_v42  ;;  %2013 = vst [vmem:[#allocation5 + $0x170] sm:$0x3f] %v1988_v58  ;;  %3035 = vrot.lane.b32.xlu1 %v3013_v56, %s7903_s1  ;;  %v7420_v39 = vpack.c.bf16 %v4330_v60, %v4317_v36  ;;  %v7422_v40 = vpack.c.bf16 %v4329_v55, %v4316_v12 }
 0x403   :  { %v4280_v3 = vld [vmem:[#allocation5 + $0x570] sm:$0xff] }
 0x404   :  { %3156 = vrot.lane.b32.xlu0 %v3132_v24, %s7888_s28  ;;  %v7448_v15 = vpack.c.bf16 %v4280_v3, %v4267_v62  ;;  %7421 = vmatprep.subr.bf16.mxu1 %v7420_v39  ;;  %v3727_v5 = vpop.permute.xlu1 %3726  ;;  %v3427_v24 = vld [vmem:[#allocation4 + $0x40] sm:$0x3f] }
 0x405   :  { %v3746_v25 = vsel %vm85_vm2, %v9040_v53, %v3727_v5  ;;  %v3747_v46 = vsel %vm85_vm2, %v3727_v5, %v9184_v10  ;;  %7423 = vmatpush1.bf16.msra.mxu1 %v7422_v40  ;;  %v4342_v53 = vld [vmem:[#allocation5 + $0x760] sm:$0x3f]  ;;  %v3455_v3 = vrot.slane %v3427_v24, 4  ;;  %v3685_v24 = vld [vmem:[#allocation4 + $0x50] sm:$0x3f] }
 0x406   :  { %v9192_v0 = vpop.permute.xlu0 %3844  ;;  %7449 = vmatprep.subr.bf16.mxu0 %v7448_v15  ;;  %3771 = vst [vmem:[#allocation5 + $0x6a0] ss:$-100 sps:$4 sm:$0xcf] %v3746_v25   ;;  %3772 = vst [vmem:[#allocation5 + $0x6a8] ss:$-100 sps:$4 sm:$0xcf] %v3747_v46   ;;  %3154 = vrot.lane.b32.xlu1 %v3131_v43, %s7888_s28 }
 0x407   :  { %7451 = vmatpush1.bf16.msra.mxu0 %v7450_v4  ;;  %7003 = vmatprep.subr.msk.mxu1 %vm4372_vm10, %v4343_v41  ;;  %v4293_v62 = vld [vmem:[#allocation5 + $0x5d8] sm:$0xff]  ;;  %v3213_v15 = vld [vmem:[#allocation4 + $0x58] sm:$0x3f] }
 0x408   :  { %3247 = vrot.lane.b32.xlu0 %v3211_v7, %s7890_s30  ;;  %v3843_v33 = vpop.permute.xlu1 %3842  ;;  %v3308_v40 = vld [vmem:[#allocation4 + $0x58] sm:$0x3f] }
 0x409   :  { %v3862_v54 = vsel %vm10833_vm5, %v9048_v57, %v3843_v33  ;;  %v3863_v47 = vsel %vm10833_vm5, %v3843_v33, %v9192_v0  ;;  %7004 = vmatpush1.msk.msra.mxu1 %vm4372_vm10, %v4342_v53  ;;  %v3456_v57 = vrot.slane %v3428_v48, 4  ;;  %v3336_v43 = vrot.slane %v3308_v40, 2  ;;  %v3430_v46 = vld [vmem:[#allocation4 + $0x58] sm:$0x3f]  ;;  %v7872_v40 = vld [vmem:[%s10821_s3] sm:$0xff] }
 0x40a   :  { %v9201_v35 = vpop.permute.xlu0 %3960  ;;  %3887 = vst [vmem:[#allocation5 + $0x708] ss:$-100 sps:$4 sm:$0xf3] %v3862_v54   ;;  %3888 = vst [vmem:[#allocation5 + $0x710] ss:$-100 sps:$4 sm:$0xf3] %v3863_v47   ;;  %3245 = vrot.lane.b32.xlu1 %v3210_v44, %s7890_s30  ;;  %4554 = vmatmul.mubr.f32.vlgmr.msra.gmra.mrb[8].mxu1 %v8914_v8 }
 0x40b   :  { %7006 = vmatprep.mubr.msk.f32.mxu1 %vm10834_vm0, %v8969_v37  ;;  %v3458_v48 = vrot.slane %v3430_v46, 4 }
 0x40c   :  { %3356 = vrot.lane.b32.xlu0 %v3334_v18, %s7892_s14  ;;  %v3959_v11 = vpop.permute.xlu1 %3958 }
 0x40d   :  { %v3978_v56 = vsel %vm1888_vm7, %v9056_v13, %v3959_v11  ;;  %v3979_v36 = vsel %vm1888_vm7, %v3959_v11, %v9201_v35  ;;  %v4306_v12 = vld [vmem:[#allocation5 + $0x640] sm:$0xff]  ;;  %v4305_v42 = vld [vmem:[#allocation5 + $0x638] sm:$0xff] }
 0x40e   :  { %v9211_v52 = vpop.permute.xlu0 %1642  ;;  %4003 = vst [vmem:[#allocation5 + $0x708] sm:$0xfc] %v3978_v56  ;;  %4004 = vst [vmem:[#allocation5 + $0x710] sm:$0xfc] %v3979_v36  ;;  %3354 = vrot.lane.b32.xlu1 %v3333_v16, %s7892_s14  ;;  %v7452_v8 = vpack.c.bf16 %v4306_v12, %v4293_v62  ;;  %v7454_v58 = vpack.c.bf16 %v4305_v42, %v4292_v31  ;;  %4560 = vmatmul.mubr.f32.gmra.mrb[10].mxu1 %v8981_v17  ;;  %v4345_v16 = vld [vmem:[#allocation5 + $0x778] sm:$0x3f] }
 0x40f   :  { %7013 = vmatprep.mubr.msk.f32.mxu1 %vm10834_vm0, %v8989_v38  ;;  %v3578_v31 = vrot.slane %v3550_v27, 6  ;;  %v4344_v62 = vld [vmem:[#allocation5 + $0x770] sm:$0x3f] }
 0x410   :  { %3478 = vrot.lane.b32.xlu0 %v3456_v57, %s7904_s24  ;;  %7453 = vmatprep.subr.bf16.mxu0 %v7452_v8  ;;  %v1641_v13 = vpop.permute.xlu1 %1640  ;;  %v3429_v57 = vld [vmem:[#allocation4 + $0x50] sm:$0x3f]  ;;  %v3549_v8 = vld [vmem:[#allocation4 + $0x40] sm:$0x3f] }
 0x411   :  { %v1658_v55 = vsel %vm85_vm2, %v8901_v23, %v1641_v13  ;;  %v1659_v39 = vsel %vm85_vm2, %v1641_v13, %v9211_v52  ;;  %7455 = vmatpush1.bf16.msra.mxu0 %v7454_v58  ;;  %v4319_v25 = vld [vmem:[#allocation5 + $0x6a8] sm:$0xff]  ;;  %v3307_v23 = vld [vmem:[#allocation4 + $0x50] sm:$0x3f]  ;;  %v4318_v33 = vld [vmem:[#allocation5 + $0x6a0] sm:$0xff]  ;;  %v3457_v12 = vrot.slane %v3429_v57, 4 }
 0x412   :  { %v9222_v60 = vpop.permute.xlu0 %1760  ;;  %1683 = vst [vmem:[#allocation5 + $0x98] ss:$-100 sps:$4 sm:$0xcf] %v1658_v55   ;;  %1684 = vst [vmem:[#allocation5 + $0xa0] ss:$-100 sps:$4 sm:$0xcf] %v1659_v39   ;;  %3476 = vrot.lane.b32.xlu1 %v3455_v3, %s7904_s24 }
 0x414   :  { %3251 = vrot.lane.b32.xlu0 %v3213_v15, %s7890_s30  ;;  %v1759_v5 = vpop.permute.xlu1 %1758 }
 0x415   :  { %v1776_v7 = vsel %vm10833_vm5, %v8909_v34, %v1759_v5  ;;  %v1777_v21 = vsel %vm10833_vm5, %v1759_v5, %v9222_v60  ;;  %v4332_v41 = vld [vmem:[#allocation5 + $0x710] sm:$0xff]  ;;  %v4331_v53 = vld [vmem:[#allocation5 + $0x708] sm:$0xff]  ;;  %v3335_v34 = vrot.slane %v3307_v23, 2  ;;  %v3711_v5 = vrot.slane %v3685_v24, 2  ;;  %v3686_v24 = vld [vmem:[#allocation4 + $0x58] sm:$0x3f] }
 0x416   :  { %v9232_v4 = vpop.permute.xlu0 %1646  ;;  %1801 = vst [vmem:[#allocation5 + $0x100] ss:$-100 sps:$4 sm:$0xf3] %v1776_v7   ;;  %1802 = vst [vmem:[#allocation5 + $0x108] ss:$-100 sps:$4 sm:$0xf3] %v1777_v21   ;;  %3249 = vrot.lane.b32.xlu1 %v3212_v50, %s7890_s30  ;;  %v7456_v18 = vpack.c.bf16 %v4332_v41, %v4319_v25  ;;  %v7458_v54 = vpack.c.bf16 %v4331_v53, %v4318_v33 }
 0x417   :  { %v3552_v7 = vld [vmem:[#allocation4 + $0x58] sm:$0x3f]  ;;  %v3684_v21 = vld [vmem:[#allocation4 + $0x48] sm:$0x3f] }
 0x418   :  { %3360 = vrot.lane.b32.xlu0 %v3336_v43, %s7892_s14  ;;  %7457 = vmatprep.subr.bf16.mxu0 %v7456_v18  ;;  %v1877_v44 = vpop.permute.xlu1 %1876  ;;  %v3577_v43 = vrot.slane %v3549_v8, 6  ;;  %v3580_v33 = vrot.slane %v3552_v7, 6 }
 0x419   :  { %v1895_v11 = vsel %vm1888_vm7, %v8923_v63, %v1877_v44  ;;  %7459 = vmatpush1.bf16.msra.mxu0 %v7458_v54  ;;  %v4113_v42 = vld [vmem:[#allocation5 + $0x38] sm:$0xff]  ;;  %v4112_v3 = vld [vmem:[#allocation5 + $0x30] sm:$0xff]  ;;  %v3687_v54 = vld [vmem:[#allocation4 + $0x60] sm:$0x3f] }
 0x41a   :  { %v9240_v47 = vpop.permute.xlu0 %1764  ;;  %1920 = vst [vmem:[#allocation5 + $0x100] sm:$0xfc] %v1895_v11  ;;  %3358 = vrot.lane.b32.xlu1 %v3335_v34, %s7892_s14  ;;  %7007 = vmatprep.subr.msk.mxu0 %vm4372_vm10, %v4345_v16  ;;  %v3713_v34 = vrot.slane %v3687_v54, 2  ;;  %v3801_v11 = vld [vmem:[#allocation4 + $0x50] sm:$0x3f] }
 0x41c   :  { %3482 = vrot.lane.b32.xlu0 %v3458_v48, %s7904_s24  ;;  %v2076_v36 = vpop.permute.xlu1 %2075 }
 0x41d   :  { %v2095_v58 = vsel %vm261_vm11, %v8929_v51, %v2076_v36  ;;  %7008 = vmatpush1.msk.msra.mxu0 %vm4372_vm10, %v4344_v62  ;;  %v4126_v13 = vld [vmem:[#allocation5 + $0xa0] sm:$0xff]  ;;  %v4125_v55 = vld [vmem:[#allocation5 + $0x98] sm:$0xff] }
 0x41e   :  { %v1879_v56 = vpop.permute.xlu0 %1878  ;;  %2121 = vst [vmem:[#allocation5 + $0x1d0] ss:$-100 sps:$4 sm:$0xcf] %v2095_v58   ;;  %3480 = vrot.lane.b32.xlu1 %v3457_v12, %s7904_s24  ;;  %v7460_v39 = vpack.c.bf16 %v4126_v13, %v4113_v42  ;;  %v7462_v15 = vpack.c.bf16 %v4125_v55, %v4112_v3  ;;  %4631 = vmatmul.mubr.f32.vlgmr.msra.gmra.mrb[12].mxu0 %v7872_v40  ;;  %v3827_v42 = vrot.slane %v3801_v11, 4  ;;  %v3917_v13 = vld [vmem:[#allocation4 + $0x50] sm:$0x3f] }
 0x41f   :  { %v1896_v63 = vsel %vm1888_vm7, %v1877_v44, %v1879_v56  ;;  %7010 = vmatprep.mubr.msk.f32.mxu0 %vm10834_vm0, %v8969_v37  ;;  %v3551_v44 = vld [vmem:[#allocation4 + $0x50] sm:$0x3f]  ;;  %v3800_v3 = vld [vmem:[#allocation4 + $0x48] sm:$0x3f] }
 0x420   :  { %1921 = vst [vmem:[#allocation5 + $0x108] sm:$0xfc] %v1896_v63  ;;  %3600 = vrot.lane.b32.xlu0 %v3578_v31, %s7906_s22  ;;  %7461 = vmatprep.subr.bf16.mxu1 %v7460_v39  ;;  %v1645_v51 = vpop.permute.xlu1 %1644  ;;  %v3579_v27 = vrot.slane %v3551_v44, 6  ;;  %v3712_v63 = vrot.slane %v3686_v24, 2  ;;  %v3919_v44 = vld [vmem:[#allocation4 + $0x60] sm:$0x3f] }
 0x421   :  { %v1660_v46 = vsel %vm85_vm2, %v9211_v52, %v1645_v51  ;;  %v1661_v23 = vsel %vm85_vm2, %v1645_v51, %v9232_v4  ;;  %7463 = vmatpush1.bf16.msra.mxu1 %v7462_v15  ;;  %v3710_v52 = vrot.slane %v3684_v21, 2  ;;  %v4138_v62 = vld [vmem:[#allocation5 + $0x100] sm:$0xff] }
 0x422   :  { %v9256_v50 = vpop.permute.xlu0 %2077  ;;  %1685 = vst [vmem:[#allocation5 + $0xa8] ss:$-100 sps:$4 sm:$0xcf] %v1660_v46   ;;  %1686 = vst [vmem:[#allocation5 + $0xb0] ss:$-100 sps:$4 sm:$0xcf] %v1661_v23   ;;  %3598 = vrot.lane.b32.xlu1 %v3577_v43, %s7906_s22  ;;  %4637 = vmatmul.mubr.f32.gmra.mrb[14].mxu0 %v8981_v17 }
 0x423   :  { %v2096_v25 = vsel %vm261_vm11, %v2076_v36, %v9256_v50  ;;  %7017 = vmatprep.mubr.msk.f32.mxu0 %vm10834_vm0, %v8989_v38  ;;  %v3943_v23 = vrot.slane %v3917_v13, 6 }
 0x424   :  { %2122 = vst [vmem:[#allocation5 + $0x1d8] ss:$-100 sps:$4 sm:$0xcf] %v2096_v25   ;;  %3732 = vrot.lane.b32.xlu0 %v3711_v5, %s7879_s23  ;;  %v1763_v41 = vpop.permute.xlu1 %1762 }
 0x425   :  { %v1778_v53 = vsel %vm10833_vm5, %v9222_v60, %v1763_v41  ;;  %v1779_v18 = vsel %vm10833_vm5, %v1763_v41, %v9240_v47  ;;  %v4151_v38 = vld [vmem:[#allocation5 + $0x168] sm:$0xff] }
 0x426   :  { %v9269_v37 = vpop.permute.xlu0 %1882  ;;  %1803 = vst [vmem:[#allocation5 + $0x110] ss:$-100 sps:$4 sm:$0xf3] %v1778_v53   ;;  %1804 = vst [vmem:[#allocation5 + $0x118] ss:$-100 sps:$4 sm:$0xf3] %v1779_v18   ;;  %3730 = vrot.lane.b32.xlu1 %v3710_v52, %s7879_s23  ;;  %v7466_v12 = vpack.c.bf16 %v4151_v38, %v4138_v62 }
 0x427   :  { %v4139_v16 = vld [vmem:[#allocation5 + $0x108] sm:$0xff] }
 0x428   :  { %3604 = vrot.lane.b32.xlu0 %v3580_v33, %s7906_s22  ;;  %v1881_v48 = vpop.permute.xlu1 %1880  ;;  %v3803_v41 = vld [vmem:[#allocation4 + $0x60] sm:$0x3f]  ;;  %v3916_v33 = vld [vmem:[#allocation4 + $0x48] sm:$0x3f] }
 0x429   :  { %v1897_v60 = vsel %vm1888_vm7, %v1879_v56, %v1881_v48  ;;  %v1898_v57 = vsel %vm1888_vm7, %v1881_v48, %v9269_v37  ;;  %v4115_v58 = vld [vmem:[#allocation5 + $0x48] sm:$0xff]  ;;  %v4114_v40 = vld [vmem:[#allocation5 + $0x40] sm:$0xff]  ;;  %v3829_v18 = vrot.slane %v3803_v41, 4  ;;  %v3942_v54 = vrot.slane %v3916_v33, 6 }
 0x42a   :  { %v9279_v17 = vpop.permute.xlu0 %1974  ;;  %1922 = vst [vmem:[#allocation5 + $0x110] sm:$0xfc] %v1897_v60  ;;  %1923 = vst [vmem:[#allocation5 + $0x118] sm:$0xfc] %v1898_v57  ;;  %3602 = vrot.lane.b32.xlu1 %v3579_v27, %s7906_s22  ;;  %v3945_v27 = vrot.slane %v3919_v44, 6 }
 0x42b   :  { %v4152_v31 = vld [vmem:[#allocation5 + $0x170] sm:$0xff] }
 0x42c   :  { %3736 = vrot.lane.b32.xlu0 %v3713_v34, %s7879_s23  ;;  %v7464_v36 = vpack.c.bf16 %v4152_v31, %v4139_v16  ;;  %v1973_v56 = vpop.permute.xlu1 %1972  ;;  %v3802_v34 = vld [vmem:[#allocation4 + $0x58] sm:$0x3f]  ;;  %v1599_v16 = vld [vmem:[#allocation4 + $0x60] sm:$0x3f] }
 0x42d   :  { %v1989_v55 = vsel %vm1980_vm3, %v9096_v61, %v1973_v56  ;;  %v1990_v39 = vsel %vm1980_vm3, %v1973_v56, %v9279_v17  ;;  %v4128_v15 = vld [vmem:[#allocation5 + $0xb0] sm:$0xff]  ;;  %v4127_v51 = vld [vmem:[#allocation5 + $0xa8] sm:$0xff]  ;;  %v3826_v61 = vrot.slane %v3800_v3, 4  ;;  %v3828_v60 = vrot.slane %v3802_v34, 4  ;;  %v3918_v31 = vld [vmem:[#allocation4 + $0x58] sm:$0x3f] }
 0x42e   :  { %v9286_v8 = vpop.permute.xlu0 %2081  ;;  %7465 = vmatprep.subr.bf16.mxu1 %v7464_v36  ;;  %2014 = vst [vmem:[#allocation5 + $0x178] sm:$0x3f] %v1989_v55  ;;  %2015 = vst [vmem:[#allocation5 + $0x180] sm:$0x3f] %v1990_v39  ;;  %3734 = vrot.lane.b32.xlu1 %v3712_v63, %s7879_s23  ;;  %v7496_v5 = vpack.c.bf16 %v4128_v15, %v4115_v58  ;;  %v7498_v43 = vpack.c.bf16 %v4127_v51, %v4114_v40  ;;  %v1625_v13 = vrot.slane %v1599_v16, 2 }
 0x42f   :  { %7467 = vmatpush1.bf16.msra.mxu1 %v7466_v12  ;;  %v3944_v3 = vrot.slane %v3918_v31, 6  ;;  %v1717_v39 = vld [vmem:[#allocation4 + $0x60] sm:$0x3f]  ;;  %v1598_v15 = vld [vmem:[#allocation4 + $0x58] sm:$0x3f] }
 0x430   :  { %3848 = vrot.lane.b32.xlu0 %v3827_v42, %s7882_s18  ;;  %7497 = vmatprep.subr.bf16.mxu0 %v7496_v5  ;;  %v2080_v46 = vpop.permute.xlu1 %2079  ;;  %v1743_v5 = vrot.slane %v1717_v39, 4  ;;  %v4022_v34 = vld [vmem:[#allocation4 + $0x60] sm:$0x3f] }
 0x431   :  { %v2097_v7 = vsel %vm261_vm11, %v9256_v50, %v2080_v46  ;;  %v2098_v21 = vsel %vm261_vm11, %v2080_v46, %v9286_v8  ;;  %7499 = vmatpush1.bf16.msra.mxu0 %v7498_v43  ;;  %v4141_v57 = vld [vmem:[#allocation5 + $0x118] sm:$0xff]  ;;  %v4140_v62 = vld [vmem:[#allocation5 + $0x110] sm:$0xff]  ;;  %v1624_v43 = vrot.slane %v1598_v15, 2  ;;  %v1835_v16 = vld [vmem:[#allocation4 + $0x60] sm:$0x3f] }
 0x432   :  { %v2200_v25 = vpop.permute.xlu0 %2199  ;;  %2123 = vst [vmem:[#allocation5 + $0x1e0] ss:$-100 sps:$4 sm:$0xcf] %v2097_v7   ;;  %2124 = vst [vmem:[#allocation5 + $0x1e8] ss:$-100 sps:$4 sm:$0xcf] %v2098_v21   ;;  %3846 = vrot.lane.b32.xlu1 %v3826_v61, %s7882_s18 }
 0x433   :  { %v1940_v15 = vld [vmem:[#allocation4 + $0x60] sm:$0x3f] }
 0x434   :  { %3964 = vrot.lane.b32.xlu0 %v3943_v23, %s7905_s19  ;;  %v2198_v53 = vpop.permute.xlu1 %2197  ;;  %v1716_v23 = vld [vmem:[#allocation4 + $0x58] sm:$0x3f] }
 0x435   :  { %v2217_v50 = vsel %vm305_vm13, %v8935_v22, %v2198_v53  ;;  %v2218_v48 = vsel %vm305_vm13, %v2198_v53, %v2200_v25  ;;  %v1742_v44 = vrot.slane %v1716_v23, 4 }
 0x436   :  { %v2322_v52 = vpop.permute.xlu0 %2321  ;;  %2243 = vst [vmem:[#allocation5 + $0x238] ss:$-100 sps:$4 sm:$0xf3] %v2217_v50   ;;  %2244 = vst [vmem:[#allocation5 + $0x240] ss:$-100 sps:$4 sm:$0xf3] %v2218_v48   ;;  %3962 = vrot.lane.b32.xlu1 %v3942_v54, %s7905_s19 }
 0x437   :  { %v4020_v48 = vld [vmem:[#allocation4 + $0x50] sm:$0x3f] }
 0x438   :  { %3852 = vrot.lane.b32.xlu0 %v3829_v18, %s7882_s18  ;;  %v2320_v11 = vpop.permute.xlu1 %2319 }
 0x439   :  { %v2339_v22 = vsel %vm349_vm15, %v8942_v32, %v2320_v11  ;;  %v2340_v24 = vsel %vm349_vm15, %v2320_v11, %v2322_v52  ;;  %v4154_v36 = vld [vmem:[#allocation5 + $0x180] sm:$0xff]  ;;  %v4153_v12 = vld [vmem:[#allocation5 + $0x178] sm:$0xff] }
 0x43a   :  { %v9305_v38 = vpop.permute.xlu0 %2203  ;;  %2365 = vst [vmem:[#allocation5 + $0x238] sm:$0xfc] %v2339_v22  ;;  %2366 = vst [vmem:[#allocation5 + $0x240] sm:$0xfc] %v2340_v24  ;;  %3850 = vrot.lane.b32.xlu1 %v3828_v60, %s7882_s18  ;;  %v7500_v42 = vpack.c.bf16 %v4154_v36, %v4141_v57  ;;  %v7502_v56 = vpack.c.bf16 %v4153_v12, %v4140_v62  ;;  %v4019_v60 = vld [vmem:[#allocation4 + $0x48] sm:$0x3f] }
 0x43c   :  { %3968 = vrot.lane.b32.xlu0 %v3945_v27, %s7905_s19  ;;  %7501 = vmatprep.subr.bf16.mxu0 %v7500_v42  ;;  %v2202_v58 = vpop.permute.xlu1 %2201 }
 0x43d   :  { %v2219_v32 = vsel %vm305_vm13, %v2200_v25, %v2202_v58  ;;  %v2220_v55 = vsel %vm305_vm13, %v2202_v58, %v9305_v38  ;;  %7503 = vmatpush1.bf16.msra.mxu0 %v7502_v56  ;;  %v4165_v46 = vld [vmem:[#allocation5 + $0x1d8] sm:$0xff]  ;;  %v4164_v21 = vld [vmem:[#allocation5 + $0x1d0] sm:$0xff]  ;;  %v1861_v58 = vrot.slane %v1835_v16, 6 }
 0x43e   :  { %v9312_v63 = vpop.permute.xlu0 %2325  ;;  %2245 = vst [vmem:[#allocation5 + $0x248] ss:$-100 sps:$4 sm:$0xf3] %v2219_v32   ;;  %2246 = vst [vmem:[#allocation5 + $0x250] ss:$-100 sps:$4 sm:$0xf3] %v2220_v55   ;;  %3966 = vrot.lane.b32.xlu1 %v3944_v3, %s7905_s19 }
 0x43f   :  { %v4021_v3 = vld [vmem:[#allocation4 + $0x58] sm:$0x3f] }
 0x440   :  { %1650 = vrot.lane.b32.xlu0 %v1625_v13, %s7879_s23  ;;  %v2324_v51 = vpop.permute.xlu1 %2323  ;;  %v1834_v32 = vld [vmem:[#allocation4 + $0x58] sm:$0x3f] }
 0x441   :  { %v2341_v25 = vsel %vm349_vm15, %v2322_v52, %v2324_v51  ;;  %v2342_v61 = vsel %vm349_vm15, %v2324_v51, %v9312_v63  ;;  %v4178_v7 = vld [vmem:[#allocation5 + $0x240] sm:$0xff]  ;;  %v4177_v41 = vld [vmem:[#allocation5 + $0x238] sm:$0xff]  ;;  %v1860_v51 = vrot.slane %v1834_v32, 6  ;;  %v2154_v32 = vld [vmem:[#allocation4 + $0x68] sm:$0x3f] }
 0x442   :  { %v2417_v40 = vpop.permute.xlu0 %2416  ;;  %2367 = vst [vmem:[#allocation5 + $0x248] sm:$0xfc] %v2341_v25  ;;  %2368 = vst [vmem:[#allocation5 + $0x250] sm:$0xfc] %v2342_v61  ;;  %1648 = vrot.lane.b32.xlu1 %v1624_v43, %s7879_s23  ;;  %v7468_v33 = vpack.c.bf16 %v4178_v7, %v4165_v46  ;;  %v7470_v53 = vpack.c.bf16 %v4177_v41, %v4164_v21 }
 0x444   :  { %1768 = vrot.lane.b32.xlu0 %v1743_v5, %s7882_s18  ;;  %7469 = vmatprep.subr.bf16.mxu1 %v7468_v33  ;;  %v2415_v54 = vpop.permute.xlu1 %2414  ;;  %v2031_v5 = vld [vmem:[#allocation4 + $0x60] sm:$0x3f] }
 0x445   :  { %v2435_v52 = vsel %vm2428_vm6, %v8736_v29, %v2415_v54  ;;  %v2436_v50 = vsel %vm2428_vm6, %v2415_v54, %v2417_v40  ;;  %7471 = vmatpush1.bf16.msra.mxu1 %v7470_v53  ;;  %v4167_v57 = vld [vmem:[#allocation5 + $0x1e8] sm:$0xff]  ;;  %v4166_v24 = vld [vmem:[#allocation5 + $0x1e0] sm:$0xff]  ;;  %v2059_v53 = vrot.slane %v2031_v5, 2  ;;  %v2182_v5 = vrot.slane %v2154_v32, 4  ;;  %v2481_v32 = vld [vmem:[#allocation4 + $0x68] sm:$0x3f] }
 0x446   :  { %v2527_v18 = vpop.permute.xlu0 %2526  ;;  %2461 = vst [vmem:[#allocation5 + $0x2a0] sm:$0x3f] %v2435_v52  ;;  %2462 = vst [vmem:[#allocation5 + $0x2a8] sm:$0x3f] %v2436_v50  ;;  %1766 = vrot.lane.b32.xlu1 %v1742_v44, %s7882_s18  ;;  %v1939_v44 = vld [vmem:[#allocation4 + $0x58] sm:$0x3f] }
 0x447   :  { %v2152_v52 = vld [vmem:[#allocation4 + $0x58] sm:$0x3f] }
 0x448   :  { %4054 = vrot.lane.b32.xlu0 %v4020_v48, %s7903_s1  ;;  %v2525_v11 = vpop.permute.xlu1 %2524  ;;  %v2030_v50 = vld [vmem:[#allocation4 + $0x58] sm:$0x3f] }
 0x449   :  { %v2545_v29 = vsel %vm2538_vm9, %v8958_v45, %v2525_v11  ;;  %v2546_v31 = vsel %vm2538_vm9, %v2525_v11, %v2527_v18  ;;  %v4180_v22 = vld [vmem:[#allocation5 + $0x250] sm:$0xff]  ;;  %v4179_v36 = vld [vmem:[#allocation5 + $0x248] sm:$0xff]  ;;  %v2180_v11 = vrot.slane %v2152_v52, 4 }
 0x44a   :  { %v9329_v27 = vpop.permute.xlu0 %2420  ;;  %2571 = vst [vmem:[#allocation5 + $0x308] ss:$-100 sps:$4 sm:$0xcf] %v2545_v29   ;;  %2572 = vst [vmem:[#allocation5 + $0x310] ss:$-100 sps:$4 sm:$0xcf] %v2546_v31   ;;  %4052 = vrot.lane.b32.xlu1 %v4019_v60, %s7903_s1  ;;  %v7504_v62 = vpack.c.bf16 %v4180_v22, %v4167_v57  ;;  %v7506_v12 = vpack.c.bf16 %v4179_v36, %v4166_v24 }
 0x44b   :  { %v2058_v60 = vrot.slane %v2030_v50, 2  ;;  %v2274_v57 = vld [vmem:[#allocation4 + $0x58] sm:$0x3f] }
 0x44c   :  { %4058 = vrot.lane.b32.xlu0 %v4022_v34, %s7903_s1  ;;  %7505 = vmatprep.subr.bf16.mxu0 %v7504_v62  ;;  %v2419_v56 = vpop.permute.xlu1 %2418 }
 0x44d   :  { %v2437_v45 = vsel %vm2428_vm6, %v2417_v40, %v2419_v56  ;;  %v2438_v13 = vsel %vm2428_vm6, %v2419_v56, %v9329_v27  ;;  %7507 = vmatpush1.bf16.msra.mxu0 %v7506_v12 }
 0x44e   :  { %v9336_v42 = vpop.permute.xlu0 %2530  ;;  %2463 = vst [vmem:[#allocation5 + $0x2b0] sm:$0x3f] %v2437_v45  ;;  %2464 = vst [vmem:[#allocation5 + $0x2b8] sm:$0x3f] %v2438_v13  ;;  %4056 = vrot.lane.b32.xlu1 %v4021_v3, %s7903_s1 }
 0x450   :  { %1886 = vrot.lane.b32.xlu0 %v1861_v58, %s7905_s19  ;;  %v2529_v39 = vpop.permute.xlu1 %2528 }
 0x451   :  { %v2547_v40 = vsel %vm2538_vm9, %v2527_v18, %v2529_v39  ;;  %v2548_v43 = vsel %vm2538_vm9, %v2529_v39, %v9336_v42  ;;  %v4191_v46 = vld [vmem:[#allocation5 + $0x2a8] sm:$0xff]  ;;  %v4204_v23 = vld [vmem:[#allocation5 + $0x310] sm:$0xff]  ;;  %v4190_v25 = vld [vmem:[#allocation5 + $0x2a0] sm:$0xff] }
 0x452   :  { %v9343_v55 = vpop.permute.xlu0 %2724  ;;  %2573 = vst [vmem:[#allocation5 + $0x318] ss:$-100 sps:$4 sm:$0xcf] %v2547_v40   ;;  %2574 = vst [vmem:[#allocation5 + $0x320] ss:$-100 sps:$4 sm:$0xcf] %v2548_v43   ;;  %1884 = vrot.lane.b32.xlu1 %v1860_v51, %s7905_s19  ;;  %v7472_v61 = vpack.c.bf16 %v4204_v23, %v4191_v46 }
 0x453   :  { %v4203_v7 = vld [vmem:[#allocation5 + $0x308] sm:$0xff]  ;;  %v2383_v23 = vld [vmem:[#allocation4 + $0x58] sm:$0x3f] }
 0x454   :  { %1978 = vrot.lane.b32.xlu0 %v1940_v15, %s7903_s1  ;;  %v7474_v21 = vpack.c.bf16 %v4203_v7, %v4190_v25  ;;  %7473 = vmatprep.subr.bf16.mxu1 %v7472_v61  ;;  %v2723_v33 = vpop.permute.xlu1 %2722  ;;  %v2153_v39 = vld [vmem:[#allocation4 + $0x60] sm:$0x3f] }
 0x455   :  { %v2740_v18 = vsel %vm85_vm2, %v9105_v6, %v2723_v33  ;;  %v2741_v54 = vsel %vm85_vm2, %v2723_v33, %v9343_v55  ;;  %v2032_v6 = vld [vmem:[#allocation4 + $0x68] sm:$0x3f]  ;;  %v2181_v40 = vrot.slane %v2153_v39, 4  ;;  %v2275_v46 = vld [vmem:[#allocation4 + $0x60] sm:$0x3f] }
 0x456   :  { %v9350_v41 = vpop.permute.xlu0 %2814  ;;  %7475 = vmatpush1.bf16.msra.mxu1 %v7474_v21  ;;  %2765 = vst [vmem:[#allocation5 + $0x370] sm:$0xfc] %v2740_v18  ;;  %2766 = vst [vmem:[#allocation5 + $0x378] sm:$0xfc] %v2741_v54  ;;  %1976 = vrot.lane.b32.xlu1 %v1939_v44, %s7903_s1  ;;  %v2060_v45 = vrot.slane %v2032_v6, 2  ;;  %v2303_v7 = vrot.slane %v2275_v46, 6 }
 0x457   :  { %v2479_v33 = vld [vmem:[#allocation4 + $0x58] sm:$0x3f] }
 0x458   :  { %2085 = vrot.lane.b32.xlu0 %v2059_v53, %s7888_s28  ;;  %v2813_v34 = vpop.permute.xlu1 %2812  ;;  %v2276_v53 = vld [vmem:[#allocation4 + $0x68] sm:$0x3f] }
 0x459   :  { %v2830_v16 = vsel %vm10833_vm5, %v9065_v26, %v2813_v34  ;;  %v2831_v29 = vsel %vm10833_vm5, %v2813_v34, %v9350_v41  ;;  %v4193_v31 = vld [vmem:[#allocation5 + $0x2b8] sm:$0xff]  ;;  %v4206_v22 = vld [vmem:[#allocation5 + $0x320] sm:$0xff]  ;;  %v4192_v24 = vld [vmem:[#allocation5 + $0x2b0] sm:$0xff]  ;;  %v2302_v26 = vrot.slane %v2274_v57, 6  ;;  %v2507_v57 = vrot.slane %v2479_v33, 2 }
 0x45a   :  { %v9358_v48 = vpop.permute.xlu0 %2917  ;;  %2855 = vst [vmem:[#allocation5 + $0x3d8] sm:$0x3f] %v2830_v16  ;;  %2856 = vst [vmem:[#allocation5 + $0x3e0] sm:$0x3f] %v2831_v29  ;;  %2083 = vrot.lane.b32.xlu1 %v2058_v60, %s7888_s28  ;;  %v7508_v36 = vpack.c.bf16 %v4206_v22, %v4193_v31  ;;  %v4205_v62 = vld [vmem:[#allocation5 + $0x318] sm:$0xff]  ;;  %v2304_v6 = vrot.slane %v2276_v53, 6 }
 0x45b   :  { %v7510_v12 = vpack.c.bf16 %v4205_v62, %v4192_v24  ;;  %v2385_v22 = vld [vmem:[#allocation4 + $0x68] sm:$0x3f]  ;;  %v2384_v62 = vld [vmem:[#allocation4 + $0x60] sm:$0x3f] }
 0x45c   :  { %2205 = vrot.lane.b32.xlu0 %v2180_v11, %s7890_s30  ;;  %7509 = vmatprep.subr.bf16.mxu0 %v7508_v36  ;;  %v2916_v58 = vpop.permute.xlu1 %2915  ;;  %v2873_v33 = vld [vmem:[#allocation4 + $0x60] sm:$0x3f]  ;;  %v2681_v53 = vld [vmem:[#allocation4 + $0x68] sm:$0x3f] }
 0x45d   :  { %v2933_v13 = vsel %vm1888_vm7, %v9117_v20, %v2916_v58  ;;  %v2934_v3 = vsel %vm1888_vm7, %v2916_v58, %v9358_v48  ;;  %7511 = vmatpush1.bf16.msra.mxu0 %v7510_v12  ;;  %v4217_v21 = vld [vmem:[#allocation5 + $0x378] sm:$0xff]  ;;  %v4216_v44 = vld [vmem:[#allocation5 + $0x370] sm:$0xff]  ;;  %v2480_v12 = vld [vmem:[#allocation4 + $0x60] sm:$0x3f] }
 0x45e   :  { %v9366_v56 = vpop.permute.xlu0 %2728  ;;  %2958 = vst [vmem:[#allocation5 + $0x440] ss:$-100 sps:$4 sm:$0xcf] %v2933_v13   ;;  %2959 = vst [vmem:[#allocation5 + $0x448] ss:$-100 sps:$4 sm:$0xcf] %v2934_v3   ;;  %2087 = vrot.lane.b32.xlu1 %v2060_v45, %s7888_s28 }
 0x45f   :  { %v2508_v13 = vrot.slane %v2480_v12, 2  ;;  %v2874_v12 = vld [vmem:[#allocation4 + $0x68] sm:$0x3f] }
 0x460   :  { %2327 = vrot.lane.b32.xlu0 %v2302_v26, %s7892_s14  ;;  %v2727_v51 = vpop.permute.xlu1 %2726 }
 0x461   :  { %v2742_v20 = vsel %vm85_vm2, %v9343_v55, %v2727_v51  ;;  %v2743_v43 = vsel %vm85_vm2, %v2727_v51, %v9366_v56 }
 0x462   :  { %v9374_v15 = vpop.permute.xlu0 %2818  ;;  %2767 = vst [vmem:[#allocation5 + $0x380] sm:$0xfc] %v2742_v20  ;;  %2768 = vst [vmem:[#allocation5 + $0x388] sm:$0xfc] %v2743_v43  ;;  %2207 = vrot.lane.b32.xlu1 %v2181_v40, %s7890_s30 }
 0x464   :  { %2209 = vrot.lane.b32.xlu0 %v2182_v5, %s7890_s30  ;;  %v2817_v61 = vpop.permute.xlu1 %2816 }
 0x465   :  { %v2832_v55 = vsel %vm10833_vm5, %v9350_v41, %v2817_v61  ;;  %v2833_v18 = vsel %vm10833_vm5, %v2817_v61, %v9374_v15  ;;  %v4230_v54 = vld [vmem:[#allocation5 + $0x3e0] sm:$0xff]  ;;  %v4229_v52 = vld [vmem:[#allocation5 + $0x3d8] sm:$0xff]  ;;  %v2509_v61 = vrot.slane %v2481_v32, 2 }
 0x466   :  { %v9382_v25 = vpop.permute.xlu0 %2921  ;;  %2857 = vst [vmem:[#allocation5 + $0x3e8] sm:$0x3f] %v2832_v55  ;;  %2858 = vst [vmem:[#allocation5 + $0x3f0] sm:$0x3f] %v2833_v18  ;;  %2329 = vrot.lane.b32.xlu1 %v2303_v7, %s7892_s14  ;;  %v7476_v50 = vpack.c.bf16 %v4230_v54, %v4217_v21  ;;  %v7478_v34 = vpack.c.bf16 %v4229_v52, %v4216_v44  ;;  %v2783_v21 = vld [vmem:[#allocation4 + $0x60] sm:$0x3f] }
 0x467   :  { %v2899_v54 = vrot.slane %v2873_v33, 2  ;;  %v2707_v44 = vrot.slane %v2681_v53, 6  ;;  %v3106_v53 = vld [vmem:[#allocation4 + $0x68] sm:$0x3f] }
 0x468   :  { %2422 = vrot.lane.b32.xlu0 %v2383_v23, %s7904_s24  ;;  %7477 = vmatprep.subr.bf16.mxu1 %v7476_v50  ;;  %v2920_v60 = vpop.permute.xlu1 %2919  ;;  %v2989_v50 = vld [vmem:[#allocation4 + $0x60] sm:$0x3f] }
 0x469   :  { %v2935_v41 = vsel %vm1888_vm7, %v9358_v48, %v2920_v60  ;;  %v2936_v16 = vsel %vm1888_vm7, %v2920_v60, %v9382_v25  ;;  %7479 = vmatpush1.bf16.msra.mxu1 %v7478_v34  ;;  %v2680_v48 = vld [vmem:[#allocation4 + $0x60] sm:$0x3f]  ;;  %v4218_v5 = vld [vmem:[#allocation5 + $0x380] sm:$0xff] }
 0x46a   :  { %v3034_v11 = vpop.permute.xlu0 %3033  ;;  %2960 = vst [vmem:[#allocation5 + $0x450] ss:$-100 sps:$4 sm:$0xcf] %v2935_v41   ;;  %2961 = vst [vmem:[#allocation5 + $0x458] ss:$-100 sps:$4 sm:$0xcf] %v2936_v16   ;;  %2331 = vrot.lane.b32.xlu1 %v2304_v6, %s7892_s14 }
 0x46b   :  { %v2706_v45 = vrot.slane %v2680_v48, 6  ;;  %v4219_v3 = vld [vmem:[#allocation5 + $0x388] sm:$0xff]  ;;  %v2784_v48 = vld [vmem:[#allocation4 + $0x68] sm:$0x3f] }
 0x46c   :  { %2532 = vrot.lane.b32.xlu0 %v2507_v57, %s7906_s22  ;;  %v3032_v31 = vpop.permute.xlu1 %3031 }
 0x46d   :  { %v3049_v24 = vsel %vm1980_vm3, %v9128_v28, %v3032_v31  ;;  %v3050_v36 = vsel %vm1980_vm3, %v3032_v31, %v3034_v11 }
 0x46e   :  { %v3153_v29 = vpop.permute.xlu0 %3152  ;;  %3074 = vst [vmem:[#allocation5 + $0x4a8] ss:$-100 sps:$4 sm:$0xf3] %v3049_v24   ;;  %3075 = vst [vmem:[#allocation5 + $0x4b0] ss:$-100 sps:$4 sm:$0xf3] %v3050_v36   ;;  %2424 = vrot.lane.b32.xlu1 %v2384_v62, %s7904_s24 }
 0x46f   :  { %v3015_v24 = vrot.slane %v2989_v50, 4  ;;  %v3215_v50 = vld [vmem:[#allocation4 + $0x68] sm:$0x3f] }
 0x470   :  { %2426 = vrot.lane.b32.xlu0 %v2385_v22, %s7904_s24  ;;  %v3151_v26 = vpop.permute.xlu1 %3150 }
 0x471   :  { %v3170_v28 = vsel %vm261_vm11, %v9139_v2, %v3151_v26  ;;  %v3171_v39 = vsel %vm261_vm11, %v3151_v26, %v3153_v29  ;;  %v4232_v51 = vld [vmem:[#allocation5 + $0x3f0] sm:$0xff]  ;;  %v4231_v40 = vld [vmem:[#allocation5 + $0x3e8] sm:$0xff] }
 0x472   :  { %v9401_v58 = vpop.permute.xlu0 %3037  ;;  %3196 = vst [vmem:[#allocation5 + $0x4a8] sm:$0xfc] %v3170_v28  ;;  %3197 = vst [vmem:[#allocation5 + $0x4b0] sm:$0xfc] %v3171_v39  ;;  %2534 = vrot.lane.b32.xlu1 %v2508_v13, %s7906_s22  ;;  %v7512_v20 = vpack.c.bf16 %v4232_v51, %v4219_v3  ;;  %v7514_v43 = vpack.c.bf16 %v4231_v40, %v4218_v5  ;;  %v2900_v3 = vrot.slane %v2874_v12, 2 }
 0x473   :  { %v3107_v28 = vld [vmem:[#allocation4 + $0x70] sm:$0x3f] }
 0x474   :  { %2730 = vrot.lane.b32.xlu0 %v2706_v45, %s7879_s23  ;;  %7513 = vmatprep.subr.bf16.mxu0 %v7512_v20  ;;  %v3036_v23 = vpop.permute.xlu1 %3035 }
 0x475   :  { %v3051_v2 = vsel %vm1980_vm3, %v3034_v11, %v3036_v23  ;;  %v3052_v7 = vsel %vm1980_vm3, %v3036_v23, %v9401_v58  ;;  %7515 = vmatpush1.bf16.msra.mxu0 %v7514_v43  ;;  %v4243_v52 = vld [vmem:[#allocation5 + $0x448] sm:$0xff]  ;;  %v4242_v57 = vld [vmem:[#allocation5 + $0x440] sm:$0xff] }
 0x476   :  { %v9408_v46 = vpop.permute.xlu0 %3156  ;;  %3076 = vst [vmem:[#allocation5 + $0x4b8] ss:$-100 sps:$4 sm:$0xf3] %v3051_v2   ;;  %3077 = vst [vmem:[#allocation5 + $0x4c0] ss:$-100 sps:$4 sm:$0xf3] %v3052_v7   ;;  %2536 = vrot.lane.b32.xlu1 %v2509_v61, %s7906_s22 }
 0x477   :  { %v3135_v7 = vrot.slane %v3107_v28, 6 }
 0x478   :  { %2820 = vrot.lane.b32.xlu0 %v2783_v21, %s7882_s18  ;;  %v3155_v18 = vpop.permute.xlu1 %3154 }
 0x479   :  { %v3172_v34 = vsel %vm261_vm11, %v3153_v29, %v3155_v18  ;;  %v3173_v11 = vsel %vm261_vm11, %v3155_v18, %v9408_v46  ;;  %v4256_v60 = vld [vmem:[#allocation5 + $0x4b0] sm:$0xff]  ;;  %v4255_v6 = vld [vmem:[#allocation5 + $0x4a8] sm:$0xff] }
 0x47a   :  { %v9415_v55 = vpop.permute.xlu0 %3247  ;;  %3198 = vst [vmem:[#allocation5 + $0x4b8] sm:$0xfc] %v3172_v34  ;;  %3199 = vst [vmem:[#allocation5 + $0x4c0] sm:$0xfc] %v3173_v11  ;;  %2732 = vrot.lane.b32.xlu1 %v2707_v44, %s7879_s23  ;;  %v7480_v41 = vpack.c.bf16 %v4256_v60, %v4243_v52  ;;  %v7482_v16 = vpack.c.bf16 %v4255_v6, %v4242_v57  ;;  %v3105_v29 = vld [vmem:[#allocation4 + $0x60] sm:$0x3f] }
 0x47b   :  { %v3133_v26 = vrot.slane %v3105_v29, 6  ;;  %v3134_v44 = vrot.slane %v3106_v53, 6  ;;  %v3310_v34 = vld [vmem:[#allocation4 + $0x68] sm:$0x3f]  ;;  %v3214_v11 = vld [vmem:[#allocation4 + $0x60] sm:$0x3f] }
 0x47c   :  { %2923 = vrot.lane.b32.xlu0 %v2899_v54, %s7905_s19  ;;  %7481 = vmatprep.subr.bf16.mxu1 %v7480_v41  ;;  %v3246_v22 = vpop.permute.xlu1 %3245  ;;  %v3338_v6 = vrot.slane %v3310_v34, 2  ;;  %v3688_v53 = vld [vmem:[#allocation4 + $0x68] sm:$0x3f] }
 0x47d   :  { %v3265_v36 = vsel %vm305_vm13, %v9077_v30, %v3246_v22  ;;  %v3266_v62 = vsel %vm305_vm13, %v3246_v22, %v9415_v55  ;;  %7483 = vmatpush1.bf16.msra.mxu1 %v7482_v16  ;;  %v4245_v32 = vld [vmem:[#allocation5 + $0x458] sm:$0xff]  ;;  %v2990_v30 = vld [vmem:[#allocation4 + $0x68] sm:$0x3f]  ;;  %v3309_v22 = vld [vmem:[#allocation4 + $0x60] sm:$0x3f] }
 0x47e   :  { %v9422_v31 = vpop.permute.xlu0 %3356  ;;  %3291 = vst [vmem:[#allocation5 + $0x510] sm:$0x3f] %v3265_v36  ;;  %3292 = vst [vmem:[#allocation5 + $0x518] sm:$0x3f] %v3266_v62  ;;  %2822 = vrot.lane.b32.xlu1 %v2784_v48, %s7882_s18  ;;  %v4244_v40 = vld [vmem:[#allocation5 + $0x450] sm:$0xff] }
 0x47f   :  { %v3432_v16 = vld [vmem:[#allocation4 + $0x68] sm:$0x3f] }
 0x480   :  { %3039 = vrot.lane.b32.xlu0 %v3015_v24, %s7903_s1  ;;  %v3355_v13 = vpop.permute.xlu1 %3354 }
 0x481   :  { %v3374_v39 = vsel %vm349_vm15, %v9151_v49, %v3355_v13  ;;  %v3375_v51 = vsel %vm349_vm15, %v3355_v13, %v9422_v31  ;;  %v4258_v5 = vld [vmem:[#allocation5 + $0x4c0] sm:$0xff]  ;;  %v4257_v20 = vld [vmem:[#allocation5 + $0x4b8] sm:$0xff]  ;;  %v3016_v49 = vrot.slane %v2990_v30, 4 }
 0x482   :  { %v9430_v45 = vpop.permute.xlu0 %3478  ;;  %3400 = vst [vmem:[#allocation5 + $0x578] ss:$-100 sps:$4 sm:$0xcf] %v3374_v39   ;;  %3401 = vst [vmem:[#allocation5 + $0x580] ss:$-100 sps:$4 sm:$0xcf] %v3375_v51   ;;  %2925 = vrot.lane.b32.xlu1 %v2900_v3, %s7905_s19  ;;  %v7516_v43 = vpack.c.bf16 %v4258_v5, %v4245_v32  ;;  %v7518_v23 = vpack.c.bf16 %v4257_v20, %v4244_v40 }
 0x483   :  { %v3460_v3 = vrot.slane %v3432_v16, 4  ;;  %v3337_v32 = vrot.slane %v3309_v22, 2  ;;  %v3311_v30 = vld [vmem:[#allocation4 + $0x70] sm:$0x3f]  ;;  %v3431_v39 = vld [vmem:[#allocation4 + $0x60] sm:$0x3f] }
 0x484   :  { %3158 = vrot.lane.b32.xlu0 %v3133_v26, %s7888_s28  ;;  %7517 = vmatprep.subr.bf16.mxu0 %v7516_v43  ;;  %v3477_v2 = vpop.permute.xlu1 %3476  ;;  %v3339_v40 = vrot.slane %v3311_v30, 2  ;;  %v3459_v20 = vrot.slane %v3431_v39, 4 }
 0x485   :  { %v3496_v21 = vsel %vm2428_vm6, %v9162_v59, %v3477_v2  ;;  %v3497_v33 = vsel %vm2428_vm6, %v3477_v2, %v9430_v45  ;;  %7519 = vmatpush1.bf16.msra.mxu0 %v7518_v23  ;;  %v3553_v23 = vld [vmem:[#allocation4 + $0x60] sm:$0x3f]  ;;  %v3216_v2 = vld [vmem:[#allocation4 + $0x70] sm:$0x3f] }
 0x486   :  { %v9438_v61 = vpop.permute.xlu0 %3251  ;;  %3522 = vst [vmem:[#allocation5 + $0x5e0] ss:$-100 sps:$4 sm:$0xf3] %v3496_v21   ;;  %3523 = vst [vmem:[#allocation5 + $0x5e8] ss:$-100 sps:$4 sm:$0xf3] %v3497_v33   ;;  %3041 = vrot.lane.b32.xlu1 %v3016_v49, %s7903_s1 }
 0x487   :  { %v3581_v21 = vrot.slane %v3553_v23, 6 }
 0x488   :  { %3162 = vrot.lane.b32.xlu0 %v3135_v7, %s7888_s28  ;;  %v3250_v54 = vpop.permute.xlu1 %3249 }
 0x489   :  { %v3267_v52 = vsel %vm305_vm13, %v9415_v55, %v3250_v54  ;;  %v3268_v59 = vsel %vm305_vm13, %v3250_v54, %v9438_v61  ;;  %v4269_v41 = vld [vmem:[#allocation5 + $0x518] sm:$0xff]  ;;  %v4268_v36 = vld [vmem:[#allocation5 + $0x510] sm:$0xff] }
 0x48a   :  { %v9446_v18 = vpop.permute.xlu0 %3360  ;;  %3293 = vst [vmem:[#allocation5 + $0x520] sm:$0x3f] %v3267_v52  ;;  %3294 = vst [vmem:[#allocation5 + $0x528] sm:$0x3f] %v3268_v59  ;;  %3160 = vrot.lane.b32.xlu1 %v3134_v44, %s7888_s28  ;;  %v3433_v54 = vld [vmem:[#allocation4 + $0x70] sm:$0x3f] }
 0x48b   :  { %v3461_v16 = vrot.slane %v3433_v54, 4 }
 0x48c   :  { %3255 = vrot.lane.b32.xlu0 %v3215_v50, %s7890_s30  ;;  %v3359_v57 = vpop.permute.xlu1 %3358 }
 0x48d   :  { %v3376_v55 = vsel %vm349_vm15, %v9422_v31, %v3359_v57  ;;  %v3377_v24 = vsel %vm349_vm15, %v3359_v57, %v9446_v18  ;;  %v4282_v29 = vld [vmem:[#allocation5 + $0x580] sm:$0xff]  ;;  %v4281_v62 = vld [vmem:[#allocation5 + $0x578] sm:$0xff] }
 0x48e   :  { %v9454_v60 = vpop.permute.xlu0 %3482  ;;  %3402 = vst [vmem:[#allocation5 + $0x588] ss:$-100 sps:$4 sm:$0xcf] %v3376_v55   ;;  %3403 = vst [vmem:[#allocation5 + $0x590] ss:$-100 sps:$4 sm:$0xcf] %v3377_v24   ;;  %3253 = vrot.lane.b32.xlu1 %v3214_v11, %s7890_s30  ;;  %v7484_v48 = vpack.c.bf16 %v4282_v29, %v4269_v41  ;;  %v7486_v12 = vpack.c.bf16 %v4281_v62, %v4268_v36 }
 0x48f   :  { %v3714_v41 = vrot.slane %v3688_v53, 2  ;;  %v3554_v24 = vld [vmem:[#allocation4 + $0x68] sm:$0x3f] }
 0x490   :  { %3364 = vrot.lane.b32.xlu0 %v3338_v6, %s7892_s14  ;;  %7485 = vmatprep.subr.bf16.mxu1 %v7484_v48  ;;  %v3481_v13 = vpop.permute.xlu1 %3480  ;;  %v3582_v48 = vrot.slane %v3554_v24, 6 }
 0x491   :  { %v3498_v31 = vsel %vm2428_vm6, %v9430_v45, %v3481_v13  ;;  %v3499_v28 = vsel %vm2428_vm6, %v3481_v13, %v9454_v60  ;;  %7487 = vmatpush1.bf16.msra.mxu1 %v7486_v12  ;;  %v3805_v13 = vld [vmem:[#allocation4 + $0x70] sm:$0x3f] }
 0x492   :  { %v3601_v26 = vpop.permute.xlu0 %3600  ;;  %3524 = vst [vmem:[#allocation5 + $0x5f0] ss:$-100 sps:$4 sm:$0xf3] %v3498_v31   ;;  %3525 = vst [vmem:[#allocation5 + $0x5f8] ss:$-100 sps:$4 sm:$0xf3] %v3499_v28   ;;  %3362 = vrot.lane.b32.xlu1 %v3337_v32, %s7892_s14 }
 0x494   :  { %3486 = vrot.lane.b32.xlu0 %v3460_v3, %s7904_s24  ;;  %v3599_v5 = vpop.permute.xlu1 %3598  ;;  %v3689_v3 = vld [vmem:[#allocation4 + $0x70] sm:$0x3f] }
 0x495   :  { %v3618_v43 = vsel %vm2538_vm9, %v9173_v1, %v3599_v5  ;;  %v3619_v45 = vsel %vm2538_vm9, %v3599_v5, %v3601_v26  ;;  %v4271_v33 = vld [vmem:[#allocation5 + $0x528] sm:$0xff]  ;;  %v4270_v59 = vld [vmem:[#allocation5 + $0x520] sm:$0xff] }
 0x496   :  { %v3733_v51 = vpop.permute.xlu0 %3732  ;;  %3644 = vst [vmem:[#allocation5 + $0x5e0] sm:$0xfc] %v3618_v43  ;;  %3645 = vst [vmem:[#allocation5 + $0x5e8] sm:$0xfc] %v3619_v45  ;;  %3484 = vrot.lane.b32.xlu1 %v3459_v20, %s7904_s24  ;;  %v3831_v43 = vrot.slane %v3805_v13, 4  ;;  %v3715_v45 = vrot.slane %v3689_v3, 2 }
 0x497   :  { %v4023_v3 = vld [vmem:[#allocation4 + $0x68] sm:$0x3f] }
 0x498   :  { %3366 = vrot.lane.b32.xlu0 %v3339_v40, %s7892_s14  ;;  %v3731_v49 = vpop.permute.xlu1 %3730  ;;  %s7912_s14 = smov 113  }
 0x499   :  { %v3748_v1 = vsel %vm85_vm2, %v9184_v10, %v3731_v49  ;;  %v3749_v44 = vsel %vm85_vm2, %v3731_v49, %v3733_v51  ;;  %v4284_v52 = vld [vmem:[#allocation5 + $0x590] sm:$0xff]  ;;  %v4283_v50 = vld [vmem:[#allocation5 + $0x588] sm:$0xff]  ;;  %v3555_v10 = vld [vmem:[#allocation4 + $0x70] sm:$0x3f] }
 0x49a   :  { %v9473_v7 = vpop.permute.xlu0 %3604  ;;  %3773 = vst [vmem:[#allocation5 + $0x6b0] ss:$-100 sps:$4 sm:$0xcf] %v3748_v1   ;;  %3774 = vst [vmem:[#allocation5 + $0x6b8] ss:$-100 sps:$4 sm:$0xcf] %v3749_v44   ;;  %3257 = vrot.lane.b32.xlu1 %v3216_v2, %s7890_s30  ;;  %v7520_v34 = vpack.c.bf16 %v4284_v52, %v4271_v33  ;;  %v7522_v11 = vpack.c.bf16 %v4283_v50, %v4270_v59 }
 0x49b   :  { %v3583_v29 = vrot.slane %v3555_v10, 6  ;;  %v3921_v2 = vld [vmem:[#allocation4 + $0x70] sm:$0x3f]  ;;  %v3804_v49 = vld [vmem:[#allocation4 + $0x68] sm:$0x3f] }
 0x49c   :  { %3606 = vrot.lane.b32.xlu0 %v3581_v21, %s7906_s22  ;;  %7521 = vmatprep.subr.bf16.mxu0 %v7520_v34  ;;  %v3603_v6 = vpop.permute.xlu1 %3602  ;;  %v9497_v21 = vpop.f32.mrb[8].mxu0  ;;  %v3947_v54 = vrot.slane %v3921_v2, 6  ;;  %v3830_v1 = vrot.slane %v3804_v49, 4 }
 0x49d   :  { %v3620_v22 = vsel %vm2538_vm9, %v3601_v26, %v3603_v6  ;;  %v3621_v55 = vsel %vm2538_vm9, %v3603_v6, %v9473_v7  ;;  %7523 = vmatpush1.bf16.msra.mxu0 %v7522_v11  ;;  %v4295_v12 = vld [vmem:[#allocation5 + $0x5e8] sm:$0xff]  ;;  %v4294_v28 = vld [vmem:[#allocation5 + $0x5e0] sm:$0xff]  ;;  %v9504_v6 = vpop.f32.mrb[9].mxu0 }
 0x49e   :  { %v9480_v57 = vpop.permute.xlu0 %3736  ;;  %3646 = vst [vmem:[#allocation5 + $0x5f0] sm:$0xfc] %v3620_v22  ;;  %3647 = vst [vmem:[#allocation5 + $0x5f8] sm:$0xfc] %v3621_v55  ;;  %3488 = vrot.lane.b32.xlu1 %v3461_v16, %s7904_s24  ;;  %v9508_v10 = vpop.f32.mrb[10].mxu0 }
 0x4a0   :  { %3738 = vrot.lane.b32.xlu0 %v3714_v41, %s7879_s23  ;;  %v3735_v62 = vpop.permute.xlu1 %3734 }
 0x4a1   :  { %v3750_v26 = vsel %vm85_vm2, %v3733_v51, %v3735_v62  ;;  %v3751_v32 = vsel %vm85_vm2, %v3735_v62, %v9480_v57  ;;  %v4308_v31 = vld [vmem:[#allocation5 + $0x650] sm:$0xff]  ;;  %v4307_v30 = vld [vmem:[#allocation5 + $0x648] sm:$0xff]  ;;  %v4024_v62 = vld [vmem:[#allocation4 + $0x70] sm:$0x3f] }
 0x4a2   :  { %v3849_v36 = vpop.permute.xlu0 %3848  ;;  %3775 = vst [vmem:[#allocation5 + $0x6c0] ss:$-100 sps:$4 sm:$0xcf] %v3750_v26   ;;  %3776 = vst [vmem:[#allocation5 + $0x6c8] ss:$-100 sps:$4 sm:$0xcf] %v3751_v32   ;;  %3608 = vrot.lane.b32.xlu1 %v3582_v48, %s7906_s22  ;;  %v7488_v39 = vpack.c.bf16 %v4308_v31, %v4295_v12  ;;  %v7490_v5 = vpack.c.bf16 %v4307_v30, %v4294_v28 }
 0x4a3   :  { %v9515_v48 = vpop.f32.mrb[11].mxu0  ;;  %v4354_v12 = vld [vmem:[%s10822_s4 + $0x8] sm:$0xff] }
 0x4a4   :  { %3610 = vrot.lane.b32.xlu0 %v3583_v29, %s7906_s22  ;;  %7489 = vmatprep.subr.bf16.mxu1 %v7488_v39  ;;  %v3847_v20 = vpop.permute.xlu1 %3846 }
 0x4a5   :  { %v3864_v51 = vsel %vm10833_vm5, %v9192_v0, %v3847_v20  ;;  %v3865_v23 = vsel %vm10833_vm5, %v3847_v20, %v3849_v36  ;;  %7491 = vmatpush1.bf16.msra.mxu1 %v7490_v5  ;;  %v4297_v44 = vld [vmem:[#allocation5 + $0x5f8] sm:$0xff]  ;;  %v3920_v0 = vld [vmem:[#allocation4 + $0x68] sm:$0x3f] }
 0x4a6   :  { %v3965_v40 = vpop.permute.xlu0 %3964  ;;  %3889 = vst [vmem:[#allocation5 + $0x718] ss:$-100 sps:$4 sm:$0xf3] %v3864_v51   ;;  %3890 = vst [vmem:[#allocation5 + $0x720] ss:$-100 sps:$4 sm:$0xf3] %v3865_v23   ;;  %3740 = vrot.lane.b32.xlu1 %v3715_v45, %s7879_s23 }
 0x4a7   :  { %v4296_v34 = vld [vmem:[#allocation5 + $0x5f0] sm:$0xff]  ;;  %v3946_v55 = vrot.slane %v3920_v0, 6 }
 0x4a8   :  { %3856 = vrot.lane.b32.xlu0 %v3831_v43, %s7882_s18  ;;  %v3963_v53 = vpop.permute.xlu1 %3962  ;;  %v4353_v43 = vld [vmem:[%s10822_s4] sm:$0xff] }
 0x4a9   :  { %v3980_v52 = vsel %vm1888_vm7, %v9201_v35, %v3963_v53  ;;  %v3981_v59 = vsel %vm1888_vm7, %v3963_v53, %v3965_v40  ;;  %v4310_v50 = vld [vmem:[#allocation5 + $0x660] sm:$0xff]  ;;  %v4309_v11 = vld [vmem:[#allocation5 + $0x658] sm:$0xff] }
 0x4aa   :  { %v9499_v33 = vpop.permute.xlu0 %3852  ;;  %4005 = vst [vmem:[#allocation5 + $0x718] sm:$0xfc] %v3980_v52  ;;  %4006 = vst [vmem:[#allocation5 + $0x720] sm:$0xfc] %v3981_v59  ;;  %3854 = vrot.lane.b32.xlu1 %v3830_v1, %s7882_s18  ;;  %v7524_v41 = vpack.c.bf16 %v4310_v50, %v4297_v44  ;;  %v7526_v16 = vpack.c.bf16 %v4309_v11, %v4296_v34 }
 0x4ac   :  { %3972 = vrot.lane.b32.xlu0 %v3947_v54, %s7905_s19  ;;  %7525 = vmatprep.subr.bf16.mxu0 %v7524_v41  ;;  %v3851_v35 = vpop.permute.xlu1 %3850 }
 0x4ad   :  { %v3866_v24 = vsel %vm10833_vm5, %v3849_v36, %v3851_v35  ;;  %v3867_v29 = vsel %vm10833_vm5, %v3851_v35, %v9499_v33  ;;  %7527 = vmatpush1.bf16.msra.mxu0 %v7526_v16  ;;  %v4321_v26 = vld [vmem:[#allocation5 + $0x6b8] sm:$0xff]  ;;  %v4320_v30 = vld [vmem:[#allocation5 + $0x6b0] sm:$0xff] }
 0x4ae   :  { %v9510_v22 = vpop.permute.xlu0 %3968  ;;  %3891 = vst [vmem:[#allocation5 + $0x728] ss:$-100 sps:$4 sm:$0xf3] %v3866_v24   ;;  %3892 = vst [vmem:[#allocation5 + $0x730] ss:$-100 sps:$4 sm:$0xf3] %v3867_v29   ;;  %3970 = vrot.lane.b32.xlu1 %v3946_v55, %s7905_s19 }
 0x4b0   :  { %4062 = vrot.lane.b32.xlu0 %v4024_v62, %s7903_s1  ;;  %v3967_v13 = vpop.permute.xlu1 %3966 }
 0x4b1   :  { %v3982_v32 = vsel %vm1888_vm7, %v3965_v40, %v3967_v13  ;;  %v3983_v31 = vsel %vm1888_vm7, %v3967_v13, %v9510_v22  ;;  %v4334_v28 = vld [vmem:[#allocation5 + $0x720] sm:$0xff]  ;;  %v4333_v39 = vld [vmem:[#allocation5 + $0x718] sm:$0xff] }
 0x4b2   :  { %v1651_v36 = vpop.permute.xlu0 %1650  ;;  %4007 = vst [vmem:[#allocation5 + $0x728] sm:$0xfc] %v3982_v32  ;;  %4008 = vst [vmem:[#allocation5 + $0x730] sm:$0xfc] %v3983_v31  ;;  %4060 = vrot.lane.b32.xlu1 %v4023_v3, %s7903_s1  ;;  %v7492_v5 = vpack.c.bf16 %v4334_v28, %v4321_v26  ;;  %v7494_v20 = vpack.c.bf16 %v4333_v39, %v4320_v30  ;;  %v9557_v39 = vld [vmem:[%s10821_s3] sm:$0xff] }
 0x4b3   :  { %1690 = vst.msk [vmem:[#allocation5 + $0x60] sm:$0xc0] %vm1689_vm12, %v1651_v36 }
 0x4b4   :  { %1704 = vst.msk [vmem:[#allocation5 + $0xc8] sm:$0xf] %vm1703_vm1, %v1651_v36  ;;  %4362 = vperm.xlu0 %7729, %v4354_v12   ;;  %7493 = vmatprep.subr.bf16.mxu1 %v7492_v5  ;;  %v1649_v40 = vpop.permute.xlu1 %1648 }
 0x4b5   :  { %v1662_v51 = vsel %vm85_vm2, %v9232_v4, %v1649_v40  ;;  %v1663_v23 = vsel %vm85_vm2, %v1649_v40, %v1651_v36  ;;  %7495 = vmatpush1.bf16.msra.mxu1 %v7494_v20  ;;  %v4323_v53 = vld [vmem:[#allocation5 + $0x6c8] sm:$0xff]  ;;  %v4322_v0 = vld [vmem:[#allocation5 + $0x6c0] sm:$0xff] }
 0x4b6   :  { %v1769_v45 = vpop.permute.xlu0 %1768  ;;  %1687 = vst [vmem:[#allocation5 + $0xb8] ss:$-100 sps:$4 sm:$0xcf] %v1662_v51   ;;  %1688 = vst [vmem:[#allocation5 + $0xc0] ss:$-100 sps:$4 sm:$0xcf] %v1663_v23   ;;  %4357 = vperm.xlu1 %7730, %v4353_v43  }
 0x4b7   :  { %1808 = vst.msk [vmem:[#allocation5 + $0xc8] sm:$0xf0] %vm1807_vm4, %v1769_v45 }
 0x4b8   :  { %1822 = vst.msk [vmem:[#allocation5 + $0x130] sm:$0x3] %vm1821_vm8, %v1769_v45  ;;  %v1767_v49 = vpop.permute.xlu1 %1766 }
 0x4b9   :  { %v1780_v54 = vsel %vm10833_vm5, %v9240_v47, %v1767_v49  ;;  %v1781_v1 = vsel %vm10833_vm5, %v1767_v49, %v1769_v45  ;;  %v4336_v44 = vld [vmem:[#allocation5 + $0x730] sm:$0xff]  ;;  %v4335_v52 = vld [vmem:[#allocation5 + $0x728] sm:$0xff]  ;;  %vm1926_vm5 = vcmask 678914  }
 0x4ba   :  { %v4055_v2 = vpop.permute.xlu0 %4054  ;;  %1805 = vst [vmem:[#allocation5 + $0x120] ss:$-100 sps:$4 sm:$0xf3] %v1780_v54   ;;  %1806 = vst [vmem:[#allocation5 + $0x128] ss:$-100 sps:$4 sm:$0xf3] %v1781_v1   ;;  %v7528_v4 = vpack.c.bf16 %v4336_v44, %v4323_v53  ;;  %v7530_v59 = vpack.c.bf16 %v4335_v52, %v4322_v0 }
 0x4bb   :  { %v9566_v45 = vld [vmem:[%s10821_s3 + $0x18] sm:$0xff]  ;;  %v7876_v0 = vld [vmem:[%s10821_s3 + $0x8] sm:$0xff] }
 0x4bc   :  { %7529 = vmatprep.subr.bf16.mxu0 %v7528_v4  ;;  %v4053_v34 = vpop.permute.xlu1 %4052 }
 0x4bd   :  { %v4070_v11 = vsel %vm1980_vm3, %v9088_v19, %v4053_v34  ;;  %v4071_v41 = vsel %vm1980_vm3, %v4053_v34, %v4055_v2  ;;  %7531 = vmatpush1.bf16.msra.mxu0 %v7530_v59  ;;  %v4117_v26 = vld [vmem:[#allocation5 + $0x58] sm:$0xff]  ;;  %v4116_v31 = vld [vmem:[#allocation5 + $0x50] sm:$0xff] }
 0x4be   :  { %v9539_v50 = vpop.permute.xlu0 %4058  ;;  %4095 = vst [vmem:[#allocation5 + $0x780] sm:$0x3f] %v4070_v11  ;;  %4096 = vst [vmem:[#allocation5 + $0x788] sm:$0x3f] %v4071_v41  ;;  %v4131_v51 = vld [vmem:[#allocation5 + $0xc8] sm:$0xff] }
 0x4c0   :  { %v4057_v16 = vpop.permute.xlu1 %4056 }
 0x4c1   :  { %v4072_v35 = vsel %vm1980_vm3, %v4055_v2, %v4057_v16  ;;  %v4073_v55 = vsel %vm1980_vm3, %v4057_v16, %v9539_v50  ;;  %v4130_v24 = vld [vmem:[#allocation5 + $0xc0] sm:$0xff]  ;;  %v4129_v62 = vld [vmem:[#allocation5 + $0xb8] sm:$0xff] }
 0x4c2   :  { %v1887_v47 = vpop.permute.xlu0 %1886  ;;  %4097 = vst [vmem:[#allocation5 + $0x790] sm:$0x3f] %v4072_v35  ;;  %4098 = vst [vmem:[#allocation5 + $0x798] sm:$0x3f] %v4073_v55  ;;  %v7532_v32 = vpack.c.bf16 %v4130_v24, %v4117_v26  ;;  %v7534_v28 = vpack.c.bf16 %v4129_v62, %v4116_v31  ;;  %v9575_v2 = vld [vmem:[%s10821_s3 + $0x10] sm:$0xff]  ;;  %s7907_s3 = smov 116  }
 0x4c3   :  { %1927 = vst.msk [vmem:[#allocation5 + $0x130] sm:$0xfc] %vm1926_vm5, %v1887_v47 }
 0x4c4   :  { %v1885_v19 = vpop.permute.xlu1 %1884 }
 0x4c5   :  { %v1899_v12 = vsel %vm1888_vm7, %v9269_v37, %v1885_v19  ;;  %v1900_v36 = vsel %vm1888_vm7, %v1885_v19, %v1887_v47  ;;  %v4347_v13 = vld [vmem:[#allocation5 + $0x788] sm:$0x3f]  ;;  %v4346_v3 = vld [vmem:[#allocation5 + $0x780] sm:$0x3f] }
 0x4c6   :  { %v1979_v29 = vpop.permute.xlu0 %1978  ;;  %1924 = vst [vmem:[#allocation5 + $0x120] sm:$0xfc] %v1899_v12  ;;  %1925 = vst [vmem:[#allocation5 + $0x128] sm:$0xfc] %v1900_v36  ;;  %7011 = vmatprep.subr.msk.mxu1 %vm4372_vm10, %v4347_v13 }
 0x4c7   :  { %2018 = vst.msk [vmem:[#allocation5 + $0x198] sm:$0x3f] %vm1585_vm14, %v1979_v29  ;;  %7012 = vmatpush1.msk.msra.mxu1 %vm4372_vm10, %v4346_v3 }
 0x4c8   :  { %4708 = vmatmul.mubr.f32.vlgmr.msra.gmra.mrb[12].mxu1 %v9557_v39  ;;  %7533 = vmatprep.subr.bf16.mxu1 %v7532_v32  ;;  %v1977_v37 = vpop.permute.xlu1 %1976 }
 0x4c9   :  { %v1991_v5 = vsel %vm1980_vm3, %v9279_v17, %v1977_v37  ;;  %v1992_v20 = vsel %vm1980_vm3, %v1977_v37, %v1979_v29  ;;  %7535 = vmatpush1.bf16.msra.mxu1 %v7534_v28  ;;  %v4349_v43 = vld [vmem:[#allocation5 + $0x798] sm:$0x3f]  ;;  %7014 = vmatprep.mubr.msk.f32.mxu1 %vm10834_vm0, %v9566_v45  ;;  %v4348_v40 = vld [vmem:[#allocation5 + $0x790] sm:$0x3f]  ;;  %v4118_v17 = vld [vmem:[#allocation5 + $0x60] sm:$0xff] }
 0x4ca   :  { %v2086_v30 = vpop.permute.xlu0 %2085  ;;  %2016 = vst [vmem:[#allocation5 + $0x188] sm:$0x3f] %v1991_v5  ;;  %2017 = vst [vmem:[#allocation5 + $0x190] sm:$0x3f] %v1992_v20  ;;  %7015 = vmatprep.subr.msk.mxu0 %vm4372_vm10, %v4349_v43  ;;  %v7569_v53 = vpack.c.bf16 %v4131_v51, %v4118_v17  ;;  %v4144_v36 = vld [vmem:[#allocation5 + $0x130] sm:$0xff] }
 0x4cb   :  { %7016 = vmatpush1.msk.msra.mxu0 %vm4372_vm10, %v4348_v40 }
 0x4cc   :  { %4714 = vmatmul.mubr.f32.gmra.mrb[14].mxu1 %v9575_v2  ;;  %4785 = vmatmul.mubr.f32.vlgmr.msra.gmra.mrb[16].mxu0 %v9557_v39  ;;  %v2084_v49 = vpop.permute.xlu1 %2083 }
 0x4cd   :  { %7568 = vmatprep.subr.bf16.mxu0 %v7901_v9  ;;  %v2099_v1 = vsel %vm261_vm11, %v9286_v8, %v2084_v49  ;;  %v2100_v44 = vsel %vm261_vm11, %v2084_v49, %v2086_v30  ;;  %7018 = vmatprep.mubr.msk.f32.mxu0 %vm10834_vm0, %v9566_v45  ;;  %v4143_v11 = vld [vmem:[#allocation5 + $0x128] sm:$0xff]  ;;  %v4142_v35 = vld [vmem:[#allocation5 + $0x120] sm:$0xff] }
 0x4ce   :  { %v2206_v23 = vpop.permute.xlu0 %2205  ;;  %2125 = vst [vmem:[#allocation5 + $0x1f0] ss:$-100 sps:$4 sm:$0xcf] %v2099_v1   ;;  %2126 = vst [vmem:[#allocation5 + $0x1f8] ss:$-100 sps:$4 sm:$0xcf] %v2100_v44   ;;  %7570 = vmatpush1.bf16.msra.mxu0 %v7569_v53  ;;  %7021 = vmatprep.mubr.msk.f32.mxu1 %vm10834_vm0, %v7876_v0 }
 0x4cf   :  { %v2221_v54 = vsel %vm305_vm13, %v9305_v38, %v2206_v23  ;;  %7571 = vmatprep.subr.bf16.mxu0 %v7901_v9 }
 0x4d0   :  { %2247 = vst [vmem:[#allocation5 + $0x258] ss:$-100 sps:$4 sm:$0xf3] %v2221_v54   ;;  %4791 = vmatmul.mubr.f32.gmra.mrb[18].mxu0 %v9575_v2  ;;  %v2088_v8 = vpop.permute.xlu1 %2087 }
 0x4d1   :  { %v2101_v4 = vsel %vm261_vm11, %v2086_v30, %v2088_v8  ;;  %7024 = vmatprep.mubr.msk.f32.mxu0 %vm10834_vm0, %v7876_v0  ;;  %vm10839_vm0 = vcmask 1014784  }
 0x4d2   :  { %v2328_v38 = vpop.permute.xlu0 %2327  ;;  %2127 = vst.msk [vmem:[#allocation5 + $0x198] sm:$0xc0] %vm1689_vm12, %v2101_v4 }
 0x4d3   :  { %v2343_v52 = vsel %vm349_vm15, %v9312_v63, %v2328_v38  ;;  %2140 = vst.msk [vmem:[#allocation5 + $0x200] sm:$0xf] %vm1703_vm1, %v2101_v4 }
 0x4d4   :  { %2369 = vst [vmem:[#allocation5 + $0x258] sm:$0xfc] %v2343_v52  ;;  %v2208_v34 = vpop.permute.xlu1 %2207 }
 0x4d5   :  { %v2222_v41 = vsel %vm305_vm13, %v2206_v23, %v2208_v34  ;;  %v4156_v16 = vld [vmem:[#allocation5 + $0x190] sm:$0xff]  ;;  %v4155_v55 = vld [vmem:[#allocation5 + $0x188] sm:$0xff] }
 0x4d6   :  { %v2210_v59 = vpop.permute.xlu0 %2209  ;;  %2248 = vst [vmem:[#allocation5 + $0x260] ss:$-100 sps:$4 sm:$0xf3] %v2222_v41   ;;  %v7536_v63 = vpack.c.bf16 %v4156_v16, %v4143_v11  ;;  %v7538_v24 = vpack.c.bf16 %v4155_v55, %v4142_v35 }
 0x4d7   :  { %v2223_v47 = vsel %vm305_vm13, %v2208_v34, %v2210_v59  ;;  %v4168_v23 = vld [vmem:[#allocation5 + $0x1f0] sm:$0xff] }
 0x4d8   :  { %2249 = vst.msk [vmem:[#allocation5 + $0x200] sm:$0xf0] %vm1807_vm4, %v2223_v47  ;;  %7537 = vmatprep.subr.bf16.mxu1 %v7536_v63  ;;  %v2330_v19 = vpop.permute.xlu1 %2329 }
 0x4d9   :  { %2262 = vst.msk [vmem:[#allocation5 + $0x268] sm:$0x3] %vm1821_vm8, %v2223_v47  ;;  %v2344_v12 = vsel %vm349_vm15, %v2328_v38, %v2330_v19  ;;  %7539 = vmatpush1.bf16.msra.mxu1 %v7538_v24  ;;  %v4157_v13 = vld [vmem:[#allocation5 + $0x198] sm:$0xff] }
 0x4da   :  { %v2423_v29 = vpop.permute.xlu0 %2422  ;;  %2370 = vst [vmem:[#allocation5 + $0x260] sm:$0xfc] %v2344_v12  ;;  %v7572_v3 = vpack.c.bf16 %v4157_v13, %v4144_v36 }
 0x4db   :  { %v2439_v62 = vsel %vm2428_vm6, %v9329_v27, %v2423_v29  ;;  %v4181_v20 = vld [vmem:[#allocation5 + $0x258] sm:$0xff] }
 0x4dc   :  { %2465 = vst [vmem:[#allocation5 + $0x2c0] sm:$0x3f] %v2439_v62  ;;  %7573 = vmatpush1.bf16.msra.mxu0 %v7572_v3  ;;  %v2332_v32 = vpop.permute.xlu1 %2331  ;;  %v7542_v53 = vpack.c.bf16 %v4181_v20, %v4168_v23 }
 0x4dd   :  { %v2345_v28 = vsel %vm349_vm15, %v2330_v19, %v2332_v32  ;;  %7574 = vmatprep.subr.bf16.mxu0 %v7901_v9  ;;  %v9611_v27 = vpop.f32.mrb[8].mxu1  ;;  %v4169_v51 = vld [vmem:[#allocation5 + $0x1f8] sm:$0xff] }
 0x4de   :  { %v2533_v26 = vpop.permute.xlu0 %2532  ;;  %2371 = vst.msk [vmem:[#allocation5 + $0x268] sm:$0xfc] %vm1926_vm5, %v2345_v28  ;;  %v9613_v30 = vpop.f32.mrb[9].mxu1 }
 0x4df   :  { %v2549_v31 = vsel %vm2538_vm9, %v9336_v42, %v2533_v26  ;;  %v4170_v8 = vld [vmem:[#allocation5 + $0x200] sm:$0xff] }
 0x4e0   :  { %2575 = vst [vmem:[#allocation5 + $0x328] ss:$-100 sps:$4 sm:$0xcf] %v2549_v31   ;;  %v2425_v5 = vpop.permute.xlu1 %2424 }
 0x4e1   :  { %v2440_v43 = vsel %vm2428_vm6, %v2423_v29, %v2425_v5  ;;  %v4182_v42 = vld [vmem:[#allocation5 + $0x260] sm:$0xff]  ;;  %v9618_v49 = vpop.f32.mrb[10].mxu1 }
 0x4e2   :  { %v2427_v37 = vpop.permute.xlu0 %2426  ;;  %2466 = vst [vmem:[#allocation5 + $0x2c8] sm:$0x3f] %v2440_v43  ;;  %v7540_v17 = vpack.c.bf16 %v4182_v42, %v4169_v51  ;;  %v9620_v54 = vpop.f32.mrb[11].mxu1 }
 0x4e3   :  { %v2441_v40 = vsel %vm2428_vm6, %v2425_v5, %v2427_v37 }
 0x4e4   :  { %2467 = vst.msk [vmem:[#allocation5 + $0x2d0] sm:$0x3f] %vm1585_vm14, %v2441_v40  ;;  %7541 = vmatprep.subr.bf16.mxu1 %v7540_v17  ;;  %v2535_v44 = vpop.permute.xlu1 %2534 }
 0x4e5   :  { %v2550_v38 = vsel %vm2538_vm9, %v2533_v26, %v2535_v44  ;;  %7543 = vmatpush1.bf16.msra.mxu1 %v7542_v53  ;;  %v4183_v52 = vld [vmem:[#allocation5 + $0x268] sm:$0xff] }
 0x4e6   :  { %v2731_v1 = vpop.permute.xlu0 %2730  ;;  %2576 = vst [vmem:[#allocation5 + $0x330] ss:$-100 sps:$4 sm:$0xcf] %v2550_v38   ;;  %v7575_v4 = vpack.c.bf16 %v4183_v52, %v4170_v8 }
 0x4e7   :  { %v2744_v0 = vsel %vm85_vm2, %v9366_v56, %v2731_v1  ;;  %v4194_v16 = vld [vmem:[#allocation5 + $0x2c0] sm:$0xff]  ;;  %v4207_v35 = vld [vmem:[#allocation5 + $0x328] sm:$0xff] }
 0x4e8   :  { %2769 = vst [vmem:[#allocation5 + $0x390] sm:$0xfc] %v2744_v0  ;;  %7576 = vmatpush1.bf16.msra.mxu0 %v7575_v4  ;;  %v2537_v34 = vpop.permute.xlu1 %2536  ;;  %v7546_v19 = vpack.c.bf16 %v4207_v35, %v4194_v16 }
 0x4e9   :  { %v2551_v41 = vsel %vm2538_vm9, %v2535_v44, %v2537_v34  ;;  %7577 = vmatprep.subr.bf16.mxu0 %v7901_v9 }
 0x4ea   :  { %v2821_v59 = vpop.permute.xlu0 %2820  ;;  %2577 = vst.msk [vmem:[#allocation5 + $0x2d0] sm:$0xc0] %vm1689_vm12, %v2551_v41 }
 0x4eb   :  { %v2834_v11 = vsel %vm10839_vm0, %v9374_v15, %v2821_v59  ;;  %2590 = vst.msk [vmem:[#allocation5 + $0x338] sm:$0xf] %vm1703_vm1, %v2551_v41 }
 0x4ec   :  { %2859 = vst [vmem:[#allocation5 + $0x3f8] sm:$0x3f] %v2834_v11  ;;  %v2733_v47 = vpop.permute.xlu1 %2732 }
 0x4ed   :  { %v2745_v63 = vsel %vm85_vm2, %v2731_v1, %v2733_v47  ;;  %2771 = vst.msk [vmem:[#allocation5 + $0x3a0] sm:$0xfc] %vm1926_vm5, %v2733_v47  ;;  %v4195_v15 = vld [vmem:[#allocation5 + $0x2c8] sm:$0xff]  ;;  %v4208_v24 = vld [vmem:[#allocation5 + $0x330] sm:$0xff] }
 0x4ee   :  { %v2924_v56 = vpop.permute.xlu0 %2923  ;;  %2770 = vst [vmem:[#allocation5 + $0x398] sm:$0xfc] %v2745_v63  ;;  %v7544_v29 = vpack.c.bf16 %v4208_v24, %v4195_v15 }
 0x4ef   :  { %v2937_v55 = vsel %vm1888_vm7, %v9382_v25, %v2924_v56 }
 0x4f0   :  { %2962 = vst [vmem:[#allocation5 + $0x460] ss:$-100 sps:$4 sm:$0xcf] %v2937_v55   ;;  %7545 = vmatprep.subr.bf16.mxu1 %v7544_v29  ;;  %v2823_v12 = vpop.permute.xlu1 %2822 }
 0x4f1   :  { %v2835_v13 = vsel %vm10839_vm0, %v2821_v59, %v2823_v12  ;;  %2861 = vst.msk [vmem:[#allocation5 + $0x408] sm:$0x3f] %vm1585_vm14, %v2823_v12  ;;  %7547 = vmatpush1.bf16.msra.mxu1 %v7546_v19  ;;  %v4196_v25 = vld [vmem:[#allocation5 + $0x2d0] sm:$0xff]  ;;  %v9639_v32 = vpop.f32.mrb[12].mxu0 }
 0x4f2   :  { %v3040_v62 = vpop.permute.xlu0 %3039  ;;  %v4209_v3 = vld [vmem:[#allocation5 + $0x338] sm:$0xff]  ;;  %2860 = vst [vmem:[#allocation5 + $0x400] sm:$0x3f] %v2835_v13  ;;  %v9641_v31 = vpop.f32.mrb[13].mxu0  ;;  %v4220_v59 = vld [vmem:[#allocation5 + $0x390] sm:$0xff] }
 0x4f3   :  { %v3053_v36 = vsel %vm1980_vm3, %v9401_v58, %v3040_v62  ;;  %v7578_v26 = vpack.c.bf16 %v4209_v3, %v4196_v25 }
 0x4f4   :  { %3078 = vst [vmem:[#allocation5 + $0x4c8] ss:$-100 sps:$4 sm:$0xf3] %v3053_v36   ;;  %v2926_v37 = vpop.permute.xlu1 %2925  ;;  %v4222_v23 = vld [vmem:[#allocation5 + $0x3a0] sm:$0xff] }
 0x4f5   :  { %7579 = vmatpush1.bf16.msra.mxu0 %v7578_v26  ;;  %v2938_v5 = vsel %vm1888_vm7, %v2924_v56, %v2926_v37  ;;  %2964 = vst.msk [vmem:[#allocation5 + $0x408] sm:$0xc0] %vm1689_vm12, %v2926_v37  ;;  %v9649_v20 = vpop.f32.mrb[14].mxu0  ;;  %v4221_v8 = vld [vmem:[#allocation5 + $0x398] sm:$0xff] }
 0x4f6   :  { %v3159_v28 = vpop.permute.xlu0 %3158  ;;  %2977 = vst.msk [vmem:[#allocation5 + $0x470] sm:$0xf] %vm1703_vm1, %v2926_v37  ;;  %7580 = vmatprep.subr.bf16.mxu0 %v7901_v9  ;;  %2963 = vst [vmem:[#allocation5 + $0x468] ss:$-100 sps:$4 sm:$0xcf] %v2938_v5   ;;  %v9651_v43 = vpop.f32.mrb[15].mxu0 }
 0x4f7   :  { %v3174_v58 = vsel %vm261_vm11, %v9408_v46, %v3159_v28  ;;  %v4233_v1 = vld [vmem:[#allocation5 + $0x3f8] sm:$0xff] }
 0x4f8   :  { %3200 = vst [vmem:[#allocation5 + $0x4c8] sm:$0xfc] %v3174_v58  ;;  %v3042_v51 = vpop.permute.xlu1 %3041  ;;  %v7550_v34 = vpack.c.bf16 %v4233_v1, %v4220_v59 }
 0x4f9   :  { %v3054_v42 = vsel %vm1980_vm3, %v3040_v62, %v3042_v51  ;;  %3080 = vst.msk [vmem:[#allocation5 + $0x470] sm:$0xf0] %vm1807_vm4, %v3042_v51 }
 0x4fa   :  { %v3163_v40 = vpop.permute.xlu0 %3162  ;;  %3093 = vst.msk [vmem:[#allocation5 + $0x4d8] sm:$0x3] %vm1821_vm8, %v3042_v51  ;;  %3079 = vst [vmem:[#allocation5 + $0x4d0] ss:$-100 sps:$4 sm:$0xf3] %v3054_v42  }
 0x4fb   :  { %v4246_v36 = vld [vmem:[#allocation5 + $0x460] sm:$0xff] }
 0x4fc   :  { %v3161_v17 = vpop.permute.xlu1 %3160  ;;  %v4235_v53 = vld [vmem:[#allocation5 + $0x408] sm:$0xff] }
 0x4fd   :  { %v3175_v44 = vsel %vm261_vm11, %v3159_v28, %v3161_v17  ;;  %v3176_v0 = vsel %vm261_vm11, %v3161_v17, %v3163_v40  ;;  %v7581_v38 = vpack.c.bf16 %v4235_v53, %v4222_v23  ;;  %v4234_v52 = vld [vmem:[#allocation5 + $0x400] sm:$0xff] }
 0x4fe   :  { %v3256_v46 = vpop.permute.xlu0 %3255  ;;  %3201 = vst [vmem:[#allocation5 + $0x4d0] sm:$0xfc] %v3175_v44  ;;  %3202 = vst.msk [vmem:[#allocation5 + $0x4d8] sm:$0xfc] %vm1926_vm5, %v3176_v0  ;;  %v7548_v4 = vpack.c.bf16 %v4234_v52, %v4221_v8 }
 0x4ff   :  { %7582 = vmatpush1.bf16.msra.mxu0 %v7581_v38  ;;  %v4259_v63 = vld [vmem:[#allocation5 + $0x4c8] sm:$0xff] }
 0x500   :  { %7549 = vmatprep.subr.bf16.mxu1 %v7548_v4  ;;  %v3254_v41 = vpop.permute.xlu1 %3253  ;;  %7583 = vmatprep.subr.bf16.mxu0 %v7901_v9  ;;  %v4248_v55 = vld [vmem:[#allocation5 + $0x470] sm:$0xff]  ;;  %v7554_v13 = vpack.c.bf16 %v4259_v63, %v4246_v36 }
 0x501   :  { %v3269_v56 = vsel %vm305_vm13, %v9438_v61, %v3254_v41  ;;  %v3270_v47 = vsel %vm305_vm13, %v3254_v41, %v3256_v46  ;;  %7551 = vmatpush1.bf16.msra.mxu1 %v7550_v34  ;;  %v4247_v29 = vld [vmem:[#allocation5 + $0x468] sm:$0xff] }
 0x502   :  { %v3365_v11 = vpop.permute.xlu0 %3364  ;;  %3295 = vst [vmem:[#allocation5 + $0x530] sm:$0x3f] %v3269_v56  ;;  %3296 = vst [vmem:[#allocation5 + $0x538] sm:$0x3f] %v3270_v47 }
 0x504   :  { %v3363_v35 = vpop.permute.xlu1 %3362 }
 0x505   :  { %v3378_v15 = vsel %vm349_vm15, %v9446_v18, %v3363_v35  ;;  %v3379_v24 = vsel %vm349_vm15, %v3363_v35, %v3365_v11  ;;  %v4260_v19 = vld [vmem:[#allocation5 + $0x4d0] sm:$0xff]  ;;  %v4261_v62 = vld [vmem:[#allocation5 + $0x4d8] sm:$0xff] }
 0x506   :  { %v3487_v16 = vpop.permute.xlu0 %3486  ;;  %3404 = vst [vmem:[#allocation5 + $0x598] ss:$-100 sps:$4 sm:$0xcf] %v3378_v15   ;;  %3405 = vst [vmem:[#allocation5 + $0x5a0] ss:$-100 sps:$4 sm:$0xcf] %v3379_v24   ;;  %v7552_v61 = vpack.c.bf16 %v4260_v19, %v4247_v29  ;;  %v7584_v12 = vpack.c.bf16 %v4261_v62, %v4248_v55 }
 0x508   :  { %7553 = vmatprep.subr.bf16.mxu1 %v7552_v61  ;;  %7585 = vmatpush1.bf16.msra.mxu0 %v7584_v12  ;;  %v3485_v3 = vpop.permute.xlu1 %3484 }
 0x509   :  { %v3500_v18 = vsel %vm2428_vm6, %v9454_v60, %v3485_v3  ;;  %v3501_v28 = vsel %vm2428_vm6, %v3485_v3, %v3487_v16  ;;  %7555 = vmatpush1.bf16.msra.mxu1 %v7554_v13  ;;  %7586 = vmatprep.subr.bf16.mxu0 %v7901_v9 }
 0x50a   :  { %v3367_v25 = vpop.permute.xlu0 %3366  ;;  %3526 = vst [vmem:[#allocation5 + $0x600] ss:$-100 sps:$4 sm:$0xf3] %v3500_v18   ;;  %3527 = vst [vmem:[#allocation5 + $0x608] ss:$-100 sps:$4 sm:$0xf3] %v3501_v28  }
 0x50b   :  { %v3380_v26 = vsel %vm349_vm15, %v3365_v11, %v3367_v25  ;;  %vm10840_vm15 = vmmov %vm10839_vm0 }
 0x50c   :  { %3406 = vst.msk [vmem:[#allocation5 + $0x540] sm:$0xc0] %vm1689_vm12, %v3380_v26  ;;  %v3258_v58 = vpop.permute.xlu1 %3257 }
 0x50d   :  { %3419 = vst.msk [vmem:[#allocation5 + $0x5a8] sm:$0xf] %vm1703_vm1, %v3380_v26  ;;  %v3271_v40 = vsel %vm305_vm13, %v3256_v46, %v3258_v58  ;;  %v4273_v42 = vld [vmem:[#allocation5 + $0x538] sm:$0xff]  ;;  %v4272_v1 = vld [vmem:[#allocation5 + $0x530] sm:$0xff] }
 0x50e   :  { %v3607_v37 = vpop.permute.xlu0 %3606  ;;  %3297 = vst.msk [vmem:[#allocation5 + $0x540] sm:$0x3f] %vm1585_vm14, %v3271_v40 }
 0x50f   :  { %v3622_v5 = vsel %vm2538_vm9, %v9473_v7, %v3607_v37 }
 0x510   :  { %3648 = vst [vmem:[#allocation5 + $0x600] sm:$0xfc] %v3622_v5  ;;  %v3489_v51 = vpop.permute.xlu1 %3488 }
 0x511   :  { %v3502_v23 = vsel %vm2428_vm6, %v3487_v16, %v3489_v51  ;;  %v4286_v53 = vld [vmem:[#allocation5 + $0x5a0] sm:$0xff]  ;;  %v4285_v44 = vld [vmem:[#allocation5 + $0x598] sm:$0xff]  ;;  %vm10841_vm6 = vmmov %vm10839_vm0 }
 0x512   :  { %v3739_v60 = vpop.permute.xlu0 %3738  ;;  %3528 = vst.msk [vmem:[#allocation5 + $0x5a8] sm:$0xf0] %vm1807_vm4, %v3502_v23  ;;  %v7556_v7 = vpack.c.bf16 %v4286_v53, %v4273_v42  ;;  %v7558_v46 = vpack.c.bf16 %v4285_v44, %v4272_v1 }
 0x513   :  { %v3752_v17 = vsel %vm85_vm2, %v9480_v57, %v3739_v60  ;;  %3541 = vst.msk [vmem:[#allocation5 + $0x610] sm:$0x3] %vm1821_vm8, %v3502_v23 }
 0x514   :  { %3777 = vst [vmem:[#allocation5 + $0x6d0] ss:$-100 sps:$4 sm:$0xcf] %v3752_v17   ;;  %7557 = vmatprep.subr.bf16.mxu1 %v7556_v7  ;;  %v3609_v38 = vpop.permute.xlu1 %3608 }
 0x515   :  { %v3623_v8 = vsel %vm2538_vm9, %v3607_v37, %v3609_v38  ;;  %7559 = vmatpush1.bf16.msra.mxu1 %v7558_v46  ;;  %v4274_v34 = vld [vmem:[#allocation5 + $0x540] sm:$0xff] }
 0x516   :  { %v3611_v0 = vpop.permute.xlu0 %3610  ;;  %3649 = vst [vmem:[#allocation5 + $0x608] sm:$0xfc] %v3623_v8 }
 0x517   :  { %v3624_v52 = vsel %vm2538_vm9, %v3609_v38, %v3611_v0  ;;  %v4298_v13 = vld [vmem:[#allocation5 + $0x600] sm:$0xff]  ;;  %vm6937_vm9 = vcmask 9216  }
 0x518   :  { %3650 = vst.msk [vmem:[#allocation5 + $0x610] sm:$0xfc] %vm1926_vm5, %v3624_v52  ;;  %v3741_v4 = vpop.permute.xlu1 %3740 }
 0x519   :  { %v3753_v59 = vsel %vm85_vm2, %v3739_v60, %v3741_v4  ;;  %3779 = vst.msk [vmem:[#allocation5 + $0x678] sm:$0xc0] %vm1689_vm12, %v3741_v4  ;;  %v4287_v11 = vld [vmem:[#allocation5 + $0x5a8] sm:$0xff] }
 0x51a   :  { %v3857_v57 = vpop.permute.xlu0 %3856  ;;  %3792 = vst.msk [vmem:[#allocation5 + $0x6e0] sm:$0xf] %vm1703_vm1, %v3741_v4  ;;  %3778 = vst [vmem:[#allocation5 + $0x6d8] ss:$-100 sps:$4 sm:$0xcf] %v3753_v59   ;;  %v7587_v41 = vpack.c.bf16 %v4287_v11, %v4274_v34 }
 0x51b   :  { %3895 = vst.msk [vmem:[#allocation5 + $0x6e0] sm:$0xf0] %vm1807_vm4, %v3857_v57  ;;  %v4311_v29 = vld [vmem:[#allocation5 + $0x668] sm:$0xff]  ;;  %vm5476_vm4 = vcmask 138240  }
 0x51c   :  { %3908 = vst.msk [vmem:[#allocation5 + $0x748] sm:$0x3] %vm1821_vm8, %v3857_v57  ;;  %7588 = vmatpush1.bf16.msra.mxu0 %v7587_v41  ;;  %v3855_v47 = vpop.permute.xlu1 %3854  ;;  %v7562_v25 = vpack.c.bf16 %v4311_v29, %v4298_v13  ;;  %vm6849_vm8 = vcmask 687104  }
 0x51d   :  { %v3868_v16 = vsel %vm10840_vm15, %v9499_v33, %v3855_v47  ;;  %v3869_v35 = vsel %vm10841_vm6, %v3855_v47, %v3857_v57  ;;  %7589 = vmatprep.subr.bf16.mxu0 %v7901_v9  ;;  %v4299_v33 = vld [vmem:[#allocation5 + $0x608] sm:$0xff] }
 0x51e   :  { %v3973_v56 = vpop.permute.xlu0 %3972  ;;  %3893 = vst [vmem:[#allocation5 + $0x738] ss:$-100 sps:$4 sm:$0xf3] %v3868_v16   ;;  %3894 = vst [vmem:[#allocation5 + $0x740] ss:$-100 sps:$4 sm:$0xf3] %v3869_v35  }
 0x51f   :  { %4011 = vst.msk [vmem:[#allocation5 + $0x748] sm:$0xfc] %vm1926_vm5, %v3973_v56  ;;  %v4300_v15 = vld [vmem:[#allocation5 + $0x610] sm:$0xff]  ;;  %vm10842_vm5 = vcmask 179200  }
 0x520   :  { %v3971_v63 = vpop.permute.xlu1 %3970  ;;  %v4313_v24 = vld [vmem:[#allocation5 + $0x678] sm:$0xff]  ;;  %vm10843_vm1 = vmmov %vm10842_vm5 }
 0x521   :  { %v3984_v19 = vsel %vm1888_vm7, %v9510_v22, %v3971_v63  ;;  %v3985_v62 = vsel %vm1888_vm7, %v3971_v63, %v3973_v56  ;;  %v7590_v61 = vpack.c.bf16 %v4313_v24, %v4300_v15  ;;  %v4312_v12 = vld [vmem:[#allocation5 + $0x670] sm:$0xff]  ;;  %vm5493_vm7 = vcmask 7168  }
 0x522   :  { %v4063_v55 = vpop.permute.xlu0 %4062  ;;  %4009 = vst [vmem:[#allocation5 + $0x738] sm:$0xfc] %v3984_v19  ;;  %4010 = vst [vmem:[#allocation5 + $0x740] sm:$0xfc] %v3985_v62  ;;  %v7560_v36 = vpack.c.bf16 %v4312_v12, %v4299_v33  ;;  %v4326_v26 = vld [vmem:[#allocation5 + $0x6e0] sm:$0xff] }
 0x523   :  { %4101 = vst.msk [vmem:[#allocation5 + $0x7b0] sm:$0x3f] %vm1585_vm14, %v4063_v55  ;;  %7591 = vmatpush1.bf16.msra.mxu0 %v7590_v61  ;;  %vm4987_vm14 = vcmask 678912  }
 0x524   :  { %7561 = vmatprep.subr.bf16.mxu1 %v7560_v36  ;;  %v4061_v3 = vpop.permute.xlu1 %4060  ;;  %7592 = vmatprep.subr.bf16.mxu0 %v7901_v9 }
 0x525   :  { %v4074_v22 = vsel %vm1980_vm3, %v9539_v50, %v4061_v3  ;;  %v4075_v28 = vsel %vm1980_vm3, %v4061_v3, %v4063_v55  ;;  %7563 = vmatpush1.bf16.msra.mxu1 %v7562_v25  ;;  %v4325_v58 = vld [vmem:[#allocation5 + $0x6d8] sm:$0xff]  ;;  %v4324_v40 = vld [vmem:[#allocation5 + $0x6d0] sm:$0xff] }
 0x526   :  { %v4339_v18 = vld [vmem:[#allocation5 + $0x748] sm:$0xff]  ;;  %4099 = vst [vmem:[#allocation5 + $0x7a0] sm:$0x3f] %v4074_v22  ;;  %4100 = vst [vmem:[#allocation5 + $0x7a8] sm:$0x3f] %v4075_v28 }
 0x527   :  { %v7593_v37 = vpack.c.bf16 %v4339_v18, %v4326_v26 }
 0x529   :  { %7594 = vmatpush1.bf16.msra.mxu0 %v7593_v37  ;;  %v4338_v5 = vld [vmem:[#allocation5 + $0x740] sm:$0xff]  ;;  %v4337_v60 = vld [vmem:[#allocation5 + $0x738] sm:$0xff] }
 0x52a   :  { %4910 = vmatprep.subr.mxu0 %v7898_v14  ;;  %v4352_v51 = vld [vmem:[#allocation5 + $0x7b0] sm:$0x3f]  ;;  %v7564_v42 = vpack.c.bf16 %v4338_v5, %v4325_v58  ;;  %v7566_v17 = vpack.c.bf16 %v4337_v60, %v4324_v40 }
 0x52c   :  { %7565 = vmatprep.subr.bf16.mxu1 %v7564_v42 }
 0x52d   :  { %7023 = vmatpush1.msk.msra.mxu0 %vm4372_vm10, %v4352_v51  ;;  %7567 = vmatpush1.bf16.msra.mxu1 %v7566_v17  ;;  %v4351_v50 = vld [vmem:[#allocation5 + $0x7a8] sm:$0x3f]  ;;  %v4350_v23 = vld [vmem:[#allocation5 + $0x7a0] sm:$0x3f] }
 0x52e   :  { %4939 = vmatmul.mubr.f32.vlgmr.msra.gmra.mrb[20].mxu0 %v9557_v39  ;;  %7019 = vmatprep.subr.msk.mxu1 %vm4372_vm10, %v4351_v50 }
 0x52f   :  { %7025 = vmatprep.mubr.msk.f32.mxu0 %vm10842_vm5, %v9566_v45  ;;  %7627 = vmatprep.subr.bf16.mxu0 %v7901_v9 }
 0x531   :  { %7020 = vmatpush1.msk.msra.mxu1 %vm4372_vm10, %v4350_v23  ;;  %vm6935_vm10 = vcmask 15360  }
 0x532   :  { %4944 = vmatmul.mubr.f32.gmra.mrb[22].mxu0 %v9575_v2  ;;  %4862 = vmatmul.mubr.f32.vlgmr.msra.gmra.mrb[16].mxu1 %v9557_v39 }
 0x533   :  { %v9711_v53 = vpop.permute.xlu0 %4362  ;;  %7022 = vmatprep.mubr.msk.f32.mxu1 %vm10843_vm1, %v9566_v45 }
 0x534   :  { %v4564_v1 = vadd.f32 %v9620_v54, %v9711_v53  ;;  %v4641_v44 = vadd.f32 %v9651_v43, %v9711_v53  ;;  %v4485_v7 = vadd.f32 %v9508_v10, %v9711_v53  ;;  %v4562_v46 = vadd.f32 %v9618_v49, %v9711_v53 }
 0x535   :  { %v9725_v0 = vpop.permute.xlu1 %4357  ;;  %v4487_v45 = vadd.f32 %v9515_v48, %v9711_v53 }
 0x536   :  { %7761 = vtanh.f32 %v4564_v1  ;;  %4868 = vmatmul.mubr.f32.gmra.mrb[18].mxu1 %v9575_v2  ;;  %v4479_v54 = vadd.f32 %v9497_v21, %v9725_v0  ;;  %v4556_v39 = vadd.f32 %v9611_v27, %v9725_v0  ;;  %v4481_v10 = vadd.f32 %v9504_v6, %v9725_v0 }
 0x537   :  { %7763 = vtanh.f32 %v4641_v44  ;;  %v4558_v49 = vadd.f32 %v9613_v30, %v9725_v0  ;;  %v4633_v2 = vadd.f32 %v9639_v32, %v9725_v0  ;;  %v4635_v21 = vadd.f32 %v9641_v31, %v9725_v0 }
 0x538   :  { %7765 = vtanh.f32 %v4485_v7  ;;  %v4639_v6 = vadd.f32 %v9649_v20, %v9711_v53 }
 0x539   :  { %7767 = vtanh.f32 %v4562_v46 }
 0x53a   :  { %7769 = vtanh.f32 %v4479_v54 }
 0x53b   :  { %7771 = vtanh.f32 %v4556_v39 }
 0x53c   :  { %7773 = vtanh.f32 %v4481_v10 }
 0x53d   :  { %7775 = vtanh.f32 %v4487_v45 }
 0x53e   :  { %7777 = vtanh.f32 %v4558_v49 }
 0x53f   :  { %7779 = vtanh.f32 %v4633_v2 }
 0x540   :  { %v9744_v27 = vpop.eup %7761  ;;  %7781 = vtanh.f32 %v4635_v21 }
 0x541   :  { %v7764_v48 = vpop.eup %7763  ;;  %7783 = vtanh.f32 %v4639_v6 }
 0x542   :  { %v9746_v30 = vpop.eup %7765  ;;  %4994 = vst [vmem:[#allocation6 + $0x90] sm:$0xff] %v7764_v48 }
 0x543   :  { %v9748_v43 = vpop.eup %7767  ;;  %5080 = vrot.lane.b32.xlu0 %v9746_v30, %s7879_s23 }
 0x544   :  { %v9752_v32 = vpop.eup %7769 }
 0x545   :  { %v9754_v31 = vpop.eup %7771  ;;  %5054 = vrot.lane.b32.xlu1 %v9752_v32, %s7879_s23 }
 0x546   :  { %v9758_v20 = vpop.eup %7773 }
 0x547   :  { %v9760_v38 = vpop.eup %7775  ;;  %5208 = vrot.lane.b32.xlu0 %v9746_v30, %s7888_s28 }
 0x548   :  { %v9764_v8 = vpop.eup %7777 }
 0x549   :  { %v9766_v52 = vpop.eup %7779  ;;  %5182 = vrot.lane.b32.xlu1 %v9752_v32, %s7888_s28 }
 0x54a   :  { %v7782_v57 = vpop.eup %7781 }
 0x54b   :  { %v9770_v4 = vpop.eup %7783  ;;  %5336 = vrot.lane.b32.xlu0 %v9746_v30, %s7890_s30  ;;  %4980 = vst [vmem:[#allocation6 + $0x28] sm:$0xff] %v7782_v57 }
 0x54d   :  { %5310 = vrot.lane.b32.xlu1 %v9752_v32, %s7890_s30 }
 0x54f   :  { %5058 = vrot.lane.b32.xlu0 %v9754_v31, %s7879_s23 }
 0x551   :  { %5056 = vrot.lane.b32.xlu1 %v9758_v20, %s7879_s23 }
 0x553   :  { %5186 = vrot.lane.b32.xlu0 %v9754_v31, %s7888_s28 }
 0x555   :  { %5184 = vrot.lane.b32.xlu1 %v9758_v20, %s7888_s28 }
 0x557   :  { %5314 = vrot.lane.b32.xlu0 %v9754_v31, %s7890_s30 }
 0x559   :  { %5312 = vrot.lane.b32.xlu1 %v9758_v20, %s7890_s30 }
 0x55b   :  { %5084 = vrot.lane.b32.xlu0 %v9748_v43, %s7879_s23 }
 0x55d   :  { %5082 = vrot.lane.b32.xlu1 %v9760_v38, %s7879_s23 }
 0x55f   :  { %5212 = vrot.lane.b32.xlu0 %v9748_v43, %s7888_s28 }
 0x561   :  { %5210 = vrot.lane.b32.xlu1 %v9760_v38, %s7888_s28 }
 0x563   :  { %5340 = vrot.lane.b32.xlu0 %v9748_v43, %s7890_s30 }
 0x565   :  { %5338 = vrot.lane.b32.xlu1 %v9760_v38, %s7890_s30 }
 0x567   :  { %5086 = vrot.lane.b32.xlu0 %v9744_v27, %s7879_s23 }
 0x569   :  { %5060 = vrot.lane.b32.xlu1 %v9764_v8, %s7879_s23 }
 0x56b   :  { %5214 = vrot.lane.b32.xlu0 %v9744_v27, %s7888_s28 }
 0x56d   :  { %5188 = vrot.lane.b32.xlu1 %v9764_v8, %s7888_s28 }
 0x56f   :  { %5342 = vrot.lane.b32.xlu0 %v9744_v27, %s7890_s30 }
 0x571   :  { %5316 = vrot.lane.b32.xlu1 %v9764_v8, %s7890_s30 }
 0x573   :  { %5062 = vrot.lane.b32.xlu0 %v9766_v52, %s7879_s23 }
 0x575   :  { %5064 = vrot.lane.b32.xlu1 %v7782_v57, %s7879_s23 }
 0x577   :  { %5190 = vrot.lane.b32.xlu0 %v9766_v52, %s7888_s28 }
 0x579   :  { %5192 = vrot.lane.b32.xlu1 %v7782_v57, %s7888_s28 }
 0x57b   :  { %5318 = vrot.lane.b32.xlu0 %v9766_v52, %s7890_s30 }
 0x57d   :  { %5320 = vrot.lane.b32.xlu1 %v7782_v57, %s7890_s30 }
 0x57f   :  { %5090 = vrot.lane.b32.xlu0 %v7764_v48, %s7879_s23 }
 0x581   :  { %5088 = vrot.lane.b32.xlu1 %v9770_v4, %s7879_s23 }
 0x583   :  { %5218 = vrot.lane.b32.xlu0 %v7764_v48, %s7888_s28 }
 0x585   :  { %5216 = vrot.lane.b32.xlu1 %v9770_v4, %s7888_s28 }
 0x587   :  { %5346 = vrot.lane.b32.xlu0 %v7764_v48, %s7890_s30 }
 0x589   :  { %5344 = vrot.lane.b32.xlu1 %v9770_v4, %s7890_s30 }
 0x59b   :  { %v4709_v59 = vpop.f32.mrb[12].mxu1 }
 0x59c   :  { %v4710_v34 = vadd.f32 %v4709_v59, %v9725_v0  ;;  %v4711_v11 = vpop.f32.mrb[13].mxu1 }
 0x59d   :  { %v4712_v41 = vadd.f32 %v4711_v11, %v9725_v0 }
 0x59e   :  { %7785 = vtanh.f32 %v4710_v34 }
 0x59f   :  { %7787 = vtanh.f32 %v4712_v41  ;;  %v4715_v56 = vpop.f32.mrb[14].mxu1  ;;  %v4786_v47 = vpop.f32.mrb[16].mxu0 }
 0x5a0   :  { %v4716_v16 = vadd.f32 %v4715_v56, %v9711_v53  ;;  %v4787_v35 = vadd.f32 %v4786_v47, %v9725_v0  ;;  %v4717_v55 = vpop.f32.mrb[15].mxu1  ;;  %v4788_v63 = vpop.f32.mrb[17].mxu0 }
 0x5a1   :  { %v4718_v15 = vadd.f32 %v4717_v55, %v9711_v53  ;;  %v4789_v24 = vadd.f32 %v4788_v63, %v9725_v0 }
 0x5a2   :  { %7789 = vtanh.f32 %v4716_v16 }
 0x5a3   :  { %7791 = vtanh.f32 %v4787_v35  ;;  %v4792_v29 = vpop.f32.mrb[18].mxu0 }
 0x5a4   :  { %7793 = vtanh.f32 %v4718_v15  ;;  %v4793_v19 = vadd.f32 %v4792_v29, %v9711_v53  ;;  %v4794_v62 = vpop.f32.mrb[19].mxu0 }
 0x5a5   :  { %7795 = vtanh.f32 %v4789_v24  ;;  %v4795_v61 = vadd.f32 %v4794_v62, %v9711_v53 }
 0x5a6   :  { %7797 = vtanh.f32 %v4793_v19 }
 0x5a7   :  { %7799 = vtanh.f32 %v4795_v61 }
 0x5a8   :  { %v7786_v33 = vpop.eup %7785 }
 0x5a9   :  { %v7788_v12 = vpop.eup %7787  ;;  %4981 = vst [vmem:[#allocation6 + $0x30] sm:$0xff] %v7786_v33 }
 0x5aa   :  { %4982 = vst [vmem:[#allocation6 + $0x38] sm:$0xff] %v7788_v12 }
 0x5ac   :  { %v7790_v36 = vpop.eup %7789 }
 0x5ad   :  { %v9838_v13 = vpop.eup %7791  ;;  %4995 = vst [vmem:[#allocation6 + $0x98] sm:$0xff] %v7790_v36 }
 0x5ae   :  { %v7794_v25 = vpop.eup %7793  ;;  %5070 = vrot.lane.b32.xlu1 %v9838_v13, %s7879_s23 }
 0x5af   :  { %v9842_v3 = vpop.eup %7795  ;;  %4996 = vst [vmem:[#allocation6 + $0xa0] sm:$0xff] %v7794_v25 }
 0x5b0   :  { %v9844_v26 = vpop.eup %7797 }
 0x5b1   :  { %v9846_v18 = vpop.eup %7799  ;;  %5096 = vrot.lane.b32.xlu0 %v9844_v26, %s7879_s23 }
 0x5b2   :  { %5198 = vrot.lane.b32.xlu1 %v9838_v13, %s7888_s28 }
 0x5b5   :  { %v5081_v22 = vpop.permute.xlu0 %5080  ;;  %5224 = vrot.lane.b32.xlu0 %v9844_v26, %s7888_s28 }
 0x5b6   :  { %5326 = vrot.lane.b32.xlu1 %v9838_v13, %s7890_s30 }
 0x5b7   :  { %v5055_v28 = vpop.permute.xlu1 %5054 }
 0x5b9   :  { %v5209_v37 = vpop.permute.xlu0 %5208  ;;  %5352 = vrot.lane.b32.xlu0 %v9844_v26, %s7890_s30 }
 0x5ba   :  { %5072 = vrot.lane.b32.xlu1 %v9842_v3, %s7879_s23 }
 0x5bb   :  { %v5183_v58 = vpop.permute.xlu1 %5182 }
 0x5bd   :  { %v5337_v5 = vpop.permute.xlu0 %5336 }
 0x5be   :  { %5200 = vrot.lane.b32.xlu1 %v9842_v3, %s7888_s28 }
 0x5bf   :  { %v5311_v40 = vpop.permute.xlu1 %5310 }
 0x5c1   :  { %v5059_v60 = vpop.permute.xlu0 %5058 }
 0x5c2   :  { %5328 = vrot.lane.b32.xlu1 %v9842_v3, %s7890_s30 }
 0x5c3   :  { %v5057_v51 = vpop.permute.xlu1 %5056 }
 0x5c4   :  { %v5106_v17 = vsel %vm85_vm2, %v5055_v28, %v5057_v51  ;;  %v5107_v50 = vsel %vm85_vm2, %v5057_v51, %v5059_v60 }
 0x5c5   :  { %v5187_v42 = vpop.permute.xlu0 %5186  ;;  %v5156_v7 = vadd.f32 %v9752_v32, %v5106_v17  ;;  %v5157_v46 = vadd.f32 %v9758_v20, %v5107_v50 }
 0x5c6   :  { %5098 = vrot.lane.b32.xlu1 %v9846_v18, %s7879_s23 }
 0x5c7   :  { %v5185_v23 = vpop.permute.xlu1 %5184 }
 0x5c8   :  { %v5234_v1 = vsel %vm261_vm11, %v5183_v58, %v5185_v23  ;;  %v5235_v44 = vsel %vm261_vm11, %v5185_v23, %v5187_v42 }
 0x5c9   :  { %v5315_v54 = vpop.permute.xlu0 %5314  ;;  %v5284_v39 = vadd.f32 %v5234_v1, %v5156_v7  ;;  %v5285_v10 = vadd.f32 %v5235_v44, %v5157_v46 }
 0x5ca   :  { %5226 = vrot.lane.b32.xlu1 %v9846_v18, %s7888_s28 }
 0x5cb   :  { %v5313_v45 = vpop.permute.xlu1 %5312 }
 0x5cc   :  { %v5362_v49 = vsel %vm305_vm13, %v5311_v40, %v5313_v45  ;;  %v5363_v2 = vsel %vm305_vm13, %v5313_v45, %v5315_v54 }
 0x5cd   :  { %v5085_v21 = vpop.permute.xlu0 %5084  ;;  %v5412_v6 = vadd.f32 %v5362_v49, %v5284_v39  ;;  %v5413_v48 = vadd.f32 %v5363_v2, %v5285_v10 }
 0x5ce   :  { %5354 = vrot.lane.b32.xlu1 %v9846_v18, %s7890_s30 }
 0x5cf   :  { %v9876_v57 = vmul.f32 0.25, %v5412_v6  ;;  %v9878_v32 = vmul.f32 0.25, %v5413_v48  ;;  %v5083_v20 = vpop.permute.xlu1 %5082 }
 0x5d0   :  { %v5118_v34 = vsel %vm85_vm2, %v5081_v22, %v5083_v20  ;;  %v5119_v11 = vsel %vm85_vm2, %v5083_v20, %v5085_v21 }
 0x5d1   :  { %5465 = vst [vmem:[#allocation7 + $0x8] sm:$0xff] %v9878_v32  ;;  %v5213_v59 = vpop.permute.xlu0 %5212  ;;  %5494 = vst.msk [vmem:[#allocation8] sm:$0xff] %vm5493_vm7, %v9876_v57  ;;  %v5169_v16 = vadd.f32 %v9746_v30, %v5118_v34  ;;  %v5170_v35 = vadd.f32 %v9760_v38, %v5119_v11 }
 0x5d3   :  { %v5211_v41 = vpop.permute.xlu1 %5210 }
 0x5d4   :  { %v5246_v56 = vsel %vm261_vm11, %v5209_v37, %v5211_v41  ;;  %v5247_v47 = vsel %vm261_vm11, %v5211_v41, %v5213_v59 }
 0x5d5   :  { %v5341_v55 = vpop.permute.xlu0 %5340  ;;  %v5297_v63 = vadd.f32 %v5246_v56, %v5169_v16  ;;  %v5298_v15 = vadd.f32 %v5247_v47, %v5170_v35 }
 0x5d7   :  { %v5339_v24 = vpop.permute.xlu1 %5338 }
 0x5d8   :  { %v5374_v29 = vsel %vm305_vm13, %v5337_v5, %v5339_v24  ;;  %v5375_v19 = vsel %vm305_vm13, %v5339_v24, %v5341_v55  ;;  %v5605_v62 = vld [vmem:[#allocation7 + $0x8] sm:$0xff] }
 0x5d9   :  { %v5087_v61 = vpop.permute.xlu0 %5086  ;;  %v5425_v33 = vadd.f32 %v5374_v29, %v5297_v63  ;;  %v5426_v12 = vadd.f32 %v5375_v19, %v5298_v15  ;;  %5607 = vst.msk [vmem:[#allocation8 + $0x50] sm:$0xff] %vm5493_vm7, %v5605_v62 }
 0x5da   :  { %v5120_v38 = vsel %vm85_vm2, %v5085_v21, %v5087_v61 }
 0x5db   :  { %v9894_v36 = vmul.f32 0.25, %v5425_v33  ;;  %v9896_v25 = vmul.f32 0.25, %v5426_v12  ;;  %v5061_v30 = vpop.permute.xlu1 %5060  ;;  %v5171_v58 = vadd.f32 %v9748_v43, %v5120_v38 }
 0x5dc   :  { %v5108_v37 = vsel %vm85_vm2, %v5059_v60, %v5061_v30 }
 0x5dd   :  { %5479 = vst [vmem:[#allocation7 + $0x70] sm:$0xff] %v9896_v25  ;;  %v5215_v22 = vpop.permute.xlu0 %5214  ;;  %5495 = vst.msk [vmem:[#allocation8 + $0x8] sm:$0xff] %vm5493_vm7, %v9894_v36  ;;  %v5158_v17 = vadd.f32 %v9754_v31, %v5108_v37 }
 0x5de   :  { %v5248_v28 = vsel %vm261_vm11, %v5213_v59, %v5215_v22 }
 0x5df   :  { %v5189_v5 = vpop.permute.xlu1 %5188  ;;  %v5299_v51 = vadd.f32 %v5248_v28, %v5171_v58 }
 0x5e0   :  { %v5236_v40 = vsel %vm261_vm11, %v5187_v42, %v5189_v5 }
 0x5e1   :  { %v5343_v50 = vpop.permute.xlu0 %5342  ;;  %v5286_v44 = vadd.f32 %v5236_v40, %v5158_v17 }
 0x5e2   :  { %v5376_v23 = vsel %vm305_vm13, %v5341_v55, %v5343_v50 }
 0x5e3   :  { %v5427_v1 = vadd.f32 %v5376_v23, %v5299_v51  ;;  %v5317_v7 = vpop.permute.xlu1 %5316 }
 0x5e4   :  { %v5364_v46 = vsel %vm305_vm13, %v5315_v54, %v5317_v7  ;;  %v5606_v39 = vld [vmem:[#allocation7 + $0x70] sm:$0xff] }
 0x5e5   :  { %v9909_v10 = vmul.f32 0.25, %v5427_v1  ;;  %v5063_v60 = vpop.permute.xlu0 %5062  ;;  %v5414_v45 = vadd.f32 %v5364_v46, %v5286_v44  ;;  %5608 = vst.msk [vmem:[#allocation8 + $0x58] sm:$0xff] %vm5493_vm7, %v5606_v39 }
 0x5e6   :  { %v5109_v42 = vsel %vm85_vm2, %v5061_v30, %v5063_v60 }
 0x5e7   :  { %5480 = vst [vmem:[#allocation7 + $0x78] sm:$0xff] %v9909_v10  ;;  %v9913_v43 = vmul.f32 0.25, %v5414_v45  ;;  %v5065_v31 = vpop.permute.xlu1 %5064  ;;  %v5159_v21 = vadd.f32 %v9764_v8, %v5109_v42 }
 0x5e8   :  { %v5110_v54 = vsel %vm85_vm2, %v5063_v60, %v5065_v31 }
 0x5e9   :  { %5466 = vst [vmem:[#allocation7 + $0x10] sm:$0xff] %v9913_v43  ;;  %v5191_v49 = vpop.permute.xlu0 %5190  ;;  %v5160_v59 = vadd.f32 %v9766_v52, %v5110_v54 }
 0x5ea   :  { %v5237_v2 = vsel %vm261_vm11, %v5189_v5, %v5191_v49 }
 0x5eb   :  { %v5193_v6 = vpop.permute.xlu1 %5192  ;;  %v5287_v20 = vadd.f32 %v5237_v2, %v5159_v21 }
 0x5ec   :  { %v5238_v48 = vsel %vm261_vm11, %v5191_v49, %v5193_v6 }
 0x5ed   :  { %v5319_v34 = vpop.permute.xlu0 %5318  ;;  %v5288_v47 = vadd.f32 %v5238_v48, %v5160_v59 }
 0x5ee   :  { %v5365_v11 = vsel %vm305_vm13, %v5317_v7, %v5319_v34  ;;  %v5718_v41 = vld [vmem:[#allocation7 + $0x78] sm:$0xff] }
 0x5ef   :  { %v5415_v56 = vadd.f32 %v5365_v11, %v5287_v20  ;;  %v5321_v16 = vpop.permute.xlu1 %5320  ;;  %5720 = vst.msk [vmem:[#allocation8 + $0xa8] sm:$0xff] %vm5493_vm7, %v5718_v41 }
 0x5f0   :  { %v5366_v35 = vsel %vm305_vm13, %v5319_v34, %v5321_v16  ;;  %v5717_v55 = vld [vmem:[#allocation7 + $0x10] sm:$0xff] }
 0x5f1   :  { %v9925_v63 = vmul.f32 0.25, %v5415_v56  ;;  %v5091_v8 = vpop.permute.xlu0 %5090  ;;  %v5416_v15 = vadd.f32 %v5366_v35, %v5288_v47  ;;  %5719 = vst.msk [vmem:[#allocation8 + $0xa0] sm:$0xff] %vm5493_vm7, %v5717_v55 }
 0x5f3   :  { %5467 = vst [vmem:[#allocation7 + $0x18] sm:$0xff] %v9925_v63  ;;  %v9929_v52 = vmul.f32 0.25, %v5416_v15  ;;  %v5089_v24 = vpop.permute.xlu1 %5088 }
 0x5f4   :  { %v5121_v19 = vsel %vm85_vm2, %v5087_v61, %v5089_v24  ;;  %v5122_v62 = vsel %vm85_vm2, %v5089_v24, %v5091_v8 }
 0x5f5   :  { %5468 = vst [vmem:[#allocation7 + $0x20] sm:$0xff] %v9929_v52  ;;  %v5219_v29 = vpop.permute.xlu0 %5218  ;;  %v5172_v38 = vadd.f32 %v9744_v27, %v5121_v19  ;;  %v5173_v28 = vadd.f32 %v9770_v4, %v5122_v62 }
 0x5f7   :  { %v5217_v33 = vpop.permute.xlu1 %5216 }
 0x5f8   :  { %v5249_v12 = vsel %vm261_vm11, %v5215_v22, %v5217_v33  ;;  %v5250_v30 = vsel %vm261_vm11, %v5217_v33, %v5219_v29 }
 0x5f9   :  { %v5347_v58 = vpop.permute.xlu0 %5346  ;;  %v5300_v5 = vadd.f32 %v5249_v12, %v5172_v38  ;;  %v5301_v40 = vadd.f32 %v5250_v30, %v5173_v28 }
 0x5fa   :  { %v5829_v37 = vld [vmem:[#allocation7 + $0x18] sm:$0xff] }
 0x5fb   :  { %v5345_v51 = vpop.permute.xlu1 %5344  ;;  %5831 = vst.msk [vmem:[#allocation8 + $0xf0] sm:$0xff] %vm5493_vm7, %v5829_v37 }
 0x5fc   :  { %v5377_v61 = vsel %vm305_vm13, %v5343_v50, %v5345_v51  ;;  %v5378_v17 = vsel %vm305_vm13, %v5345_v51, %v5347_v58  ;;  %v5941_v23 = vld [vmem:[#allocation7 + $0x20] sm:$0xff] }
 0x5fd   :  { %v5428_v1 = vadd.f32 %v5377_v61, %v5300_v5  ;;  %v5429_v22 = vadd.f32 %v5378_v17, %v5301_v40  ;;  %5943 = vst.msk [vmem:[#allocation8 + $0x140] sm:$0xff] %vm5493_vm7, %v5941_v23 }
 0x5ff   :  { %v9942_v44 = vmul.f32 0.25, %v5428_v1  ;;  %v9944_v27 = vmul.f32 0.25, %v5429_v22 }
 0x601   :  { %v4940_v4 = vpop.f32.mrb[20].mxu0  ;;  %5481 = vst [vmem:[#allocation7 + $0x80] sm:$0xff] %v9942_v44  ;;  %5482 = vst [vmem:[#allocation7 + $0x88] sm:$0xff] %v9944_v27 }
 0x602   :  { %v4941_v7 = vadd.f32 %v4940_v4, %v9725_v0  ;;  %v4942_v46 = vpop.f32.mrb[21].mxu0 }
 0x604   :  { %7801 = vtanh.f32 %v4941_v7 }
 0x605   :  { %v4945_v50 = vpop.f32.mrb[22].mxu0  ;;  %v4863_v45 = vpop.f32.mrb[16].mxu1 }
 0x606   :  { %v4946_v39 = vadd.f32 %v4945_v50, %v9711_v53  ;;  %v4947_v60 = vpop.f32.mrb[23].mxu0  ;;  %v4864_v31 = vadd.f32 %v4863_v45, %v9725_v0  ;;  %v4865_v42 = vpop.f32.mrb[17].mxu1 }
 0x607   :  { %v4866_v54 = vadd.f32 %v4865_v42, %v9725_v0 }
 0x608   :  { %7803 = vtanh.f32 %v4946_v39  ;;  %v5942_v49 = vld [vmem:[#allocation7 + $0x88] sm:$0xff]  ;;  %v5830_v2 = vld [vmem:[#allocation7 + $0x80] sm:$0xff] }
 0x609   :  { %5944 = vst.msk [vmem:[#allocation8 + $0x148] sm:$0xff] %vm5493_vm7, %v5942_v49  ;;  %5832 = vst.msk [vmem:[#allocation8 + $0xf8] sm:$0xff] %vm5493_vm7, %v5830_v2  ;;  %7805 = vtanh.f32 %v4864_v31  ;;  %v4869_v21 = vpop.f32.mrb[18].mxu1 }
 0x60a   :  { %7807 = vtanh.f32 %v4866_v54  ;;  %v4870_v6 = vadd.f32 %v4869_v21, %v9711_v53  ;;  %v4871_v48 = vpop.f32.mrb[19].mxu1 }
 0x60b   :  { %v4872_v20 = vadd.f32 %v4871_v48, %v9711_v53 }
 0x60c   :  { %7809 = vtanh.f32 %v4870_v6 }
 0x60d   :  { %7811 = vtanh.f32 %v4872_v20 }
 0x60e   :  { %v7802_v59 = vpop.eup %7801 }
 0x60f   :  { %4988 = vst.msk [vmem:[#allocation6 + $0x60] sm:$0xff] %vm4987_vm14, %v7802_v59 }
 0x612   :  { %v7804_v34 = vpop.eup %7803 }
 0x613   :  { %5001 = vst.msk [vmem:[#allocation6 + $0xc8] sm:$0xff] %vm4987_vm14, %v7804_v34  ;;  %v9956_v0 = vpop.eup %7805 }
 0x614   :  { %v9958_v11 = vpop.eup %7807  ;;  %5074 = vrot.lane.b32.xlu0 %v9956_v0, %s7879_s23 }
 0x615   :  { %5076 = vrot.lane.b32.xlu1 %v9958_v11, %s7879_s23 }
 0x616   :  { %v9964_v41 = vpop.eup %7809  ;;  %v9988_v35 = vld [vmem:[#allocation6 + $0x60] sm:$0xff] }
 0x617   :  { %v9966_v56 = vpop.eup %7811 }
 0x618   :  { %5202 = vrot.lane.b32.xlu0 %v9956_v0, %s7888_s28 }
 0x619   :  { %5204 = vrot.lane.b32.xlu1 %v9958_v11, %s7888_s28 }
 0x61a   :  { %v10015_v38 = vld [vmem:[#allocation6 + $0xc8] sm:$0xff] }
 0x61c   :  { %5330 = vrot.lane.b32.xlu0 %v9956_v0, %s7890_s30 }
 0x61d   :  { %5332 = vrot.lane.b32.xlu1 %v9958_v11, %s7890_s30 }
 0x620   :  { %5100 = vrot.lane.b32.xlu0 %v9964_v41, %s7879_s23  ;;  %v5071_v53 = vpop.permute.xlu1 %5070 }
 0x621   :  { %5102 = vrot.lane.b32.xlu1 %v9966_v56, %s7879_s23 }
 0x623   :  { %v5097_v19 = vpop.permute.xlu0 %5096 }
 0x624   :  { %5228 = vrot.lane.b32.xlu0 %v9964_v41, %s7888_s28  ;;  %v5199_v47 = vpop.permute.xlu1 %5198 }
 0x625   :  { %5230 = vrot.lane.b32.xlu1 %v9966_v56, %s7888_s28 }
 0x627   :  { %v5225_v37 = vpop.permute.xlu0 %5224 }
 0x628   :  { %5356 = vrot.lane.b32.xlu0 %v9964_v41, %s7890_s30  ;;  %v5327_v16 = vpop.permute.xlu1 %5326 }
 0x629   :  { %5358 = vrot.lane.b32.xlu1 %v9966_v56, %s7890_s30 }
 0x62c   :  { %5078 = vrot.lane.b32.xlu0 %v9988_v35, %s7879_s23  ;;  %v9992_v55 = vpop.permute.xlu1 %5072 }
 0x62d   :  { %5513 = vrot.lane.b32.xlu1 %v9876_v57, %s7882_s18  ;;  %v5114_v8 = vsel %vm85_vm2, %v5071_v53, %v9992_v55 }
 0x62e   :  { %v5164_v29 = vadd.f32 %v9838_v13, %v5114_v8 }
 0x630   :  { %5206 = vrot.lane.b32.xlu0 %v9988_v35, %s7888_s28  ;;  %v10000_v15 = vpop.permute.xlu1 %5200 }
 0x631   :  { %5537 = vrot.lane.b32.xlu1 %v9876_v57, %s7903_s1  ;;  %v5242_v24 = vsel %vm261_vm11, %v5199_v47, %v10000_v15 }
 0x632   :  { %v5292_v62 = vadd.f32 %v5242_v24, %v5164_v29 }
 0x634   :  { %5334 = vrot.lane.b32.xlu0 %v9988_v35, %s7890_s30  ;;  %v10009_v33 = vpop.permute.xlu1 %5328 }
 0x635   :  { %5561 = vrot.lane.b32.xlu1 %v9876_v57, %s7907_s3  ;;  %v5370_v12 = vsel %vm305_vm13, %v5327_v16, %v10009_v33 }
 0x636   :  { %v5420_v30 = vadd.f32 %v5370_v12, %v5292_v62 }
 0x638   :  { %5104 = vrot.lane.b32.xlu0 %v10015_v38, %s7879_s23  ;;  %v5446_v13 = vmul.f32 0.25, %v5420_v30  ;;  %v10019_v28 = vpop.permute.xlu1 %5098 }
 0x639   :  { %5585 = vrot.lane.b32.xlu1 %v9876_v57, %s7908_s27  ;;  %v5126_v58 = vsel %vm85_vm2, %v5097_v19, %v10019_v28  ;;  %v5353_v57 = vpop.permute.xlu0 %5352 }
 0x63a   :  { %v5177_v51 = vadd.f32 %v9844_v26, %v5126_v58 }
 0x63c   :  { %5232 = vrot.lane.b32.xlu0 %v10015_v38, %s7888_s28  ;;  %v10027_v5 = vpop.permute.xlu1 %5226 }
 0x63d   :  { %5673 = vrot.lane.b32.xlu1 %v9878_v32, %s7907_s3  ;;  %v5254_v40 = vsel %vm261_vm11, %v5225_v37, %v10027_v5 }
 0x63e   :  { %v5305_v61 = vadd.f32 %v5254_v40, %v5177_v51 }
 0x640   :  { %5360 = vrot.lane.b32.xlu0 %v10015_v38, %s7890_s30  ;;  %v10036_v17 = vpop.permute.xlu1 %5354 }
 0x641   :  { %5697 = vrot.lane.b32.xlu1 %v9878_v32, %s7908_s27  ;;  %v5382_v23 = vsel %vm305_vm13, %v5353_v57, %v10036_v17 }
 0x642   :  { %v5433_v1 = vadd.f32 %v5382_v23, %v5305_v61 }
 0x644   :  { %5515 = vrot.lane.b32.xlu0 %v9894_v36, %s7882_s18  ;;  %v10044_v22 = vmul.f32 0.25, %v5433_v1 }
 0x645   :  { %5625 = vrot.lane.b32.xlu1 %v9878_v32, %s7882_s18 }
 0x648   :  { %5539 = vrot.lane.b32.xlu0 %v9894_v36, %s7903_s1 }
 0x649   :  { %5649 = vrot.lane.b32.xlu1 %v9878_v32, %s7903_s1 }
 0x64c   :  { %5563 = vrot.lane.b32.xlu0 %v9894_v36, %s7907_s3 }
 0x64d   :  { %5737 = vrot.lane.b32.xlu1 %v9913_v43, %s7882_s18 }
 0x650   :  { %5587 = vrot.lane.b32.xlu0 %v9894_v36, %s7908_s27 }
 0x651   :  { %5761 = vrot.lane.b32.xlu1 %v9913_v43, %s7903_s1 }
 0x654   :  { %5675 = vrot.lane.b32.xlu0 %v9896_v25, %s7907_s3 }
 0x655   :  { %5785 = vrot.lane.b32.xlu1 %v9913_v43, %s7907_s3 }
 0x658   :  { %5699 = vrot.lane.b32.xlu0 %v9896_v25, %s7908_s27 }
 0x659   :  { %5809 = vrot.lane.b32.xlu1 %v9913_v43, %s7908_s27 }
 0x65c   :  { %5627 = vrot.lane.b32.xlu0 %v9896_v25, %s7882_s18 }
 0x65d   :  { %5849 = vrot.lane.b32.xlu1 %v9925_v63, %s7882_s18 }
 0x660   :  { %5651 = vrot.lane.b32.xlu0 %v9896_v25, %s7903_s1 }
 0x661   :  { %5873 = vrot.lane.b32.xlu1 %v9925_v63, %s7903_s1 }
 0x664   :  { %5739 = vrot.lane.b32.xlu0 %v9909_v10, %s7882_s18 }
 0x665   :  { %5897 = vrot.lane.b32.xlu1 %v9925_v63, %s7907_s3 }
 0x668   :  { %5763 = vrot.lane.b32.xlu0 %v9909_v10, %s7903_s1 }
 0x669   :  { %5921 = vrot.lane.b32.xlu1 %v9925_v63, %s7908_s27 }
 0x66c   :  { %5787 = vrot.lane.b32.xlu0 %v9909_v10, %s7907_s3 }
 0x66d   :  { %5961 = vrot.lane.b32.xlu1 %v9929_v52, %s7882_s18 }
 0x670   :  { %5811 = vrot.lane.b32.xlu0 %v9909_v10, %s7908_s27 }
 0x671   :  { %5985 = vrot.lane.b32.xlu1 %v9929_v52, %s7903_s1 }
 0x674   :  { %5851 = vrot.lane.b32.xlu0 %v9942_v44, %s7882_s18 }
 0x675   :  { %5500 = vrot.lane.b32.xlu1 %v5446_v13, %s7909_s2 }
 0x678   :  { %5875 = vrot.lane.b32.xlu0 %v9942_v44, %s7903_s1 }
 0x679   :  { %5525 = vrot.lane.b32.xlu1 %v5446_v13, %s7881_s15 }
 0x67c   :  { %5899 = vrot.lane.b32.xlu0 %v9942_v44, %s7907_s3 }
 0x67d   :  { %5549 = vrot.lane.b32.xlu1 %v5446_v13, %s7910_s29 }
 0x680   :  { %5923 = vrot.lane.b32.xlu0 %v9942_v44, %s7908_s27 }
 0x681   :  { %5573 = vrot.lane.b32.xlu1 %v5446_v13, %s7911_s13 }
 0x684   :  { %5963 = vrot.lane.b32.xlu0 %v9944_v27, %s7882_s18 }
 0x685   :  { %5597 = vrot.lane.b32.xlu1 %v5446_v13, %s7912_s14 }
 0x686   :  { %v5075_v26 = vpop.permute.xlu0 %5074 }
 0x687   :  { %v5077_v32 = vpop.permute.xlu1 %5076  ;;  %v5115_v36 = vsel %vm85_vm2, %v9992_v55, %v5075_v26 }
 0x688   :  { %5987 = vrot.lane.b32.xlu0 %v9944_v27, %s7903_s1  ;;  %v5116_v25 = vsel %vm85_vm2, %v5075_v26, %v5077_v32  ;;  %v5165_v44 = vadd.f32 %v9842_v3, %v5115_v36 }
 0x689   :  { %v5166_v7 = vadd.f32 %v9956_v0, %v5116_v25 }
 0x68a   :  { %v5203_v10 = vpop.permute.xlu0 %5202 }
 0x68b   :  { %v5243_v43 = vsel %vm261_vm11, %v10000_v15, %v5203_v10  ;;  %v5205_v63 = vpop.permute.xlu1 %5204 }
 0x68c   :  { %v5244_v4 = vsel %vm261_vm11, %v5203_v10, %v5205_v63  ;;  %5502 = vrot.lane.b32.xlu0 %v10044_v22, %s7909_s2  ;;  %v5293_v46 = vadd.f32 %v5243_v43, %v5165_v44 }
 0x68d   :  { %v5294_v39 = vadd.f32 %v5244_v4, %v5166_v7 }
 0x68e   :  { %v5331_v50 = vpop.permute.xlu0 %5330 }
 0x68f   :  { %v5371_v60 = vsel %vm305_vm13, %v10009_v33, %v5331_v50  ;;  %v5333_v45 = vpop.permute.xlu1 %5332 }
 0x690   :  { %v5421_v31 = vadd.f32 %v5371_v60, %v5293_v46  ;;  %v5372_v42 = vsel %vm305_vm13, %v5331_v50, %v5333_v45  ;;  %5527 = vrot.lane.b32.xlu0 %v10044_v22, %s7881_s15 }
 0x691   :  { %v5422_v3 = vadd.f32 %v5372_v42, %v5294_v39 }
 0x692   :  { %v5447_v49 = vmul.f32 0.25, %v5421_v31  ;;  %v5101_v2 = vpop.permute.xlu0 %5100 }
 0x693   :  { %v10124_v54 = vmul.f32 0.25, %v5422_v3  ;;  %v5103_v21 = vpop.permute.xlu1 %5102  ;;  %v5127_v6 = vsel %vm85_vm2, %v10019_v28, %v5101_v2 }
 0x694   :  { %5551 = vrot.lane.b32.xlu0 %v10044_v22, %s7910_s29  ;;  %5685 = vrot.lane.b32.xlu1 %v5447_v49, %s7911_s13  ;;  %v5128_v48 = vsel %vm85_vm2, %v5101_v2, %v5103_v21  ;;  %v5178_v0 = vadd.f32 %v9846_v18, %v5127_v6 }
 0x695   :  { %v5179_v47 = vadd.f32 %v9964_v41, %v5128_v48 }
 0x696   :  { %v5229_v20 = vpop.permute.xlu0 %5228 }
 0x697   :  { %v5255_v59 = vsel %vm261_vm11, %v10027_v5, %v5229_v20  ;;  %v5231_v34 = vpop.permute.xlu1 %5230 }
 0x698   :  { %v5256_v53 = vsel %vm261_vm11, %v5229_v20, %v5231_v34  ;;  %5575 = vrot.lane.b32.xlu0 %v10044_v22, %s7911_s13  ;;  %5709 = vrot.lane.b32.xlu1 %v5447_v49, %s7912_s14  ;;  %v5306_v16 = vadd.f32 %v5255_v59, %v5178_v0 }
 0x699   :  { %v5307_v8 = vadd.f32 %v5256_v53, %v5179_v47 }
 0x69a   :  { %v5357_v55 = vpop.permute.xlu0 %5356 }
 0x69b   :  { %v5383_v15 = vsel %vm305_vm13, %v10036_v17, %v5357_v55  ;;  %v5359_v24 = vpop.permute.xlu1 %5358 }
 0x69c   :  { %v5434_v29 = vadd.f32 %v5383_v15, %v5306_v16  ;;  %v5384_v19 = vsel %vm305_vm13, %v5357_v55, %v5359_v24  ;;  %5599 = vrot.lane.b32.xlu0 %v10044_v22, %s7912_s14  ;;  %5613 = vrot.lane.b32.xlu1 %v5447_v49, %s7909_s2 }
 0x69d   :  { %v5435_v18 = vadd.f32 %v5384_v19, %v5307_v8 }
 0x69e   :  { %v5460_v62 = vmul.f32 0.25, %v5434_v29  ;;  %v5079_v33 = vpop.permute.xlu0 %5078 }
 0x69f   :  { %v10146_v12 = vmul.f32 0.25, %v5435_v18  ;;  %v5514_v41 = vpop.permute.xlu1 %5513  ;;  %v5117_v30 = vsel %vm85_vm2, %v5077_v32, %v5079_v33  ;;  %v5168_v28 = vadd.f32 %v5079_v33, %v9988_v35 }
 0x6a0   :  { %5519 = vst.msk [vmem:[#allocation8 + $0x10] sm:$0xff] %vm5493_vm7, %v5514_v41  ;;  %5637 = vrot.lane.b32.xlu1 %v5447_v49, %s7881_s15  ;;  %5687 = vrot.lane.b32.xlu0 %v5460_v62, %s7911_s13  ;;  %v5167_v5 = vadd.f32 %v9958_v11, %v5117_v30 }
 0x6a2   :  { %v5207_v13 = vpop.permute.xlu0 %5206 }
 0x6a3   :  { %v5245_v37 = vsel %vm261_vm11, %v5205_v63, %v5207_v13  ;;  %v5538_v58 = vpop.permute.xlu1 %5537  ;;  %v5296_v40 = vadd.f32 %v5207_v13, %v5168_v28  ;;  %v6054_v28 = vld [vmem:[%s10824_s5 + $0x8] sm:$0xff] }
 0x6a4   :  { %5543 = vst.msk [vmem:[#allocation8 + $0x20] sm:$0xff] %vm5493_vm7, %v5538_v58  ;;  %5661 = vrot.lane.b32.xlu1 %v5447_v49, %s7910_s29  ;;  %5711 = vrot.lane.b32.xlu0 %v5460_v62, %s7912_s14  ;;  %v5295_v51 = vadd.f32 %v5245_v37, %v5167_v5  ;;  %v6165_v37 = vld [vmem:[%s10823_s6 + $0x10] sm:$0xff] }
 0x6a5   :  { %6363 = vmatprep.mubr.f32.mxu1 %v6054_v28 }
 0x6a6   :  { %v5335_v57 = vpop.permute.xlu0 %5334 }
 0x6a7   :  { %v5373_v61 = vsel %vm305_vm13, %v5333_v45, %v5335_v57  ;;  %v5424_v17 = vadd.f32 %v5335_v57, %v5296_v40  ;;  %v5562_v23 = vpop.permute.xlu1 %5561  ;;  %v6167_v40 = vld [vmem:[%s10823_s6 + $0x20] sm:$0xff] }
 0x6a8   :  { %v5423_v35 = vadd.f32 %v5373_v61, %v5295_v51  ;;  %5567 = vst.msk [vmem:[#allocation8 + $0x30] sm:$0xff] %vm5493_vm7, %v5562_v23  ;;  %5615 = vrot.lane.b32.xlu0 %v5460_v62, %s7909_s2  ;;  %5725 = vrot.lane.b32.xlu1 %v10124_v54, %s7909_s2  ;;  %v6056_v51 = vld [vmem:[%s10824_s5 + $0x18] sm:$0xff] }
 0x6a9   :  { %v5450_v11 = vmul.f32 0.25, %v5424_v17  ;;  %v6169_v17 = vld [vmem:[%s10823_s6 + $0x30] sm:$0xff] }
 0x6aa   :  { %v10163_v1 = vmul.f32 0.25, %v5423_v35  ;;  %v5105_v22 = vpop.permute.xlu0 %5104 }
 0x6ab   :  { %5477 = vst.msk [vmem:[#allocation7 + $0x60] sm:$0xff] %vm5476_vm4, %v5450_v11  ;;  %v5586_v26 = vpop.permute.xlu1 %5585  ;;  %v5129_v32 = vsel %vm85_vm2, %v5103_v21, %v5105_v22  ;;  %v5181_v25 = vadd.f32 %v5105_v22, %v10015_v38  ;;  %vm5506_vm2 = vcmask 15368   ;;  %v6166_v11 = vld [vmem:[%s10823_s6 + $0x18] sm:$0xff] }
 0x6ac   :  { %5591 = vst.msk [vmem:[#allocation8 + $0x40] sm:$0xff] %vm5493_vm7, %v5586_v26  ;;  %5639 = vrot.lane.b32.xlu0 %v5460_v62, %s7881_s15  ;;  %5749 = vrot.lane.b32.xlu1 %v10124_v54, %s7881_s15  ;;  %v5180_v63 = vadd.f32 %v9966_v56, %v5129_v32  ;;  %v6168_v26 = vld [vmem:[%s10823_s6 + $0x28] sm:$0xff]  ;;  %v6173_v32 = vld [vmem:[%s10823_s6 + $0x50] sm:$0xff] }
 0x6ae   :  { %v5233_v36 = vpop.permute.xlu0 %5232 }
 0x6af   :  { %v5257_v10 = vsel %vm261_vm11, %v5231_v34, %v5233_v36  ;;  %v5674_v43 = vpop.permute.xlu1 %5673  ;;  %v5309_v44 = vadd.f32 %v5233_v36, %v5181_v25  ;;  %vm6253_vm11 = vcmask 130048   ;;  %v6170_v25 = vld [vmem:[%s10823_s6 + $0x38] sm:$0xff] }
 0x6b0   :  { %5679 = vst.msk [vmem:[#allocation8 + $0x80] sm:$0xff] %vm5493_vm7, %v5674_v43  ;;  %5663 = vrot.lane.b32.xlu0 %v5460_v62, %s7910_s29  ;;  %5773 = vrot.lane.b32.xlu1 %v10124_v54, %s7910_s29  ;;  %v5308_v4 = vadd.f32 %v5257_v10, %v5180_v63  ;;  %v6175_v10 = vld [vmem:[%s10823_s6 + $0x60] sm:$0xff]  ;;  %v6172_v63 = vld [vmem:[%s10823_s6 + $0x48] sm:$0xff] }
 0x6b1   :  { %7026 = vmatprep.mubr.msk.f32.mxu0 %vm6253_vm11, %v6056_v51 }
 0x6b2   :  { %v5361_v7 = vpop.permute.xlu0 %5360  ;;  %v10194_v49 = vld [vmem:[#allocation7 + $0x60] sm:$0xff] }
 0x6b3   :  { %v5385_v46 = vsel %vm305_vm13, %v5359_v24, %v5361_v7  ;;  %v5437_v50 = vadd.f32 %v5361_v7, %v5309_v44  ;;  %v5698_v39 = vpop.permute.xlu1 %5697  ;;  %v6177_v44 = vld [vmem:[%s10823_s6 + $0x70] sm:$0xff]  ;;  %vm10844_vm13 = vmmov 0  }
 0x6b4   :  { %v5436_v38 = vadd.f32 %v5385_v46, %v5308_v4  ;;  %5703 = vst.msk [vmem:[#allocation8 + $0x90] sm:$0xff] %vm5493_vm7, %v5698_v39  ;;  %5797 = vrot.lane.b32.xlu1 %v10124_v54, %s7911_s13  ;;  %5727 = vrot.lane.b32.xlu0 %v10146_v12, %s7909_s2  ;;  %v6174_v46 = vld [vmem:[%s10823_s6 + $0x58] sm:$0xff] }
 0x6b5   :  { %v5463_v56 = vmul.f32 0.25, %v5437_v50  ;;  %v6606_v50 = vld [vmem:[%s10825_s8 + $0x8] sm:$0xff] }
 0x6b6   :  { %v10184_v60 = vmul.f32 0.25, %v5436_v38  ;;  %v5516_v45 = vpop.permute.xlu0 %5515 }
 0x6b7   :  { %5490 = vst.msk [vmem:[#allocation7 + $0xc8] sm:$0xff] %vm5476_vm4, %v5463_v56  ;;  %v5626_v31 = vpop.permute.xlu1 %5625  ;;  %v6176_v56 = vld [vmem:[%s10823_s6 + $0x68] sm:$0xff] }
 0x6b8   :  { %5520 = vst.msk [vmem:[#allocation8 + $0x18] sm:$0xff] %vm5493_vm7, %v5516_v45  ;;  %5631 = vst.msk [vmem:[#allocation8 + $0x60] sm:$0xff] %vm5493_vm7, %v5626_v31  ;;  %5821 = vrot.lane.b32.xlu1 %v10124_v54, %s7912_s14  ;;  %5751 = vrot.lane.b32.xlu0 %v10146_v12, %s7881_s15 }
 0x6ba   :  { %v5540_v42 = vpop.permute.xlu0 %5539 }
 0x6bb   :  { %5544 = vst.msk [vmem:[#allocation8 + $0x28] sm:$0xff] %vm5493_vm7, %v5540_v42  ;;  %v5650_v3 = vpop.permute.xlu1 %5649  ;;  %v6605_v42 = vld [vmem:[%s10825_s8] sm:$0xff] }
 0x6bc   :  { %5655 = vst.msk [vmem:[#allocation8 + $0x70] sm:$0xff] %vm5493_vm7, %v5650_v3  ;;  %5949 = vrot.lane.b32.xlu1 %v10194_v49, %s7909_s2  ;;  %5775 = vrot.lane.b32.xlu0 %v10146_v12, %s7910_s29  ;;  %v6610_v3 = vld [vmem:[%s10825_s8 + $0x28] sm:$0xff] }
 0x6be   :  { %v5564_v2 = vpop.permute.xlu0 %5563  ;;  %v10214_v59 = vld [vmem:[#allocation7 + $0xc8] sm:$0xff] }
 0x6bf   :  { %5568 = vst.msk [vmem:[#allocation8 + $0x38] sm:$0xff] %vm5493_vm7, %v5564_v2  ;;  %v5738_v54 = vpop.permute.xlu1 %5737 }
 0x6c0   :  { %5743 = vst.msk [vmem:[#allocation8 + $0xb0] sm:$0xff] %vm5493_vm7, %v5738_v54  ;;  %5973 = vrot.lane.b32.xlu1 %v10194_v49, %s7881_s15  ;;  %5799 = vrot.lane.b32.xlu0 %v10146_v12, %s7911_s13  ;;  %v6607_v54 = vld [vmem:[%s10825_s8 + $0x10] sm:$0xff] }
 0x6c2   :  { %v5588_v21 = vpop.permute.xlu0 %5587 }
 0x6c3   :  { %5592 = vst.msk [vmem:[#allocation8 + $0x48] sm:$0xff] %vm5493_vm7, %v5588_v21  ;;  %v5762_v6 = vpop.permute.xlu1 %5761  ;;  %v6612_v21 = vld [vmem:[%s10825_s8 + $0x38] sm:$0xff] }
 0x6c4   :  { %5767 = vst.msk [vmem:[#allocation8 + $0xc0] sm:$0xff] %vm5493_vm7, %v5762_v6  ;;  %5997 = vrot.lane.b32.xlu1 %v10194_v49, %s7910_s29  ;;  %5823 = vrot.lane.b32.xlu0 %v10146_v12, %s7912_s14 }
 0x6c6   :  { %v5676_v48 = vpop.permute.xlu0 %5675 }
 0x6c7   :  { %5680 = vst.msk [vmem:[#allocation8 + $0x88] sm:$0xff] %vm5493_vm7, %v5676_v48  ;;  %v5786_v20 = vpop.permute.xlu1 %5785 }
 0x6c8   :  { %5791 = vst.msk [vmem:[#allocation8 + $0xd0] sm:$0xff] %vm5493_vm7, %v5786_v20  ;;  %5861 = vrot.lane.b32.xlu1 %v10163_v1, %s7881_s15  ;;  %5951 = vrot.lane.b32.xlu0 %v10214_v59, %s7909_s2  ;;  %v6609_v20 = vld [vmem:[%s10825_s8 + $0x20] sm:$0xff] }
 0x6ca   :  { %v5700_v34 = vpop.permute.xlu0 %5699 }
 0x6cb   :  { %5704 = vst.msk [vmem:[#allocation8 + $0x98] sm:$0xff] %vm5493_vm7, %v5700_v34  ;;  %v5810_v0 = vpop.permute.xlu1 %5809 }
 0x6cc   :  { %5815 = vst.msk [vmem:[#allocation8 + $0xe0] sm:$0xff] %vm5493_vm7, %v5810_v0  ;;  %5885 = vrot.lane.b32.xlu1 %v10163_v1, %s7910_s29  ;;  %5975 = vrot.lane.b32.xlu0 %v10214_v59, %s7881_s15 }
 0x6ce   :  { %v5628_v53 = vpop.permute.xlu0 %5627 }
 0x6cf   :  { %5632 = vst.msk [vmem:[#allocation8 + $0x68] sm:$0xff] %vm5493_vm7, %v5628_v53  ;;  %v5850_v47 = vpop.permute.xlu1 %5849 }
 0x6d0   :  { %5855 = vst.msk [vmem:[#allocation8 + $0x100] sm:$0xff] %vm5493_vm7, %v5850_v47  ;;  %5909 = vrot.lane.b32.xlu1 %v10163_v1, %s7911_s13  ;;  %5999 = vrot.lane.b32.xlu0 %v10214_v59, %s7910_s29 }
 0x6d2   :  { %v5652_v16 = vpop.permute.xlu0 %5651 }
 0x6d3   :  { %5656 = vst.msk [vmem:[#allocation8 + $0x78] sm:$0xff] %vm5493_vm7, %v5652_v16  ;;  %v5874_v55 = vpop.permute.xlu1 %5873 }
 0x6d4   :  { %5879 = vst.msk [vmem:[#allocation8 + $0x110] sm:$0xff] %vm5493_vm7, %v5874_v55  ;;  %5933 = vrot.lane.b32.xlu1 %v10163_v1, %s7912_s14  ;;  %5863 = vrot.lane.b32.xlu0 %v10184_v60, %s7881_s15 }
 0x6d6   :  { %v5740_v8 = vpop.permute.xlu0 %5739 }
 0x6d7   :  { %5744 = vst.msk [vmem:[#allocation8 + $0xb8] sm:$0xff] %vm5493_vm7, %v5740_v8  ;;  %v5898_v15 = vpop.permute.xlu1 %5897 }
 0x6d8   :  { %5903 = vst.msk [vmem:[#allocation8 + $0x120] sm:$0xff] %vm5493_vm7, %v5898_v15  ;;  %6009 = vrot.lane.b32.xlu1 %v9929_v52, %s7907_s3  ;;  %5887 = vrot.lane.b32.xlu0 %v10184_v60, %s7910_s29 }
 0x6da   :  { %v5764_v24 = vpop.permute.xlu0 %5763 }
 0x6db   :  { %5768 = vst.msk [vmem:[#allocation8 + $0xc8] sm:$0xff] %vm5493_vm7, %v5764_v24  ;;  %v5922_v29 = vpop.permute.xlu1 %5921  ;;  %v6611_v24 = vld [vmem:[%s10825_s8 + $0x30] sm:$0xff] }
 0x6dc   :  { %5927 = vst.msk [vmem:[#allocation8 + $0x130] sm:$0xff] %vm5493_vm7, %v5922_v29  ;;  %5837 = vrot.lane.b32.xlu1 %v10163_v1, %s7909_s2  ;;  %5911 = vrot.lane.b32.xlu0 %v10184_v60, %s7911_s13  ;;  %v6171_v1 = vld [vmem:[%s10823_s6 + $0x40] sm:$0xff] }
 0x6dd   :  { %v6837_v29 = vld [vmem:[%s10826_s10] sm:$0xff] }
 0x6de   :  { %v5788_v19 = vpop.permute.xlu0 %5787 }
 0x6df   :  { %5792 = vst.msk [vmem:[#allocation8 + $0xd8] sm:$0xff] %vm5493_vm7, %v5788_v19  ;;  %v5962_v18 = vpop.permute.xlu1 %5961 }
 0x6e0   :  { %5967 = vst.msk [vmem:[#allocation8 + $0x150] sm:$0xff] %vm5493_vm7, %v5962_v18  ;;  %6021 = vrot.lane.b32.xlu1 %v10194_v49, %s7911_s13  ;;  %5935 = vrot.lane.b32.xlu0 %v10184_v60, %s7912_s14 }
 0x6e2   :  { %v5812_v62 = vpop.permute.xlu0 %5811 }
 0x6e3   :  { %5816 = vst.msk [vmem:[#allocation8 + $0xe8] sm:$0xff] %vm5493_vm7, %v5812_v62  ;;  %v5986_v33 = vpop.permute.xlu1 %5985 }
 0x6e4   :  { %5991 = vst.msk [vmem:[#allocation8 + $0x160] sm:$0xff] %vm5493_vm7, %v5986_v33  ;;  %6033 = vrot.lane.b32.xlu1 %v9929_v52, %s7908_s27  ;;  %6011 = vrot.lane.b32.xlu0 %v9944_v27, %s7907_s3  ;;  %v6163_v52 = vld [vmem:[%s10823_s6] sm:$0xff] }
 0x6e6   :  { %v5852_v12 = vpop.permute.xlu0 %5851 }
 0x6e7   :  { %5856 = vst.msk [vmem:[#allocation8 + $0x108] sm:$0xff] %vm5493_vm7, %v5852_v12  ;;  %v5501_v41 = vpop.permute.xlu1 %5500 }
 0x6e8   :  { %5507 = vst.msk [vmem:[#allocation8] sm:$0xff] %vm5506_vm2, %v5501_v41  ;;  %6045 = vrot.lane.b32.xlu1 %v10194_v49, %s7912_s14  ;;  %6023 = vrot.lane.b32.xlu0 %v10214_v59, %s7911_s13 }
 0x6ea   :  { %v5876_v30 = vpop.permute.xlu0 %5875 }
 0x6eb   :  { %5880 = vst.msk [vmem:[#allocation8 + $0x118] sm:$0xff] %vm5493_vm7, %v5876_v30  ;;  %v5526_v13 = vpop.permute.xlu1 %5525 }
 0x6ec   :  { %5531 = vst.msk [vmem:[#allocation8 + $0x10] sm:$0xff] %vm5506_vm2, %v5526_v13  ;;  %6180 = vperm.xlu1 %7730, %v6163_v52   ;;  %5839 = vrot.lane.b32.xlu0 %v10184_v60, %s7909_s2  ;;  %v6608_v60 = vld [vmem:[%s10825_s8 + $0x18] sm:$0xff]  ;;  %v6613_v13 = vld [vmem:[%s10825_s8 + $0x40] sm:$0xff] }
 0x6ee   :  { %v5900_v58 = vpop.permute.xlu0 %5899 }
 0x6ef   :  { %5904 = vst.msk [vmem:[#allocation8 + $0x128] sm:$0xff] %vm5493_vm7, %v5900_v58  ;;  %v5550_v5 = vpop.permute.xlu1 %5549  ;;  %v6113_v8 = vld [vmem:[#allocation8] sm:$0xff]  ;;  %v5008_v58 = vld [vmem:[#allocation6 + $0x30] sm:$0xff] }
 0x6f0   :  { %5555 = vst.msk [vmem:[#allocation8 + $0x20] sm:$0xff] %vm5506_vm2, %v5550_v5  ;;  %6190 = vperm.xlu1 %7730, %v6165_v37   ;;  %6035 = vrot.lane.b32.xlu0 %v9944_v27, %s7908_s27  ;;  %v6164_v27 = vld [vmem:[%s10823_s6 + $0x8] sm:$0xff]  ;;  %v6615_v5 = vld [vmem:[%s10825_s8 + $0x50] sm:$0xf] }
 0x6f2   :  { %v5924_v57 = vpop.permute.xlu0 %5923 }
 0x6f3   :  { %5928 = vst.msk [vmem:[#allocation8 + $0x138] sm:$0xff] %vm5493_vm7, %v5924_v57  ;;  %v5574_v61 = vpop.permute.xlu1 %5573  ;;  %v6115_v52 = vld [vmem:[#allocation8 + $0x10] sm:$0xff]  ;;  %v5021_v57 = vld [vmem:[#allocation6 + $0x98] sm:$0xff] }
 0x6f4   :  { %5579 = vst.msk [vmem:[#allocation8 + $0x30] sm:$0xff] %vm5506_vm2, %v5574_v61  ;;  %6200 = vperm.xlu1 %7730, %v6167_v40   ;;  %6047 = vrot.lane.b32.xlu0 %v10214_v59, %s7912_s14  ;;  %v6614_v59 = vld [vmem:[%s10825_s8 + $0x48] sm:$0xff] }
 0x6f5   :  { %v6838_v61 = vld [vmem:[%s10826_s10 + $0x8] sm:$0x3] }
 0x6f6   :  { %v5964_v23 = vpop.permute.xlu0 %5963 }
 0x6f7   :  { %5968 = vst.msk [vmem:[#allocation8 + $0x158] sm:$0xff] %vm5493_vm7, %v5964_v23  ;;  %v5598_v35 = vpop.permute.xlu1 %5597 }
 0x6f8   :  { %5603 = vst.msk [vmem:[#allocation8 + $0x40] sm:$0xff] %vm5506_vm2, %v5598_v35  ;;  %6185 = vperm.xlu0 %7729, %v6164_v27   ;;  %6210 = vperm.xlu1 %7730, %v6169_v17  }
 0x6fa   :  { %v5988_v22 = vpop.permute.xlu0 %5987 }
 0x6fb   :  { %5992 = vst.msk [vmem:[#allocation8 + $0x168] sm:$0xff] %vm5493_vm7, %v5988_v22 }
 0x6fc   :  { %6195 = vperm.xlu0 %7729, %v6166_v11   ;;  %6220 = vperm.xlu1 %7730, %v6171_v1  }
 0x6fe   :  { %v5503_v36 = vpop.permute.xlu0 %5502 }
 0x6ff   :  { %5508 = vst.msk [vmem:[#allocation8 + $0x8] sm:$0xff] %vm5506_vm2, %v5503_v36  ;;  %v6117_v36 = vld [vmem:[#allocation8 + $0x20] sm:$0xff] }
 0x700   :  { %6205 = vperm.xlu0 %7729, %v6168_v26   ;;  %6230 = vperm.xlu1 %7730, %v6173_v32   ;;  %v5009_v26 = vld [vmem:[#allocation6 + $0x38] sm:$0xff] }
 0x702   :  { %v5528_v43 = vpop.permute.xlu0 %5527 }
 0x703   :  { %5532 = vst.msk [vmem:[#allocation8 + $0x18] sm:$0xff] %vm5506_vm2, %v5528_v43 }
 0x704   :  { %6215 = vperm.xlu0 %7729, %v6170_v25   ;;  %6240 = vperm.xlu1 %7730, %v6175_v10  }
 0x706   :  { %v5552_v4 = vpop.permute.xlu0 %5551  ;;  %v5686_v7 = vpop.permute.xlu1 %5685  ;;  %v6114_v34 = vld [vmem:[#allocation8 + $0x8] sm:$0xff] }
 0x707   :  { %5556 = vst.msk [vmem:[#allocation8 + $0x28] sm:$0xff] %vm5506_vm2, %v5552_v4  ;;  %5691 = vst.msk [vmem:[#allocation8 + $0x80] sm:$0xff] %vm5506_vm2, %v5686_v7  ;;  %v7597_v15 = vpack.c.bf16 %v6114_v34, %v6113_v8  ;;  %v5022_v7 = vld [vmem:[#allocation6 + $0xa0] sm:$0xff] }
 0x708   :  { %6225 = vperm.xlu0 %7729, %v6172_v63   ;;  %6250 = vperm.xlu1 %7730, %v6177_v44  }
 0x70a   :  { %v5576_v39 = vpop.permute.xlu0 %5575  ;;  %v5710_v38 = vpop.permute.xlu1 %5709  ;;  %v6116_v19 = vld [vmem:[#allocation8 + $0x18] sm:$0xff] }
 0x70b   :  { %5580 = vst.msk [vmem:[#allocation8 + $0x38] sm:$0xff] %vm5506_vm2, %v5576_v39  ;;  %5715 = vst.msk [vmem:[#allocation8 + $0x90] sm:$0xff] %vm5506_vm2, %v5710_v38  ;;  %v7601_v30 = vpack.c.bf16 %v6116_v19, %v6115_v52 }
 0x70c   :  { %6235 = vperm.xlu0 %7729, %v6174_v46   ;;  %6623 = vperm.xlu1 %7730, %v6606_v50   ;;  %v6119_v50 = vld [vmem:[#allocation8 + $0x30] sm:$0xff] }
 0x70e   :  { %v5600_v45 = vpop.permute.xlu0 %5599  ;;  %v5614_v31 = vpop.permute.xlu1 %5613  ;;  %v6129_v47 = vld [vmem:[#allocation8 + $0x80] sm:$0xff]  ;;  %v6118_v23 = vld [vmem:[#allocation8 + $0x28] sm:$0xff] }
 0x70f   :  { %5604 = vst.msk [vmem:[#allocation8 + $0x48] sm:$0xff] %vm5506_vm2, %v5600_v45  ;;  %5619 = vst.msk [vmem:[#allocation8 + $0x50] sm:$0xff] %vm5506_vm2, %v5614_v31  ;;  %v7605_v25 = vpack.c.bf16 %v6118_v23, %v6117_v36 }
 0x710   :  { %6245 = vperm.xlu0 %7729, %v6176_v56   ;;  %6633 = vperm.xlu1 %7730, %v6608_v60  }
 0x712   :  { %v5688_v49 = vpop.permute.xlu0 %5687  ;;  %v5638_v2 = vpop.permute.xlu1 %5637  ;;  %v6131_v33 = vld [vmem:[#allocation8 + $0x90] sm:$0xff]  ;;  %v6120_v10 = vld [vmem:[#allocation8 + $0x38] sm:$0xff] }
 0x713   :  { %5692 = vst.msk [vmem:[#allocation8 + $0x88] sm:$0xff] %vm5506_vm2, %v5688_v49  ;;  %5643 = vst.msk [vmem:[#allocation8 + $0x60] sm:$0xff] %vm5506_vm2, %v5638_v2  ;;  %v7609_v39 = vpack.c.bf16 %v6120_v10, %v6119_v50 }
 0x714   :  { %6618 = vperm.xlu0 %7729, %v6605_v42   ;;  %6643 = vperm.xlu1 %7730, %v6610_v3   ;;  %v6121_v3 = vld [vmem:[#allocation8 + $0x40] sm:$0xff] }
 0x716   :  { %v5712_v6 = vpop.permute.xlu0 %5711  ;;  %v5662_v48 = vpop.permute.xlu1 %5661  ;;  %v6122_v38 = vld [vmem:[#allocation8 + $0x48] sm:$0xff] }
 0x717   :  { %5716 = vst.msk [vmem:[#allocation8 + $0x98] sm:$0xff] %vm5506_vm2, %v5712_v6  ;;  %5667 = vst.msk [vmem:[#allocation8 + $0x70] sm:$0xff] %vm5506_vm2, %v5662_v48  ;;  %v7613_v49 = vpack.c.bf16 %v6122_v38, %v6121_v3 }
 0x718   :  { %6628 = vperm.xlu0 %7729, %v6607_v54   ;;  %6653 = vperm.xlu1 %7730, %v6612_v21  }
 0x71a   :  { %v5616_v0 = vpop.permute.xlu0 %5615  ;;  %v5726_v53 = vpop.permute.xlu1 %5725  ;;  %v6130_v16 = vld [vmem:[#allocation8 + $0x88] sm:$0xff] }
 0x71b   :  { %5620 = vst.msk [vmem:[#allocation8 + $0x58] sm:$0xff] %vm5506_vm2, %v5616_v0  ;;  %5731 = vst.msk [vmem:[#allocation8 + $0xa0] sm:$0xff] %vm5506_vm2, %v5726_v53  ;;  %v7595_v55 = vpack.c.bf16 %v6130_v16, %v6129_v47 }
 0x71c   :  { %6638 = vperm.xlu0 %7729, %v6609_v20   ;;  %6663 = vperm.xlu1 %7730, %v6614_v59   ;;  %v6123_v59 = vld [vmem:[#allocation8 + $0x50] sm:$0xff] }
 0x71d   :  { %7596 = vmatprep.subr.bf16.mxu1 %v7595_v55 }
 0x71e   :  { %v5640_v18 = vpop.permute.xlu0 %5639  ;;  %7598 = vmatpush3.bf16.msra.mxu1 %v7597_v15  ;;  %v5750_v62 = vpop.permute.xlu1 %5749  ;;  %v6132_v12 = vld [vmem:[#allocation8 + $0x98] sm:$0xff]  ;;  %v6125_v15 = vld [vmem:[#allocation8 + $0x60] sm:$0xff] }
 0x71f   :  { %5644 = vst.msk [vmem:[#allocation8 + $0x68] sm:$0xff] %vm5506_vm2, %v5640_v18  ;;  %5755 = vst.msk [vmem:[#allocation8 + $0xb0] sm:$0xff] %vm5506_vm2, %v5750_v62  ;;  %v7599_v41 = vpack.c.bf16 %v6132_v12, %v6131_v33 }
 0x720   :  { %6648 = vperm.xlu0 %7729, %v6611_v24   ;;  %6841 = vperm.xlu1 %7730, %v6837_v29  }
 0x721   :  { %7600 = vmatprep.subr.bf16.mxu1 %v7599_v41 }
 0x722   :  { %v5664_v28 = vpop.permute.xlu0 %5663  ;;  %7602 = vmatpush3.bf16.msra.mxu1 %v7601_v30  ;;  %v5774_v37 = vpop.permute.xlu1 %5773  ;;  %v6133_v1 = vld [vmem:[#allocation8 + $0xa0] sm:$0xff]  ;;  %v6124_v2 = vld [vmem:[#allocation8 + $0x58] sm:$0xff] }
 0x723   :  { %5668 = vst.msk [vmem:[#allocation8 + $0x78] sm:$0xff] %vm5506_vm2, %v5664_v28  ;;  %5779 = vst.msk [vmem:[#allocation8 + $0xc0] sm:$0xff] %vm5506_vm2, %v5774_v37  ;;  %v7617_v34 = vpack.c.bf16 %v6124_v2, %v6123_v59 }
 0x724   :  { %6658 = vperm.xlu0 %7729, %v6613_v13   ;;  %5066 = vrot.lane.b32.xlu1 %v5008_v58, %s7879_s23 }
 0x726   :  { %v5728_v40 = vpop.permute.xlu0 %5727  ;;  %v5798_v51 = vpop.permute.xlu1 %5797  ;;  %v6135_v44 = vld [vmem:[#allocation8 + $0xb0] sm:$0xff]  ;;  %v6126_v0 = vld [vmem:[#allocation8 + $0x68] sm:$0xff] }
 0x727   :  { %5732 = vst.msk [vmem:[#allocation8 + $0xa8] sm:$0xff] %vm5506_vm2, %v5728_v40  ;;  %5803 = vst.msk [vmem:[#allocation8 + $0xd0] sm:$0xff] %vm5506_vm2, %v5798_v51  ;;  %v7621_v24 = vpack.c.bf16 %v6126_v0, %v6125_v15  ;;  %v6066_v15 = vld [vmem:[%s10824_s5 + $0x68] sm:$0xff] }
 0x728   :  { %6668 = vperm.xlu0 %7729, %v6615_v5   ;;  %5092 = vrot.lane.b32.xlu1 %v5021_v57, %s7879_s23 }
 0x72a   :  { %v5752_v27 = vpop.permute.xlu0 %5751  ;;  %v5822_v17 = vpop.permute.xlu1 %5821  ;;  %v6137_v45 = vld [vmem:[#allocation8 + $0xc0] sm:$0xff] }
 0x72b   :  { %5756 = vst.msk [vmem:[#allocation8 + $0xb8] sm:$0xff] %vm5506_vm2, %v5752_v27  ;;  %5827 = vst.msk [vmem:[#allocation8 + $0xe0] sm:$0xff] %vm5506_vm2, %v5822_v17 }
 0x72c   :  { %6846 = vperm.xlu0 %7729, %v6838_v61   ;;  %5194 = vrot.lane.b32.xlu1 %v5008_v58, %s7888_s28 }
 0x72e   :  { %v5776_v35 = vpop.permute.xlu0 %5775  ;;  %v5950_v11 = vpop.permute.xlu1 %5949  ;;  %v6134_v22 = vld [vmem:[#allocation8 + $0xa8] sm:$0xff]  ;;  %v6139_v6 = vld [vmem:[#allocation8 + $0xd0] sm:$0xff] }
 0x72f   :  { %5780 = vst.msk [vmem:[#allocation8 + $0xc8] sm:$0xff] %vm5506_vm2, %v5776_v35  ;;  %5955 = vst.msk [vmem:[#allocation8 + $0x140] sm:$0xff] %vm5506_vm2, %v5950_v11  ;;  %v7603_v32 = vpack.c.bf16 %v6134_v22, %v6133_v1 }
 0x730   :  { %5068 = vrot.lane.b32.xlu0 %v5009_v26, %s7879_s23  ;;  %5220 = vrot.lane.b32.xlu1 %v5021_v57, %s7888_s28 }
 0x731   :  { %7604 = vmatprep.subr.bf16.mxu1 %v7603_v32 }
 0x732   :  { %v5800_v43 = vpop.permute.xlu0 %5799  ;;  %7606 = vmatpush3.bf16.msra.mxu1 %v7605_v25  ;;  %v5974_v63 = vpop.permute.xlu1 %5973  ;;  %v6136_v4 = vld [vmem:[#allocation8 + $0xb8] sm:$0xff]  ;;  %v6141_v16 = vld [vmem:[#allocation8 + $0xe0] sm:$0xff] }
 0x733   :  { %5804 = vst.msk [vmem:[#allocation8 + $0xd8] sm:$0xff] %vm5506_vm2, %v5800_v43  ;;  %5979 = vst.msk [vmem:[#allocation8 + $0x150] sm:$0xff] %vm5506_vm2, %v5974_v63  ;;  %v7607_v46 = vpack.c.bf16 %v6136_v4, %v6135_v44 }
 0x734   :  { %5094 = vrot.lane.b32.xlu0 %v5022_v7, %s7879_s23  ;;  %5322 = vrot.lane.b32.xlu1 %v5008_v58, %s7890_s30 }
 0x735   :  { %7608 = vmatprep.subr.bf16.mxu1 %v7607_v46  ;;  %v6128_v46 = vld [vmem:[#allocation8 + $0x78] sm:$0xff] }
 0x736   :  { %v5824_v56 = vpop.permute.xlu0 %5823  ;;  %7610 = vmatpush3.bf16.msra.mxu1 %v7609_v39  ;;  %v5998_v60 = vpop.permute.xlu1 %5997  ;;  %v6138_v31 = vld [vmem:[#allocation8 + $0xc8] sm:$0xff]  ;;  %v6153_v25 = vld [vmem:[#allocation8 + $0x140] sm:$0xff] }
 0x737   :  { %5828 = vst.msk [vmem:[#allocation8 + $0xe8] sm:$0xff] %vm5506_vm2, %v5824_v56  ;;  %6003 = vst.msk [vmem:[#allocation8 + $0x160] sm:$0xff] %vm5506_vm2, %v5998_v60  ;;  %v7611_v42 = vpack.c.bf16 %v6138_v31, %v6137_v45  ;;  %v6127_v31 = vld [vmem:[#allocation8 + $0x70] sm:$0xff] }
 0x738   :  { %5196 = vrot.lane.b32.xlu0 %v5009_v26, %s7888_s28  ;;  %5348 = vrot.lane.b32.xlu1 %v5021_v57, %s7890_s30 }
 0x739   :  { %7612 = vmatprep.subr.bf16.mxu1 %v7611_v42  ;;  %v7625_v42 = vpack.c.bf16 %v6128_v46, %v6127_v31  ;;  %v6083_v46 = vld [vmem:[%s10824_s5 + $0xf0] sm:$0xff]  ;;  %v6093_v31 = vld [vmem:[%s10824_s5 + $0x140] sm:$0xff] }
 0x73a   :  { %v5952_v54 = vpop.permute.xlu0 %5951  ;;  %7614 = vmatpush3.bf16.msra.mxu1 %v7613_v49  ;;  %v5862_v21 = vpop.permute.xlu1 %5861  ;;  %v6140_v48 = vld [vmem:[#allocation8 + $0xd8] sm:$0xff]  ;;  %v6155_v44 = vld [vmem:[#allocation8 + $0x150] sm:$0xff] }
 0x73b   :  { %5956 = vst.msk [vmem:[#allocation8 + $0x148] sm:$0xff] %vm5506_vm2, %v5952_v54  ;;  %5867 = vst.msk [vmem:[#allocation8 + $0x100] sm:$0xff] %vm5506_vm2, %v5862_v21  ;;  %v7615_v20 = vpack.c.bf16 %v6140_v48, %v6139_v6  ;;  %v6053_v49 = vld [vmem:[%s10824_s5] sm:$0xff]  ;;  %v6058_v6 = vld [vmem:[%s10824_s5 + $0x28] sm:$0xff] }
 0x73c   :  { %5222 = vrot.lane.b32.xlu0 %v5022_v7, %s7888_s28  ;;  %v6057_v48 = vld [vmem:[%s10824_s5 + $0x20] sm:$0xff] }
 0x73d   :  { %7616 = vmatprep.subr.bf16.mxu1 %v7615_v20 }
 0x73e   :  { %v5976_v53 = vpop.permute.xlu0 %5975  ;;  %7618 = vmatpush3.bf16.msra.mxu1 %v7617_v34  ;;  %v5886_v47 = vpop.permute.xlu1 %5885  ;;  %v6142_v55 = vld [vmem:[#allocation8 + $0xe8] sm:$0xff]  ;;  %v6157_v56 = vld [vmem:[#allocation8 + $0x160] sm:$0xff] }
 0x73f   :  { %5980 = vst.msk [vmem:[#allocation8 + $0x158] sm:$0xff] %vm5506_vm2, %v5976_v53  ;;  %5891 = vst.msk [vmem:[#allocation8 + $0x110] sm:$0xff] %vm5506_vm2, %v5886_v47  ;;  %v7619_v8 = vpack.c.bf16 %v6142_v55, %v6141_v16  ;;  %v6062_v53 = vld [vmem:[%s10824_s5 + $0x48] sm:$0xff]  ;;  %v6055_v47 = vld [vmem:[%s10824_s5 + $0x10] sm:$0xff] }
 0x740   :  { %5324 = vrot.lane.b32.xlu0 %v5009_v26, %s7890_s30  ;;  %v6061_v16 = vld [vmem:[%s10824_s5 + $0x40] sm:$0xff]  ;;  %v6060_v55 = vld [vmem:[%s10824_s5 + $0x38] sm:$0xff] }
 0x741   :  { %7620 = vmatprep.subr.bf16.mxu1 %v7619_v8 }
 0x742   :  { %v6000_v29 = vpop.permute.xlu0 %5999  ;;  %7622 = vmatpush3.bf16.msra.mxu1 %v7621_v24  ;;  %v5910_v19 = vpop.permute.xlu1 %5909  ;;  %v6145_v30 = vld [vmem:[#allocation8 + $0x100] sm:$0xff]  ;;  %v6154_v32 = vld [vmem:[#allocation8 + $0x148] sm:$0xff] }
 0x743   :  { %6004 = vst.msk [vmem:[#allocation8 + $0x168] sm:$0xff] %vm5506_vm2, %v6000_v29  ;;  %5915 = vst.msk [vmem:[#allocation8 + $0x120] sm:$0xff] %vm5506_vm2, %v5910_v19  ;;  %v7640_v10 = vpack.c.bf16 %v6154_v32, %v6153_v25  ;;  %v6059_v24 = vld [vmem:[%s10824_s5 + $0x30] sm:$0xff]  ;;  %v6065_v29 = vld [vmem:[%s10824_s5 + $0x60] sm:$0xff] }
 0x744   :  { %5350 = vrot.lane.b32.xlu0 %v5022_v7, %s7890_s30  ;;  %v6064_v19 = vld [vmem:[%s10824_s5 + $0x58] sm:$0xff]  ;;  %v6086_v25 = vld [vmem:[%s10824_s5 + $0x108] sm:$0xff] }
 0x746   :  { %v5864_v18 = vpop.permute.xlu0 %5863  ;;  %v5934_v62 = vpop.permute.xlu1 %5933  ;;  %v6147_v5 = vld [vmem:[#allocation8 + $0x110] sm:$0xff]  ;;  %v6156_v43 = vld [vmem:[#allocation8 + $0x158] sm:$0xff] }
 0x747   :  { %5868 = vst.msk [vmem:[#allocation8 + $0x108] sm:$0xff] %vm5506_vm2, %v5864_v18  ;;  %5939 = vst.msk [vmem:[#allocation8 + $0x130] sm:$0xff] %vm5506_vm2, %v5934_v62  ;;  %v7643_v4 = vpack.c.bf16 %v6156_v43, %v6155_v44  ;;  %v6085_v43 = vld [vmem:[%s10824_s5 + $0x100] sm:$0xff] }
 0x74a   :  { %v5888_v33 = vpop.permute.xlu0 %5887  ;;  %v6010_v12 = vpop.permute.xlu1 %6009  ;;  %v6149_v27 = vld [vmem:[#allocation8 + $0x120] sm:$0xff]  ;;  %v6158_v7 = vld [vmem:[#allocation8 + $0x168] sm:$0xff] }
 0x74b   :  { %5892 = vst.msk [vmem:[#allocation8 + $0x118] sm:$0xff] %vm5506_vm2, %v5888_v33  ;;  %v7646_v45 = vpack.c.bf16 %v6158_v7, %v6157_v56  ;;  %v6070_v33 = vld [vmem:[%s10824_s5 + $0x88] sm:$0xff] }
 0x74c   :  { %6015 = vst.msk [vmem:[#allocation8 + $0x170] sm:$0xff] %vm5493_vm7, %v6010_v12  ;;  %v6063_v12 = vld [vmem:[%s10824_s5 + $0x50] sm:$0xff]  ;;  %v6090_v7 = vld [vmem:[%s10824_s5 + $0x128] sm:$0xff] }
 0x74e   :  { %v5912_v41 = vpop.permute.xlu0 %5911  ;;  %v5838_v52 = vpop.permute.xlu1 %5837  ;;  %v6146_v13 = vld [vmem:[#allocation8 + $0x108] sm:$0xff]  ;;  %v6151_v1 = vld [vmem:[#allocation8 + $0x130] sm:$0xff] }
 0x74f   :  { %5916 = vst.msk [vmem:[#allocation8 + $0x128] sm:$0xff] %vm5506_vm2, %v5912_v41  ;;  %5843 = vst.msk [vmem:[#allocation8 + $0xf0] sm:$0xff] %vm5506_vm2, %v5838_v52  ;;  %v7628_v28 = vpack.c.bf16 %v6146_v13, %v6145_v30  ;;  %v6069_v41 = vld [vmem:[%s10824_s5 + $0x80] sm:$0xff]  ;;  %v6068_v52 = vld [vmem:[%s10824_s5 + $0x78] sm:$0xff] }
 0x751   :  { %7629 = vmatpush1.bf16.msra.mxu0 %v7628_v28  ;;  %v6074_v28 = vld [vmem:[%s10824_s5 + $0xa8] sm:$0xff] }
 0x752   :  { %v5936_v37 = vpop.permute.xlu0 %5935  ;;  %v6022_v58 = vpop.permute.xlu1 %6021  ;;  %7630 = vmatprep.subr.bf16.mxu0 %v7901_v9  ;;  %v6148_v40 = vld [vmem:[#allocation8 + $0x118] sm:$0xff] }
 0x753   :  { %5940 = vst.msk [vmem:[#allocation8 + $0x138] sm:$0xff] %vm5506_vm2, %v5936_v37  ;;  %6027 = vst.msk [vmem:[#allocation8 + $0x170] sm:$0xff] %vm5506_vm2, %v6022_v58  ;;  %v7631_v51 = vpack.c.bf16 %v6148_v40, %v6147_v5  ;;  %v6067_v37 = vld [vmem:[%s10824_s5 + $0x70] sm:$0xff]  ;;  %v6073_v58 = vld [vmem:[%s10824_s5 + $0xa0] sm:$0xff] }
 0x754   :  { %v6072_v5 = vld [vmem:[%s10824_s5 + $0x98] sm:$0xff] }
 0x755   :  { %7632 = vmatpush1.bf16.msra.mxu0 %v7631_v51 }
 0x756   :  { %v6012_v57 = vpop.permute.xlu0 %6011  ;;  %v6034_v61 = vpop.permute.xlu1 %6033  ;;  %7633 = vmatprep.subr.bf16.mxu0 %v7901_v9  ;;  %v6150_v17 = vld [vmem:[#allocation8 + $0x128] sm:$0xff]  ;;  %v6143_v39 = vld [vmem:[#allocation8 + $0xf0] sm:$0xff] }
 0x757   :  { %6016 = vst.msk [vmem:[#allocation8 + $0x178] sm:$0xff] %vm5493_vm7, %v6012_v57  ;;  %6039 = vst.msk [vmem:[#allocation8 + $0x180] sm:$0xff] %vm5493_vm7, %v6034_v61  ;;  %v7634_v23 = vpack.c.bf16 %v6150_v17, %v6149_v27  ;;  %v6078_v57 = vld [vmem:[%s10824_s5 + $0xc8] sm:$0xff]  ;;  %v6071_v61 = vld [vmem:[%s10824_s5 + $0x90] sm:$0xff] }
 0x758   :  { %v6077_v27 = vld [vmem:[%s10824_s5 + $0xc0] sm:$0xff]  ;;  %v6076_v17 = vld [vmem:[%s10824_s5 + $0xb8] sm:$0xff] }
 0x759   :  { %7635 = vmatpush1.bf16.msra.mxu0 %v7634_v23 }
 0x75a   :  { %v6024_v35 = vpop.permute.xlu0 %6023  ;;  %v6046_v11 = vpop.permute.xlu1 %6045  ;;  %7636 = vmatprep.subr.bf16.mxu0 %v7901_v9  ;;  %v6152_v22 = vld [vmem:[#allocation8 + $0x138] sm:$0xff]  ;;  %v6159_v2 = vld [vmem:[#allocation8 + $0x170] sm:$0xff] }
 0x75b   :  { %6028 = vst.msk [vmem:[#allocation8 + $0x178] sm:$0xff] %vm5506_vm2, %v6024_v35  ;;  %6051 = vst.msk [vmem:[#allocation8 + $0x180] sm:$0xff] %vm5506_vm2, %v6046_v11  ;;  %v7637_v26 = vpack.c.bf16 %v6152_v22, %v6151_v1  ;;  %v6082_v11 = vld [vmem:[%s10824_s5 + $0xe8] sm:$0xff]  ;;  %v6075_v1 = vld [vmem:[%s10824_s5 + $0xb0] sm:$0xff] }
 0x75c   :  { %v6081_v22 = vld [vmem:[%s10824_s5 + $0xe0] sm:$0xff] }
 0x75d   :  { %7638 = vmatpush1.bf16.msra.mxu0 %v7637_v26  ;;  %v6080_v26 = vld [vmem:[%s10824_s5 + $0xd8] sm:$0xff] }
 0x75e   :  { %v5840_v36 = vpop.permute.xlu0 %5839  ;;  %7639 = vmatprep.subr.bf16.mxu0 %v7901_v9 }
 0x75f   :  { %5844 = vst.msk [vmem:[#allocation8 + $0xf8] sm:$0xff] %vm5506_vm2, %v5840_v36 }
 0x761   :  { %7641 = vmatpush1.bf16.msra.mxu0 %v7640_v10  ;;  %v6079_v10 = vld [vmem:[%s10824_s5 + $0xd0] sm:$0xff] }
 0x762   :  { %v6036_v63 = vpop.permute.xlu0 %6035  ;;  %7642 = vmatprep.subr.bf16.mxu0 %v7901_v9  ;;  %v6160_v3 = vld [vmem:[#allocation8 + $0x178] sm:$0xff]  ;;  %v6161_v20 = vld [vmem:[#allocation8 + $0x180] sm:$0xff] }
 0x763   :  { %6040 = vst.msk [vmem:[#allocation8 + $0x188] sm:$0xff] %vm5493_vm7, %v6036_v63  ;;  %v7649_v21 = vpack.c.bf16 %v6160_v3, %v6159_v2  ;;  %v6084_v63 = vld [vmem:[%s10824_s5 + $0xf8] sm:$0xff]  ;;  %v6098_v2 = vld [vmem:[%s10824_s5 + $0x168] sm:$0xff] }
 0x765   :  { %7644 = vmatpush1.bf16.msra.mxu0 %v7643_v4 }
 0x766   :  { %v6048_v50 = vpop.permute.xlu0 %6047  ;;  %7645 = vmatprep.subr.bf16.mxu0 %v7901_v9  ;;  %v6144_v38 = vld [vmem:[#allocation8 + $0xf8] sm:$0xff] }
 0x767   :  { %6052 = vst.msk [vmem:[#allocation8 + $0x188] sm:$0xff] %vm5506_vm2, %v6048_v50  ;;  %v7623_v60 = vpack.c.bf16 %v6144_v38, %v6143_v39  ;;  %v6089_v50 = vld [vmem:[%s10824_s5 + $0x120] sm:$0xff]  ;;  %v6088_v39 = vld [vmem:[%s10824_s5 + $0x118] sm:$0xff] }
 0x769   :  { %7624 = vmatprep.subr.bf16.mxu1 %v7623_v60  ;;  %7647 = vmatpush1.bf16.msra.mxu0 %v7646_v45  ;;  %v6094_v60 = vld [vmem:[%s10824_s5 + $0x148] sm:$0xff]  ;;  %v6087_v45 = vld [vmem:[%s10824_s5 + $0x110] sm:$0xff] }
 0x76a   :  { %7626 = vmatpush3.bf16.msra.mxu1 %v7625_v42  ;;  %7648 = vmatprep.subr.bf16.mxu0 %v7901_v9  ;;  %v6092_v42 = vld [vmem:[%s10824_s5 + $0x138] sm:$0xff] }
 0x76b   :  { %v10446_v54 = vpop.permute.xlu1 %6180  ;;  %7654 = vmatprep.subr.bf16.mxu1 %v7901_v9 }
 0x76d   :  { %6364 = vmatmul.mubr.f32.vlgmr.msra.gmra.mrb[20].mxu1 %v6053_v49  ;;  %7650 = vmatpush1.bf16.msra.mxu0 %v7649_v21  ;;  %v6091_v21 = vld [vmem:[%s10824_s5 + $0x130] sm:$0xff] }
 0x76e   :  { %6368 = vmatprep.mubr.f32.mxu1 %v6058_v6  ;;  %7651 = vmatprep.subr.bf16.mxu0 %v7901_v9  ;;  %v6162_v59 = vld [vmem:[#allocation8 + $0x188] sm:$0xff]  ;;  %v6097_v6 = vld [vmem:[%s10824_s5 + $0x160] sm:$0xff] }
 0x76f   :  { %v10456_v34 = vpop.permute.xlu1 %6190  ;;  %v7652_v0 = vpack.c.bf16 %v6162_v59, %v6161_v20 }
 0x771   :  { %6369 = vmatmul.mubr.f32.gmra.mrb[22].mxu1 %v6057_v48  ;;  %7653 = vmatpush1.bf16.msra.mxu0 %v7652_v0  ;;  %v6096_v48 = vld [vmem:[%s10824_s5 + $0x158] sm:$0xff]  ;;  %v6102_v0 = vld [vmem:[%s10824_s5 + $0x188] sm:$0xff] }
 0x772   :  { %6373 = vmatprep.mubr.f32.mxu1 %v6062_v53  ;;  %v6095_v53 = vld [vmem:[%s10824_s5 + $0x150] sm:$0xff] }
 0x773   :  { %v10470_v8 = vpop.permute.xlu1 %6200 }
 0x774   :  { %6504 = vmatmul.mubr.f32.vlgmr.msra.gmra.mrb[24].mxu0 %v6055_v47  ;;  %v6101_v47 = vld [vmem:[%s10824_s5 + $0x180] sm:$0xff] }
 0x775   :  { %6374 = vmatmul.mubr.f32.gmra.mrb[24].mxu1 %v6061_v16  ;;  %7027 = vmatprep.mubr.msk.f32.mxu0 %vm6253_vm11, %v6060_v55  ;;  %v6100_v16 = vld [vmem:[%s10824_s5 + $0x178] sm:$0xff] }
 0x776   :  { %6378 = vmatprep.mubr.f32.mxu1 %v6066_v15 }
 0x777   :  { %v10485_v18 = vpop.permute.xlu0 %6185  ;;  %v10487_v62 = vpop.permute.xlu1 %6210 }
 0x778   :  { %6509 = vmatmul.mubr.f32.gmra.mrb[26].mxu0 %v6059_v24  ;;  %v6106_v24 = vld [vmem:[%s10824_s5 + $0x1a8] sm:$0xff] }
 0x779   :  { %6379 = vmatmul.mubr.f32.gmra.mrb[26].mxu1 %v6065_v29  ;;  %7028 = vmatprep.mubr.msk.f32.mxu0 %vm6253_vm11, %v6064_v19  ;;  %v6099_v29 = vld [vmem:[%s10824_s5 + $0x170] sm:$0xff]  ;;  %v6105_v19 = vld [vmem:[%s10824_s5 + $0x1a0] sm:$0xff] }
 0x77a   :  { %6383 = vmatprep.mubr.f32.mxu1 %v6070_v33  ;;  %v6104_v33 = vld [vmem:[%s10824_s5 + $0x198] sm:$0xff] }
 0x77b   :  { %v10502_v30 = vpop.permute.xlu0 %6195  ;;  %v10504_v13 = vpop.permute.xlu1 %6220 }
 0x77c   :  { %6514 = vmatmul.mubr.f32.gmra.mrb[28].mxu0 %v6063_v12 }
 0x77d   :  { %6384 = vmatmul.mubr.f32.gmra.mrb[28].mxu1 %v6069_v41  ;;  %7029 = vmatprep.mubr.msk.f32.mxu0 %vm6253_vm11, %v6068_v52  ;;  %v6110_v52 = vld [vmem:[%s10824_s5 + $0x1c8] sm:$0xff] }
 0x77e   :  { %6388 = vmatprep.mubr.f32.mxu1 %v6074_v28  ;;  %v6103_v28 = vld [vmem:[%s10824_s5 + $0x190] sm:$0xff] }
 0x77f   :  { %v10519_v40 = vpop.permute.xlu0 %6205  ;;  %v10521_v51 = vpop.permute.xlu1 %6230 }
 0x780   :  { %6519 = vmatmul.mubr.f32.gmra.mrb[30].mxu0 %v6067_v37  ;;  %v6109_v37 = vld [vmem:[%s10824_s5 + $0x1c0] sm:$0xff] }
 0x781   :  { %6389 = vmatmul.mubr.f32.gmra.mrb[30].mxu1 %v6073_v58  ;;  %7030 = vmatprep.mubr.msk.f32.mxu0 %vm6253_vm11, %v6072_v5  ;;  %v6108_v58 = vld [vmem:[%s10824_s5 + $0x1b8] sm:$0xff] }
 0x782   :  { %6393 = vmatprep.mubr.f32.mxu1 %v6078_v57 }
 0x783   :  { %v10536_v23 = vpop.permute.xlu0 %6215  ;;  %v10538_v35 = vpop.permute.xlu1 %6240 }
 0x784   :  { %6524 = vmatmul.mubr.f32.gmra.mrb[32].mxu0 %v6071_v61  ;;  %v6107_v61 = vld [vmem:[%s10824_s5 + $0x1b0] sm:$0xff] }
 0x785   :  { %6394 = vmatmul.mubr.f32.gmra.mrb[32].mxu1 %v6077_v27  ;;  %7031 = vmatprep.mubr.msk.f32.mxu0 %vm6253_vm11, %v6076_v17  ;;  %v6112_v27 = vld [vmem:[%s10824_s5 + $0x1d8] sm:$0xff] }
 0x786   :  { %6398 = vmatprep.mubr.f32.mxu1 %v6082_v11 }
 0x787   :  { %v10553_v32 = vpop.permute.xlu0 %6225  ;;  %v10555_v36 = vpop.permute.xlu1 %6250 }
 0x788   :  { %6529 = vmatmul.mubr.f32.gmra.mrb[34].mxu0 %v6075_v1  ;;  %v6111_v1 = vld [vmem:[%s10824_s5 + $0x1d0] sm:$0xff] }
 0x789   :  { %6399 = vmatmul.mubr.f32.gmra.mrb[34].mxu1 %v6081_v22  ;;  %7032 = vmatprep.mubr.msk.f32.mxu0 %vm6253_vm11, %v6080_v26 }
 0x78a   :  { %6403 = vmatprep.mubr.f32.mxu1 %v6086_v25 }
 0x78b   :  { %v10570_v44 = vpop.permute.xlu0 %6235  ;;  %v10572_v4 = vpop.permute.xlu1 %6623 }
 0x78c   :  { %6534 = vmatmul.mubr.f32.gmra.mrb[36].mxu0 %v6079_v10 }
 0x78d   :  { %6404 = vmatmul.mubr.f32.gmra.mrb[36].mxu1 %v6085_v43  ;;  %7033 = vmatprep.mubr.msk.f32.mxu0 %vm6253_vm11, %v6084_v63 }
 0x78e   :  { %6408 = vmatprep.mubr.f32.mxu1 %v6090_v7 }
 0x78f   :  { %v10587_v38 = vpop.permute.xlu0 %6245  ;;  %v10589_v56 = vpop.permute.xlu1 %6633 }
 0x790   :  { %6539 = vmatmul.mubr.f32.gmra.mrb[38].mxu0 %v6083_v46 }
 0x791   :  { %6409 = vmatmul.mubr.f32.gmra.mrb[38].mxu1 %v6089_v50  ;;  %7034 = vmatprep.mubr.msk.f32.mxu0 %vm6253_vm11, %v6088_v39 }
 0x792   :  { %6413 = vmatprep.mubr.f32.mxu1 %v6094_v60 }
 0x793   :  { %v10604_v3 = vpop.permute.xlu0 %6618  ;;  %v10606_v49 = vpop.permute.xlu1 %6643 }
 0x794   :  { %6544 = vmatmul.mubr.f32.gmra.mrb[40].mxu0 %v6087_v45 }
 0x795   :  { %6414 = vmatmul.mubr.f32.gmra.mrb[40].mxu1 %v6093_v31  ;;  %7035 = vmatprep.mubr.msk.f32.mxu0 %vm6253_vm11, %v6092_v42 }
 0x796   :  { %6418 = vmatprep.mubr.f32.mxu1 %v6098_v2 }
 0x797   :  { %v10621_v20 = vpop.permute.xlu0 %6628  ;;  %v10623_v59 = vpop.permute.xlu1 %6653 }
 0x798   :  { %6549 = vmatmul.mubr.f32.gmra.mrb[42].mxu0 %v6091_v21 }
 0x799   :  { %6419 = vmatmul.mubr.f32.gmra.mrb[42].mxu1 %v6097_v6  ;;  %7036 = vmatprep.mubr.msk.f32.mxu0 %vm6253_vm11, %v6096_v48 }
 0x79a   :  { %6423 = vmatprep.mubr.f32.mxu1 %v6102_v0 }
 0x79b   :  { %v10638_v55 = vpop.permute.xlu0 %6638  ;;  %v10640_v15 = vpop.permute.xlu1 %6663 }
 0x79c   :  { %6554 = vmatmul.mubr.f32.gmra.mrb[44].mxu0 %v6095_v53 }
 0x79d   :  { %6424 = vmatmul.mubr.f32.gmra.mrb[44].mxu1 %v6101_v47  ;;  %7037 = vmatprep.mubr.msk.f32.mxu0 %vm6253_vm11, %v6100_v16 }
 0x79e   :  { %6428 = vmatprep.mubr.f32.mxu1 %v6106_v24 }
 0x79f   :  { %v10655_v12 = vpop.permute.xlu0 %6648  ;;  %v10657_v41 = vpop.permute.xlu1 %6841 }
 0x7a0   :  { %6559 = vmatmul.mubr.f32.gmra.mrb[46].mxu0 %v6099_v29 }
 0x7a1   :  { %6429 = vmatmul.mubr.f32.gmra.mrb[46].mxu1 %v6105_v19  ;;  %7038 = vmatprep.mubr.msk.f32.mxu0 %vm6253_vm11, %v6104_v33 }
 0x7a2   :  { %6433 = vmatprep.mubr.f32.mxu1 %v6110_v52 }
 0x7a3   :  { %v10672_v5 = vpop.permute.xlu0 %6658  ;;  %v5067_v57 = vpop.permute.xlu1 %5066 }
 0x7a4   :  { %6564 = vmatmul.mubr.f32.gmra.mrb[48].mxu0 %v6103_v28 }
 0x7a5   :  { %6434 = vmatmul.mubr.f32.gmra.mrb[48].mxu1 %v6109_v37  ;;  %7039 = vmatprep.mubr.msk.f32.mxu0 %vm6253_vm11, %v6108_v58 }
 0x7a6   :  { %7217 = vmatprep.mubr.msk.f32.mxu1 %vm10844_vm13, %v7898_v14 }
 0x7a7   :  { %v10683_v17 = vpop.permute.xlu0 %6668  ;;  %v5093_v11 = vpop.permute.xlu1 %5092 }
 0x7a8   :  { %6569 = vmatmul.mubr.f32.gmra.mrb[50].mxu0 %v6107_v61 }
 0x7a9   :  { %7040 = vmatprep.mubr.msk.f32.mxu0 %vm6253_vm11, %v6112_v27 }
 0x7ab   :  { %v10689_v22 = vpop.permute.xlu0 %6846  ;;  %v5195_v26 = vpop.permute.xlu1 %5194 }
 0x7ac   :  { %6574 = vmatmul.mubr.f32.gmra.mrb[52].mxu0 %v6111_v1 }
 0x7af   :  { %v5069_v25 = vpop.permute.xlu0 %5068  ;;  %v5221_v10 = vpop.permute.xlu1 %5220 }
 0x7b3   :  { %v5095_v43 = vpop.permute.xlu0 %5094  ;;  %v5323_v63 = vpop.permute.xlu1 %5322 }
 0x7b7   :  { %v5197_v7 = vpop.permute.xlu0 %5196  ;;  %v5349_v46 = vpop.permute.xlu1 %5348 }
 0x7bb   :  { %v5223_v50 = vpop.permute.xlu0 %5222 }
 0x7bf   :  { %v5325_v39 = vpop.permute.xlu0 %5324 }
 0x7c3   :  { %v5351_v60 = vpop.permute.xlu0 %5350 }
 0x840   :  { %v7092_v45 = vpop.f32.mrb[20].mxu1 }
 0x841   :  { %v7093_v31 = vpop.f32.mrb[21].mxu1 }
 0x842   :  { %v7094_v42 = vadd.f32 %v7093_v31, %v7092_v45 }
 0x844   :  { %v7095_v2 = vpop.f32.mrb[22].mxu1  ;;  %v6366_v48 = vadd.f32 %v7094_v42, %v10446_v54 }
 0x845   :  { %v7096_v21 = vpop.f32.mrb[23].mxu1 }
 0x846   :  { %v7097_v6 = vadd.f32 %v7096_v21, %v7095_v2 }
 0x847   :  { %v6505_v0 = vpop.f32.mrb[24].mxu0 }
 0x848   :  { %v6506_v53 = vadd.f32 %v6505_v0, %v6366_v48  ;;  %v7098_v47 = vpop.f32.mrb[24].mxu1  ;;  %v6507_v16 = vpop.f32.mrb[25].mxu0  ;;  %v6371_v19 = vadd.f32 %v7097_v6, %v10485_v18 }
 0x849   :  { %v7099_v24 = vpop.f32.mrb[25].mxu1 }
 0x84a   :  { %v7100_v29 = vadd.f32 %v7099_v24, %v7098_v47  ;;  %7813 = vtanh.f32 %v6506_v53 }
 0x84b   :  { %v6510_v33 = vpop.f32.mrb[26].mxu0 }
 0x84c   :  { %v6511_v52 = vadd.f32 %v6510_v33, %v6371_v19  ;;  %v7101_v28 = vpop.f32.mrb[26].mxu1  ;;  %v6512_v37 = vpop.f32.mrb[27].mxu0  ;;  %v6376_v61 = vadd.f32 %v7100_v29, %v10456_v34 }
 0x84d   :  { %v7102_v58 = vpop.f32.mrb[27].mxu1 }
 0x84e   :  { %7815 = vtanh.f32 %v6511_v52  ;;  %v7103_v57 = vadd.f32 %v7102_v58, %v7101_v28 }
 0x84f   :  { %v6515_v27 = vpop.f32.mrb[28].mxu0 }
 0x850   :  { %v6516_v54 = vadd.f32 %v6515_v27, %v6376_v61  ;;  %v7104_v11 = vpop.f32.mrb[28].mxu1  ;;  %v6517_v1 = vpop.f32.mrb[29].mxu0  ;;  %v6381_v10 = vadd.f32 %v7103_v57, %v10502_v30 }
 0x851   :  { %v7105_v26 = vpop.f32.mrb[29].mxu1 }
 0x852   :  { %v7106_v25 = vadd.f32 %v7105_v26, %v7104_v11  ;;  %7817 = vtanh.f32 %v6516_v54 }
 0x853   :  { %v6520_v43 = vpop.f32.mrb[30].mxu0 }
 0x854   :  { %v6521_v18 = vadd.f32 %v6520_v43, %v6381_v10  ;;  %v7107_v63 = vpop.f32.mrb[30].mxu1  ;;  %v6522_v7 = vpop.f32.mrb[31].mxu0  ;;  %v6386_v39 = vadd.f32 %v7106_v25, %v10470_v8 }
 0x855   :  { %v7108_v46 = vpop.f32.mrb[31].mxu1  ;;  %v7814_v60 = vpop.eup %7813 }
 0x856   :  { %7819 = vtanh.f32 %v6521_v18  ;;  %v7109_v50 = vadd.f32 %v7108_v46, %v7107_v63 }
 0x857   :  { %v6525_v34 = vpop.f32.mrb[32].mxu0 }
 0x858   :  { %v7816_v45 = vpop.eup %7815  ;;  %v6526_v31 = vadd.f32 %v6525_v34, %v6386_v39  ;;  %v7110_v42 = vpop.f32.mrb[32].mxu1  ;;  %v6391_v30 = vadd.f32 %v7109_v50, %v10519_v40 }
 0x859   :  { %v6527_v2 = vpop.f32.mrb[33].mxu0  ;;  %v7111_v21 = vpop.f32.mrb[33].mxu1  ;;  %v7655_v6 = vpack.c.bf16 %v7816_v45, %v7814_v60 }
 0x85a   :  { %v7112_v48 = vadd.f32 %v7111_v21, %v7110_v42  ;;  %7821 = vtanh.f32 %v6526_v31 }
 0x85b   :  { %v6530_v0 = vpop.f32.mrb[34].mxu0  ;;  %7656 = vmatpush3.bf16.msra.mxu1 %v7655_v6 }
 0x85c   :  { %v6531_v53 = vadd.f32 %v6530_v0, %v6391_v30  ;;  %v7113_v47 = vpop.f32.mrb[34].mxu1  ;;  %v6532_v16 = vpop.f32.mrb[35].mxu0  ;;  %7657 = vmatprep.subr.bf16.mxu1 %v7901_v9  ;;  %v6396_v29 = vadd.f32 %v7112_v48, %v10487_v62 }
 0x85d   :  { %v7114_v8 = vpop.f32.mrb[35].mxu1  ;;  %v7818_v19 = vpop.eup %7817 }
 0x85e   :  { %7823 = vtanh.f32 %v6531_v53  ;;  %v7115_v24 = vadd.f32 %v7114_v8, %v7113_v47 }
 0x85f   :  { %v6535_v33 = vpop.f32.mrb[36].mxu0 }
 0x860   :  { %v7820_v52 = vpop.eup %7819  ;;  %v6536_v28 = vadd.f32 %v6535_v33, %v6396_v29  ;;  %v7116_v37 = vpop.f32.mrb[36].mxu1  ;;  %v6401_v27 = vadd.f32 %v7115_v24, %v10536_v23 }
 0x861   :  { %v6537_v58 = vpop.f32.mrb[37].mxu0  ;;  %v7117_v40 = vpop.f32.mrb[37].mxu1  ;;  %v7658_v57 = vpack.c.bf16 %v7820_v52, %v7818_v19 }
 0x862   :  { %v7118_v61 = vadd.f32 %v7117_v40, %v7116_v37  ;;  %7825 = vtanh.f32 %v6536_v28 }
 0x863   :  { %v6540_v54 = vpop.f32.mrb[38].mxu0  ;;  %7659 = vmatpush3.bf16.msra.mxu1 %v7658_v57 }
 0x864   :  { %v6541_v11 = vadd.f32 %v6540_v54, %v6401_v27  ;;  %v7119_v1 = vpop.f32.mrb[38].mxu1  ;;  %v6542_v26 = vpop.f32.mrb[39].mxu0  ;;  %7660 = vmatprep.subr.bf16.mxu1 %v7901_v9  ;;  %v6406_v10 = vadd.f32 %v7118_v61, %v10504_v13 }
 0x865   :  { %v7120_v62 = vpop.f32.mrb[39].mxu1  ;;  %v7822_v43 = vpop.eup %7821 }
 0x866   :  { %7827 = vtanh.f32 %v6541_v11  ;;  %v7121_v25 = vadd.f32 %v7120_v62, %v7119_v1 }
 0x867   :  { %v6545_v18 = vpop.f32.mrb[40].mxu0 }
 0x868   :  { %v7824_v63 = vpop.eup %7823  ;;  %v6546_v7 = vadd.f32 %v6545_v18, %v6406_v10  ;;  %v7122_v46 = vpop.f32.mrb[40].mxu1  ;;  %v6411_v34 = vadd.f32 %v7121_v25, %v10553_v32 }
 0x869   :  { %v6547_v50 = vpop.f32.mrb[41].mxu0  ;;  %v7123_v23 = vpop.f32.mrb[41].mxu1  ;;  %v7661_v39 = vpack.c.bf16 %v7824_v63, %v7822_v43 }
 0x86a   :  { %v7124_v60 = vadd.f32 %v7123_v23, %v7122_v46  ;;  %7829 = vtanh.f32 %v6546_v7 }
 0x86b   :  { %v6550_v45 = vpop.f32.mrb[42].mxu0  ;;  %7662 = vmatpush3.bf16.msra.mxu1 %v7661_v39 }
 0x86c   :  { %v6551_v31 = vadd.f32 %v6550_v45, %v6411_v34  ;;  %v7125_v42 = vpop.f32.mrb[42].mxu1  ;;  %v6552_v2 = vpop.f32.mrb[43].mxu0  ;;  %7663 = vmatprep.subr.bf16.mxu1 %v7901_v9  ;;  %v6416_v6 = vadd.f32 %v7124_v60, %v10521_v51  ;;  %v6596_v45 = vld [vmem:[%s10827_s7 + $0x10] sm:$0xff] }
 0x86d   :  { %v7126_v13 = vpop.f32.mrb[43].mxu1  ;;  %v7826_v48 = vpop.eup %7825  ;;  %v6599_v2 = vld [vmem:[%s10827_s7 + $0x28] sm:$0xff] }
 0x86e   :  { %7831 = vtanh.f32 %v6551_v31  ;;  %v7127_v21 = vadd.f32 %v7126_v13, %v7125_v42  ;;  %v6597_v31 = vld [vmem:[%s10827_s7 + $0x18] sm:$0xff]  ;;  %v6598_v42 = vld [vmem:[%s10827_s7 + $0x20] sm:$0xff]  ;;  %v6600_v13 = vld [vmem:[%s10827_s7 + $0x30] sm:$0xff] }
 0x86f   :  { %v6555_v30 = vpop.f32.mrb[44].mxu0 }
 0x870   :  { %v7828_v0 = vpop.eup %7827  ;;  %v6556_v53 = vadd.f32 %v6555_v30, %v6416_v6  ;;  %v7128_v47 = vpop.f32.mrb[44].mxu1  ;;  %v6421_v29 = vadd.f32 %v7127_v21, %v10570_v44  ;;  %v6601_v21 = vld [vmem:[%s10827_s7 + $0x38] sm:$0xff]  ;;  %v6602_v6 = vld [vmem:[%s10827_s7 + $0x40] sm:$0xff]  ;;  %v6604_v30 = vld [vmem:[%s10827_s7 + $0x50] sm:$0xf] }
 0x871   :  { %v6557_v16 = vpop.f32.mrb[45].mxu0  ;;  %v7129_v32 = vpop.f32.mrb[45].mxu1  ;;  %v7664_v8 = vpack.c.bf16 %v7828_v0, %v7826_v48  ;;  %v6603_v48 = vld [vmem:[%s10827_s7 + $0x48] sm:$0xff]  ;;  %v6835_v0 = vld [vmem:[%s10828_s9] sm:$0xff] }
 0x872   :  { %v7130_v24 = vadd.f32 %v7129_v32, %v7128_v47  ;;  %7833 = vtanh.f32 %v6556_v53  ;;  %7272 = vmatprep.mubr.msk.f32.mxu0 %vm6849_vm8, %v6835_v0 }
 0x873   :  { %v6560_v19 = vpop.f32.mrb[46].mxu0  ;;  %7665 = vmatpush3.bf16.msra.mxu1 %v7664_v8 }
 0x874   :  { %v6561_v33 = vadd.f32 %v6560_v19, %v6421_v29  ;;  %v7131_v52 = vpop.f32.mrb[46].mxu1  ;;  %v6562_v28 = vpop.f32.mrb[47].mxu0  ;;  %7666 = vmatprep.subr.bf16.mxu1 %v7901_v9  ;;  %v6426_v58 = vadd.f32 %v7130_v24, %v10538_v35 }
 0x875   :  { %v7132_v51 = vpop.f32.mrb[47].mxu1  ;;  %v7830_v40 = vpop.eup %7829 }
 0x876   :  { %7835 = vtanh.f32 %v6561_v33  ;;  %v7133_v37 = vadd.f32 %v7132_v51, %v7131_v52 }
 0x877   :  { %v6565_v57 = vpop.f32.mrb[48].mxu0 }
 0x878   :  { %v7832_v61 = vpop.eup %7831  ;;  %v6566_v27 = vadd.f32 %v6565_v57, %v6426_v58  ;;  %v7134_v54 = vpop.f32.mrb[48].mxu1  ;;  %v6431_v62 = vadd.f32 %v7133_v37, %v10587_v38 }
 0x879   :  { %v6567_v11 = vpop.f32.mrb[49].mxu0  ;;  %v7135_v44 = vpop.f32.mrb[49].mxu1  ;;  %v7667_v1 = vpack.c.bf16 %v7832_v61, %v7830_v40 }
 0x87a   :  { %v7136_v26 = vadd.f32 %v7135_v44, %v7134_v54  ;;  %7837 = vtanh.f32 %v6566_v27 }
 0x87b   :  { %v6570_v25 = vpop.f32.mrb[50].mxu0  ;;  %7668 = vmatpush3.bf16.msra.mxu1 %v7667_v1 }
 0x87c   :  { %v6571_v10 = vadd.f32 %v6570_v25, %v6431_v62  ;;  %v6572_v43 = vpop.f32.mrb[51].mxu0  ;;  %7669 = vmatprep.subr.bf16.mxu1 %v7901_v9  ;;  %v6436_v35 = vadd.f32 %v7136_v26, %v10555_v36  ;;  %v7834_v18 = vpop.eup %7833  ;;  %v6594_v36 = vld [vmem:[%s10827_s7] sm:$0xff] }
 0x87e   :  { %7839 = vtanh.f32 %v6571_v10 }
 0x87f   :  { %v6575_v63 = vpop.f32.mrb[52].mxu0 }
 0x880   :  { %v7836_v7 = vpop.eup %7835  ;;  %v6576_v46 = vadd.f32 %v6575_v63, %v6436_v35  ;;  %v6577_v50 = vpop.f32.mrb[53].mxu0 }
 0x881   :  { %v7670_v23 = vpack.c.bf16 %v7836_v7, %v7834_v18 }
 0x882   :  { %7841 = vtanh.f32 %v6576_v46 }
 0x883   :  { %7671 = vmatpush3.bf16.msra.mxu1 %v7670_v23 }
 0x884   :  { %7672 = vmatprep.subr.bf16.mxu1 %v7901_v9  ;;  %v7838_v38 = vpop.eup %7837  ;;  %v6595_v9 = vld [vmem:[%s10827_s7 + $0x8] sm:$0xff] }
 0x888   :  { %v7840_v39 = vpop.eup %7839 }
 0x889   :  { %v7673_v60 = vpack.c.bf16 %v7840_v39, %v7838_v38 }
 0x88b   :  { %7674 = vmatpush3.bf16.msra.mxu1 %v7673_v60 }
 0x88c   :  { %7215 = vmatprep.subr.mxu1 %v7898_v14  ;;  %v7842_v34 = vpop.eup %7841 }
 0x88f   :  { %7216 = vmatpush3.msra.mxu1 %v7842_v34  ;;  %v6836_v34 = vld [vmem:[%s10828_s9 + $0x8] sm:$0x3] }
 0x890   :  { %7218 = vmatmul.mubr.msk.f32.vlgmr.msra.gmra.mrb[50].mxu1 %vm1980_vm3, %v6594_v36 }
 0x891   :  { %7220 = vmatprep.mubr.msk.f32.mxu1 %vm10844_vm13, %v7898_v14 }
 0x894   :  { %7221 = vmatmul.mubr.msk.f32.gmra.mrb[52].mxu1 %vm1980_vm3, %v6595_v9 }
 0x895   :  { %7223 = vmatprep.mubr.msk.f32.mxu1 %vm10844_vm13, %v7898_v14 }
 0x898   :  { %7224 = vmatmul.mubr.msk.f32.gmra.mrb[54].mxu1 %vm1980_vm3, %v6596_v45 }
 0x899   :  { %7226 = vmatprep.mubr.msk.f32.mxu1 %vm10844_vm13, %v7898_v14 }
 0x89c   :  { %7227 = vmatmul.mubr.msk.f32.gmra.mrb[56].mxu1 %vm1980_vm3, %v6597_v31 }
 0x89d   :  { %7229 = vmatprep.mubr.msk.f32.mxu1 %vm10844_vm13, %v7898_v14 }
 0x8a0   :  { %7230 = vmatmul.mubr.msk.f32.gmra.mrb[58].mxu1 %vm1980_vm3, %v6598_v42 }
 0x8a1   :  { %7232 = vmatprep.mubr.msk.f32.mxu1 %vm10844_vm13, %v7898_v14 }
 0x8a4   :  { %7233 = vmatmul.mubr.msk.f32.gmra.mrb[60].mxu1 %vm1980_vm3, %v6599_v2 }
 0x8a5   :  { %7235 = vmatprep.mubr.msk.f32.mxu1 %vm10844_vm13, %v7898_v14 }
 0x8a8   :  { %7236 = vmatmul.mubr.msk.f32.gmra.mrb[62].mxu1 %vm1980_vm3, %v6600_v13 }
 0x8a9   :  { %7238 = vmatprep.mubr.msk.f32.mxu1 %vm10844_vm13, %v7898_v14 }
 0x8ac   :  { %7239 = vmatmul.mubr.msk.f32.gmra.mrb[64].mxu1 %vm1980_vm3, %v6601_v21 }
 0x8ad   :  { %7241 = vmatprep.mubr.msk.f32.mxu1 %vm10844_vm13, %v7898_v14 }
 0x8b0   :  { %7242 = vmatmul.mubr.msk.f32.gmra.mrb[66].mxu1 %vm1980_vm3, %v6602_v6 }
 0x8b1   :  { %7244 = vmatprep.mubr.msk.f32.mxu1 %vm10844_vm13, %v7898_v14 }
 0x8b4   :  { %7245 = vmatmul.mubr.msk.f32.gmra.mrb[68].mxu1 %vm1980_vm3, %v6603_v48 }
 0x8b5   :  { %7247 = vmatprep.mubr.msk.f32.mxu1 %vm10844_vm13, %v7898_v14 }
 0x8b8   :  { %7248 = vmatmul.mubr.msk.f32.gmra.mrb[70].mxu1 %vm1980_vm3, %v6604_v30  ;;  %vm6856_vm3 = vcmask 1043456  }
 0x963   :  { %v6770_v53 = vpop.f32.mrb[50].mxu1 }
 0x964   :  { %v7219_v47 = vpop.f32.mrb[51].mxu1  ;;  %v6771_v16 = vadd.f32 %v6770_v53, %v10604_v3 }
 0x966   :  { %7843 = vtanh.f32 %v6771_v16 }
 0x967   :  { %v6775_v32 = vpop.f32.mrb[52].mxu1 }
 0x968   :  { %v6776_v14 = vadd.f32 %v6775_v32, %v10572_v4  ;;  %v7222_v8 = vpop.f32.mrb[53].mxu1 }
 0x96a   :  { %7845 = vtanh.f32 %v6776_v14 }
 0x96b   :  { %v6780_v24 = vpop.f32.mrb[54].mxu1 }
 0x96c   :  { %v7225_v29 = vpop.f32.mrb[55].mxu1  ;;  %v6781_v19 = vadd.f32 %v6780_v24, %v10621_v20 }
 0x96e   :  { %7847 = vtanh.f32 %v6781_v19 }
 0x96f   :  { %v6785_v33 = vpop.f32.mrb[56].mxu1 }
 0x970   :  { %v6786_v52 = vadd.f32 %v6785_v33, %v10589_v56  ;;  %v7228_v28 = vpop.f32.mrb[57].mxu1  ;;  %v7844_v51 = vpop.eup %7843 }
 0x972   :  { %7849 = vtanh.f32 %v6786_v52 }
 0x973   :  { %v6790_v37 = vpop.f32.mrb[58].mxu1 }
 0x974   :  { %v7846_v58 = vpop.eup %7845  ;;  %v7231_v3 = vpop.f32.mrb[59].mxu1  ;;  %v6791_v40 = vadd.f32 %v6790_v37, %v10638_v55 }
 0x975   :  { %v7675_v4 = vpack.c.bf16 %v7846_v58, %v7844_v51 }
 0x976   :  { %7851 = vtanh.f32 %v6791_v40 }
 0x977   :  { %v6795_v57 = vpop.f32.mrb[60].mxu1  ;;  %7676 = vmatprep.subr.bf16.mxu0 %v7675_v4 }
 0x978   :  { %v6796_v61 = vadd.f32 %v6795_v57, %v10606_v49  ;;  %7678 = vmatpush3.bf16.msra.mxu0 %v7675_v4  ;;  %v7234_v27 = vpop.f32.mrb[61].mxu1  ;;  %v7848_v20 = vpop.eup %7847 }
 0x97a   :  { %7853 = vtanh.f32 %v6796_v61 }
 0x97b   :  { %v6800_v56 = vpop.f32.mrb[62].mxu1 }
 0x97c   :  { %v7850_v54 = vpop.eup %7849  ;;  %v7237_v11 = vpop.f32.mrb[63].mxu1  ;;  %v6801_v44 = vadd.f32 %v6800_v56, %v10655_v12 }
 0x97d   :  { %v7679_v1 = vpack.c.bf16 %v7850_v54, %v7848_v20 }
 0x97e   :  { %7855 = vtanh.f32 %v6801_v44 }
 0x97f   :  { %v6805_v26 = vpop.f32.mrb[64].mxu1  ;;  %7680 = vmatprep.subr.bf16.mxu0 %v7679_v1 }
 0x980   :  { %v6806_v55 = vadd.f32 %v6805_v26, %v10623_v59  ;;  %7682 = vmatpush3.bf16.msra.mxu0 %v7679_v1  ;;  %v7240_v62 = vpop.f32.mrb[65].mxu1  ;;  %v7852_v49 = vpop.eup %7851 }
 0x982   :  { %7857 = vtanh.f32 %v6806_v55 }
 0x983   :  { %v6810_v25 = vpop.f32.mrb[66].mxu1 }
 0x984   :  { %v7854_v10 = vpop.eup %7853  ;;  %v7243_v43 = vpop.f32.mrb[67].mxu1  ;;  %v6811_v35 = vadd.f32 %v6810_v25, %v10672_v5 }
 0x985   :  { %v7683_v18 = vpack.c.bf16 %v7854_v10, %v7852_v49 }
 0x986   :  { %7859 = vtanh.f32 %v6811_v35 }
 0x987   :  { %v6815_v63 = vpop.f32.mrb[68].mxu1  ;;  %7684 = vmatprep.subr.bf16.mxu0 %v7683_v18 }
 0x988   :  { %v6816_v12 = vadd.f32 %v6815_v63, %v10640_v15  ;;  %7686 = vmatpush3.bf16.msra.mxu0 %v7683_v18  ;;  %v7246_v7 = vpop.f32.mrb[69].mxu1  ;;  %v7856_v59 = vpop.eup %7855 }
 0x98a   :  { %7861 = vtanh.f32 %v6816_v12 }
 0x98b   :  { %v6820_v46 = vpop.f32.mrb[70].mxu1 }
 0x98c   :  { %v7858_v50 = vpop.eup %7857  ;;  %v6821_v23 = vadd.f32 %v6820_v46, %v10683_v17  ;;  %v7249_v38 = vpop.f32.mrb[71].mxu1 }
 0x98d   :  { %v7687_v39 = vpack.c.bf16 %v7858_v50, %v7856_v59 }
 0x98e   :  { %7863 = vtanh.f32 %v6821_v23 }
 0x98f   :  { %7688 = vmatprep.subr.bf16.mxu0 %v7687_v39 }
 0x990   :  { %7690 = vmatpush3.bf16.msra.mxu0 %v7687_v39  ;;  %v7860_v5 = vpop.eup %7859 }
 0x994   :  { %v7862_v60 = vpop.eup %7861 }
 0x995   :  { %v7691_v36 = vpack.c.bf16 %v7862_v60, %v7860_v5 }
 0x997   :  { %7692 = vmatprep.subr.bf16.mxu0 %v7691_v36 }
 0x998   :  { %v7864_v15 = vpop.eup %7863  ;;  %7694 = vmatpush3.bf16.msra.mxu0 %v7691_v36 }
 0x999   :  { %7270 = vmatprep.subr.msk.mxu0 %vm6856_vm3, %v7864_v15 }
 0x99c   :  { %7271 = vmatpush3.msk.msra.mxu0 %vm6856_vm3, %v7864_v15 }
 0x99d   :  { %7273 = vmatmul.mubr.msk.f32.vlgmr.msra.gmra.mrb[54].mxu0 %vm6849_vm8, %v6836_v34 }
 0xa70   :  { %v7274_v17 = vpop.f32.mrb[54].mxu0 }
 0xa71   :  { %v6932_v9 = vadd.f32 %v7274_v17, %v10689_v22  ;;  %v6926_v45 = vpop.f32.mrb[55].mxu0 }
 0xa72   :  { %v6927_v31 = vadd.f32 %v6926_v45, %v10657_v41 }
 0xa73   :  { %6938 = vst.msk [vmem:[%s10829_s11 + $0x8] sm:$0x3] %vm6937_vm9, %v6932_v9  ;;  %v6940_v42 = vsel %vm6937_vm9, %v6932_v9, -inf }
 0xa74   :  { %6936 = vst.msk [vmem:[%s10829_s11] sm:$0xff] %vm6935_vm10, %v6927_v31  ;;  %v6939_v2 = vsel %vm6935_vm10, %v6927_v31, -inf }
 0xa75   :  { %v6941_v13 = vmax.f32 %v6939_v2, %v6940_v42 }
 0xa77   :  { %v6942_v22 = vrot.slane %v6941_v13, 4 }
 0xa79   :  { %v6943_v21 = vmax.f32 %v6941_v13, %v6942_v22 }
 0xa7b   :  { %v6944_v6 = vrot.slane %v6943_v21, 2 }
 0xa7d   :  { %v6945_v48 = vmax.f32 %v6943_v21, %v6944_v6 }
 0xa7f   :  { %v6946_v41 = vrot.slane %v6945_v48, 1 }
 0xa81   :  { %v6947_v30 = vmax.f32 %v6945_v48, %v6946_v41 }
 0xa83   :  { %v6948_v0 = vsub.f32 %v6927_v31, %v6947_v30  ;;  %v6949_v53 = vsub.f32 %v6932_v9, %v6947_v30 }
 0xa85   :  { %v6950_v47 = vmul.f32 1.442695, %v6948_v0  ;;  %v6952_v16 = vmul.f32 1.442695, %v6949_v53 }
 0xa87   :  { %7865 = vpow2.f32 %v6950_v47 }
 0xa88   :  { %7867 = vpow2.f32 %v6952_v16 }
 0xa91   :  { %v7866_v32 = vpop.eup %7865 }
 0xa92   :  { %v7868_v14 = vpop.eup %7867  ;;  %v6954_v8 = vsel %vm6935_vm10, %v7866_v32, 0.0 }
 0xa93   :  { %v6955_v24 = vsel %vm6937_vm9, %v7868_v14, 0.0 }
 0xa94   :  { %v6956_v29 = vadd.f32 %v6955_v24, %v6954_v8 }
 0xa96   :  { %v6957_v19 = vrot.slane %v6956_v29, 4 }
 0xa98   :  { %v6958_v33 = vadd.f32 %v6957_v19, %v6956_v29 }
 0xa9a   :  { %v6959_v52 = vrot.slane %v6958_v33, 2 }
 0xa9c   :  { %v6960_v28 = vadd.f32 %v6959_v52, %v6958_v33 }
 0xa9e   :  { %v6961_v51 = vrot.slane %v6960_v28, 1 }
 0xaa0   :  { %v6962_v37 = vadd.f32 %v6961_v51, %v6960_v28 }
 0xaa2   :  { %7869 = vrcp.f32 %v6962_v37 }
 0xaac   :  { %v7870_v58 = vpop.eup %7869 }
 0xaad   :  { %v6964_v3 = vmul.f32 %v7870_v58, %v7866_v32  ;;  %v6965_v40 = vmul.f32 %v7870_v58, %v7868_v14 }
 0xaaf   :  { %6966 = vst.msk [vmem:[%s10830_s12] sm:$0xff] %vm6935_vm10, %v6964_v3 }
 0xab0   :  { %6967 = vst.msk [vmem:[%s10830_s12 + $0x8] sm:$0x3] %vm6937_vm9, %v6965_v40 }

</bundles_post_ra>
